<compile_context>
chip_gen: v6e
topology: v6e:2x2x1
jax: 0.10.0
libtpu: 0.0.40
codegen_flags: <defaults>
</compile_context>

<pallas_src>
import jax
import jax.numpy as jnp
import numpy as np
from jax.experimental import pallas as pl
from jax.experimental.pallas import tpu as pltpu


def _vgg_fused_kernel(x1_ref, w1_ref, b1_ref, w2_ref, b2_ref, w3_ref, b3_ref,
                      o1_ref, o2_ref, o3_ref, pad2_ref, pad3_ref):
    """All three VGG stages in one invocation (batch folded into matmul M).

    x1_ref : (N*H1*W1, 9*Cin0) bf16 -- stage-1 im2col patches (built in wrapper)
    wK_ref : (9*Cin, Cout)     bf16 -- 3x3 weights flattened (dy, dx, cin)-major
    bK_ref : (1, Cout)         f32
    oK_ref : (N, H/2^K, W/2^K, Cout) f32 -- pooled stage outputs
    padK_ref: f32 VMEM scratch holding the zero-padded input of stage K
    """
    N, Ho1, Wo1, C1 = o1_ref.shape
    _, Ho2, Wo2, C2 = o2_ref.shape
    _, Ho3, Wo3, C3 = o3_ref.shape
    H1, W1 = 2 * Ho1, 2 * Wo1
    H2, W2 = Ho1, Wo1
    H3, W3 = Ho2, Wo2

    def matmul_bias_relu(patches, w_ref, b_ref):
        # bf16 MXU operands, f32 accumulation; bias + ReLU in f32.
        acc = jnp.dot(patches.astype(jnp.bfloat16), w_ref[...],
                      preferred_element_type=jnp.float32)
        return jnp.maximum(acc + b_ref[...], 0.0)              # (M, Cout) f32

    def pool2x2(acc, n, h, w, c):
        # acc: (n*h*w, c), row-major over (n, h, w) -> (n, h//2, w//2, c).
        # Pool W pairs, then H pairs; lane dim (c) untouched, rank stays <= 4.
        ho, wo = h // 2, w // 2
        r = jnp.max(acc.reshape(n * h * wo, 2, c), axis=1)     # pairs along W
        r = jnp.max(r.reshape(n * ho, 2, wo, c), axis=1)       # pairs along H
        return r.reshape(n, ho, wo, c)

    def im2col(pad_ref, h, w):
        # (N, h+2, w+2, C) padded activation -> (N*h*w, 9*C) patches so the
        # whole stage is ONE big-K matmul instead of 9 small-K ones.
        xp = pad_ref[...]
        c = xp.shape[-1]
        pieces = [xp[:, dy:dy + h, dx:dx + w, :]
                  for dy in range(3) for dx in range(3)]
        return jnp.concatenate(pieces, axis=-1).reshape(N * h * w, 9 * c)

    # ---- stage 1: (N*H1*W1, 27) @ (27, 64) --------------------------------
    a1 = matmul_bias_relu(x1_ref[...], w1_ref, b1_ref)
    p1 = pool2x2(a1, N, H1, W1, C1)
    o1_ref[...] = p1.astype(o1_ref.dtype)

    # ---- stage 2: 1-pixel halo handled in VMEM (no wrapper pad / HBM trip) --
    pad2_ref[...] = jnp.zeros_like(pad2_ref)
    pad2_ref[:, 1:1 + H2, 1:1 + W2, :] = p1
    a2 = matmul_bias_relu(im2col(pad2_ref, H2, W2), w2_ref, b2_ref)
    p2 = pool2x2(a2, N, H2, W2, C2)
    o2_ref[...] = p2.astype(o2_ref.dtype)

    # ---- stage 3 -----------------------------------------------------------
    pad3_ref[...] = jnp.zeros_like(pad3_ref)
    pad3_ref[:, 1:1 + H3, 1:1 + W3, :] = p2
    a3 = matmul_bias_relu(im2col(pad3_ref, H3, W3), w3_ref, b3_ref)
    p3 = pool2x2(a3, N, H3, W3, C3)
    o3_ref[...] = p3.astype(o3_ref.dtype)


def vgg_forward(x_nchw, params):
    """Matches VGG.forward: returns (pool1, pool2, pool3) in NCHW."""
    (w1, b1), (w2, b2), (w3, b3) = params
    x = jnp.transpose(x_nchw, (0, 2, 3, 1)).astype(jnp.float32)   # NCHW -> NHWC
    N, H, W, Cin = x.shape
    C1, C2, C3 = w1.shape[-1], w2.shape[-1], w3.shape[-1]
    assert H % 8 == 0 and W % 8 == 0

    # Stage-1 im2col in the wrapper: feeding Cin=3 directly would leave vregs
    # 3/128-lane occupied; (N*H*W, 27) @ (27, 64) is a single dense matmul.
    xp = jnp.pad(x, ((0, 0), (1, 1), (1, 1), (0, 0)))
    patches = jnp.concatenate(
        [xp[:, dy:dy + H, dx:dx + W, :] for dy in range(3) for dx in range(3)],
        axis=-1)                                                  # (N, H, W, 9*Cin)
    x1 = patches.reshape(N * H * W, 9 * Cin).astype(jnp.bfloat16)

    # Weights pre-packed as (9*Cin, Cout), (dy, dx, cin)-major; bf16 operands.
    w1p = w1.reshape(9 * Cin, C1).astype(jnp.bfloat16)
    w2p = w2.reshape(9 * C1, C2).astype(jnp.bfloat16)
    w3p = w3.reshape(9 * C2, C3).astype(jnp.bfloat16)
    b1p = b1.reshape(1, C1).astype(jnp.float32)
    b2p = b2.reshape(1, C2).astype(jnp.float32)
    b3p = b3.reshape(1, C3).astype(jnp.float32)

    Ho1, Wo1 = H // 2, W // 2
    Ho2, Wo2 = Ho1 // 2, Wo1 // 2
    Ho3, Wo3 = Ho2 // 2, Wo2 // 2

    out_shape = (
        jax.ShapeDtypeStruct((N, Ho1, Wo1, C1), jnp.float32),
        jax.ShapeDtypeStruct((N, Ho2, Wo2, C2), jnp.float32),
        jax.ShapeDtypeStruct((N, Ho3, Wo3, C3), jnp.float32),
    )

    grid_spec = pltpu.PrefetchScalarGridSpec(
        num_scalar_prefetch=0,
        grid=(1,),                       # whole (tiny) problem in one step
        in_specs=[
            pl.BlockSpec((N * H * W, 9 * Cin), lambda i: (0, 0)),
            pl.BlockSpec((9 * Cin, C1), lambda i: (0, 0)),
            pl.BlockSpec((1, C1), lambda i: (0, 0)),
            pl.BlockSpec((9 * C1, C2), lambda i: (0, 0)),
            pl.BlockSpec((1, C2), lambda i: (0, 0)),
            pl.BlockSpec((9 * C2, C3), lambda i: (0, 0)),
            pl.BlockSpec((1, C3), lambda i: (0, 0)),
        ],
        out_specs=(
            pl.BlockSpec((N, Ho1, Wo1, C1), lambda i: (0, 0, 0, 0)),
            pl.BlockSpec((N, Ho2, Wo2, C2), lambda i: (0, 0, 0, 0)),
            pl.BlockSpec((N, Ho3, Wo3, C3), lambda i: (0, 0, 0, 0)),
        ),
        scratch_shapes=[
            pltpu.VMEM((N, Ho1 + 2, Wo1 + 2, C1), jnp.float32),   # padded stage-2 input
            pltpu.VMEM((N, Ho2 + 2, Wo2 + 2, C2), jnp.float32),   # padded stage-3 input
        ],
    )

    p1, p2, p3 = pl.pallas_call(
        _vgg_fused_kernel,
        out_shape=out_shape,
        grid_spec=grid_spec,
        compiler_params=pltpu.CompilerParams(
            dimension_semantics=("arbitrary",)),
    )(x1, w1p, b1p, w2p, b2p, w3p, b3p)

    # NHWC -> NCHW once per output, outside the kernel.
    return (jnp.transpose(p1, (0, 3, 1, 2)),
            jnp.transpose(p2, (0, 3, 1, 2)),
            jnp.transpose(p3, (0, 3, 1, 2)))


def init_vgg_params(key):
    """Deterministic synthetic parameters; weights stored as (3,3,Cin,Cout) HWIO."""
    specs = [(3, 64), (64, 128), (128, 256)]
    params = []
    for i, (cin, cout) in enumerate(specs):
        kw, kb = jax.random.split(jax.random.fold_in(key, i))
        fan_in = cin * 9
        w = jax.random.normal(kw, (3, 3, cin, cout), jnp.float32) / np.sqrt(fan_in)
        b = jax.random.normal(kb, (cout,), jnp.float32) * 0.01
        params.append((w, b))
    return params


def _reference_forward(x_nchw, params, matmul_dtype=jnp.float32):
    """Pure-JAX reference (lax conv + reduce_window).

    matmul_dtype=bf16 rounds the conv operands exactly like the kernel does
    (f32 accumulation), which allows a tight numerical comparison.
    """
    x = jnp.transpose(x_nchw, (0, 2, 3, 1)).astype(jnp.float32)
    outs = []
    for w, b in params:
        y = jax.lax.conv_general_dilated(
            x.astype(matmul_dtype), w.astype(matmul_dtype),
            window_strides=(1, 1), padding="SAME",
            dimension_numbers=("NHWC", "HWIO", "NHWC"),
            preferred_element_type=jnp.float32)
        y = jnp.maximum(y + b[None, None, None, :], 0.0)
        y = jax.lax.reduce_window(
            y, -jnp.inf, jax.lax.max,
            window_dimensions=(1, 2, 2, 1),
            window_strides=(1, 2, 2, 1), padding="VALID")
        x = y
        outs.append(jnp.transpose(y, (0, 3, 1, 2)))
    return tuple(outs)


if __name__ == "__main__":
    key = jax.random.PRNGKey(0)
    kx, kp = jax.random.split(key)

    # Small NCHW input consistent with the module (Cin must be 3).
    x = jax.random.normal(kx, (2, 3, 16, 16), jnp.float32)
    params = init_vgg_params(kp)

    vgg_fwd = jax.jit(vgg_forward)
    outs = jax.block_until_ready(vgg_fwd(x, params))
    pool1, pool2, pool3 = outs

    assert pool1.shape == (2, 64, 8, 8)
    assert pool2.shape == (2, 128, 4, 4)
    assert pool3.shape == (2, 256, 2, 2)

    # Tight check vs a reference whose matmul operands are bf16-rounded
    # identically to the kernel (f32 accumulation in both).
    refs_bf16 = _reference_forward(x, params, matmul_dtype=jnp.bfloat16)
    for got, ref in zip(outs, refs_bf16):
        np.testing.assert_allclose(np.asarray(got), np.asarray(ref),
                                   rtol=2e-3, atol=2e-3)

    # Loose sanity check vs the exact-f32 reference (kernel uses bf16 MXU
    # operands, so a looser tolerance applies).
    refs_f32 = _reference_forward(x, params, matmul_dtype=jnp.float32)
    for got, ref in zip(outs, refs_f32):
        np.testing.assert_allclose(np.asarray(got), np.asarray(ref),
                                   rtol=1e-1, atol=1e-1)

    print("KERNEL_OK")
</pallas_src>

<mosaic_0001>
module attributes {stable_mosaic.version = 11 : i64} {
  func.func @_vgg_fused_kernel(%arg0: i32, %arg1: memref<512x27xbf16, #tpu.memory_space<vmem>>, %arg2: memref<27x64xbf16, #tpu.memory_space<vmem>>, %arg3: memref<1x64xf32, #tpu.memory_space<vmem>>, %arg4: memref<576x128xbf16, #tpu.memory_space<vmem>>, %arg5: memref<1x128xf32, #tpu.memory_space<vmem>>, %arg6: memref<1152x256xbf16, #tpu.memory_space<vmem>>, %arg7: memref<1x256xf32, #tpu.memory_space<vmem>>, %arg8: memref<2x8x8x64xf32, #tpu.memory_space<vmem>>, %arg9: memref<2x4x4x128xf32, #tpu.memory_space<vmem>>, %arg10: memref<2x2x2x256xf32, #tpu.memory_space<vmem>>, %arg11: memref<2x10x10x64xf32, #tpu.memory_space<vmem>>, %arg12: memref<2x6x6x128xf32, #tpu.memory_space<vmem>>) attributes {dimension_semantics = [#tpu.dimension_semantics<arbitrary>], iteration_bounds = array<i64: 1>, scalar_prefetch = 0 : i64, scratch_operands = 2 : i64, tpu.core_type = #tpu.core_type<tc>, window_params = [{pipeline_mode = #tpu.pipeline_mode<synchronous>, transform_indices = @transform_0, window_bounds = array<i64: 512, 27>}, {pipeline_mode = #tpu.pipeline_mode<synchronous>, transform_indices = @transform_1, window_bounds = array<i64: 27, 64>}, {pipeline_mode = #tpu.pipeline_mode<synchronous>, transform_indices = @transform_2, window_bounds = array<i64: 1, 64>}, {pipeline_mode = #tpu.pipeline_mode<synchronous>, transform_indices = @transform_3, window_bounds = array<i64: 576, 128>}, {pipeline_mode = #tpu.pipeline_mode<synchronous>, transform_indices = @transform_4, window_bounds = array<i64: 1, 128>}, {pipeline_mode = #tpu.pipeline_mode<synchronous>, transform_indices = @transform_5, window_bounds = array<i64: 1152, 256>}, {pipeline_mode = #tpu.pipeline_mode<synchronous>, transform_indices = @transform_6, window_bounds = array<i64: 1, 256>}, {pipeline_mode = #tpu.pipeline_mode<synchronous>, transform_indices = @transform_7, window_bounds = array<i64: 2, 8, 8, 64>}, {pipeline_mode = #tpu.pipeline_mode<synchronous>, transform_indices = @transform_8, window_bounds = array<i64: 2, 4, 4, 128>}, {pipeline_mode = #tpu.pipeline_mode<synchronous>, transform_indices = @transform_9, window_bounds = array<i64: 2, 2, 2, 256>}]} {
    %c0 = arith.constant 0 : index
    %c0_0 = arith.constant 0 : index
    %0 = vector.load %arg1[%c0, %c0_0] : memref<512x27xbf16, #tpu.memory_space<vmem>>, vector<512x27xbf16>
    %c0_1 = arith.constant 0 : index
    %c0_2 = arith.constant 0 : index
    %1 = vector.load %arg2[%c0_1, %c0_2] : memref<27x64xbf16, #tpu.memory_space<vmem>>, vector<27x64xbf16>
    %cst = arith.constant dense<0.000000e+00> : vector<512x64xf32>
    %2 = tpu.matmul %0, %1, %cst {dimension_numbers = #tpu.dot_dimension_numbers<[1], [0], [0], [1], [0, 0, 1, 1], [], []>} : vector<512x27xbf16>, vector<27x64xbf16>, vector<512x64xf32> -> vector<512x64xf32>
    %c0_3 = arith.constant 0 : index
    %c0_4 = arith.constant 0 : index
    %3 = vector.load %arg3[%c0_3, %c0_4] : memref<1x64xf32, #tpu.memory_space<vmem>>, vector<1x64xf32>
    %4 = vector.broadcast %3 : vector<1x64xf32> to vector<512x64xf32>
    %5 = arith.addf %2, %4 : vector<512x64xf32>
    %cst_5 = arith.constant 0.000000e+00 : f32
    %6 = vector.broadcast %cst_5 : f32 to vector<512x64xf32>
    %7 = arith.maximumf %5, %6 : vector<512x64xf32>
    %8 = vector.shape_cast %7 : vector<512x64xf32> to vector<256x2x64xf32>
    %cst_6 = arith.constant dense<0xFF800000> : vector<256x64xf32>
    %9 = vector.multi_reduction <maximumf>, %8, %cst_6 [1] : vector<256x2x64xf32> to vector<256x64xf32>
    %10 = vector.shape_cast %9 : vector<256x64xf32> to vector<16x2x8x64xf32>
    %cst_7 = arith.constant dense<0xFF800000> : vector<16x8x64xf32>
    %11 = vector.multi_reduction <maximumf>, %10, %cst_7 [1] : vector<16x2x8x64xf32> to vector<16x8x64xf32>
    %12 = vector.shape_cast %11 : vector<16x8x64xf32> to vector<2x8x8x64xf32>
    %c0_8 = arith.constant 0 : index
    %c0_9 = arith.constant 0 : index
    %c0_10 = arith.constant 0 : index
    %c0_11 = arith.constant 0 : index
    %13 = vector.load %arg8[%c0_8, %c0_9, %c0_10, %c0_11] : memref<2x8x8x64xf32, #tpu.memory_space<vmem>>, vector<2x8x8x64xf32>
    tpu.vector_store %arg8[%c0_8, %c0_9, %c0_10, %c0_11], %12 {strides = array<i32>} : memref<2x8x8x64xf32, #tpu.memory_space<vmem>>, vector<2x8x8x64xf32>,
    %cst_12 = arith.constant 0.000000e+00 : f32
    %14 = vector.broadcast %cst_12 : f32 to vector<2x10x10x64xf32>
    %c0_13 = arith.constant 0 : index
    %c0_14 = arith.constant 0 : index
    %c0_15 = arith.constant 0 : index
    %c0_16 = arith.constant 0 : index
    %15 = vector.load %arg11[%c0_13, %c0_14, %c0_15, %c0_16] : memref<2x10x10x64xf32, #tpu.memory_space<vmem>>, vector<2x10x10x64xf32>
    tpu.vector_store %arg11[%c0_13, %c0_14, %c0_15, %c0_16], %14 {strides = array<i32>} : memref<2x10x10x64xf32, #tpu.memory_space<vmem>>, vector<2x10x10x64xf32>,
    %c0_17 = arith.constant 0 : index
    %c1 = arith.constant 1 : index
    %c1_18 = arith.constant 1 : index
    %c0_19 = arith.constant 0 : index
    %16 = vector.load %arg11[%c0_17, %c1, %c1_18, %c0_19] : memref<2x10x10x64xf32, #tpu.memory_space<vmem>>, vector<2x8x8x64xf32>
    tpu.vector_store %arg11[%c0_17, %c1, %c1_18, %c0_19], %12 {strides = array<i32>} : memref<2x10x10x64xf32, #tpu.memory_space<vmem>>, vector<2x8x8x64xf32>,
    %c0_20 = arith.constant 0 : index
    %c0_21 = arith.constant 0 : index
    %c0_22 = arith.constant 0 : index
    %c0_23 = arith.constant 0 : index
    %17 = vector.load %arg11[%c0_20, %c0_21, %c0_22, %c0_23] : memref<2x10x10x64xf32, #tpu.memory_space<vmem>>, vector<2x10x10x64xf32>
    %18 = vector.extract_strided_slice %17 {offsets = [0, 0, 0, 0], sizes = [2, 8, 8, 64], strides = [1, 1, 1, 1]} : vector<2x10x10x64xf32> to vector<2x8x8x64xf32>
    %19 = vector.extract_strided_slice %17 {offsets = [0, 0, 1, 0], sizes = [2, 8, 8, 64], strides = [1, 1, 1, 1]} : vector<2x10x10x64xf32> to vector<2x8x8x64xf32>
    %20 = vector.extract_strided_slice %17 {offsets = [0, 0, 2, 0], sizes = [2, 8, 8, 64], strides = [1, 1, 1, 1]} : vector<2x10x10x64xf32> to vector<2x8x8x64xf32>
    %21 = vector.extract_strided_slice %17 {offsets = [0, 1, 0, 0], sizes = [2, 8, 8, 64], strides = [1, 1, 1, 1]} : vector<2x10x10x64xf32> to vector<2x8x8x64xf32>
    %22 = vector.extract_strided_slice %17 {offsets = [0, 1, 1, 0], sizes = [2, 8, 8, 64], strides = [1, 1, 1, 1]} : vector<2x10x10x64xf32> to vector<2x8x8x64xf32>
    %23 = vector.extract_strided_slice %17 {offsets = [0, 1, 2, 0], sizes = [2, 8, 8, 64], strides = [1, 1, 1, 1]} : vector<2x10x10x64xf32> to vector<2x8x8x64xf32>
    %24 = vector.extract_strided_slice %17 {offsets = [0, 2, 0, 0], sizes = [2, 8, 8, 64], strides = [1, 1, 1, 1]} : vector<2x10x10x64xf32> to vector<2x8x8x64xf32>
    %25 = vector.extract_strided_slice %17 {offsets = [0, 2, 1, 0], sizes = [2, 8, 8, 64], strides = [1, 1, 1, 1]} : vector<2x10x10x64xf32> to vector<2x8x8x64xf32>
    %26 = vector.extract_strided_slice %17 {offsets = [0, 2, 2, 0], sizes = [2, 8, 8, 64], strides = [1, 1, 1, 1]} : vector<2x10x10x64xf32> to vector<2x8x8x64xf32>
    %27 = tpu.concatenate %18, %19, %20, %21, %22, %23, %24, %25, %26 in 3 : vector<2x8x8x64xf32>, vector<2x8x8x64xf32>, vector<2x8x8x64xf32>, vector<2x8x8x64xf32>, vector<2x8x8x64xf32>, vector<2x8x8x64xf32>, vector<2x8x8x64xf32>, vector<2x8x8x64xf32>, vector<2x8x8x64xf32> -> vector<2x8x8x576xf32>
    %28 = vector.shape_cast %27 : vector<2x8x8x576xf32> to vector<128x576xf32>
    %29 = arith.truncf %28 : vector<128x576xf32> to vector<128x576xbf16>
    %c0_24 = arith.constant 0 : index
    %c0_25 = arith.constant 0 : index
    %30 = vector.load %arg4[%c0_24, %c0_25] : memref<576x128xbf16, #tpu.memory_space<vmem>>, vector<576x128xbf16>
    %cst_26 = arith.constant dense<0.000000e+00> : vector<128x128xf32>
    %31 = tpu.matmul %29, %30, %cst_26 {dimension_numbers = #tpu.dot_dimension_numbers<[1], [0], [0], [1], [0, 0, 1, 1], [], []>} : vector<128x576xbf16>, vector<576x128xbf16>, vector<128x128xf32> -> vector<128x128xf32>
    %c0_27 = arith.constant 0 : index
    %c0_28 = arith.constant 0 : index
    %32 = vector.load %arg5[%c0_27, %c0_28] : memref<1x128xf32, #tpu.memory_space<vmem>>, vector<1x128xf32>
    %33 = vector.broadcast %32 : vector<1x128xf32> to vector<128x128xf32>
    %34 = arith.addf %31, %33 : vector<128x128xf32>
    %cst_29 = arith.constant 0.000000e+00 : f32
    %35 = vector.broadcast %cst_29 : f32 to vector<128x128xf32>
    %36 = arith.maximumf %34, %35 : vector<128x128xf32>
    %37 = vector.shape_cast %36 : vector<128x128xf32> to vector<64x2x128xf32>
    %cst_30 = arith.constant dense<0xFF800000> : vector<64x128xf32>
    %38 = vector.multi_reduction <maximumf>, %37, %cst_30 [1] : vector<64x2x128xf32> to vector<64x128xf32>
    %39 = vector.shape_cast %38 : vector<64x128xf32> to vector<8x2x4x128xf32>
    %cst_31 = arith.constant dense<0xFF800000> : vector<8x4x128xf32>
    %40 = vector.multi_reduction <maximumf>, %39, %cst_31 [1] : vector<8x2x4x128xf32> to vector<8x4x128xf32>
    %41 = vector.shape_cast %40 : vector<8x4x128xf32> to vector<2x4x4x128xf32>
    %c0_32 = arith.constant 0 : index
    %c0_33 = arith.constant 0 : index
    %c0_34 = arith.constant 0 : index
    %c0_35 = arith.constant 0 : index
    %42 = vector.load %arg9[%c0_32, %c0_33, %c0_34, %c0_35] : memref<2x4x4x128xf32, #tpu.memory_space<vmem>>, vector<2x4x4x128xf32>
    tpu.vector_store %arg9[%c0_32, %c0_33, %c0_34, %c0_35], %41 {strides = array<i32>} : memref<2x4x4x128xf32, #tpu.memory_space<vmem>>, vector<2x4x4x128xf32>,
    %cst_36 = arith.constant 0.000000e+00 : f32
    %43 = vector.broadcast %cst_36 : f32 to vector<2x6x6x128xf32>
    %c0_37 = arith.constant 0 : index
    %c0_38 = arith.constant 0 : index
    %c0_39 = arith.constant 0 : index
    %c0_40 = arith.constant 0 : index
    %44 = vector.load %arg12[%c0_37, %c0_38, %c0_39, %c0_40] : memref<2x6x6x128xf32, #tpu.memory_space<vmem>>, vector<2x6x6x128xf32>
    tpu.vector_store %arg12[%c0_37, %c0_38, %c0_39, %c0_40], %43 {strides = array<i32>} : memref<2x6x6x128xf32, #tpu.memory_space<vmem>>, vector<2x6x6x128xf32>,
    %c0_41 = arith.constant 0 : index
    %c1_42 = arith.constant 1 : index
    %c1_43 = arith.constant 1 : index
    %c0_44 = arith.constant 0 : index
    %45 = vector.load %arg12[%c0_41, %c1_42, %c1_43, %c0_44] : memref<2x6x6x128xf32, #tpu.memory_space<vmem>>, vector<2x4x4x128xf32>
    tpu.vector_store %arg12[%c0_41, %c1_42, %c1_43, %c0_44], %41 {strides = array<i32>} : memref<2x6x6x128xf32, #tpu.memory_space<vmem>>, vector<2x4x4x128xf32>,
    %c0_45 = arith.constant 0 : index
    %c0_46 = arith.constant 0 : index
    %c0_47 = arith.constant 0 : index
    %c0_48 = arith.constant 0 : index
    %46 = vector.load %arg12[%c0_45, %c0_46, %c0_47, %c0_48] : memref<2x6x6x128xf32, #tpu.memory_space<vmem>>, vector<2x6x6x128xf32>
    %47 = vector.extract_strided_slice %46 {offsets = [0, 0, 0, 0], sizes = [2, 4, 4, 128], strides = [1, 1, 1, 1]} : vector<2x6x6x128xf32> to vector<2x4x4x128xf32>
    %48 = vector.extract_strided_slice %46 {offsets = [0, 0, 1, 0], sizes = [2, 4, 4, 128], strides = [1, 1, 1, 1]} : vector<2x6x6x128xf32> to vector<2x4x4x128xf32>
    %49 = vector.extract_strided_slice %46 {offsets = [0, 0, 2, 0], sizes = [2, 4, 4, 128], strides = [1, 1, 1, 1]} : vector<2x6x6x128xf32> to vector<2x4x4x128xf32>
    %50 = vector.extract_strided_slice %46 {offsets = [0, 1, 0, 0], sizes = [2, 4, 4, 128], strides = [1, 1, 1, 1]} : vector<2x6x6x128xf32> to vector<2x4x4x128xf32>
    %51 = vector.extract_strided_slice %46 {offsets = [0, 1, 1, 0], sizes = [2, 4, 4, 128], strides = [1, 1, 1, 1]} : vector<2x6x6x128xf32> to vector<2x4x4x128xf32>
    %52 = vector.extract_strided_slice %46 {offsets = [0, 1, 2, 0], sizes = [2, 4, 4, 128], strides = [1, 1, 1, 1]} : vector<2x6x6x128xf32> to vector<2x4x4x128xf32>
    %53 = vector.extract_strided_slice %46 {offsets = [0, 2, 0, 0], sizes = [2, 4, 4, 128], strides = [1, 1, 1, 1]} : vector<2x6x6x128xf32> to vector<2x4x4x128xf32>
    %54 = vector.extract_strided_slice %46 {offsets = [0, 2, 1, 0], sizes = [2, 4, 4, 128], strides = [1, 1, 1, 1]} : vector<2x6x6x128xf32> to vector<2x4x4x128xf32>
    %55 = vector.extract_strided_slice %46 {offsets = [0, 2, 2, 0], sizes = [2, 4, 4, 128], strides = [1, 1, 1, 1]} : vector<2x6x6x128xf32> to vector<2x4x4x128xf32>
    %56 = tpu.concatenate %47, %48, %49, %50, %51, %52, %53, %54, %55 in 3 : vector<2x4x4x128xf32>, vector<2x4x4x128xf32>, vector<2x4x4x128xf32>, vector<2x4x4x128xf32>, vector<2x4x4x128xf32>, vector<2x4x4x128xf32>, vector<2x4x4x128xf32>, vector<2x4x4x128xf32>, vector<2x4x4x128xf32> -> vector<2x4x4x1152xf32>
    %57 = vector.shape_cast %56 : vector<2x4x4x1152xf32> to vector<32x1152xf32>
    %58 = arith.truncf %57 : vector<32x1152xf32> to vector<32x1152xbf16>
    %c0_49 = arith.constant 0 : index
    %c0_50 = arith.constant 0 : index
    %59 = vector.load %arg6[%c0_49, %c0_50] : memref<1152x256xbf16, #tpu.memory_space<vmem>>, vector<1152x256xbf16>
    %cst_51 = arith.constant dense<0.000000e+00> : vector<32x256xf32>
    %60 = tpu.matmul %58, %59, %cst_51 {dimension_numbers = #tpu.dot_dimension_numbers<[1], [0], [0], [1], [0, 0, 1, 1], [], []>} : vector<32x1152xbf16>, vector<1152x256xbf16>, vector<32x256xf32> -> vector<32x256xf32>
    %c0_52 = arith.constant 0 : index
    %c0_53 = arith.constant 0 : index
    %61 = vector.load %arg7[%c0_52, %c0_53] : memref<1x256xf32, #tpu.memory_space<vmem>>, vector<1x256xf32>
    %62 = vector.broadcast %61 : vector<1x256xf32> to vector<32x256xf32>
    %63 = arith.addf %60, %62 : vector<32x256xf32>
    %cst_54 = arith.constant 0.000000e+00 : f32
    %64 = vector.broadcast %cst_54 : f32 to vector<32x256xf32>
    %65 = arith.maximumf %63, %64 : vector<32x256xf32>
    %66 = vector.shape_cast %65 : vector<32x256xf32> to vector<16x2x256xf32>
    %cst_55 = arith.constant dense<0xFF800000> : vector<16x256xf32>
    %67 = vector.multi_reduction <maximumf>, %66, %cst_55 [1] : vector<16x2x256xf32> to vector<16x256xf32>
    %68 = vector.shape_cast %67 : vector<16x256xf32> to vector<4x2x2x256xf32>
    %cst_56 = arith.constant dense<0xFF800000> : vector<4x2x256xf32>
    %69 = vector.multi_reduction <maximumf>, %68, %cst_56 [1] : vector<4x2x2x256xf32> to vector<4x2x256xf32>
    %70 = vector.shape_cast %69 : vector<4x2x256xf32> to vector<2x2x2x256xf32>
    %c0_57 = arith.constant 0 : index
    %c0_58 = arith.constant 0 : index
    %c0_59 = arith.constant 0 : index
    %c0_60 = arith.constant 0 : index
    %71 = vector.load %arg10[%c0_57, %c0_58, %c0_59, %c0_60] : memref<2x2x2x256xf32, #tpu.memory_space<vmem>>, vector<2x2x2x256xf32>
    tpu.vector_store %arg10[%c0_57, %c0_58, %c0_59, %c0_60], %70 {strides = array<i32>} : memref<2x2x2x256xf32, #tpu.memory_space<vmem>>, vector<2x2x2x256xf32>,
    return
  }
  func.func @transform_0(%arg0: i32) -> (i32, i32) {
    %c0_i32 = arith.constant 0 : i32
    %c0_i32_0 = arith.constant 0 : i32
    %c0_i32_1 = arith.constant 0 : i32
    return %c0_i32, %c0_i32_0 : i32, i32
  }
  func.func @transform_1(%arg0: i32) -> (i32, i32) {
    %c0_i32 = arith.constant 0 : i32
    %c0_i32_0 = arith.constant 0 : i32
    %c0_i32_1 = arith.constant 0 : i32
    return %c0_i32, %c0_i32_0 : i32, i32
  }
  func.func @transform_2(%arg0: i32) -> (i32, i32) {
    %c0_i32 = arith.constant 0 : i32
    %c0_i32_0 = arith.constant 0 : i32
    %c0_i32_1 = arith.constant 0 : i32
    return %c0_i32, %c0_i32_0 : i32, i32
  }
  func.func @transform_3(%arg0: i32) -> (i32, i32) {
    %c0_i32 = arith.constant 0 : i32
    %c0_i32_0 = arith.constant 0 : i32
    %c0_i32_1 = arith.constant 0 : i32
    return %c0_i32, %c0_i32_0 : i32, i32
  }
  func.func @transform_4(%arg0: i32) -> (i32, i32) {
    %c0_i32 = arith.constant 0 : i32
    %c0_i32_0 = arith.constant 0 : i32
    %c0_i32_1 = arith.constant 0 : i32
    return %c0_i32, %c0_i32_0 : i32, i32
  }
  func.func @transform_5(%arg0: i32) -> (i32, i32) {
    %c0_i32 = arith.constant 0 : i32
    %c0_i32_0 = arith.constant 0 : i32
    %c0_i32_1 = arith.constant 0 : i32
    return %c0_i32, %c0_i32_0 : i32, i32
  }
  func.func @transform_6(%arg0: i32) -> (i32, i32) {
    %c0_i32 = arith.constant 0 : i32
    %c0_i32_0 = arith.constant 0 : i32
    %c0_i32_1 = arith.constant 0 : i32
    return %c0_i32, %c0_i32_0 : i32, i32
  }
  func.func @transform_7(%arg0: i32) -> (i32, i32, i32, i32) {
    %c0_i32 = arith.constant 0 : i32
    %c0_i32_0 = arith.constant 0 : i32
    %c0_i32_1 = arith.constant 0 : i32
    %c0_i32_2 = arith.constant 0 : i32
    %c0_i32_3 = arith.constant 0 : i32
    return %c0_i32, %c0_i32_0, %c0_i32_1, %c0_i32_2 : i32, i32, i32, i32
  }
  func.func @transform_8(%arg0: i32) -> (i32, i32, i32, i32) {
    %c0_i32 = arith.constant 0 : i32
    %c0_i32_0 = arith.constant 0 : i32
    %c0_i32_1 = arith.constant 0 : i32
    %c0_i32_2 = arith.constant 0 : i32
    %c0_i32_3 = arith.constant 0 : i32
    return %c0_i32, %c0_i32_0, %c0_i32_1, %c0_i32_2 : i32, i32, i32, i32
  }
  func.func @transform_9(%arg0: i32) -> (i32, i32, i32, i32) {
    %c0_i32 = arith.constant 0 : i32
    %c0_i32_0 = arith.constant 0 : i32
    %c0_i32_1 = arith.constant 0 : i32
    %c0_i32_2 = arith.constant 0 : i32
    %c0_i32_3 = arith.constant 0 : i32
    return %c0_i32, %c0_i32_0, %c0_i32_1, %c0_i32_2 : i32, i32, i32, i32
  }
}

</mosaic_0001>

<bundles_post_ra>
// kernel: vgg_forward.1
= control target key start
LH: loop header
LB: loop body
LE: loop exit
PB: predicated region body
PF: predicated region fallthrough
CT: control target
= control target key end

     0   :  { %15 = vsyncpa [#allocation5], 0  ;;  %vm375_vm0 = vcmask 1044480   ;;  %vm376_vm1 = vcmask 1045504   ;;  %v9712_v1 = vmov 65535   ;;  %vm278_vm2 = vcmask 220160   ;;  %s12881_s0 = inlined_call_operand.vmem [shape: bf16[512,27], index: 0, kind: input, shape index: {}]   ;;  %s12882_s1 = inlined_call_operand.vmem [shape: bf16[27,64], index: 1, kind: input, shape index: {}]   ;;  %s12883_s2 = inlined_call_operand.vmem [shape: f32[1,64], index: 2, kind: input, shape index: {}]   ;;  %s12884_s3 = inlined_call_operand.vmem [shape: bf16[576,128], index: 3, kind: input, shape index: {}]   ;;  %s12885_s4 = inlined_call_operand.vmem [shape: f32[1,128], index: 4, kind: input, shape index: {}]   ;;  %s12886_s5 = inlined_call_operand.vmem [shape: bf16[1152,256], index: 5, kind: input, shape index: {}]   ;;  %s12887_s6 = inlined_call_operand.vmem [shape: f32[1,256], index: 6, kind: input, shape index: {}]   ;;  %s12888_s7 = inlined_call_operand.hbm [shape: f32[2,8,8,64], index: 7, kind: output, shape index: {0}]   ;;  %s12889_s8 = inlined_call_operand.hbm [shape: f32[2,4,4,128], index: 8, kind: output, shape index: {1}]   ;;  %s12890_s9 = inlined_call_operand.hbm [shape: f32[2,2,2,256], index: 9, kind: output, shape index: {2}]  }
   0x1   :  { %v9329_v0 = vld [vmem:[%s12882_s1 + $0x8] sm:$0x3f]   ;;  %v377_v2 = vsel %vm375_vm0, 4294967295, %v9712_v1  ;;  %v9331_v3 = vld [vmem:[%s12881_s0] sm:$0xff]   ;;  %v9333_v8 = vld [vmem:[%s12881_s0 + $0x10] sm:$0xff]  }
   0x2   :  { %v378_v4 = vsel %vm376_vm1, %v377_v2, 0  ;;  %v9330_v6 = vld [vmem:[%s12882_s1] sm:$0xff]   ;;  %9100 = vmatprep.mubr.msk.bf16.mxu0 %vm278_vm2, %v9331_v3  ;;  %v9332_v7 = vld [vmem:[%s12881_s0 + $0x8] sm:$0xff]   ;;  %v9334_v9 = vld [vmem:[%s12881_s0 + $0x18] sm:$0xff]  }
   0x3   :  { %v380_v5 = vand.u32 %v9329_v0, %v378_v4  ;;  %v9335_v10 = vld [vmem:[%s12881_s0 + $0x20] sm:$0xff]   ;;  %v9336_v11 = vld [vmem:[%s12881_s0 + $0x28] sm:$0xff]   ;;  %v9337_v12 = vld [vmem:[%s12881_s0 + $0x30] sm:$0xff]  }
   0x4   :  { %v9338_v13 = vld [vmem:[%s12881_s0 + $0x38] sm:$0xff]   ;;  %v9339_v14 = vld [vmem:[%s12881_s0 + $0x40] sm:$0xff]   ;;  %v9340_v15 = vld [vmem:[%s12881_s0 + $0x48] sm:$0xff]  }
   0x5   :  { %9096 = vmatprep.subr.bf16.mxu0 %v380_v5  ;;  %v9341_v16 = vld [vmem:[%s12881_s0 + $0x50] sm:$0xff]   ;;  %v9342_v17 = vld [vmem:[%s12881_s0 + $0x58] sm:$0xff]   ;;  %v9343_v18 = vld [vmem:[%s12881_s0 + $0x60] sm:$0xff]  }
   0x6   :  { %9097 = vmatpush3.bf16.msra.mxu0 %v380_v5  ;;  %v9344_v19 = vld [vmem:[%s12881_s0 + $0x68] sm:$0xff]   ;;  %v9345_v20 = vld [vmem:[%s12881_s0 + $0x70] sm:$0xff]   ;;  %v9346_v21 = vld [vmem:[%s12881_s0 + $0x78] sm:$0xff]  }
   0x7   :  { %9098 = vmatprep.subr.bf16.mxu0 %v9330_v6  ;;  %v9347_v22 = vld [vmem:[%s12881_s0 + $0x80] sm:$0xff]   ;;  %v9348_v23 = vld [vmem:[%s12881_s0 + $0x88] sm:$0xff]   ;;  %v9349_v24 = vld [vmem:[%s12881_s0 + $0x90] sm:$0xff]  }
   0x8   :  { %v9350_v25 = vld [vmem:[%s12881_s0 + $0x98] sm:$0xff]   ;;  %v9351_v26 = vld [vmem:[%s12881_s0 + $0xa0] sm:$0xff]   ;;  %v9352_v27 = vld [vmem:[%s12881_s0 + $0xa8] sm:$0xff]  }
   0x9   :  { %v9353_v28 = vld [vmem:[%s12881_s0 + $0xb0] sm:$0xff]   ;;  %v9354_v29 = vld [vmem:[%s12881_s0 + $0xb8] sm:$0xff]   ;;  %v9355_v30 = vld [vmem:[%s12881_s0 + $0xc0] sm:$0xff]  }
   0xa   :  { %9099 = vmatpush3.bf16.msra.mxu0 %v9330_v6  ;;  %v9356_v31 = vld [vmem:[%s12881_s0 + $0xc8] sm:$0xff]   ;;  %v9357_v32 = vld [vmem:[%s12881_s0 + $0xd0] sm:$0xff]  }
   0xd   :  { %9101 = vmatmul.mubr.msk.bf16.vlgmr.msra.gmra.mxu0 %vm278_vm2, %v9332_v7 }
   0xe   :  { %9104 = vmatprep.mubr.msk.bf16.mxu0 %vm278_vm2, %v9333_v8 }
  0x15   :  { %9105 = vmatmul.mubr.msk.bf16.gmra.mxu0 %vm278_vm2, %v9334_v9 }
  0x16   :  { %9108 = vmatprep.mubr.msk.bf16.mxu0 %vm278_vm2, %v9335_v10 }
  0x1d   :  { %9109 = vmatmul.mubr.msk.bf16.gmra.mxu0 %vm278_vm2, %v9336_v11 }
  0x1e   :  { %9112 = vmatprep.mubr.msk.bf16.mxu0 %vm278_vm2, %v9337_v12 }
  0x25   :  { %9113 = vmatmul.mubr.msk.bf16.gmra.mxu0 %vm278_vm2, %v9338_v13 }
  0x26   :  { %9116 = vmatprep.mubr.msk.bf16.mxu0 %vm278_vm2, %v9339_v14 }
  0x2d   :  { %9117 = vmatmul.mubr.msk.bf16.gmra.mxu0 %vm278_vm2, %v9340_v15 }
  0x2e   :  { %9120 = vmatprep.mubr.msk.bf16.mxu0 %vm278_vm2, %v9341_v16 }
  0x35   :  { %9121 = vmatmul.mubr.msk.bf16.gmra.mxu0 %vm278_vm2, %v9342_v17 }
  0x36   :  { %9124 = vmatprep.mubr.msk.bf16.mxu0 %vm278_vm2, %v9343_v18 }
  0x3d   :  { %9125 = vmatmul.mubr.msk.bf16.gmra.mxu0 %vm278_vm2, %v9344_v19 }
  0x3e   :  { %9128 = vmatprep.mubr.msk.bf16.mxu0 %vm278_vm2, %v9345_v20 }
  0x45   :  { %9129 = vmatmul.mubr.msk.bf16.gmra.mxu0 %vm278_vm2, %v9346_v21 }
  0x46   :  { %9132 = vmatprep.mubr.msk.bf16.mxu0 %vm278_vm2, %v9347_v22 }
  0x4d   :  { %9133 = vmatmul.mubr.msk.bf16.gmra.mxu0 %vm278_vm2, %v9348_v23 }
  0x4e   :  { %9136 = vmatprep.mubr.msk.bf16.mxu0 %vm278_vm2, %v9349_v24 }
  0x55   :  { %9137 = vmatmul.mubr.msk.bf16.gmra.mxu0 %vm278_vm2, %v9350_v25 }
  0x56   :  { %9140 = vmatprep.mubr.msk.bf16.mxu0 %vm278_vm2, %v9351_v26 }
  0x5d   :  { %9141 = vmatmul.mubr.msk.bf16.gmra.mxu0 %vm278_vm2, %v9352_v27 }
  0x5e   :  { %9144 = vmatprep.mubr.msk.bf16.mxu0 %vm278_vm2, %v9353_v28 }
  0x65   :  { %9145 = vmatmul.mubr.msk.bf16.gmra.mxu0 %vm278_vm2, %v9354_v29 }
  0x66   :  { %9148 = vmatprep.mubr.msk.bf16.mxu0 %vm278_vm2, %v9355_v30 }
  0x67   :  { %16 = vsyncpa [#allocation7], 0  ;;  %v9358_v33 = vld [vmem:[%s12881_s0 + $0xd8] sm:$0xff]   ;;  %v9359_v34 = vld [vmem:[%s12881_s0 + $0xe0] sm:$0xff]   ;;  %vm2143_vm3 = vcmask 517120   ;;  %vm3936_vm4 = vcmask 523264   ;;  %v803_v41 = vlaneseq }
  0x68   :  { %v9360_v35 = vld [vmem:[%s12881_s0 + $0xe8] sm:$0xff]   ;;  %v9361_v36 = vld [vmem:[%s12881_s0 + $0xf0] sm:$0xff]   ;;  %v9362_v37 = vld [vmem:[%s12881_s0 + $0xf8] sm:$0xff]   ;;  %v9713_v38 = vmov 0.0   ;;  %v9714_v39 = vmov 1983009808  }
  0x69   :  { %4602 = vst.msk [vmem:[#allocation2 + $0x10] sm:$0xff] %vm3936_vm4, %v9713_v38  ;;  %4600 = vst.msk [vmem:[#allocation2] sm:$0xff] %vm3936_vm4, %v9713_v38  ;;  %v801_v40 = vunpack.c.l.s4 %v9714_v39  ;;  %v9948_v43 = vshrl.u32 %v803_v41, 7  ;;  %v9953_v44 = vld [vmem:[%s12883_s2] ss:$0 sm:$0xff]  ;;  %vm4449_vm5 = vcmask 1041409  }
  0x6a   :  { %4603 = vst.msk [vmem:[#allocation2 + $0x18] sm:$0x3] %vm2143_vm3, %v9713_v38  ;;  %4601 = vst.msk [vmem:[#allocation2 + $0x8] sm:$0x3] %vm2143_vm3, %v9713_v38  ;;  %vm4451_vm6 = vcmask 1042434   ;;  %vm4453_vm7 = vcmask 1043459  }
  0x6b   :  { %4604 = vst.msk [vmem:[#allocation2 + $0x20] sm:$0xff] %vm3936_vm4, %v9713_v38  ;;  %4606 = vst.msk [vmem:[#allocation2 + $0x30] sm:$0xff] %vm3936_vm4, %v9713_v38  ;;  %v802_v42 = vunpack.c.0.s8 %v801_v40  ;;  %vm4455_vm8 = vcmask 1044484   ;;  %vm4457_vm9 = vcmask 1045509   ;;  %vm4459_vm10 = vcmask 1046534   ;;  %s9715_s21 = smov 64  }
  0x6c   :  { %4605 = vst.msk [vmem:[#allocation2 + $0x28] sm:$0x3] %vm2143_vm3, %v9713_v38  ;;  %4607 = vst.msk [vmem:[#allocation2 + $0x38] sm:$0x3] %vm2143_vm3, %v9713_v38  ;;  %vm4461_vm11 = vcmask 1047559   ;;  %vm4729_vm12 = vcmask 1046528  }
  0x6d   :  { %9149 = vmatmul.mubr.msk.bf16.gmra.mxu0 %vm278_vm2, %v9356_v31  ;;  %4608 = vst.msk [vmem:[#allocation2 + $0x40] sm:$0xff] %vm3936_vm4, %v9713_v38  ;;  %4610 = vst.msk [vmem:[#allocation2 + $0x50] sm:$0xff] %vm3936_vm4, %v9713_v38  ;;  %v9957_v47 = vsub.s32 %v802_v42, %v9948_v43  ;;  %vm6114_vm13 = vcmask 1041408   ;;  %s9718_s1 = smov [#allocation4]  }
  0x6e   :  { %9152 = vmatprep.mubr.msk.bf16.mxu0 %vm278_vm2, %v9357_v32  ;;  %4609 = vst.msk [vmem:[#allocation2 + $0x48] sm:$0x3] %vm2143_vm3, %v9713_v38  ;;  %4611 = vst.msk [vmem:[#allocation2 + $0x58] sm:$0x3] %vm2143_vm3, %v9713_v38  ;;  %s8596_s20 = sshll.u32 %s9718_s1, 4  ;;  %s8597_s20 = int_to_ptr.vmem [resolvable:$true] %s8596_s20 }
  0x6f   :  { %4612 = vst.msk [vmem:[#allocation2 + $0x60] sm:$0xff] %vm3936_vm4, %v9713_v38  ;;  %4614 = vst.msk [vmem:[#allocation2 + $0x70] sm:$0xff] %vm3936_vm4, %v9713_v38 }
  0x70   :  { %4613 = vst.msk [vmem:[#allocation2 + $0x68] sm:$0x3] %vm2143_vm3, %v9713_v38  ;;  %4615 = vst.msk [vmem:[#allocation2 + $0x78] sm:$0x3] %vm2143_vm3, %v9713_v38 }
  0x71   :  { %4616 = vst.msk [vmem:[#allocation2 + $0x80] sm:$0xff] %vm3936_vm4, %v9713_v38  ;;  %4618 = vst.msk [vmem:[#allocation2 + $0x90] sm:$0xff] %vm3936_vm4, %v9713_v38 }
  0x72   :  { %4617 = vst.msk [vmem:[#allocation2 + $0x88] sm:$0x3] %vm2143_vm3, %v9713_v38  ;;  %4619 = vst.msk [vmem:[#allocation2 + $0x98] sm:$0x3] %vm2143_vm3, %v9713_v38 }
  0x73   :  { %4620 = vst.msk [vmem:[#allocation2 + $0xa0] sm:$0xff] %vm3936_vm4, %v9713_v38  ;;  %4622 = vst.msk [vmem:[#allocation2 + $0xb0] sm:$0xff] %vm3936_vm4, %v9713_v38 }
  0x74   :  { %4621 = vst.msk [vmem:[#allocation2 + $0xa8] sm:$0x3] %vm2143_vm3, %v9713_v38  ;;  %4623 = vst.msk [vmem:[#allocation2 + $0xb8] sm:$0x3] %vm2143_vm3, %v9713_v38 }
  0x75   :  { %9153 = vmatmul.mubr.msk.bf16.gmra.mxu0 %vm278_vm2, %v9358_v33  ;;  %4624 = vst.msk [vmem:[#allocation2 + $0xc0] sm:$0xff] %vm3936_vm4, %v9713_v38  ;;  %4626 = vst.msk [vmem:[#allocation2 + $0xd0] sm:$0xff] %vm3936_vm4, %v9713_v38 }
  0x76   :  { %9156 = vmatprep.mubr.msk.bf16.mxu0 %vm278_vm2, %v9359_v34  ;;  %4625 = vst.msk [vmem:[#allocation2 + $0xc8] sm:$0x3] %vm2143_vm3, %v9713_v38  ;;  %4627 = vst.msk [vmem:[#allocation2 + $0xd8] sm:$0x3] %vm2143_vm3, %v9713_v38 }
  0x77   :  { %4628 = vst.msk [vmem:[#allocation2 + $0xe0] sm:$0xff] %vm3936_vm4, %v9713_v38  ;;  %4630 = vst.msk [vmem:[#allocation2 + $0xf0] sm:$0xff] %vm3936_vm4, %v9713_v38 }
  0x78   :  { %4629 = vst.msk [vmem:[#allocation2 + $0xe8] sm:$0x3] %vm2143_vm3, %v9713_v38  ;;  %4631 = vst.msk [vmem:[#allocation2 + $0xf8] sm:$0x3] %vm2143_vm3, %v9713_v38 }
  0x79   :  { %4632 = vst.msk [vmem:[#allocation2 + $0x100] sm:$0xff] %vm3936_vm4, %v9713_v38  ;;  %4634 = vst.msk [vmem:[#allocation2 + $0x110] sm:$0xff] %vm3936_vm4, %v9713_v38 }
  0x7a   :  { %4633 = vst.msk [vmem:[#allocation2 + $0x108] sm:$0x3] %vm2143_vm3, %v9713_v38  ;;  %4635 = vst.msk [vmem:[#allocation2 + $0x118] sm:$0x3] %vm2143_vm3, %v9713_v38 }
  0x7b   :  { %4636 = vst.msk [vmem:[#allocation2 + $0x120] sm:$0xff] %vm3936_vm4, %v9713_v38  ;;  %4638 = vst.msk [vmem:[#allocation2 + $0x130] sm:$0xff] %vm3936_vm4, %v9713_v38 }
  0x7c   :  { %4637 = vst.msk [vmem:[#allocation2 + $0x128] sm:$0x3] %vm2143_vm3, %v9713_v38  ;;  %4639 = vst.msk [vmem:[#allocation2 + $0x138] sm:$0x3] %vm2143_vm3, %v9713_v38 }
  0x7d   :  { %9157 = vmatmul.mubr.msk.bf16.gmra.mxu0 %vm278_vm2, %v9360_v35  ;;  %6667 = vst [vmem:[#allocation3] sm:$0x3f] %v9713_v38  ;;  %6668 = vst [vmem:[#allocation3 + $0x8] sm:$0x3f] %v9713_v38 }
  0x7e   :  { %9160 = vmatprep.mubr.msk.bf16.mxu0 %vm278_vm2, %v9361_v36  ;;  %6669 = vst [vmem:[#allocation3 + $0x10] sm:$0x3f] %v9713_v38  ;;  %6670 = vst [vmem:[#allocation3 + $0x18] sm:$0x3f] %v9713_v38 }
  0x7f   :  { %6671 = vst [vmem:[#allocation3 + $0x20] sm:$0x3f] %v9713_v38  ;;  %6672 = vst [vmem:[#allocation3 + $0x28] sm:$0x3f] %v9713_v38 }
  0x80   :  { %6673 = vst [vmem:[#allocation3 + $0x30] sm:$0x3f] %v9713_v38  ;;  %6674 = vst [vmem:[#allocation3 + $0x38] sm:$0x3f] %v9713_v38 }
  0x81   :  { %6675 = vst [vmem:[#allocation3 + $0x40] sm:$0x3f] %v9713_v38  ;;  %6676 = vst [vmem:[#allocation3 + $0x48] sm:$0x3f] %v9713_v38 }
  0x82   :  { %6677 = vst [vmem:[#allocation3 + $0x50] sm:$0x3f] %v9713_v38  ;;  %6678 = vst [vmem:[#allocation3 + $0x58] sm:$0x3f] %v9713_v38 }
  0x83   :  { %12898 = vst [vmem:[#allocation11_spill] sm:$0xff] %v9948_v43  ;;  %12899 = vst [vmem:[#allocation12_spill] sm:$0xff] %v9957_v47 }
  0x85   :  { %9161 = vmatmul.mubr.msk.bf16.gmra.mxu0 %vm278_vm2, %v9362_v37 }
  0xcd   :  { %v9102_v45 = vpop.f32.mrf.mxu0 }
  0xce   :  { %v425_v46 = vadd.f32 %v9102_v45, %v9953_v44 }
  0xcf   :  { %v416_v48 = vpop.f32.mrf.mxu0 }
  0xd0   :  { %v673_v49 = vmax.f32 %v425_v46, 0.0  ;;  %v417_v50 = vadd.f32 %v9953_v44, %v416_v48 }
  0xd1   :  { %v9103_v51 = vpop.f32.mrf.mxu0 }
  0xd2   :  { %v833_v52 = vcombine.high %v673_v49, %v673_v49  ;;  %v840_v53 = vrot.slane %v673_v49, %v9957_v47  ;;  %v671_v54 = vmax.f32 %v417_v50, 0.0  ;;  %v428_v55 = vadd.f32 %v9103_v51, %v9953_v44 }
  0xd3   :  { %v419_v56 = vpop.f32.mrf.mxu0 }
  0xd4   :  { %v847_v57 = vrot.slane %v833_v52, %v9957_v47  ;;  %v848_v58 = vcombine.high %v840_v53, %v840_v53  ;;  %v2200_v59 = vsel %vm2143_vm3, %v840_v53, -inf  ;;  %v799_v60 = vcombine.high %v671_v54, %v671_v54 }
  0xd5   :  { %v2201_v61 = vrot.slane %v2200_v59, 4  ;;  %v806_v62 = vrot.slane %v671_v54, %v9957_v47  ;;  %v9965_v63 = vmax.f32 %v428_v55, 0.0  ;;  %v9968_v0 = vadd.f32 %v9953_v44, %v419_v56 }
  0xd6   :  { %v849_v1 = vcombine.high %v847_v57, %v847_v57  ;;  %v2207_v2 = vsel %vm2143_vm3, %v848_v58, -inf  ;;  %v2214_v3 = vsel %vm2143_vm3, %v847_v57, -inf  ;;  %v813_v4 = vrot.slane %v799_v60, %v9957_v47 }
  0xd7   :  { %v2202_v5 = vmax.f32 %v2200_v59, %v2201_v61  ;;  %v2208_v6 = vrot.slane %v2207_v2, 4  ;;  %v2215_v7 = vrot.slane %v2214_v3, 4  ;;  %v814_v8 = vcombine.high %v806_v62, %v806_v62 }
  0xd8   :  { %v2221_v9 = vsel %vm2143_vm3, %v849_v1, -inf  ;;  %v815_v10 = vcombine.high %v813_v4, %v813_v4  ;;  %v2144_v11 = vsel %vm2143_vm3, %v806_v62, -inf  ;;  %v2158_v12 = vsel %vm2143_vm3, %v813_v4, -inf }
  0xd9   :  { %v2203_v13 = vrot.slane %v2202_v5, 2  ;;  %v2209_v14 = vmax.f32 %v2207_v2, %v2208_v6  ;;  %v2216_v15 = vmax.f32 %v2214_v3, %v2215_v7  ;;  %v2222_v16 = vrot.slane %v2221_v9, 4 }
  0xda   :  { %v2145_v17 = vrot.slane %v2144_v11, 4  ;;  %v2151_v18 = vsel %vm2143_vm3, %v814_v8, -inf  ;;  %v2159_v19 = vrot.slane %v2158_v12, 4  ;;  %v2165_v20 = vsel %vm2143_vm3, %v815_v10, -inf }
  0xdb   :  { %v2204_v21 = vmax.f32 %v2202_v5, %v2203_v13  ;;  %v2210_v22 = vrot.slane %v2209_v14, 2  ;;  %v2217_v23 = vrot.slane %v2216_v15, 2  ;;  %v2223_v24 = vmax.f32 %v2221_v9, %v2222_v16 }
  0xdc   :  { %v2146_v25 = vmax.f32 %v2144_v11, %v2145_v17  ;;  %v2152_v26 = vrot.slane %v2151_v18, 4  ;;  %v2160_v27 = vmax.f32 %v2158_v12, %v2159_v19  ;;  %v2166_v28 = vrot.slane %v2165_v20, 4 }
  0xdd   :  { %v2205_v29 = vrot.slane %v2204_v21, 1  ;;  %v2211_v30 = vmax.f32 %v2209_v14, %v2210_v22  ;;  %v2218_v31 = vmax.f32 %v2216_v15, %v2217_v23  ;;  %v2224_v32 = vrot.slane %v2223_v24, 2 }
  0xde   :  { %v2147_v33 = vrot.slane %v2146_v25, 2  ;;  %v2153_v34 = vmax.f32 %v2151_v18, %v2152_v26  ;;  %v2161_v35 = vrot.slane %v2160_v27, 2  ;;  %v2167_v36 = vmax.f32 %v2165_v20, %v2166_v28 }
  0xdf   :  { %v2206_v37 = vmax.f32 %v2204_v21, %v2205_v29  ;;  %v2212_v38 = vrot.slane %v2211_v30, 1  ;;  %v2219_v39 = vrot.slane %v2218_v31, 1  ;;  %v2225_v40 = vmax.f32 %v2223_v24, %v2224_v32  ;;  %v10002_v24 = vpop.f32.mrf.mxu0 }
  0xe0   :  { %v2148_v41 = vmax.f32 %v2146_v25, %v2147_v33  ;;  %v2154_v42 = vrot.slane %v2153_v34, 2  ;;  %v2162_v45 = vmax.f32 %v2160_v27, %v2161_v35  ;;  %v2168_v46 = vrot.slane %v2167_v36, 2 }
  0xe1   :  { %v2213_v48 = vmax.f32 %v2211_v30, %v2212_v38  ;;  %v2220_v49 = vmax.f32 %v2218_v31, %v2219_v39  ;;  %v2226_v50 = vrot.slane %v2225_v40, 1  ;;  %v3938_v51 = vsel %vm3936_vm4, %v2206_v37, -inf }
  0xe2   :  { %v2149_v52 = vrot.slane %v2148_v41, 1  ;;  %v2155_v53 = vmax.f32 %v2153_v34, %v2154_v42  ;;  %v2163_v54 = vrot.slane %v2162_v45, 1  ;;  %v2169_v55 = vmax.f32 %v2167_v36, %v2168_v46 }
  0xe3   :  { %v2227_v56 = vmax.f32 %v2225_v40, %v2226_v50  ;;  %v3941_v57 = vsel %vm3936_vm4, %v2213_v48, -inf  ;;  %v3944_v58 = vsel %vm3936_vm4, %v2220_v49, -inf  ;;  %v850_v59 = vcombine.high %v9965_v63, %v9965_v63 }
  0xe4   :  { %v2150_v60 = vmax.f32 %v2148_v41, %v2149_v52  ;;  %v2156_v61 = vrot.slane %v2155_v53, 1  ;;  %v2164_v62 = vmax.f32 %v2162_v45, %v2163_v54  ;;  %v2170_v1 = vrot.slane %v2169_v55, 1  ;;  %v432_v41 = vpop.f32.mrf.mxu0 }
  0xe5   :  { %v9984_v2 = vsel %vm3936_vm4, %v2227_v56, -inf  ;;  %v857_v3 = vrot.slane %v9965_v63, %v9957_v47  ;;  %v864_v4 = vrot.slane %v850_v59, %v9957_v47  ;;  %v672_v5 = vmax.f32 %v9968_v0, 0.0 }
  0xe6   :  { %v2157_v6 = vmax.f32 %v2155_v53, %v2156_v61  ;;  %v2171_v7 = vmax.f32 %v2169_v55, %v2170_v1  ;;  %v3937_v8 = vsel %vm3936_vm4, %v2150_v60, -inf  ;;  %v3943_v9 = vsel %vm3936_vm4, %v2164_v62, -inf  ;;  %v9107_v61 = vpop.f32.mrf.mxu0 }
  0xe7   :  { %v3939_v10 = vmax.f32 %v3937_v8, %v3938_v51  ;;  %v3945_v11 = vmax.f32 %v3943_v9, %v3944_v58  ;;  %v865_v12 = vcombine.high %v857_v3, %v857_v3  ;;  %v866_v13 = vcombine.high %v864_v4, %v864_v4 }
  0xe8   :  { %v3940_v14 = vsel %vm3936_vm4, %v2157_v6, -inf  ;;  %v9994_v15 = vsel %vm3936_vm4, %v2171_v7, -inf  ;;  %v2228_v63 = vsel %vm2143_vm3, %v857_v3, -inf  ;;  %v2242_v16 = vsel %vm2143_vm3, %v864_v4, -inf }
  0xe9   :  { %v3942_v0 = vmax.f32 %v3940_v14, %v3941_v57  ;;  %v3948_v17 = vmax.f32 %v9994_v15, %v9984_v2  ;;  %v2229_v18 = vrot.slane %v2228_v63, 4  ;;  %v2235_v19 = vsel %vm2143_vm3, %v865_v12, -inf }
  0xea   :  { %v2236_v20 = vrot.slane %v2235_v19, 4  ;;  %v2243_v21 = vrot.slane %v2242_v16, 4  ;;  %v2249_v22 = vsel %vm2143_vm3, %v866_v13, -inf  ;;  %v816_v23 = vcombine.high %v672_v5, %v672_v5 }
  0xeb   :  { %v4450_v25 = vsel %vm4449_vm5, %v3942_v0, %v3939_v10  ;;  %v2230_v26 = vmax.f32 %v2228_v63, %v2229_v18  ;;  %v2250_v27 = vrot.slane %v2249_v22, 4  ;;  %v823_v28 = vrot.slane %v672_v5, %v9957_v47  ;;  %v435_v0 = vpop.f32.mrf.mxu0 }
  0xec   :  { %v4452_v29 = vsel %vm4451_vm6, %v3945_v11, %v4450_v25  ;;  %v2237_v30 = vmax.f32 %v2235_v19, %v2236_v20  ;;  %v2244_v31 = vmax.f32 %v2242_v16, %v2243_v21  ;;  %v830_v32 = vrot.slane %v816_v23, %v9957_v47 }
  0xed   :  { %v2231_v33 = vrot.slane %v2230_v26, 2  ;;  %v2251_v34 = vmax.f32 %v2249_v22, %v2250_v27  ;;  %v831_v35 = vcombine.high %v823_v28, %v823_v28  ;;  %v2172_v36 = vsel %vm2143_vm3, %v823_v28, -inf }
  0xee   :  { %v2238_v37 = vrot.slane %v2237_v30, 2  ;;  %v2245_v38 = vrot.slane %v2244_v31, 2  ;;  %v832_v39 = vcombine.high %v830_v32, %v830_v32  ;;  %v2173_v40 = vrot.slane %v2172_v36, 4 }
  0xef   :  { %v2232_v42 = vmax.f32 %v2230_v26, %v2231_v33  ;;  %v2252_v45 = vrot.slane %v2251_v34, 2  ;;  %v2179_v46 = vsel %vm2143_vm3, %v831_v35, -inf  ;;  %v2186_v48 = vsel %vm2143_vm3, %v830_v32, -inf }
  0xf0   :  { %v2239_v49 = vmax.f32 %v2237_v30, %v2238_v37  ;;  %v2246_v50 = vmax.f32 %v2244_v31, %v2245_v38  ;;  %v2174_v51 = vmax.f32 %v2172_v36, %v2173_v40  ;;  %v2180_v52 = vrot.slane %v2179_v46, 4 }
  0xf1   :  { %v2233_v53 = vrot.slane %v2232_v42, 1  ;;  %v2253_v54 = vmax.f32 %v2251_v34, %v2252_v45  ;;  %v2187_v55 = vrot.slane %v2186_v48, 4  ;;  %v2193_v56 = vsel %vm2143_vm3, %v832_v39, -inf }
  0xf2   :  { %v2240_v57 = vrot.slane %v2239_v49, 1  ;;  %v2247_v58 = vrot.slane %v2246_v50, 1  ;;  %v2175_v59 = vrot.slane %v2174_v51, 2  ;;  %v2181_v60 = vmax.f32 %v2179_v46, %v2180_v52 }
  0xf3   :  { %v2234_v62 = vmax.f32 %v2232_v42, %v2233_v53  ;;  %v2254_v1 = vrot.slane %v2253_v54, 1  ;;  %v2188_v3 = vmax.f32 %v2186_v48, %v2187_v55  ;;  %v2194_v4 = vrot.slane %v2193_v56, 4 }
  0xf4   :  { %v2241_v5 = vmax.f32 %v2239_v49, %v2240_v57  ;;  %v2248_v6 = vmax.f32 %v2246_v50, %v2247_v58  ;;  %v2176_v7 = vmax.f32 %v2174_v51, %v2175_v59  ;;  %v2182_v8 = vrot.slane %v2181_v60, 2 }
  0xf5   :  { %v2255_v9 = vmax.f32 %v2253_v54, %v2254_v1  ;;  %v3950_v10 = vsel %vm3936_vm4, %v2234_v62, -inf  ;;  %v2189_v11 = vrot.slane %v2188_v3, 2  ;;  %v2195_v12 = vmax.f32 %v2193_v56, %v2194_v4 }
  0xf6   :  { %v3953_v13 = vsel %vm3936_vm4, %v2241_v5, -inf  ;;  %v3956_v14 = vsel %vm3936_vm4, %v2248_v6, -inf  ;;  %v2177_v63 = vrot.slane %v2176_v7, 1  ;;  %v2183_v16 = vmax.f32 %v2181_v60, %v2182_v8 }
  0xf7   :  { %v3959_v18 = vsel %vm3936_vm4, %v2255_v9, -inf  ;;  %v2190_v19 = vmax.f32 %v2188_v3, %v2189_v11  ;;  %v2196_v20 = vrot.slane %v2195_v12, 2  ;;  %v4454_v21 = vsel %vm4453_vm7, %v3948_v17, %v4452_v29 }
  0xf8   :  { %v2178_v22 = vmax.f32 %v2176_v7, %v2177_v63  ;;  %v2184_v23 = vrot.slane %v2183_v16, 1  ;;  %v441_v25 = vadd.f32 %v10002_v24, %v9953_v44  ;;  %v433_v26 = vadd.f32 %v9953_v44, %v432_v41 }
  0xf9   :  { %v2191_v27 = vrot.slane %v2190_v19, 1  ;;  %v2197_v28 = vmax.f32 %v2195_v12, %v2196_v20  ;;  %v444_v30 = vadd.f32 %v9107_v61, %v9953_v44  ;;  %v10025_v31 = vadd.f32 %v9953_v44, %v435_v0 }
  0xfa   :  { %v2185_v32 = vmax.f32 %v2183_v16, %v2184_v23  ;;  %v3949_v2 = vsel %vm3936_vm4, %v2178_v22, -inf  ;;  %v677_v15 = vmax.f32 %v441_v25, 0.0  ;;  %v675_v17 = vmax.f32 %v433_v26, 0.0 }
  0xfb   :  { %v2192_v29 = vmax.f32 %v2190_v19, %v2191_v27  ;;  %v2198_v33 = vrot.slane %v2197_v28, 1  ;;  %v3951_v34 = vmax.f32 %v3949_v2, %v3950_v10  ;;  %v10028_v35 = vmax.f32 %v444_v30, 0.0 }
  0xfc   :  { %v3952_v24 = vsel %vm3936_vm4, %v2185_v32, -inf  ;;  %v901_v36 = vcombine.high %v677_v15, %v677_v15  ;;  %v908_v37 = vrot.slane %v677_v15, %v9957_v47  ;;  %v867_v38 = vcombine.high %v675_v17, %v675_v17 }
  0xfd   :  { %v2199_v39 = vmax.f32 %v2197_v28, %v2198_v33  ;;  %v3954_v40 = vmax.f32 %v3952_v24, %v3953_v13  ;;  %v3955_v41 = vsel %vm3936_vm4, %v2192_v29, -inf  ;;  %v4456_v42 = vsel %vm4455_vm8, %v3951_v34, %v4454_v21 }
  0xfe   :  { %v3957_v45 = vmax.f32 %v3955_v41, %v3956_v14  ;;  %v915_v46 = vrot.slane %v901_v36, %v9957_v47  ;;  %v916_v48 = vcombine.high %v908_v37, %v908_v37  ;;  %v2312_v49 = vsel %vm2143_vm3, %v908_v37, -inf }
  0xff   :  { %v3958_v50 = vsel %vm3936_vm4, %v2199_v39, -inf  ;;  %v4458_v51 = vsel %vm4457_vm9, %v3954_v40, %v4456_v42  ;;  %v2313_v52 = vrot.slane %v2312_v49, 4  ;;  %v874_v53 = vrot.slane %v675_v17, %v9957_v47 }
 0x100   :  { %v3960_v54 = vmax.f32 %v3958_v50, %v3959_v18  ;;  %v4460_v55 = vsel %vm4459_vm10, %v3957_v45, %v4458_v51  ;;  %v917_v56 = vcombine.high %v915_v46, %v915_v46  ;;  %v2319_v57 = vsel %vm2143_vm3, %v916_v48, -inf }
 0x101   :  { %v2314_v58 = vmax.f32 %v2312_v49, %v2313_v52  ;;  %v2320_v59 = vrot.slane %v2319_v57, 4  ;;  %v2326_v60 = vsel %vm2143_vm3, %v915_v46, -inf  ;;  %v881_v61 = vrot.slane %v867_v38, %v9957_v47 }
 0x102   :  { %v4462_v62 = vsel %vm4461_vm11, %v3960_v54, %v4460_v55  ;;  %v2327_v1 = vrot.slane %v2326_v60, 4  ;;  %v2333_v3 = vsel %vm2143_vm3, %v917_v56, -inf  ;;  %v882_v4 = vcombine.high %v874_v53, %v874_v53 }
 0x103   :  { %4584 = vst.msk [vmem:[#allocation4] sm:$0xff] %vm3936_vm4, %v4462_v62  ;;  %4641 = vst.msk [vmem:[#allocation2 + $0x11] sm:$0xff] %vm3936_vm4, %v4462_v62  ;;  %v2315_v5 = vrot.slane %v2314_v58, 2  ;;  %v2321_v6 = vmax.f32 %v2319_v57, %v2320_v59  ;;  %v2334_v7 = vrot.slane %v2333_v3, 4  ;;  %v883_v8 = vcombine.high %v881_v61, %v881_v61 }
 0x104   :  { %v2328_v9 = vmax.f32 %v2326_v60, %v2327_v1  ;;  %v2256_v10 = vsel %vm2143_vm3, %v874_v53, -inf  ;;  %v2263_v11 = vsel %vm2143_vm3, %v882_v4, -inf  ;;  %v2270_v12 = vsel %vm2143_vm3, %v881_v61, -inf }
 0x105   :  { %v2316_v13 = vmax.f32 %v2314_v58, %v2315_v5  ;;  %v2322_v14 = vrot.slane %v2321_v6, 2  ;;  %v2335_v63 = vmax.f32 %v2333_v3, %v2334_v7  ;;  %v2257_v16 = vrot.slane %v2256_v10, 4 }
 0x106   :  { %v2329_v0 = vrot.slane %v2328_v9, 2  ;;  %v2264_v18 = vrot.slane %v2263_v11, 4  ;;  %v2271_v19 = vrot.slane %v2270_v12, 4  ;;  %v2277_v20 = vsel %vm2143_vm3, %v883_v8, -inf }
 0x107   :  { %v2317_v21 = vrot.slane %v2316_v13, 1  ;;  %v2323_v22 = vmax.f32 %v2321_v6, %v2322_v14  ;;  %v2336_v23 = vrot.slane %v2335_v63, 2  ;;  %v2258_v25 = vmax.f32 %v2256_v10, %v2257_v16 }
 0x108   :  { %v2330_v26 = vmax.f32 %v2328_v9, %v2329_v0  ;;  %v2265_v27 = vmax.f32 %v2263_v11, %v2264_v18  ;;  %v2272_v28 = vmax.f32 %v2270_v12, %v2271_v19  ;;  %v2278_v30 = vrot.slane %v2277_v20, 4 }
 0x109   :  { %v2318_v32 = vmax.f32 %v2316_v13, %v2317_v21  ;;  %v2324_v2 = vrot.slane %v2323_v22, 1  ;;  %v2337_v15 = vmax.f32 %v2335_v63, %v2336_v23  ;;  %v2259_v17 = vrot.slane %v2258_v25, 2 }
 0x10a   :  { %v2331_v29 = vrot.slane %v2330_v26, 1  ;;  %v2266_v33 = vrot.slane %v2265_v27, 2  ;;  %v2273_v34 = vrot.slane %v2272_v28, 2  ;;  %v2279_v24 = vmax.f32 %v2277_v20, %v2278_v30  ;;  %v9110_v20 = vpop.f32.mrf.mxu0 }
 0x10b   :  { %v2325_v36 = vmax.f32 %v2323_v22, %v2324_v2  ;;  %v2338_v37 = vrot.slane %v2337_v15, 1  ;;  %v3962_v38 = vsel %vm3936_vm4, %v2318_v32, -inf  ;;  %v2260_v39 = vmax.f32 %v2258_v25, %v2259_v17 }
 0x10c   :  { %v2332_v40 = vmax.f32 %v2330_v26, %v2331_v29  ;;  %v2267_v41 = vmax.f32 %v2265_v27, %v2266_v33  ;;  %v2274_v42 = vmax.f32 %v2272_v28, %v2273_v34  ;;  %v2280_v45 = vrot.slane %v2279_v24, 2 }
 0x10d   :  { %v2339_v46 = vmax.f32 %v2337_v15, %v2338_v37  ;;  %v3965_v48 = vsel %vm3936_vm4, %v2325_v36, -inf  ;;  %v2261_v49 = vrot.slane %v2260_v39, 1  ;;  %v918_v50 = vcombine.high %v10028_v35, %v10028_v35 }
 0x10e   :  { %v3968_v51 = vsel %vm3936_vm4, %v2332_v40, -inf  ;;  %v2268_v52 = vrot.slane %v2267_v41, 1  ;;  %v2275_v53 = vrot.slane %v2274_v42, 1  ;;  %v2281_v54 = vmax.f32 %v2279_v24, %v2280_v45 }
 0x10f   :  { %v3971_v55 = vsel %vm3936_vm4, %v2339_v46, -inf  ;;  %v2262_v56 = vmax.f32 %v2260_v39, %v2261_v49  ;;  %v925_v57 = vrot.slane %v10028_v35, %v9957_v47  ;;  %v932_v58 = vrot.slane %v918_v50, %v9957_v47 }
 0x110   :  { %v2269_v59 = vmax.f32 %v2267_v41, %v2268_v52  ;;  %v2276_v60 = vmax.f32 %v2274_v42, %v2275_v53  ;;  %v2282_v61 = vrot.slane %v2281_v54, 1  ;;  %v676_v62 = vmax.f32 %v10025_v31, 0.0 }
 0x111   :  { %v3961_v1 = vsel %vm3936_vm4, %v2262_v56, -inf  ;;  %v933_v3 = vcombine.high %v925_v57, %v925_v57  ;;  %v934_v4 = vcombine.high %v932_v58, %v932_v58  ;;  %v2340_v5 = vsel %vm2143_vm3, %v925_v57, -inf }
 0x112   :  { %v2283_v6 = vmax.f32 %v2281_v54, %v2282_v61  ;;  %v3963_v7 = vmax.f32 %v3961_v1, %v3962_v38  ;;  %v3964_v8 = vsel %vm3936_vm4, %v2269_v59, -inf  ;;  %v3967_v9 = vsel %vm3936_vm4, %v2276_v60, -inf }
 0x113   :  { %v3966_v35 = vmax.f32 %v3964_v8, %v3965_v48  ;;  %v3969_v10 = vmax.f32 %v3967_v9, %v3968_v51  ;;  %v2341_v11 = vrot.slane %v2340_v5, 4  ;;  %v2347_v12 = vsel %vm2143_vm3, %v933_v3, -inf }
 0x114   :  { %v3970_v13 = vsel %vm3936_vm4, %v2283_v6, -inf  ;;  %v2348_v31 = vrot.slane %v2347_v12, 4  ;;  %v2354_v14 = vsel %vm2143_vm3, %v932_v58, -inf  ;;  %v2361_v63 = vsel %vm2143_vm3, %v934_v4, -inf }
 0x115   :  { %v3972_v16 = vmax.f32 %v3970_v13, %v3971_v55  ;;  %v4463_v0 = vsel %vm4449_vm5, %v3966_v35, %v3963_v7  ;;  %v2342_v18 = vmax.f32 %v2340_v5, %v2341_v11  ;;  %v2355_v19 = vrot.slane %v2354_v14, 4  ;;  %v448_v55 = vpop.f32.mrf.mxu0 }
 0x116   :  { %v4464_v21 = vsel %vm4451_vm6, %v3969_v10, %v4463_v0  ;;  %v2349_v22 = vmax.f32 %v2347_v12, %v2348_v31  ;;  %v2362_v23 = vrot.slane %v2361_v63, 4  ;;  %v884_v25 = vcombine.high %v676_v62, %v676_v62 }
 0x117   :  { %v2343_v26 = vrot.slane %v2342_v18, 2  ;;  %v2356_v27 = vmax.f32 %v2354_v14, %v2355_v19  ;;  %v891_v28 = vrot.slane %v676_v62, %v9957_v47  ;;  %v10073_v30 = vsel %vm4453_vm7, %v3972_v16, %v4464_v21  ;;  %v9111_v10 = vpop.f32.mrf.mxu0 }
 0x118   :  { %v2350_v32 = vrot.slane %v2349_v22, 2  ;;  %v2363_v2 = vmax.f32 %v2361_v63, %v2362_v23  ;;  %v898_v15 = vrot.slane %v884_v25, %v9957_v47  ;;  %v457_v17 = vadd.f32 %v9110_v20, %v9953_v44 }
 0x119   :  { %v2344_v29 = vmax.f32 %v2342_v18, %v2343_v26  ;;  %v2357_v33 = vrot.slane %v2356_v27, 2  ;;  %v899_v34 = vcombine.high %v891_v28, %v891_v28  ;;  %v2284_v24 = vsel %vm2143_vm3, %v891_v28, -inf }
 0x11a   :  { %v2351_v36 = vmax.f32 %v2349_v22, %v2350_v32  ;;  %v2364_v37 = vrot.slane %v2363_v2, 2  ;;  %v900_v38 = vcombine.high %v898_v15, %v898_v15  ;;  %v2285_v39 = vrot.slane %v2284_v24, 4 }
 0x11b   :  { %v2345_v40 = vrot.slane %v2344_v29, 1  ;;  %v2358_v41 = vmax.f32 %v2356_v27, %v2357_v33  ;;  %v2291_v42 = vsel %vm2143_vm3, %v899_v34, -inf  ;;  %v2298_v45 = vsel %vm2143_vm3, %v898_v15, -inf }
 0x11c   :  { %v2352_v46 = vrot.slane %v2351_v36, 1  ;;  %v2365_v48 = vmax.f32 %v2363_v2, %v2364_v37  ;;  %v2286_v49 = vmax.f32 %v2284_v24, %v2285_v39  ;;  %v2292_v50 = vrot.slane %v2291_v42, 4 }
 0x11d   :  { %v2346_v51 = vmax.f32 %v2344_v29, %v2345_v40  ;;  %v2359_v52 = vrot.slane %v2358_v41, 1  ;;  %v2299_v53 = vrot.slane %v2298_v45, 4  ;;  %v2305_v54 = vsel %vm2143_vm3, %v900_v38, -inf }
 0x11e   :  { %v2353_v56 = vmax.f32 %v2351_v36, %v2352_v46  ;;  %v2366_v57 = vrot.slane %v2365_v48, 1  ;;  %v2287_v58 = vrot.slane %v2286_v49, 2  ;;  %v2293_v59 = vmax.f32 %v2291_v42, %v2292_v50 }
 0x11f   :  { %v2360_v60 = vmax.f32 %v2358_v41, %v2359_v52  ;;  %v3974_v61 = vsel %vm3936_vm4, %v2346_v51, -inf  ;;  %v2300_v62 = vmax.f32 %v2298_v45, %v2299_v53  ;;  %v2306_v1 = vrot.slane %v2305_v54, 4 }
 0x120   :  { %v2367_v3 = vmax.f32 %v2365_v48, %v2366_v57  ;;  %v3977_v4 = vsel %vm3936_vm4, %v2353_v56, -inf  ;;  %v2288_v5 = vmax.f32 %v2286_v49, %v2287_v58  ;;  %v2294_v6 = vrot.slane %v2293_v59, 2 }
 0x121   :  { %v3980_v7 = vsel %vm3936_vm4, %v2360_v60, -inf  ;;  %v2301_v8 = vrot.slane %v2300_v62, 2  ;;  %v2307_v9 = vmax.f32 %v2305_v54, %v2306_v1  ;;  %v681_v35 = vmax.f32 %v457_v17, 0.0 }
 0x122   :  { %v3983_v11 = vsel %vm3936_vm4, %v2367_v3, -inf  ;;  %v2289_v12 = vrot.slane %v2288_v5, 1  ;;  %v2295_v13 = vmax.f32 %v2293_v59, %v2294_v6  ;;  %v449_v31 = vadd.f32 %v9953_v44, %v448_v55 }
 0x123   :  { %v2302_v14 = vmax.f32 %v2300_v62, %v2301_v8  ;;  %v2308_v63 = vrot.slane %v2307_v9, 2  ;;  %v969_v16 = vcombine.high %v681_v35, %v681_v35  ;;  %v976_v0 = vrot.slane %v681_v35, %v9957_v47 }
 0x124   :  { %v2290_v18 = vmax.f32 %v2288_v5, %v2289_v12  ;;  %v2296_v19 = vrot.slane %v2295_v13, 1  ;;  %v679_v20 = vmax.f32 %v449_v31, 0.0  ;;  %v10088_v21 = vadd.f32 %v9111_v10, %v9953_v44 }
 0x125   :  { %v2303_v22 = vrot.slane %v2302_v14, 1  ;;  %v2309_v23 = vmax.f32 %v2307_v9, %v2308_v63  ;;  %v983_v25 = vrot.slane %v969_v16, %v9957_v47  ;;  %v984_v26 = vcombine.high %v976_v0, %v976_v0 }
 0x126   :  { %v2297_v27 = vmax.f32 %v2295_v13, %v2296_v19  ;;  %v3973_v28 = vsel %vm3936_vm4, %v2290_v18, -inf  ;;  %v2424_v32 = vsel %vm2143_vm3, %v976_v0, -inf  ;;  %v935_v2 = vcombine.high %v679_v20, %v679_v20 }
 0x127   :  { %v2304_v15 = vmax.f32 %v2302_v14, %v2303_v22  ;;  %v2310_v17 = vrot.slane %v2309_v23, 1  ;;  %v3975_v29 = vmax.f32 %v3973_v28, %v3974_v61  ;;  %v985_v33 = vcombine.high %v983_v25, %v983_v25 }
 0x128   :  { %v3976_v34 = vsel %vm3936_vm4, %v2297_v27, -inf  ;;  %v2425_v24 = vrot.slane %v2424_v32, 4  ;;  %v2431_v36 = vsel %vm2143_vm3, %v984_v26, -inf  ;;  %v2438_v37 = vsel %vm2143_vm3, %v983_v25, -inf }
 0x129   :  { %v2311_v38 = vmax.f32 %v2309_v23, %v2310_v17  ;;  %v3978_v39 = vmax.f32 %v3976_v34, %v3977_v4  ;;  %v3979_v40 = vsel %vm3936_vm4, %v2304_v15, -inf  ;;  %v4466_v41 = vsel %vm4455_vm8, %v3975_v29, %v10073_v30  ;;  %v451_v34 = vpop.f32.mrf.mxu0 }
 0x12a   :  { %v3981_v42 = vmax.f32 %v3979_v40, %v3980_v7  ;;  %v2426_v45 = vmax.f32 %v2424_v32, %v2425_v24  ;;  %v2432_v46 = vrot.slane %v2431_v36, 4  ;;  %v2439_v48 = vrot.slane %v2438_v37, 4 }
 0x12b   :  { %v3982_v49 = vsel %vm3936_vm4, %v2311_v38, -inf  ;;  %v4467_v50 = vsel %vm4457_vm9, %v3978_v39, %v4466_v41  ;;  %v2445_v51 = vsel %vm2143_vm3, %v985_v33, -inf  ;;  %v942_v52 = vrot.slane %v679_v20, %v9957_v47 }
 0x12c   :  { %v3984_v53 = vmax.f32 %v3982_v49, %v3983_v11  ;;  %v4468_v54 = vsel %vm4459_vm10, %v3981_v42, %v4467_v50  ;;  %v2427_v55 = vrot.slane %v2426_v45, 2  ;;  %v2433_v56 = vmax.f32 %v2431_v36, %v2432_v46 }
 0x12d   :  { %v2440_v57 = vmax.f32 %v2438_v37, %v2439_v48  ;;  %v2446_v58 = vrot.slane %v2445_v51, 4  ;;  %v949_v30 = vrot.slane %v935_v2, %v9957_v47  ;;  %v950_v59 = vcombine.high %v942_v52, %v942_v52 }
 0x12e   :  { %v4469_v60 = vsel %vm4461_vm11, %v3984_v53, %v4468_v54  ;;  %v2428_v61 = vmax.f32 %v2426_v45, %v2427_v55  ;;  %v2434_v62 = vrot.slane %v2433_v56, 2  ;;  %v2368_v1 = vsel %vm2143_vm3, %v942_v52, -inf }
 0x12f   :  { %4585 = vst.msk [vmem:[#allocation4 + $0x8] sm:$0xff] %vm3936_vm4, %v4469_v60  ;;  %4642 = vst.msk [vmem:[#allocation2 + $0x21] sm:$0xff] %vm3936_vm4, %v4469_v60  ;;  %v2441_v3 = vrot.slane %v2440_v57, 2  ;;  %v2447_v4 = vmax.f32 %v2445_v51, %v2446_v58  ;;  %v951_v5 = vcombine.high %v949_v30, %v949_v30  ;;  %v2369_v6 = vrot.slane %v2368_v1, 4 }
 0x130   :  { %v2429_v7 = vrot.slane %v2428_v61, 1  ;;  %v2435_v8 = vmax.f32 %v2433_v56, %v2434_v62  ;;  %v2375_v9 = vsel %vm2143_vm3, %v950_v59, -inf  ;;  %v2382_v35 = vsel %vm2143_vm3, %v949_v30, -inf }
 0x131   :  { %v2442_v10 = vmax.f32 %v2440_v57, %v2441_v3  ;;  %v2448_v11 = vrot.slane %v2447_v4, 2  ;;  %v2370_v12 = vmax.f32 %v2368_v1, %v2369_v6  ;;  %v2376_v13 = vrot.slane %v2375_v9, 4 }
 0x132   :  { %v2430_v31 = vmax.f32 %v2428_v61, %v2429_v7  ;;  %v2436_v14 = vrot.slane %v2435_v8, 1  ;;  %v2383_v63 = vrot.slane %v2382_v35, 4  ;;  %v2389_v16 = vsel %vm2143_vm3, %v951_v5, -inf }
 0x133   :  { %v2443_v0 = vrot.slane %v2442_v10, 1  ;;  %v2449_v18 = vmax.f32 %v2447_v4, %v2448_v11  ;;  %v2371_v19 = vrot.slane %v2370_v12, 2  ;;  %v2377_v20 = vmax.f32 %v2375_v9, %v2376_v13 }
 0x134   :  { %v2437_v22 = vmax.f32 %v2435_v8, %v2436_v14  ;;  %v3986_v23 = vsel %vm3936_vm4, %v2430_v31, -inf  ;;  %v2384_v25 = vmax.f32 %v2382_v35, %v2383_v63  ;;  %v2390_v26 = vrot.slane %v2389_v16, 4  ;;  %v9114_v31 = vpop.f32.mrf.mxu0 }
 0x135   :  { %v2444_v27 = vmax.f32 %v2442_v10, %v2443_v0  ;;  %v2450_v28 = vrot.slane %v2449_v18, 1  ;;  %v2372_v32 = vmax.f32 %v2370_v12, %v2371_v19  ;;  %v2378_v2 = vrot.slane %v2377_v20, 2 }
 0x136   :  { %v3989_v15 = vsel %vm3936_vm4, %v2437_v22, -inf  ;;  %v2385_v17 = vrot.slane %v2384_v25, 2  ;;  %v2391_v29 = vmax.f32 %v2389_v16, %v2390_v26  ;;  %v682_v33 = vmax.f32 %v10088_v21, 0.0 }
 0x137   :  { %v2451_v24 = vmax.f32 %v2449_v18, %v2450_v28  ;;  %v3992_v36 = vsel %vm3936_vm4, %v2444_v27, -inf  ;;  %v2373_v37 = vrot.slane %v2372_v32, 1  ;;  %v2379_v38 = vmax.f32 %v2377_v20, %v2378_v2 }
 0x138   :  { %v2386_v39 = vmax.f32 %v2384_v25, %v2385_v17  ;;  %v2392_v40 = vrot.slane %v2391_v29, 2  ;;  %v986_v41 = vcombine.high %v682_v33, %v682_v33  ;;  %v993_v42 = vrot.slane %v682_v33, %v9957_v47 }
 0x139   :  { %v3995_v45 = vsel %vm3936_vm4, %v2451_v24, -inf  ;;  %v2374_v46 = vmax.f32 %v2372_v32, %v2373_v37  ;;  %v2380_v48 = vrot.slane %v2379_v38, 1  ;;  %v452_v49 = vadd.f32 %v9953_v44, %v451_v34 }
 0x13a   :  { %v2387_v50 = vrot.slane %v2386_v39, 1  ;;  %v2393_v51 = vmax.f32 %v2391_v29, %v2392_v40  ;;  %v1000_v21 = vrot.slane %v986_v41, %v9957_v47  ;;  %v1001_v52 = vcombine.high %v993_v42, %v993_v42 }
 0x13b   :  { %v2381_v53 = vmax.f32 %v2379_v38, %v2380_v48  ;;  %v3985_v54 = vsel %vm3936_vm4, %v2374_v46, -inf  ;;  %v2452_v55 = vsel %vm2143_vm3, %v993_v42, -inf  ;;  %v680_v56 = vmax.f32 %v452_v49, 0.0 }
 0x13c   :  { %v2388_v57 = vmax.f32 %v2386_v39, %v2387_v50  ;;  %v2394_v58 = vrot.slane %v2393_v51, 1  ;;  %v3987_v30 = vmax.f32 %v3985_v54, %v3986_v23  ;;  %v1002_v59 = vcombine.high %v1000_v21, %v1000_v21 }
 0x13d   :  { %v3988_v60 = vsel %vm3936_vm4, %v2381_v53, -inf  ;;  %v2453_v61 = vrot.slane %v2452_v55, 4  ;;  %v2459_v62 = vsel %vm2143_vm3, %v1001_v52, -inf  ;;  %v2466_v1 = vsel %vm2143_vm3, %v1000_v21, -inf }
 0x13e   :  { %v2395_v3 = vmax.f32 %v2393_v51, %v2394_v58  ;;  %v3990_v4 = vmax.f32 %v3988_v60, %v3989_v15  ;;  %v3991_v5 = vsel %vm3936_vm4, %v2388_v57, -inf  ;;  %v2460_v6 = vrot.slane %v2459_v62, 4 }
 0x13f   :  { %v3993_v7 = vmax.f32 %v3991_v5, %v3992_v36  ;;  %v2454_v8 = vmax.f32 %v2452_v55, %v2453_v61  ;;  %v2467_v9 = vrot.slane %v2466_v1, 4  ;;  %v2473_v35 = vsel %vm2143_vm3, %v1002_v59, -inf }
 0x140   :  { %v3994_v10 = vsel %vm3936_vm4, %v2395_v3, -inf  ;;  %v4470_v11 = vsel %vm4449_vm5, %v3990_v4, %v3987_v30  ;;  %v2461_v12 = vmax.f32 %v2459_v62, %v2460_v6  ;;  %v2474_v13 = vrot.slane %v2473_v35, 4  ;;  %v10149_v6 = vld [vmem:[%s12883_s2] ss:$0 sm:$0xff] }
 0x141   :  { %v3996_v14 = vmax.f32 %v3994_v10, %v3995_v45  ;;  %v4471_v63 = vsel %vm4451_vm6, %v3993_v7, %v4470_v11  ;;  %v2455_v16 = vrot.slane %v2454_v8, 2  ;;  %v2468_v0 = vmax.f32 %v2466_v1, %v2467_v9 }
 0x142   :  { %v2462_v18 = vrot.slane %v2461_v12, 2  ;;  %v2475_v19 = vmax.f32 %v2473_v35, %v2474_v13  ;;  %v952_v20 = vcombine.high %v680_v56, %v680_v56  ;;  %v959_v22 = vrot.slane %v680_v56, %v9957_v47  ;;  %v464_v56 = vpop.f32.mrf.mxu0 }
 0x143   :  { %v2456_v23 = vmax.f32 %v2454_v8, %v2455_v16  ;;  %v2469_v25 = vrot.slane %v2468_v0, 2  ;;  %v10132_v26 = vsel %vm4453_vm7, %v3996_v14, %v4471_v63  ;;  %v473_v27 = vadd.f32 %v9114_v31, %v9953_v44 }
 0x144   :  { %v2463_v28 = vmax.f32 %v2461_v12, %v2462_v18  ;;  %v2476_v32 = vrot.slane %v2475_v19, 2  ;;  %v966_v2 = vrot.slane %v952_v20, %v9957_v47  ;;  %v967_v15 = vcombine.high %v959_v22, %v959_v22 }
 0x145   :  { %v2457_v17 = vrot.slane %v2456_v23, 1  ;;  %v2470_v29 = vmax.f32 %v2468_v0, %v2469_v25  ;;  %v2396_v33 = vsel %vm2143_vm3, %v959_v22, -inf  ;;  %v685_v34 = vmax.f32 %v473_v27, 0.0 }
 0x146   :  { %v2464_v24 = vrot.slane %v2463_v28, 1  ;;  %v2477_v36 = vmax.f32 %v2475_v19, %v2476_v32  ;;  %v968_v37 = vcombine.high %v966_v2, %v966_v2  ;;  %v2397_v38 = vrot.slane %v2396_v33, 4 }
 0x147   :  { %v2458_v39 = vmax.f32 %v2456_v23, %v2457_v17  ;;  %v2471_v40 = vrot.slane %v2470_v29, 1  ;;  %v2403_v41 = vsel %vm2143_vm3, %v967_v15, -inf  ;;  %v2410_v44 = vsel %vm2143_vm3, %v966_v2, -inf }
 0x148   :  { %v2465_v42 = vmax.f32 %v2463_v28, %v2464_v24  ;;  %v2478_v45 = vrot.slane %v2477_v36, 1  ;;  %v2398_v46 = vmax.f32 %v2396_v33, %v2397_v38  ;;  %v2404_v48 = vrot.slane %v2403_v41, 4 }
 0x149   :  { %v2472_v49 = vmax.f32 %v2470_v29, %v2471_v40  ;;  %v3998_v50 = vsel %vm3936_vm4, %v2458_v39, -inf  ;;  %v2411_v51 = vrot.slane %v2410_v44, 4  ;;  %v2417_v21 = vsel %vm2143_vm3, %v968_v37, -inf }
 0x14a   :  { %v2479_v52 = vmax.f32 %v2477_v36, %v2478_v45  ;;  %v4001_v53 = vsel %vm3936_vm4, %v2465_v42, -inf  ;;  %v2399_v54 = vrot.slane %v2398_v46, 2  ;;  %v2405_v55 = vmax.f32 %v2403_v41, %v2404_v48 }
 0x14b   :  { %v4004_v57 = vsel %vm3936_vm4, %v2472_v49, -inf  ;;  %v2412_v58 = vmax.f32 %v2410_v44, %v2411_v51  ;;  %v2418_v30 = vrot.slane %v2417_v21, 4  ;;  %v1037_v59 = vcombine.high %v685_v34, %v685_v34 }
 0x14c   :  { %v4007_v60 = vsel %vm3936_vm4, %v2479_v52, -inf  ;;  %v2400_v61 = vmax.f32 %v2398_v46, %v2399_v54  ;;  %v2406_v62 = vrot.slane %v2405_v55, 2  ;;  %v1044_v1 = vrot.slane %v685_v34, %v9957_v47 }
 0x14d   :  { %v2413_v3 = vrot.slane %v2412_v58, 2  ;;  %v2419_v4 = vmax.f32 %v2417_v21, %v2418_v30  ;;  %v1051_v5 = vrot.slane %v1037_v59, %v9957_v47  ;;  %v465_v7 = vadd.f32 %v10149_v6, %v464_v56 }
 0x14e   :  { %v2401_v8 = vrot.slane %v2400_v61, 1  ;;  %v2407_v9 = vmax.f32 %v2405_v55, %v2406_v62  ;;  %v1052_v35 = vcombine.high %v1044_v1, %v1044_v1  ;;  %v2536_v10 = vsel %vm2143_vm3, %v1044_v1, -inf }
 0x14f   :  { %v2414_v11 = vmax.f32 %v2412_v58, %v2413_v3  ;;  %v2420_v12 = vrot.slane %v2419_v4, 2  ;;  %v1053_v13 = vcombine.high %v1051_v5, %v1051_v5  ;;  %v2537_v31 = vrot.slane %v2536_v10, 4 }
 0x150   :  { %v2402_v14 = vmax.f32 %v2400_v61, %v2401_v8  ;;  %v2408_v63 = vrot.slane %v2407_v9, 1  ;;  %v2543_v16 = vsel %vm2143_vm3, %v1052_v35, -inf  ;;  %v2550_v0 = vsel %vm2143_vm3, %v1051_v5, -inf }
 0x151   :  { %v2415_v18 = vrot.slane %v2414_v11, 1  ;;  %v2421_v19 = vmax.f32 %v2419_v4, %v2420_v12  ;;  %v2538_v20 = vmax.f32 %v2536_v10, %v2537_v31  ;;  %v2544_v22 = vrot.slane %v2543_v16, 4 }
 0x152   :  { %v2409_v23 = vmax.f32 %v2407_v9, %v2408_v63  ;;  %v3997_v25 = vsel %vm3936_vm4, %v2402_v14, -inf  ;;  %v2551_v27 = vrot.slane %v2550_v0, 4  ;;  %v2557_v28 = vsel %vm2143_vm3, %v1053_v13, -inf }
 0x153   :  { %v2416_v32 = vmax.f32 %v2414_v11, %v2415_v18  ;;  %v2422_v2 = vrot.slane %v2421_v19, 1  ;;  %v3999_v15 = vmax.f32 %v3997_v25, %v3998_v50  ;;  %v2539_v17 = vrot.slane %v2538_v20, 2  ;;  %v9115_v50 = vpop.f32.mrf.mxu0 }
 0x154   :  { %v4000_v29 = vsel %vm3936_vm4, %v2409_v23, -inf  ;;  %v2545_v33 = vmax.f32 %v2543_v16, %v2544_v22  ;;  %v2552_v34 = vmax.f32 %v2550_v0, %v2551_v27  ;;  %v2558_v24 = vrot.slane %v2557_v28, 4 }
 0x155   :  { %v2423_v36 = vmax.f32 %v2421_v19, %v2422_v2  ;;  %v4002_v37 = vmax.f32 %v4000_v29, %v4001_v53  ;;  %v4003_v38 = vsel %vm3936_vm4, %v2416_v32, -inf  ;;  %v4473_v39 = vsel %vm4455_vm8, %v3999_v15, %v10132_v26  ;;  %v10182_v18 = vpop.f32.mrf.mxu0 }
 0x156   :  { %v4005_v40 = vmax.f32 %v4003_v38, %v4004_v57  ;;  %v2540_v41 = vmax.f32 %v2538_v20, %v2539_v17  ;;  %v2546_v44 = vrot.slane %v2545_v33, 2  ;;  %v2553_v42 = vrot.slane %v2552_v34, 2 }
 0x157   :  { %v4006_v45 = vsel %vm3936_vm4, %v2423_v36, -inf  ;;  %v4474_v46 = vsel %vm4457_vm9, %v4002_v37, %v4473_v39  ;;  %v2559_v48 = vmax.f32 %v2557_v28, %v2558_v24  ;;  %v683_v49 = vmax.f32 %v465_v7, 0.0  ;;  %v9118_v37 = vpop.f32.mrf.mxu0 }
 0x158   :  { %v4008_v51 = vmax.f32 %v4006_v45, %v4007_v60  ;;  %v4475_v21 = vsel %vm4459_vm10, %v4005_v40, %v4474_v46  ;;  %v2541_v52 = vrot.slane %v2540_v41, 1  ;;  %v2547_v53 = vmax.f32 %v2545_v33, %v2546_v44 }
 0x159   :  { %v2554_v54 = vmax.f32 %v2552_v34, %v2553_v42  ;;  %v2560_v55 = vrot.slane %v2559_v48, 2  ;;  %v1003_v56 = vcombine.high %v683_v49, %v683_v49  ;;  %v1010_v26 = vrot.slane %v683_v49, %v9957_v47 }
 0x15a   :  { %v4476_v57 = vsel %vm4461_vm11, %v4008_v51, %v4475_v21  ;;  %v2542_v58 = vmax.f32 %v2540_v41, %v2541_v52  ;;  %v2548_v30 = vrot.slane %v2547_v53, 1  ;;  %v476_v59 = vadd.f32 %v10149_v6, %v9115_v50 }
 0x15b   :  { %4586 = vst.msk [vmem:[#allocation4 + $0x10] sm:$0xff] %vm3936_vm4, %v4476_v57  ;;  %4643 = vst.msk [vmem:[#allocation2 + $0x31] sm:$0xff] %vm3936_vm4, %v4476_v57  ;;  %v2555_v60 = vrot.slane %v2554_v54, 1  ;;  %v2561_v61 = vmax.f32 %v2559_v48, %v2560_v55  ;;  %v1017_v62 = vrot.slane %v1003_v56, %v9957_v47  ;;  %v1018_v1 = vcombine.high %v1010_v26, %v1010_v26  ;;  %v480_v55 = vpop.f32.mrf.mxu0 }
 0x15c   :  { %v2549_v3 = vmax.f32 %v2547_v53, %v2548_v30  ;;  %v10171_v4 = vsel %vm3936_vm4, %v2542_v58, -inf  ;;  %v2480_v5 = vsel %vm2143_vm3, %v1010_v26, -inf  ;;  %v686_v7 = vmax.f32 %v476_v59, 0.0 }
 0x15d   :  { %v2556_v8 = vmax.f32 %v2554_v54, %v2555_v60  ;;  %v2562_v9 = vrot.slane %v2561_v61, 1  ;;  %v1019_v35 = vcombine.high %v1017_v62, %v1017_v62  ;;  %v2481_v10 = vrot.slane %v2480_v5, 4 }
 0x15e   :  { %v10175_v11 = vsel %vm3936_vm4, %v2549_v3, -inf  ;;  %v2487_v12 = vsel %vm2143_vm3, %v1018_v1, -inf  ;;  %v2494_v13 = vsel %vm2143_vm3, %v1017_v62, -inf  ;;  %v1054_v31 = vcombine.high %v686_v7, %v686_v7 }
 0x15f   :  { %v2563_v14 = vmax.f32 %v2561_v61, %v2562_v9  ;;  %v10180_v63 = vsel %vm3936_vm4, %v2556_v8, -inf  ;;  %v2482_v16 = vmax.f32 %v2480_v5, %v2481_v10  ;;  %v2488_v0 = vrot.slane %v2487_v12, 4  ;;  %v9119_v10 = vpop.f32.mrf.mxu0 }
 0x160   :  { %v2495_v19 = vrot.slane %v2494_v13, 4  ;;  %v2501_v20 = vsel %vm2143_vm3, %v1019_v35, -inf  ;;  %v1061_v22 = vrot.slane %v686_v7, %v9957_v47  ;;  %v1068_v23 = vrot.slane %v1054_v31, %v9957_v47 }
 0x161   :  { %v10188_v25 = vsel %vm3936_vm4, %v2563_v14, -inf  ;;  %v2483_v27 = vrot.slane %v2482_v16, 2  ;;  %v2489_v28 = vmax.f32 %v2487_v12, %v2488_v0  ;;  %v2502_v32 = vrot.slane %v2501_v20, 4 }
 0x162   :  { %v2496_v2 = vmax.f32 %v2494_v13, %v2495_v19  ;;  %v1069_v15 = vcombine.high %v1061_v22, %v1061_v22  ;;  %v1070_v17 = vcombine.high %v1068_v23, %v1068_v23  ;;  %v2564_v29 = vsel %vm2143_vm3, %v1061_v22, -inf }
 0x163   :  { %v2484_v33 = vmax.f32 %v2482_v16, %v2483_v27  ;;  %v2490_v34 = vrot.slane %v2489_v28, 2  ;;  %v2503_v24 = vmax.f32 %v2501_v20, %v2502_v32  ;;  %v2565_v36 = vrot.slane %v2564_v29, 4 }
 0x164   :  { %v2497_v38 = vrot.slane %v2496_v2, 2  ;;  %v2571_v39 = vsel %vm2143_vm3, %v1069_v15, -inf  ;;  %v2578_v40 = vsel %vm2143_vm3, %v1068_v23, -inf  ;;  %v2585_v41 = vsel %vm2143_vm3, %v1070_v17, -inf }
 0x165   :  { %v2485_v44 = vrot.slane %v2484_v33, 1  ;;  %v2491_v42 = vmax.f32 %v2489_v28, %v2490_v34  ;;  %v2504_v45 = vrot.slane %v2503_v24, 2  ;;  %v2566_v46 = vmax.f32 %v2564_v29, %v2565_v36 }
 0x166   :  { %v2498_v48 = vmax.f32 %v2496_v2, %v2497_v38  ;;  %v2572_v49 = vrot.slane %v2571_v39, 4  ;;  %v2579_v50 = vrot.slane %v2578_v40, 4  ;;  %v2586_v51 = vrot.slane %v2585_v41, 4 }
 0x167   :  { %v2486_v21 = vmax.f32 %v2484_v33, %v2485_v44  ;;  %v2492_v52 = vrot.slane %v2491_v42, 1  ;;  %v2505_v53 = vmax.f32 %v2503_v24, %v2504_v45  ;;  %v2567_v54 = vrot.slane %v2566_v46, 2 }
 0x168   :  { %v2499_v56 = vrot.slane %v2498_v48, 1  ;;  %v2573_v26 = vmax.f32 %v2571_v39, %v2572_v49  ;;  %v2580_v57 = vmax.f32 %v2578_v40, %v2579_v50  ;;  %v2587_v58 = vmax.f32 %v2585_v41, %v2586_v51 }
 0x169   :  { %v2493_v30 = vmax.f32 %v2491_v42, %v2492_v52  ;;  %v2506_v59 = vrot.slane %v2505_v53, 1  ;;  %v4009_v60 = vsel %vm3936_vm4, %v2486_v21, -inf  ;;  %v2568_v61 = vmax.f32 %v2566_v46, %v2567_v54 }
 0x16a   :  { %v2500_v62 = vmax.f32 %v2498_v48, %v2499_v56  ;;  %v4011_v1 = vmax.f32 %v4009_v60, %v10171_v4  ;;  %v2574_v3 = vrot.slane %v2573_v26, 2  ;;  %v2581_v5 = vrot.slane %v2580_v57, 2 }
 0x16b   :  { %v2507_v7 = vmax.f32 %v2505_v53, %v2506_v59  ;;  %v4012_v8 = vsel %vm3936_vm4, %v2493_v30, -inf  ;;  %v2569_v9 = vrot.slane %v2568_v61, 1  ;;  %v2588_v35 = vrot.slane %v2587_v58, 2 }
 0x16c   :  { %v4014_v12 = vmax.f32 %v4012_v8, %v10175_v11  ;;  %v4015_v13 = vsel %vm3936_vm4, %v2500_v62, -inf  ;;  %v2575_v31 = vmax.f32 %v2573_v26, %v2574_v3  ;;  %v2582_v14 = vmax.f32 %v2580_v57, %v2581_v5 }
 0x16d   :  { %v4017_v16 = vmax.f32 %v4015_v13, %v10180_v63  ;;  %v4018_v0 = vsel %vm3936_vm4, %v2507_v7, -inf  ;;  %v2570_v19 = vmax.f32 %v2568_v61, %v2569_v9  ;;  %v2589_v4 = vmax.f32 %v2587_v58, %v2588_v35  ;;  %v483_v63 = vpop.f32.mrf.mxu0 }
 0x16e   :  { %v4020_v20 = vmax.f32 %v4018_v0, %v10188_v25  ;;  %v4477_v22 = vsel %vm4449_vm5, %v4014_v12, %v4011_v1  ;;  %v2576_v23 = vrot.slane %v2575_v31, 1  ;;  %v2583_v27 = vrot.slane %v2582_v14, 1 }
 0x16f   :  { %v4478_v28 = vsel %vm4451_vm6, %v4017_v16, %v4477_v22  ;;  %v2590_v32 = vrot.slane %v2589_v4, 1  ;;  %v10205_v11 = vsel %vm3936_vm4, %v2570_v19, -inf  ;;  %v468_v2 = vadd.f32 %v10149_v6, %v10182_v18 }
 0x170   :  { %v2577_v15 = vmax.f32 %v2575_v31, %v2576_v23  ;;  %v2584_v17 = vmax.f32 %v2582_v14, %v2583_v27  ;;  %v10210_v29 = vsel %vm4453_vm7, %v4020_v20, %v4478_v28  ;;  %v489_v25 = vadd.f32 %v10149_v6, %v9118_v37 }
 0x171   :  { %v2591_v33 = vmax.f32 %v2589_v4, %v2590_v32  ;;  %v684_v34 = vmax.f32 %v468_v2, 0.0  ;;  %v481_v24 = vadd.f32 %v10149_v6, %v480_v55  ;;  %v492_v36 = vadd.f32 %v10149_v6, %v9119_v10 }
 0x172   :  { %v10216_v38 = vsel %vm3936_vm4, %v2577_v15, -inf  ;;  %v10219_v39 = vsel %vm3936_vm4, %v2584_v17, -inf  ;;  %v689_v18 = vmax.f32 %v489_v25, 0.0  ;;  %v484_v40 = vadd.f32 %v10149_v6, %v483_v63 }
 0x173   :  { %v10223_v41 = vsel %vm3936_vm4, %v2591_v33, -inf  ;;  %v1020_v44 = vcombine.high %v684_v34, %v684_v34  ;;  %v1027_v37 = vrot.slane %v684_v34, %v9957_v47  ;;  %v10226_v42 = vmax.f32 %v481_v24, 0.0 }
 0x174   :  { %v1105_v45 = vcombine.high %v689_v18, %v689_v18  ;;  %v1112_v46 = vrot.slane %v689_v18, %v9957_v47  ;;  %v10229_v48 = vmax.f32 %v492_v36, 0.0  ;;  %v10231_v49 = vmax.f32 %v484_v40, 0.0 }
 0x175   :  { %v1034_v50 = vrot.slane %v1020_v44, %v9957_v47  ;;  %v1035_v51 = vcombine.high %v1027_v37, %v1027_v37  ;;  %v2508_v21 = vsel %vm2143_vm3, %v1027_v37, -inf  ;;  %v1071_v52 = vcombine.high %v10226_v42, %v10226_v42 }
 0x176   :  { %v2509_v53 = vrot.slane %v2508_v21, 4  ;;  %v1119_v54 = vrot.slane %v1105_v45, %v9957_v47  ;;  %v1120_v55 = vcombine.high %v1112_v46, %v1112_v46  ;;  %v2648_v56 = vsel %vm2143_vm3, %v1112_v46, -inf }
 0x177   :  { %v1036_v26 = vcombine.high %v1034_v50, %v1034_v50  ;;  %v2515_v57 = vsel %vm2143_vm3, %v1035_v51, -inf  ;;  %v2522_v58 = vsel %vm2143_vm3, %v1034_v50, -inf  ;;  %v2649_v30 = vrot.slane %v2648_v56, 4 }
 0x178   :  { %v2510_v59 = vmax.f32 %v2508_v21, %v2509_v53  ;;  %v2516_v60 = vrot.slane %v2515_v57, 4  ;;  %v2523_v61 = vrot.slane %v2522_v58, 4  ;;  %v1121_v62 = vcombine.high %v1119_v54, %v1119_v54 }
 0x179   :  { %v2529_v1 = vsel %vm2143_vm3, %v1036_v26, -inf  ;;  %v2650_v3 = vmax.f32 %v2648_v56, %v2649_v30  ;;  %v2655_v5 = vsel %vm2143_vm3, %v1120_v55, -inf  ;;  %v2662_v7 = vsel %vm2143_vm3, %v1119_v54, -inf }
 0x17a   :  { %v2511_v8 = vrot.slane %v2510_v59, 2  ;;  %v2517_v9 = vmax.f32 %v2515_v57, %v2516_v60  ;;  %v2524_v35 = vmax.f32 %v2522_v58, %v2523_v61  ;;  %v2530_v10 = vrot.slane %v2529_v1, 4 }
 0x17b   :  { %v2651_v12 = vrot.slane %v2650_v3, 2  ;;  %v2656_v13 = vrot.slane %v2655_v5, 4  ;;  %v2663_v31 = vrot.slane %v2662_v7, 4  ;;  %v2669_v14 = vsel %vm2143_vm3, %v1121_v62, -inf }
 0x17c   :  { %v2512_v16 = vmax.f32 %v2510_v59, %v2511_v8  ;;  %v2518_v0 = vrot.slane %v2517_v9, 2  ;;  %v2525_v19 = vrot.slane %v2524_v35, 2  ;;  %v2531_v4 = vmax.f32 %v2529_v1, %v2530_v10 }
 0x17d   :  { %v2652_v20 = vmax.f32 %v2650_v3, %v2651_v12  ;;  %v2657_v22 = vmax.f32 %v2655_v5, %v2656_v13  ;;  %v2664_v23 = vmax.f32 %v2662_v7, %v2663_v31  ;;  %v2670_v27 = vrot.slane %v2669_v14, 4 }
 0x17e   :  { %v2513_v28 = vrot.slane %v2512_v16, 1  ;;  %v2519_v32 = vmax.f32 %v2517_v9, %v2518_v0  ;;  %v2526_v2 = vmax.f32 %v2524_v35, %v2525_v19  ;;  %v2532_v63 = vrot.slane %v2531_v4, 2 }
 0x17f   :  { %v2653_v15 = vrot.slane %v2652_v20, 1  ;;  %v2658_v17 = vrot.slane %v2657_v22, 2  ;;  %v2665_v25 = vrot.slane %v2664_v23, 2  ;;  %v2671_v33 = vmax.f32 %v2669_v14, %v2670_v27 }
 0x180   :  { %v2514_v34 = vmax.f32 %v2512_v16, %v2513_v28  ;;  %v2520_v24 = vrot.slane %v2519_v32, 1  ;;  %v2527_v36 = vrot.slane %v2526_v2, 1  ;;  %v2533_v18 = vmax.f32 %v2531_v4, %v2532_v63 }
 0x181   :  { %v2654_v40 = vmax.f32 %v2652_v20, %v2653_v15  ;;  %v2659_v44 = vmax.f32 %v2657_v22, %v2658_v17  ;;  %v2666_v37 = vmax.f32 %v2664_v23, %v2665_v25  ;;  %v2672_v45 = vrot.slane %v2671_v33, 2 }
 0x182   :  { %v2521_v46 = vmax.f32 %v2519_v32, %v2520_v24  ;;  %v2528_v50 = vmax.f32 %v2526_v2, %v2527_v36  ;;  %v2534_v51 = vrot.slane %v2533_v18, 1  ;;  %v4021_v21 = vsel %vm3936_vm4, %v2514_v34, -inf }
 0x183   :  { %v4023_v53 = vmax.f32 %v4021_v21, %v10205_v11  ;;  %v2660_v54 = vrot.slane %v2659_v44, 1  ;;  %v2667_v55 = vrot.slane %v2666_v37, 1  ;;  %v2673_v56 = vmax.f32 %v2671_v33, %v2672_v45 }
 0x184   :  { %v2535_v26 = vmax.f32 %v2533_v18, %v2534_v51  ;;  %v4024_v57 = vsel %vm3936_vm4, %v2521_v46, -inf  ;;  %v4027_v58 = vsel %vm3936_vm4, %v2528_v50, -inf  ;;  %v10250_v30 = vsel %vm3936_vm4, %v2654_v40, -inf }
 0x185   :  { %v4026_v59 = vmax.f32 %v4024_v57, %v10216_v38  ;;  %v4029_v60 = vmax.f32 %v4027_v58, %v10219_v39  ;;  %v4480_v61 = vsel %vm4455_vm8, %v4023_v53, %v10210_v29  ;;  %v2661_v62 = vmax.f32 %v2659_v44, %v2660_v54 }
 0x186   :  { %v4030_v11 = vsel %vm3936_vm4, %v2535_v26, -inf  ;;  %v2668_v1 = vmax.f32 %v2666_v37, %v2667_v55  ;;  %v2674_v3 = vrot.slane %v2673_v56, 1  ;;  %v1078_v5 = vrot.slane %v10226_v42, %v9957_v47 }
 0x187   :  { %v4032_v7 = vmax.f32 %v4030_v11, %v10223_v41  ;;  %v4481_v8 = vsel %vm4457_vm9, %v4026_v59, %v4480_v61  ;;  %v10262_v9 = vsel %vm3936_vm4, %v2661_v62, -inf  ;;  %v1085_v29 = vrot.slane %v1071_v52, %v9957_v47 }
 0x188   :  { %v4482_v38 = vsel %vm4459_vm10, %v4029_v60, %v4481_v8  ;;  %v2675_v39 = vmax.f32 %v2673_v56, %v2674_v3  ;;  %v10270_v35 = vsel %vm3936_vm4, %v2668_v1, -inf  ;;  %v1086_v10 = vcombine.high %v1078_v5, %v1078_v5  ;;  %v9122_v1 = vpop.f32.mrf.mxu0 }
 0x189   :  { %v4483_v12 = vsel %vm4461_vm11, %v4032_v7, %v4482_v38  ;;  %v1087_v41 = vcombine.high %v1085_v29, %v1085_v29  ;;  %v2592_v13 = vsel %vm2143_vm3, %v1078_v5, -inf  ;;  %v2606_v31 = vsel %vm2143_vm3, %v1085_v29, -inf }
 0x18a   :  { %4587 = vst.msk [vmem:[#allocation4 + $0x18] sm:$0xff] %vm3936_vm4, %v4483_v12  ;;  %4644 = vst.msk [vmem:[#allocation2 + $0x41] sm:$0xff] %vm3936_vm4, %v4483_v12  ;;  %v10278_v42 = vsel %vm3936_vm4, %v2675_v39, -inf  ;;  %v2593_v52 = vrot.slane %v2592_v13, 4  ;;  %v2599_v14 = vsel %vm2143_vm3, %v1086_v10, -inf  ;;  %v2607_v16 = vrot.slane %v2606_v31, 4 }
 0x18b   :  { %v2600_v0 = vrot.slane %v2599_v14, 4  ;;  %v2613_v19 = vsel %vm2143_vm3, %v1087_v41, -inf  ;;  %v1122_v4 = vcombine.high %v10229_v48, %v10229_v48  ;;  %v1129_v20 = vrot.slane %v10229_v48, %v9957_v47 }
 0x18c   :  { %v2594_v22 = vmax.f32 %v2592_v13, %v2593_v52  ;;  %v2608_v23 = vmax.f32 %v2606_v31, %v2607_v16  ;;  %v2614_v27 = vrot.slane %v2613_v19, 4  ;;  %v1088_v28 = vcombine.high %v10231_v49, %v10231_v49 }
 0x18d   :  { %v2601_v32 = vmax.f32 %v2599_v14, %v2600_v0  ;;  %v1136_v2 = vrot.slane %v1122_v4, %v9957_v47  ;;  %v1137_v63 = vcombine.high %v1129_v20, %v1129_v20  ;;  %v2676_v15 = vsel %vm2143_vm3, %v1129_v20, -inf  ;;  %v9363_v4 = vld [vmem:[%s12884_s3 + $0x118] sm:$0xff]  }
 0x18e   :  { %v2595_v17 = vrot.slane %v2594_v22, 2  ;;  %v2609_v25 = vrot.slane %v2608_v23, 2  ;;  %v2615_v33 = vmax.f32 %v2613_v19, %v2614_v27  ;;  %v2677_v34 = vrot.slane %v2676_v15, 4  ;;  %v496_v19 = vpop.f32.mrf.mxu0  ;;  %9164 = vmatprep.subr.bf16.mxu0 %v9363_v4 }
 0x18f   :  { %v2602_v24 = vrot.slane %v2601_v32, 2  ;;  %v1138_v36 = vcombine.high %v1136_v2, %v1136_v2  ;;  %v2683_v48 = vsel %vm2143_vm3, %v1137_v63, -inf  ;;  %v2690_v18 = vsel %vm2143_vm3, %v1136_v2, -inf  ;;  %9165 = vmatpush3.bf16.msra.mxu0 %v9363_v4 }
 0x190   :  { %v2596_v40 = vmax.f32 %v2594_v22, %v2595_v17  ;;  %v2610_v44 = vmax.f32 %v2608_v23, %v2609_v25  ;;  %v2616_v37 = vrot.slane %v2615_v33, 2  ;;  %v2678_v45 = vmax.f32 %v2676_v15, %v2677_v34  ;;  %v9123_v34 = vpop.f32.mrf.mxu0 }
 0x191   :  { %v2603_v46 = vmax.f32 %v2601_v32, %v2602_v24  ;;  %v2684_v50 = vrot.slane %v2683_v48, 4  ;;  %v2691_v51 = vrot.slane %v2690_v18, 4  ;;  %v2697_v21 = vsel %vm2143_vm3, %v1138_v36, -inf }
 0x192   :  { %v2597_v53 = vrot.slane %v2596_v40, 1  ;;  %v2611_v54 = vrot.slane %v2610_v44, 1  ;;  %v2617_v55 = vmax.f32 %v2615_v33, %v2616_v37  ;;  %v2679_v56 = vrot.slane %v2678_v45, 2 }
 0x193   :  { %v2604_v26 = vrot.slane %v2603_v46, 1  ;;  %v2685_v57 = vmax.f32 %v2683_v48, %v2684_v50  ;;  %v2692_v58 = vmax.f32 %v2690_v18, %v2691_v51  ;;  %v2698_v59 = vrot.slane %v2697_v21, 4 }
 0x194   :  { %v2598_v60 = vmax.f32 %v2596_v40, %v2597_v53  ;;  %v2612_v61 = vmax.f32 %v2610_v44, %v2611_v54  ;;  %v2618_v62 = vrot.slane %v2617_v55, 1  ;;  %v2680_v11 = vmax.f32 %v2678_v45, %v2679_v56  ;;  %v499_v56 = vpop.f32.mrf.mxu0 }
 0x195   :  { %v2605_v3 = vmax.f32 %v2603_v46, %v2604_v26  ;;  %v2686_v5 = vrot.slane %v2685_v57, 2  ;;  %v2693_v7 = vrot.slane %v2692_v58, 2  ;;  %v2699_v8 = vmax.f32 %v2697_v21, %v2698_v59 }
 0x196   :  { %v2619_v29 = vmax.f32 %v2617_v55, %v2618_v62  ;;  %v4033_v38 = vsel %vm3936_vm4, %v2598_v60, -inf  ;;  %v4039_v39 = vsel %vm3936_vm4, %v2612_v61, -inf  ;;  %v2681_v10 = vrot.slane %v2680_v11, 1 }
 0x197   :  { %v4035_v12 = vmax.f32 %v4033_v38, %v10250_v30  ;;  %v4036_v41 = vsel %vm3936_vm4, %v2605_v3, -inf  ;;  %v4041_v13 = vmax.f32 %v4039_v39, %v10270_v35  ;;  %v2687_v31 = vmax.f32 %v2685_v57, %v2686_v5 }
 0x198   :  { %v4038_v52 = vmax.f32 %v4036_v41, %v10262_v9  ;;  %v4042_v14 = vsel %vm3936_vm4, %v2619_v29, -inf  ;;  %v2682_v16 = vmax.f32 %v2680_v11, %v2681_v10  ;;  %v2694_v0 = vmax.f32 %v2692_v58, %v2693_v7 }
 0x199   :  { %v4044_v20 = vmax.f32 %v4042_v14, %v10278_v42  ;;  %v2688_v22 = vrot.slane %v2687_v31, 1  ;;  %v2700_v30 = vrot.slane %v2699_v8, 2  ;;  %v1095_v23 = vrot.slane %v10231_v49, %v9957_v47 }
 0x19a   :  { %v4484_v35 = vsel %vm4449_vm5, %v4038_v52, %v4035_v12  ;;  %v2695_v27 = vrot.slane %v2694_v0, 1  ;;  %v10308_v9 = vsel %vm3936_vm4, %v2682_v16, -inf  ;;  %v1102_v32 = vrot.slane %v1088_v28, %v9957_v47 }
 0x19b   :  { %v4485_v2 = vsel %vm4451_vm6, %v4041_v13, %v4484_v35  ;;  %v2689_v63 = vmax.f32 %v2687_v31, %v2688_v22  ;;  %v2701_v15 = vmax.f32 %v2699_v8, %v2700_v30  ;;  %v1103_v17 = vcombine.high %v1095_v23, %v1095_v23 }
 0x19c   :  { %v2696_v42 = vmax.f32 %v2694_v0, %v2695_v27  ;;  %v1104_v25 = vcombine.high %v1102_v32, %v1102_v32  ;;  %v2620_v33 = vsel %vm2143_vm3, %v1095_v23, -inf  ;;  %v2634_v49 = vsel %vm2143_vm3, %v1102_v32, -inf }
 0x19d   :  { %v2702_v24 = vrot.slane %v2701_v15, 1  ;;  %v10315_v36 = vsel %vm3936_vm4, %v2689_v63, -inf  ;;  %v2621_v48 = vrot.slane %v2620_v33, 4  ;;  %v2627_v28 = vsel %vm2143_vm3, %v1103_v17, -inf }
 0x19e   :  { %v10319_v18 = vsel %vm3936_vm4, %v2696_v42, -inf  ;;  %v2628_v40 = vrot.slane %v2627_v28, 4  ;;  %v2635_v44 = vrot.slane %v2634_v49, 4  ;;  %v2641_v37 = vsel %vm2143_vm3, %v1104_v25, -inf }
 0x19f   :  { %v2703_v45 = vmax.f32 %v2701_v15, %v2702_v24  ;;  %v2622_v46 = vmax.f32 %v2620_v33, %v2621_v48  ;;  %v2642_v50 = vrot.slane %v2641_v37, 4  ;;  %v4486_v51 = vsel %vm4453_vm7, %v4044_v20, %v4485_v2 }
 0x1a0   :  { %v2629_v21 = vmax.f32 %v2627_v28, %v2628_v40  ;;  %v2636_v53 = vmax.f32 %v2634_v49, %v2635_v44  ;;  %v505_v54 = vadd.f32 %v10149_v6, %v9122_v1  ;;  %v497_v55 = vadd.f32 %v10149_v6, %v496_v19 }
 0x1a1   :  { %v4055_v26 = vsel %vm3936_vm4, %v2703_v45, -inf  ;;  %v2623_v57 = vrot.slane %v2622_v46, 2  ;;  %v2643_v58 = vmax.f32 %v2641_v37, %v2642_v50  ;;  %v508_v59 = vadd.f32 %v10149_v6, %v9123_v34 }
 0x1a2   :  { %v2630_v60 = vrot.slane %v2629_v21, 2  ;;  %v2637_v61 = vrot.slane %v2636_v53, 2  ;;  %v693_v62 = vmax.f32 %v505_v54, 0.0  ;;  %v691_v11 = vmax.f32 %v497_v55, 0.0 }
 0x1a3   :  { %v2624_v3 = vmax.f32 %v2622_v46, %v2623_v57  ;;  %v2644_v5 = vrot.slane %v2643_v58, 2  ;;  %v10327_v7 = vmax.f32 %v508_v59, 0.0  ;;  %v10330_v8 = vadd.f32 %v10149_v6, %v499_v56 }
 0x1a4   :  { %v2631_v1 = vmax.f32 %v2629_v21, %v2630_v60  ;;  %v2638_v29 = vmax.f32 %v2636_v53, %v2637_v61  ;;  %v1173_v38 = vcombine.high %v693_v62, %v693_v62  ;;  %v1180_v39 = vrot.slane %v693_v62, %v9957_v47 }
 0x1a5   :  { %v2625_v10 = vrot.slane %v2624_v3, 1  ;;  %v2645_v12 = vmax.f32 %v2643_v58, %v2644_v5  ;;  %v1139_v41 = vcombine.high %v691_v11, %v691_v11  ;;  %v1146_v13 = vrot.slane %v691_v11, %v9957_v47 }
 0x1a6   :  { %v2632_v31 = vrot.slane %v2631_v1, 1  ;;  %v2639_v52 = vrot.slane %v2638_v29, 1  ;;  %v1187_v14 = vrot.slane %v1173_v38, %v9957_v47  ;;  %v1188_v16 = vcombine.high %v1180_v39, %v1180_v39 }
 0x1a7   :  { %v2626_v0 = vmax.f32 %v2624_v3, %v2625_v10  ;;  %v2646_v19 = vrot.slane %v2645_v12, 1  ;;  %v2760_v4 = vsel %vm2143_vm3, %v1180_v39, -inf  ;;  %v1153_v20 = vrot.slane %v1139_v41, %v9957_v47 }
 0x1a8   :  { %v2633_v22 = vmax.f32 %v2631_v1, %v2632_v31  ;;  %v2640_v30 = vmax.f32 %v2638_v29, %v2639_v52  ;;  %v1189_v23 = vcombine.high %v1187_v14, %v1187_v14  ;;  %v2761_v35 = vrot.slane %v2760_v4, 4 }
 0x1a9   :  { %v2647_v27 = vmax.f32 %v2645_v12, %v2646_v19  ;;  %v4045_v32 = vsel %vm3936_vm4, %v2626_v0, -inf  ;;  %v2767_v2 = vsel %vm2143_vm3, %v1188_v16, -inf  ;;  %v2774_v63 = vsel %vm2143_vm3, %v1187_v14, -inf }
 0x1aa   :  { %v4047_v15 = vmax.f32 %v4045_v32, %v10308_v9  ;;  %v4048_v17 = vsel %vm3936_vm4, %v2633_v22, -inf  ;;  %v4051_v42 = vsel %vm3936_vm4, %v2640_v30, -inf  ;;  %v2762_v25 = vmax.f32 %v2760_v4, %v2761_v35  ;;  %v9364_v9 = vld [vmem:[%s12884_s3 + $0x110] sm:$0xff]  }
 0x1ab   :  { %v4050_v33 = vmax.f32 %v4048_v17, %v10315_v36  ;;  %v4053_v49 = vmax.f32 %v4051_v42, %v10319_v18  ;;  %v4054_v34 = vsel %vm3936_vm4, %v2647_v27, -inf  ;;  %v2768_v24 = vrot.slane %v2767_v2, 4  ;;  %9166 = vmatprep.subr.bf16.mxu0 %v9364_v9 }
 0x1ac   :  { %v4056_v48 = vmax.f32 %v4054_v34, %v4055_v26  ;;  %v4487_v28 = vsel %vm4455_vm8, %v4047_v15, %v4486_v51  ;;  %v2763_v40 = vrot.slane %v2762_v25, 2  ;;  %v2775_v44 = vrot.slane %v2774_v63, 4  ;;  %9167 = vmatpush3.bf16.msra.mxu0 %v9364_v9 }
 0x1ad   :  { %v4488_v37 = vsel %vm4457_vm9, %v4050_v33, %v4487_v28  ;;  %v2769_v45 = vmax.f32 %v2767_v2, %v2768_v24  ;;  %v2781_v46 = vsel %vm2143_vm3, %v1189_v23, -inf  ;;  %v1154_v36 = vcombine.high %v1146_v13, %v1146_v13 }
 0x1ae   :  { %v4489_v18 = vsel %vm4459_vm10, %v4053_v49, %v4488_v37  ;;  %v2764_v50 = vmax.f32 %v2762_v25, %v2763_v40  ;;  %v2776_v21 = vmax.f32 %v2774_v63, %v2775_v44  ;;  %v2782_v53 = vrot.slane %v2781_v46, 4 }
 0x1af   :  { %v4490_v51 = vsel %vm4461_vm11, %v4056_v48, %v4489_v18  ;;  %v2770_v54 = vrot.slane %v2769_v45, 2  ;;  %v1155_v55 = vcombine.high %v1153_v20, %v1153_v20  ;;  %v2704_v56 = vsel %vm2143_vm3, %v1146_v13, -inf }
 0x1b0   :  { %4588 = vst.msk [vmem:[#allocation4 + $0x20] sm:$0xff] %vm3936_vm4, %v4490_v51  ;;  %4645 = vst.msk [vmem:[#allocation2 + $0x51] sm:$0xff] %vm3936_vm4, %v4490_v51  ;;  %v2765_v26 = vrot.slane %v2764_v50, 1  ;;  %v2777_v57 = vrot.slane %v2776_v21, 2  ;;  %v2783_v58 = vmax.f32 %v2781_v46, %v2782_v53  ;;  %v2705_v59 = vrot.slane %v2704_v56, 4 }
 0x1b1   :  { %v2771_v60 = vmax.f32 %v2769_v45, %v2770_v54  ;;  %v2711_v61 = vsel %vm2143_vm3, %v1154_v36, -inf  ;;  %v2718_v62 = vsel %vm2143_vm3, %v1153_v20, -inf  ;;  %v2725_v11 = vsel %vm2143_vm3, %v1155_v55, -inf  ;;  %v9126_v45 = vpop.f32.mrf.mxu0 }
 0x1b2   :  { %v2766_v3 = vmax.f32 %v2764_v50, %v2765_v26  ;;  %v2778_v5 = vmax.f32 %v2776_v21, %v2777_v57  ;;  %v2784_v1 = vrot.slane %v2783_v58, 2  ;;  %v2706_v29 = vmax.f32 %v2704_v56, %v2705_v59 }
 0x1b3   :  { %v2772_v38 = vrot.slane %v2771_v60, 1  ;;  %v2712_v39 = vrot.slane %v2711_v61, 4  ;;  %v2719_v10 = vrot.slane %v2718_v62, 4  ;;  %v2726_v12 = vrot.slane %v2725_v11, 4 }
 0x1b4   :  { %v2779_v41 = vrot.slane %v2778_v5, 1  ;;  %v2785_v13 = vmax.f32 %v2783_v58, %v2784_v1  ;;  %v4058_v31 = vsel %vm3936_vm4, %v2766_v3, -inf  ;;  %v2707_v52 = vrot.slane %v2706_v29, 2 }
 0x1b5   :  { %v2773_v14 = vmax.f32 %v2771_v60, %v2772_v38  ;;  %v2713_v16 = vmax.f32 %v2711_v61, %v2712_v39  ;;  %v2720_v0 = vmax.f32 %v2718_v62, %v2719_v10  ;;  %v2727_v19 = vmax.f32 %v2725_v11, %v2726_v12  ;;  %v512_v61 = vpop.f32.mrf.mxu0 }
 0x1b6   :  { %v2780_v4 = vmax.f32 %v2778_v5, %v2779_v41  ;;  %v2786_v20 = vrot.slane %v2785_v13, 1  ;;  %v2708_v22 = vmax.f32 %v2706_v29, %v2707_v52  ;;  %v1190_v30 = vcombine.high %v10327_v7, %v10327_v7 }
 0x1b7   :  { %v4061_v23 = vsel %vm3936_vm4, %v2773_v14, -inf  ;;  %v2714_v35 = vrot.slane %v2713_v16, 2  ;;  %v2721_v27 = vrot.slane %v2720_v0, 2  ;;  %v2728_v32 = vrot.slane %v2727_v19, 2 }
 0x1b8   :  { %v2787_v2 = vmax.f32 %v2785_v13, %v2786_v20  ;;  %v4064_v63 = vsel %vm3936_vm4, %v2780_v4, -inf  ;;  %v2709_v15 = vrot.slane %v2708_v22, 1  ;;  %v1197_v17 = vrot.slane %v10327_v7, %v9957_v47 }
 0x1b9   :  { %v2715_v42 = vmax.f32 %v2713_v16, %v2714_v35  ;;  %v2722_v25 = vmax.f32 %v2720_v0, %v2721_v27  ;;  %v2729_v33 = vmax.f32 %v2727_v19, %v2728_v32  ;;  %v1204_v49 = vrot.slane %v1190_v30, %v9957_v47 }
 0x1ba   :  { %v4067_v34 = vsel %vm3936_vm4, %v2787_v2, -inf  ;;  %v2710_v24 = vmax.f32 %v2708_v22, %v2709_v15  ;;  %v1205_v48 = vcombine.high %v1197_v17, %v1197_v17  ;;  %v2788_v28 = vsel %vm2143_vm3, %v1197_v17, -inf }
 0x1bb   :  { %v2716_v40 = vrot.slane %v2715_v42, 1  ;;  %v2723_v44 = vrot.slane %v2722_v25, 1  ;;  %v2730_v9 = vrot.slane %v2729_v33, 1  ;;  %v1206_v37 = vcombine.high %v1204_v49, %v1204_v49 }
 0x1bc   :  { %v4057_v46 = vsel %vm3936_vm4, %v2710_v24, -inf  ;;  %v2789_v36 = vrot.slane %v2788_v28, 4  ;;  %v2795_v7 = vsel %vm2143_vm3, %v1205_v48, -inf  ;;  %v2802_v18 = vsel %vm2143_vm3, %v1204_v49, -inf }
 0x1bd   :  { %v2717_v50 = vmax.f32 %v2715_v42, %v2716_v40  ;;  %v2724_v21 = vmax.f32 %v2722_v25, %v2723_v44  ;;  %v2731_v53 = vmax.f32 %v2729_v33, %v2730_v9  ;;  %v4059_v51 = vmax.f32 %v4057_v46, %v4058_v31 }
 0x1be   :  { %v2790_v54 = vmax.f32 %v2788_v28, %v2789_v36  ;;  %v2796_v55 = vrot.slane %v2795_v7, 4  ;;  %v2803_v56 = vrot.slane %v2802_v18, 4  ;;  %v2809_v26 = vsel %vm2143_vm3, %v1206_v37, -inf }
 0x1bf   :  { %v4060_v57 = vsel %vm3936_vm4, %v2717_v50, -inf  ;;  %v4063_v58 = vsel %vm3936_vm4, %v2724_v21, -inf  ;;  %v4066_v59 = vsel %vm3936_vm4, %v2731_v53, -inf  ;;  %v2810_v60 = vrot.slane %v2809_v26, 4  ;;  %v9365_v50 = vld [vmem:[%s12884_s3 + $0x108] sm:$0xff]  }
 0x1c0   :  { %v4062_v62 = vmax.f32 %v4060_v57, %v4061_v23  ;;  %v4065_v11 = vmax.f32 %v4063_v58, %v4064_v63  ;;  %v4068_v3 = vmax.f32 %v4066_v59, %v4067_v34  ;;  %v2791_v5 = vrot.slane %v2790_v54, 2  ;;  %v10411_v57 = vld [vmem:[%s12883_s2] ss:$0 sm:$0xff]  ;;  %9168 = vmatprep.subr.bf16.mxu0 %v9365_v50 }
 0x1c1   :  { %v2797_v1 = vmax.f32 %v2795_v7, %v2796_v55  ;;  %v2804_v29 = vmax.f32 %v2802_v18, %v2803_v56  ;;  %v2811_v38 = vmax.f32 %v2809_v26, %v2810_v60  ;;  %v692_v39 = vmax.f32 %v10330_v8, 0.0  ;;  %9169 = vmatpush3.bf16.msra.mxu0 %v9365_v50 }
 0x1c2   :  { %v4491_v10 = vsel %vm4449_vm5, %v4062_v62, %v4059_v51  ;;  %v2792_v12 = vmax.f32 %v2790_v54, %v2791_v5  ;;  %v521_v41 = vadd.f32 %v10149_v6, %v9126_v45  ;;  %v513_v13 = vadd.f32 %v10149_v6, %v512_v61  ;;  %v9127_v45 = vpop.f32.mrf.mxu0 }
 0x1c3   :  { %v4492_v31 = vsel %vm4451_vm6, %v4065_v11, %v4491_v10  ;;  %v2798_v52 = vrot.slane %v2797_v1, 2  ;;  %v2805_v14 = vrot.slane %v2804_v29, 2  ;;  %v2812_v16 = vrot.slane %v2811_v38, 2 }
 0x1c4   :  { %v2793_v0 = vrot.slane %v2792_v12, 1  ;;  %v1156_v19 = vcombine.high %v692_v39, %v692_v39  ;;  %v1163_v4 = vrot.slane %v692_v39, %v9957_v47  ;;  %v10384_v20 = vsel %vm4453_vm7, %v4068_v3, %v4492_v31 }
 0x1c5   :  { %v2799_v8 = vmax.f32 %v2797_v1, %v2798_v52  ;;  %v2806_v22 = vmax.f32 %v2804_v29, %v2805_v14  ;;  %v2813_v30 = vmax.f32 %v2811_v38, %v2812_v16  ;;  %v697_v23 = vmax.f32 %v521_v41, 0.0 }
 0x1c6   :  { %v2794_v35 = vmax.f32 %v2792_v12, %v2793_v0  ;;  %v1170_v27 = vrot.slane %v1156_v19, %v9957_v47  ;;  %v1171_v6 = vcombine.high %v1163_v4, %v1163_v4  ;;  %v2732_v32 = vsel %vm2143_vm3, %v1163_v4, -inf }
 0x1c7   :  { %v2800_v2 = vrot.slane %v2799_v8, 1  ;;  %v2807_v63 = vrot.slane %v2806_v22, 1  ;;  %v2814_v15 = vrot.slane %v2813_v30, 1  ;;  %v2733_v17 = vrot.slane %v2732_v32, 4 }
 0x1c8   :  { %v10389_v42 = vsel %vm3936_vm4, %v2794_v35, -inf  ;;  %v1172_v25 = vcombine.high %v1170_v27, %v1170_v27  ;;  %v2739_v33 = vsel %vm2143_vm3, %v1171_v6, -inf  ;;  %v2746_v49 = vsel %vm2143_vm3, %v1170_v27, -inf }
 0x1c9   :  { %v2801_v34 = vmax.f32 %v2799_v8, %v2800_v2  ;;  %v2808_v24 = vmax.f32 %v2806_v22, %v2807_v63  ;;  %v2815_v48 = vmax.f32 %v2813_v30, %v2814_v15  ;;  %v2734_v28 = vmax.f32 %v2732_v32, %v2733_v17 }
 0x1ca   :  { %v2740_v40 = vrot.slane %v2739_v33, 4  ;;  %v2747_v44 = vrot.slane %v2746_v49, 4  ;;  %v2753_v9 = vsel %vm2143_vm3, %v1172_v25, -inf  ;;  %v1241_v37 = vcombine.high %v697_v23, %v697_v23 }
 0x1cb   :  { %v10395_v46 = vsel %vm3936_vm4, %v2801_v34, -inf  ;;  %v10398_v36 = vsel %vm3936_vm4, %v2808_v24, -inf  ;;  %v10401_v7 = vsel %vm3936_vm4, %v2815_v48, -inf  ;;  %v2735_v18 = vrot.slane %v2734_v28, 2 }
 0x1cc   :  { %v2741_v21 = vmax.f32 %v2739_v33, %v2740_v40  ;;  %v2748_v53 = vmax.f32 %v2746_v49, %v2747_v44  ;;  %v2754_v51 = vrot.slane %v2753_v9, 4  ;;  %v1248_v54 = vrot.slane %v697_v23, %v9957_v47 }
 0x1cd   :  { %v2736_v55 = vmax.f32 %v2734_v28, %v2735_v18  ;;  %v1255_v56 = vrot.slane %v1241_v37, %v9957_v47  ;;  %v695_v26 = vmax.f32 %v513_v13, 0.0  ;;  %v10414_v58 = vadd.f32 %v10411_v57, %v9127_v45 }
 0x1ce   :  { %v2742_v59 = vrot.slane %v2741_v21, 2  ;;  %v2749_v60 = vrot.slane %v2748_v53, 2  ;;  %v2755_v61 = vmax.f32 %v2753_v9, %v2754_v51  ;;  %v1256_v62 = vcombine.high %v1248_v54, %v1248_v54 }
 0x1cf   :  { %v2737_v11 = vrot.slane %v2736_v55, 1  ;;  %v1257_v3 = vcombine.high %v1255_v56, %v1255_v56  ;;  %v2872_v5 = vsel %vm2143_vm3, %v1248_v54, -inf  ;;  %v2886_v1 = vsel %vm2143_vm3, %v1255_v56, -inf }
 0x1d0   :  { %v2743_v29 = vmax.f32 %v2741_v21, %v2742_v59  ;;  %v2750_v38 = vmax.f32 %v2748_v53, %v2749_v60  ;;  %v2756_v39 = vrot.slane %v2755_v61, 2  ;;  %v2873_v10 = vrot.slane %v2872_v5, 4 }
 0x1d1   :  { %v2738_v12 = vmax.f32 %v2736_v55, %v2737_v11  ;;  %v2879_v41 = vsel %vm2143_vm3, %v1256_v62, -inf  ;;  %v2887_v13 = vrot.slane %v2886_v1, 4  ;;  %v2893_v31 = vsel %vm2143_vm3, %v1257_v3, -inf  ;;  %v10441_v11 = vld [vmem:[#allocation2 + $0x20] sm:$0xff] }
 0x1d2   :  { %v2744_v52 = vrot.slane %v2743_v29, 1  ;;  %v2751_v14 = vrot.slane %v2750_v38, 1  ;;  %v2757_v16 = vmax.f32 %v2755_v61, %v2756_v39  ;;  %v2874_v0 = vmax.f32 %v2872_v5, %v2873_v10 }
 0x1d3   :  { %v4069_v19 = vsel %vm3936_vm4, %v2738_v12, -inf  ;;  %v2880_v4 = vrot.slane %v2879_v41, 4  ;;  %v2888_v8 = vmax.f32 %v2886_v1, %v2887_v13  ;;  %v2894_v22 = vrot.slane %v2893_v31, 4 }
 0x1d4   :  { %v2745_v30 = vmax.f32 %v2743_v29, %v2744_v52  ;;  %v2752_v23 = vmax.f32 %v2750_v38, %v2751_v14  ;;  %v2758_v35 = vrot.slane %v2757_v16, 1  ;;  %v4071_v27 = vmax.f32 %v4069_v19, %v10389_v42 }
 0x1d5   :  { %v2875_v6 = vrot.slane %v2874_v0, 2  ;;  %v2881_v32 = vmax.f32 %v2879_v41, %v2880_v4  ;;  %v2889_v2 = vrot.slane %v2888_v8, 2  ;;  %v2895_v63 = vmax.f32 %v2893_v31, %v2894_v22  ;;  %v515_v41 = vpop.f32.mrf.mxu0 }
 0x1d6   :  { %v2759_v15 = vmax.f32 %v2757_v16, %v2758_v35  ;;  %v4072_v17 = vsel %vm3936_vm4, %v2745_v30, -inf  ;;  %v4075_v25 = vsel %vm3936_vm4, %v2752_v23, -inf  ;;  %v4494_v33 = vsel %vm4455_vm8, %v4071_v27, %v10384_v20 }
 0x1d7   :  { %v4074_v49 = vmax.f32 %v4072_v17, %v10395_v46  ;;  %v4077_v34 = vmax.f32 %v4075_v25, %v10398_v36  ;;  %v2876_v24 = vmax.f32 %v2874_v0, %v2875_v6  ;;  %v2882_v48 = vrot.slane %v2881_v32, 2 }
 0x1d8   :  { %v4078_v42 = vsel %vm3936_vm4, %v2759_v15, -inf  ;;  %v2890_v28 = vmax.f32 %v2888_v8, %v2889_v2  ;;  %v2896_v40 = vrot.slane %v2895_v63, 2  ;;  %v1207_v44 = vcombine.high %v695_v26, %v695_v26  ;;  %v10457_v8 = vld [vmem:[#allocation2 + $0x10] sm:$0xff] }
 0x1d9   :  { %v4080_v9 = vmax.f32 %v4078_v42, %v10401_v7  ;;  %v4495_v37 = vsel %vm4457_vm9, %v4074_v49, %v4494_v33  ;;  %v2877_v45 = vrot.slane %v2876_v24, 1  ;;  %v2883_v18 = vmax.f32 %v2881_v32, %v2882_v48 }
 0x1da   :  { %v4496_v50 = vsel %vm4459_vm10, %v4077_v34, %v4495_v37  ;;  %v2891_v20 = vrot.slane %v2890_v28, 1  ;;  %v2897_v21 = vmax.f32 %v2895_v63, %v2896_v40  ;;  %v1214_v46 = vrot.slane %v695_v26, %v9957_v47 }
 0x1db   :  { %v4497_v36 = vsel %vm4461_vm11, %v4080_v9, %v4496_v50  ;;  %v2878_v53 = vmax.f32 %v2876_v24, %v2877_v45  ;;  %v2884_v51 = vrot.slane %v2883_v18, 1  ;;  %v1221_v54 = vrot.slane %v1207_v44, %v9957_v47 }
 0x1dc   :  { %4589 = vst.msk [vmem:[#allocation4 + $0x28] sm:$0xff] %vm3936_vm4, %v4497_v36  ;;  %4646 = vst.msk [vmem:[#allocation2 + $0x61] sm:$0xff] %vm3936_vm4, %v4497_v36  ;;  %v2892_v7 = vmax.f32 %v2890_v28, %v2891_v20  ;;  %v2898_v55 = vrot.slane %v2897_v21, 1  ;;  %v1222_v56 = vcombine.high %v1214_v46, %v1214_v46  ;;  %v2816_v59 = vsel %vm2143_vm3, %v1214_v46, -inf }
 0x1dd   :  { %v2885_v60 = vmax.f32 %v2883_v18, %v2884_v51  ;;  %v10439_v61 = vsel %vm3936_vm4, %v2878_v53, -inf  ;;  %v1223_v26 = vcombine.high %v1221_v54, %v1221_v54  ;;  %v2817_v62 = vrot.slane %v2816_v59, 4 }
 0x1de   :  { %v2899_v3 = vmax.f32 %v2897_v21, %v2898_v55  ;;  %v10444_v5 = vsel %vm3936_vm4, %v2892_v7, -inf  ;;  %v2823_v1 = vsel %vm2143_vm3, %v1222_v56, -inf  ;;  %v2830_v29 = vsel %vm2143_vm3, %v1221_v54, -inf }
 0x1df   :  { %v10449_v38 = vsel %vm3936_vm4, %v2885_v60, -inf  ;;  %v2818_v39 = vmax.f32 %v2816_v59, %v2817_v62  ;;  %v2824_v10 = vrot.slane %v2823_v1, 4  ;;  %v2831_v12 = vrot.slane %v2830_v29, 4 }
 0x1e0   :  { %v10452_v13 = vsel %vm3936_vm4, %v2899_v3, -inf  ;;  %v2837_v31 = vsel %vm2143_vm3, %v1223_v26, -inf  ;;  %v698_v52 = vmax.f32 %v10414_v58, 0.0  ;;  %v4832_v14 = vrot.slane %v10441_v11, 2 }
 0x1e1   :  { %v2819_v16 = vrot.slane %v2818_v39, 2  ;;  %v2825_v0 = vmax.f32 %v2823_v1, %v2824_v10  ;;  %v2832_v19 = vmax.f32 %v2830_v29, %v2831_v12  ;;  %v2838_v4 = vrot.slane %v2837_v31, 4 }
 0x1e2   :  { %v1258_v22 = vcombine.high %v698_v52, %v698_v52  ;;  %v1265_v30 = vrot.slane %v698_v52, %v9957_v47  ;;  %v9199_v23 = vpack.i.bf16 %v10441_v11, %v10457_v8  ;;  %v516_v35 = vadd.f32 %v10411_v57, %v515_v41 }
 0x1e3   :  { %v2820_v27 = vmax.f32 %v2818_v39, %v2819_v16  ;;  %v2826_v6 = vrot.slane %v2825_v0, 2  ;;  %v2833_v32 = vrot.slane %v2832_v19, 2  ;;  %v2839_v58 = vmax.f32 %v2837_v31, %v2838_v4 }
 0x1e4   :  { %v1272_v2 = vrot.slane %v1258_v22, %v9957_v47  ;;  %v1273_v63 = vcombine.high %v1265_v30, %v1265_v30  ;;  %v2900_v15 = vsel %vm2143_vm3, %v1265_v30, -inf  ;;  %9200 = vrot.lane.b32.xlu0 %v9199_v23, %s9715_s21  ;;  %v696_v17 = vmax.f32 %v516_v35, 0.0 }
 0x1e5   :  { %v2821_v25 = vrot.slane %v2820_v27, 1  ;;  %v2827_v33 = vmax.f32 %v2825_v0, %v2826_v6  ;;  %v2834_v49 = vmax.f32 %v2832_v19, %v2833_v32  ;;  %v2840_v34 = vrot.slane %v2839_v58, 2 }
 0x1e6   :  { %v1274_v24 = vcombine.high %v1272_v2, %v1272_v2  ;;  %v2901_v48 = vrot.slane %v2900_v15, 4  ;;  %v2907_v42 = vsel %vm2143_vm3, %v1273_v63, -inf  ;;  %v2914_v28 = vsel %vm2143_vm3, %v1272_v2, -inf }
 0x1e7   :  { %v2822_v40 = vmax.f32 %v2820_v27, %v2821_v25  ;;  %v2828_v44 = vrot.slane %v2827_v33, 1  ;;  %v2835_v9 = vrot.slane %v2834_v49, 1  ;;  %v2841_v37 = vmax.f32 %v2839_v58, %v2840_v34 }
 0x1e8   :  { %v2902_v45 = vmax.f32 %v2900_v15, %v2901_v48  ;;  %v2908_v18 = vrot.slane %v2907_v42, 4  ;;  %v2915_v50 = vrot.slane %v2914_v28, 4  ;;  %v2921_v20 = vsel %vm2143_vm3, %v1274_v24, -inf  ;;  %v9130_v15 = vpop.f32.mrf.mxu0 }
 0x1e9   :  { %v2829_v21 = vmax.f32 %v2827_v33, %v2828_v44  ;;  %v2836_v46 = vmax.f32 %v2834_v49, %v2835_v9  ;;  %v2842_v36 = vrot.slane %v2841_v37, 1  ;;  %v4081_v53 = vsel %vm3936_vm4, %v2822_v40, -inf }
 0x1ea   :  { %v4083_v51 = vmax.f32 %v4081_v53, %v10439_v61  ;;  %v2903_v54 = vrot.slane %v2902_v45, 2  ;;  %v2909_v7 = vmax.f32 %v2907_v42, %v2908_v18  ;;  %v2916_v55 = vmax.f32 %v2914_v28, %v2915_v50  ;;  %v4657_v28 = vld [vmem:[#allocation2] sm:$0xff] }
 0x1eb   :  { %v2843_v56 = vmax.f32 %v2841_v37, %v2842_v36  ;;  %v4084_v59 = vsel %vm3936_vm4, %v2829_v21, -inf  ;;  %v4087_v60 = vsel %vm3936_vm4, %v2836_v46, -inf  ;;  %v2922_v26 = vrot.slane %v2921_v20, 4  ;;  %v4658_v21 = vld [vmem:[#allocation2 + $0x8] sm:$0x3]  ;;  %v9366_v46 = vld [vmem:[%s12884_s3 + $0x100] sm:$0xff]  }
 0x1ec   :  { %v4086_v62 = vmax.f32 %v4084_v59, %v10449_v38  ;;  %v4089_v3 = vmax.f32 %v4087_v60, %v10444_v5  ;;  %v2904_v1 = vmax.f32 %v2902_v45, %v2903_v54  ;;  %v2910_v29 = vrot.slane %v2909_v7, 2  ;;  %9170 = vmatprep.subr.bf16.mxu0 %v9366_v46 }
 0x1ed   :  { %v4090_v39 = vsel %vm3936_vm4, %v2843_v56, -inf  ;;  %v2917_v10 = vrot.slane %v2916_v55, 2  ;;  %v2923_v12 = vmax.f32 %v2921_v20, %v2922_v26  ;;  %v1224_v61 = vcombine.high %v696_v17, %v696_v17  ;;  %9171 = vmatpush3.bf16.msra.mxu0 %v9366_v46 }
 0x1ee   :  { %v4092_v41 = vmax.f32 %v4090_v39, %v10452_v13  ;;  %v4498_v31 = vsel %vm4449_vm5, %v4086_v62, %v4083_v51  ;;  %v2905_v52 = vrot.slane %v2904_v1, 1  ;;  %v2911_v16 = vmax.f32 %v2909_v7, %v2910_v29 }
 0x1ef   :  { %v4499_v0 = vsel %vm4451_vm6, %v4089_v3, %v4498_v31  ;;  %v2918_v19 = vmax.f32 %v2916_v55, %v2917_v10  ;;  %v2924_v4 = vrot.slane %v2923_v12, 2  ;;  %v1231_v38 = vrot.slane %v696_v17, %v9957_v47 }
 0x1f0   :  { %v2906_v5 = vmax.f32 %v2904_v1, %v2905_v52  ;;  %v2912_v22 = vrot.slane %v2911_v16, 1  ;;  %v1238_v30 = vrot.slane %v1224_v61, %v9957_v47  ;;  %v10482_v23 = vsel %vm4453_vm7, %v4092_v41, %v4499_v0 }
 0x1f1   :  { %v2919_v35 = vrot.slane %v2918_v19, 1  ;;  %v2925_v27 = vmax.f32 %v2923_v12, %v2924_v4  ;;  %v1239_v13 = vcombine.high %v1231_v38, %v1231_v38  ;;  %v2844_v6 = vsel %vm2143_vm3, %v1231_v38, -inf }
 0x1f2   :  { %v2913_v32 = vmax.f32 %v2911_v16, %v2912_v22  ;;  %v10486_v58 = vsel %vm3936_vm4, %v2906_v5, -inf  ;;  %v1240_v2 = vcombine.high %v1238_v30, %v1238_v30  ;;  %v2845_v63 = vrot.slane %v2844_v6, 4 }
 0x1f3   :  { %v2920_v17 = vmax.f32 %v2918_v19, %v2919_v35  ;;  %v2926_v25 = vrot.slane %v2925_v27, 1  ;;  %v2851_v33 = vsel %vm2143_vm3, %v1239_v13, -inf  ;;  %v2858_v49 = vsel %vm2143_vm3, %v1238_v30, -inf  ;;  %v528_v19 = vpop.f32.mrf.mxu0 }
 0x1f4   :  { %v10491_v34 = vsel %vm3936_vm4, %v2913_v32, -inf  ;;  %v2846_v24 = vmax.f32 %v2844_v6, %v2845_v63  ;;  %v2852_v48 = vrot.slane %v2851_v33, 4  ;;  %v2859_v42 = vrot.slane %v2858_v49, 4 }
 0x1f5   :  { %v2927_v40 = vmax.f32 %v2925_v27, %v2926_v25  ;;  %v10494_v44 = vsel %vm3936_vm4, %v2920_v17, -inf  ;;  %v2865_v9 = vsel %vm2143_vm3, %v1240_v2, -inf  ;;  %v537_v37 = vadd.f32 %v10411_v57, %v9130_v15 }
 0x1f6   :  { %v2847_v45 = vrot.slane %v2846_v24, 2  ;;  %v2853_v18 = vmax.f32 %v2851_v33, %v2852_v48  ;;  %v2860_v50 = vmax.f32 %v2858_v49, %v2859_v42  ;;  %v2866_v20 = vrot.slane %v2865_v9, 4  ;;  %v4660_v33 = vld [vmem:[#allocation2 + $0x18] sm:$0x3]  ;;  %v9131_v49 = vpop.f32.mrf.mxu0 }
 0x1f7   :  { %v10502_v36 = vsel %vm3936_vm4, %v2927_v40, -inf  ;;  %v701_v53 = vmax.f32 %v537_v37, 0.0  ;;  %v4730_v51 = vrot.slane %v4657_v28, 1  ;;  %v4731_v26 = vrot.slane %v4658_v21, 1 }
 0x1f8   :  { %v2848_v54 = vmax.f32 %v2846_v24, %v2847_v45  ;;  %v2854_v7 = vrot.slane %v2853_v18, 2  ;;  %v2861_v55 = vrot.slane %v2860_v50, 2  ;;  %v2867_v56 = vmax.f32 %v2865_v9, %v2866_v20 }
 0x1f9   :  { %v1309_v59 = vcombine.high %v701_v53, %v701_v53  ;;  %v1316_v60 = vrot.slane %v701_v53, %v9957_v47  ;;  %v4733_v62 = vrot.slane %v10457_v8, 1  ;;  %v4732_v41 = vsel %vm4729_vm12, %v4730_v51, %v4731_v26  ;;  %v531_v53 = vpop.f32.mrf.mxu0 }
 0x1fa   :  { %v2849_v3 = vrot.slane %v2848_v54, 1  ;;  %v2855_v1 = vmax.f32 %v2853_v18, %v2854_v7  ;;  %v2862_v29 = vmax.f32 %v2860_v50, %v2861_v55  ;;  %v2868_v39 = vrot.slane %v2867_v56, 2  ;;  %v10529_v55 = vld [vmem:[#allocation2 + $0x28] sm:$0x3] }
 0x1fb   :  { %v1323_v10 = vrot.slane %v1309_v59, %v9957_v47  ;;  %v1324_v12 = vcombine.high %v1316_v60, %v1316_v60  ;;  %v2984_v61 = vsel %vm2143_vm3, %v1316_v60, -inf  ;;  %v4734_v20 = vrot.slane %v4660_v33, 1 }
 0x1fc   :  { %v2850_v31 = vmax.f32 %v2848_v54, %v2849_v3  ;;  %v2856_v52 = vrot.slane %v2855_v1, 1  ;;  %v2863_v16 = vrot.slane %v2862_v29, 1  ;;  %v2869_v0 = vmax.f32 %v2867_v56, %v2868_v39 }
 0x1fd   :  { %v1325_v4 = vcombine.high %v1323_v10, %v1323_v10  ;;  %v2985_v38 = vrot.slane %v2984_v61, 4  ;;  %v2991_v8 = vsel %vm2143_vm3, %v1324_v12, -inf  ;;  %v2998_v5 = vsel %vm2143_vm3, %v1323_v10, -inf }
 0x1fe   :  { %v2857_v22 = vmax.f32 %v2855_v1, %v2856_v52  ;;  %v2864_v30 = vmax.f32 %v2862_v29, %v2863_v16  ;;  %v2870_v35 = vrot.slane %v2869_v0, 1  ;;  %v4093_v27 = vsel %vm3936_vm4, %v2850_v31, -inf }
 0x1ff   :  { %v4095_v13 = vmax.f32 %v4093_v27, %v10486_v58  ;;  %v2986_v6 = vmax.f32 %v2984_v61, %v2985_v38  ;;  %v2992_v32 = vrot.slane %v2991_v8, 4  ;;  %v2999_v2 = vrot.slane %v2998_v5, 4 }
 0x200   :  { %v2871_v63 = vmax.f32 %v2869_v0, %v2870_v35  ;;  %v4096_v15 = vsel %vm3936_vm4, %v2857_v22, -inf  ;;  %v4099_v17 = vsel %vm3936_vm4, %v2864_v30, -inf  ;;  %v3005_v25 = vsel %vm2143_vm3, %v1325_v4, -inf }
 0x201   :  { %v4098_v24 = vmax.f32 %v4096_v15, %v10491_v34  ;;  %v4101_v48 = vmax.f32 %v4099_v17, %v10494_v44  ;;  %v4501_v42 = vsel %vm4455_vm8, %v4095_v13, %v10482_v23  ;;  %v2987_v58 = vrot.slane %v2986_v6, 2 }
 0x202   :  { %v4102_v28 = vsel %vm3936_vm4, %v2871_v63, -inf  ;;  %v2993_v40 = vmax.f32 %v2991_v8, %v2992_v32  ;;  %v3000_v9 = vmax.f32 %v2998_v5, %v2999_v2  ;;  %v3006_v37 = vrot.slane %v3005_v25, 4 }
 0x203   :  { %v4104_v45 = vmax.f32 %v4102_v28, %v10502_v36  ;;  %v4502_v18 = vsel %vm4457_vm9, %v4098_v24, %v4501_v42  ;;  %v2988_v50 = vmax.f32 %v2986_v6, %v2987_v58  ;;  %v10526_v54 = vsel %vm4729_vm12, %v4733_v62, %v4734_v20 }
 0x204   :  { %v4503_v21 = vsel %vm4459_vm10, %v4101_v48, %v4502_v18  ;;  %v2994_v34 = vrot.slane %v2993_v40, 2  ;;  %v3001_v46 = vrot.slane %v3000_v9, 2  ;;  %v3007_v44 = vmax.f32 %v3005_v25, %v3006_v37 }
 0x205   :  { %v4504_v23 = vsel %vm4461_vm11, %v4104_v45, %v4503_v21  ;;  %v2989_v51 = vrot.slane %v2988_v50, 1  ;;  %v529_v7 = vadd.f32 %v10411_v57, %v528_v19  ;;  %v9204_v60 = vpack.i.bf16 %v10526_v54, %v4732_v41 }
 0x206   :  { %4590 = vst.msk [vmem:[#allocation4 + $0x30] sm:$0xff] %vm3936_vm4, %v4504_v23  ;;  %4647 = vst.msk [vmem:[#allocation2 + $0x71] sm:$0xff] %vm3936_vm4, %v4504_v23  ;;  %v2995_v36 = vmax.f32 %v2993_v40, %v2994_v34  ;;  %v3002_v56 = vmax.f32 %v3000_v9, %v3001_v46  ;;  %v3008_v59 = vrot.slane %v3007_v44, 2  ;;  %v540_v1 = vadd.f32 %v10411_v57, %v9131_v49 }
 0x207   :  { %v2990_v26 = vmax.f32 %v2988_v50, %v2989_v51  ;;  %v699_v3 = vmax.f32 %v529_v7, 0.0  ;;  %v532_v62 = vadd.f32 %v10411_v57, %v531_v53  ;;  %9205 = vrot.lane.b32.xlu0 %v9204_v60, %s9715_s21  ;;  %v4833_v12 = vrot.slane %v10529_v55, 2 }
 0x208   :  { %v2996_v29 = vrot.slane %v2995_v36, 1  ;;  %v3003_v39 = vrot.slane %v3002_v56, 1  ;;  %v3009_v10 = vmax.f32 %v3007_v44, %v3008_v59  ;;  %v702_v41 = vmax.f32 %v540_v1, 0.0 }
 0x209   :  { %v10539_v61 = vsel %vm3936_vm4, %v2990_v26, -inf  ;;  %v1275_v31 = vcombine.high %v699_v3, %v699_v3  ;;  %v1282_v52 = vrot.slane %v699_v3, %v9957_v47  ;;  %v10542_v4 = vmax.f32 %v532_v62, 0.0 }
 0x20a   :  { %v2997_v16 = vmax.f32 %v2995_v36, %v2996_v29  ;;  %v3004_v0 = vmax.f32 %v3002_v56, %v3003_v39  ;;  %v3010_v19 = vrot.slane %v3009_v10, 1  ;;  %v1326_v22 = vcombine.high %v702_v41, %v702_v41 }
 0x20b   :  { %v1289_v38 = vrot.slane %v1275_v31, %v9957_v47  ;;  %v1290_v8 = vcombine.high %v1282_v52, %v1282_v52  ;;  %v2928_v5 = vsel %vm2143_vm3, %v1282_v52, -inf  ;;  %v1333_v63 = vrot.slane %v702_v41, %v9957_v47 }
 0x20c   :  { %v3011_v30 = vmax.f32 %v3009_v10, %v3010_v19  ;;  %v10547_v35 = vsel %vm3936_vm4, %v2997_v16, -inf  ;;  %v10550_v27 = vsel %vm3936_vm4, %v3004_v0, -inf  ;;  %v2929_v13 = vrot.slane %v2928_v5, 4 }
 0x20d   :  { %v1291_v6 = vcombine.high %v1289_v38, %v1289_v38  ;;  %v2935_v32 = vsel %vm2143_vm3, %v1290_v8, -inf  ;;  %v2942_v2 = vsel %vm2143_vm3, %v1289_v38, -inf  ;;  %v1340_v24 = vrot.slane %v1326_v22, %v9957_v47 }
 0x20e   :  { %v10556_v15 = vsel %vm3936_vm4, %v3011_v30, -inf  ;;  %v2930_v17 = vmax.f32 %v2928_v5, %v2929_v13  ;;  %v2936_v25 = vrot.slane %v2935_v32, 4  ;;  %v2943_v33 = vrot.slane %v2942_v2, 4 }
 0x20f   :  { %v2949_v49 = vsel %vm2143_vm3, %v1291_v6, -inf  ;;  %v1341_v48 = vcombine.high %v1333_v63, %v1333_v63  ;;  %v3012_v42 = vsel %vm2143_vm3, %v1333_v63, -inf  ;;  %v1342_v37 = vcombine.high %v1340_v24, %v1340_v24 }
 0x210   :  { %v2931_v58 = vrot.slane %v2930_v17, 2  ;;  %v2937_v28 = vmax.f32 %v2935_v32, %v2936_v25  ;;  %v2944_v40 = vmax.f32 %v2942_v2, %v2943_v33  ;;  %v2950_v9 = vrot.slane %v2949_v49, 4 }
 0x211   :  { %v3013_v45 = vrot.slane %v3012_v42, 4  ;;  %v3019_v18 = vsel %vm2143_vm3, %v1341_v48, -inf  ;;  %v3026_v50 = vsel %vm2143_vm3, %v1340_v24, -inf  ;;  %v3033_v51 = vsel %vm2143_vm3, %v1342_v37, -inf  ;;  %v9134_v24 = vpop.f32.mrf.mxu0 }
 0x212   :  { %v2932_v20 = vmax.f32 %v2930_v17, %v2931_v58  ;;  %v2938_v21 = vrot.slane %v2937_v28, 2  ;;  %v2945_v34 = vrot.slane %v2944_v40, 2  ;;  %v2951_v46 = vmax.f32 %v2949_v49, %v2950_v9 }
 0x213   :  { %v3014_v44 = vmax.f32 %v3012_v42, %v3013_v45  ;;  %v3020_v53 = vrot.slane %v3019_v18, 4  ;;  %v3027_v23 = vrot.slane %v3026_v50, 4  ;;  %v3034_v1 = vrot.slane %v3033_v51, 4 }
 0x214   :  { %v2933_v7 = vrot.slane %v2932_v20, 1  ;;  %v2939_v36 = vmax.f32 %v2937_v28, %v2938_v21  ;;  %v2946_v56 = vmax.f32 %v2944_v40, %v2945_v34  ;;  %v2952_v59 = vrot.slane %v2951_v46, 2  ;;  %v10590_v34 = vld [vmem:[#allocation2 + $0x38] sm:$0x3] }
 0x215   :  { %v3015_v60 = vrot.slane %v3014_v44, 2  ;;  %v3021_v26 = vmax.f32 %v3019_v18, %v3020_v53  ;;  %v3028_v3 = vmax.f32 %v3026_v50, %v3027_v23  ;;  %v3035_v16 = vmax.f32 %v3033_v51, %v3034_v1  ;;  %v10581_v50 = vld [vmem:[#allocation2 + $0x30] sm:$0xff] }
 0x216   :  { %v2934_v62 = vmax.f32 %v2932_v20, %v2933_v7  ;;  %v2940_v29 = vrot.slane %v2939_v36, 1  ;;  %v2947_v39 = vrot.slane %v2946_v56, 1  ;;  %v2953_v10 = vmax.f32 %v2951_v46, %v2952_v59 }
 0x217   :  { %v3016_v31 = vmax.f32 %v3014_v44, %v3015_v60  ;;  %v3022_v52 = vrot.slane %v3021_v26, 2  ;;  %v3029_v41 = vrot.slane %v3028_v3, 2  ;;  %v3036_v63 = vrot.slane %v3035_v16, 2 }
 0x218   :  { %v2941_v0 = vmax.f32 %v2939_v36, %v2940_v29  ;;  %v2948_v19 = vmax.f32 %v2946_v56, %v2947_v39  ;;  %v2954_v38 = vrot.slane %v2953_v10, 1  ;;  %v4105_v8 = vsel %vm3936_vm4, %v2934_v62, -inf }
 0x219   :  { %v4107_v5 = vmax.f32 %v4105_v8, %v10539_v61  ;;  %v3017_v22 = vrot.slane %v3016_v31, 1  ;;  %v3023_v30 = vmax.f32 %v3021_v26, %v3022_v52  ;;  %v3030_v13 = vmax.f32 %v3028_v3, %v3029_v41 }
 0x21a   :  { %v2955_v6 = vmax.f32 %v2953_v10, %v2954_v38  ;;  %v4108_v32 = vsel %vm3936_vm4, %v2941_v0, -inf  ;;  %v4111_v2 = vsel %vm3936_vm4, %v2948_v19, -inf  ;;  %v3037_v61 = vmax.f32 %v3035_v16, %v3036_v63 }
 0x21b   :  { %v4110_v17 = vmax.f32 %v4108_v32, %v10547_v35  ;;  %v4113_v25 = vmax.f32 %v4111_v2, %v10550_v27  ;;  %v3018_v33 = vmax.f32 %v3016_v31, %v3017_v22  ;;  %v3024_v49 = vrot.slane %v3023_v30, 1 }
 0x21c   :  { %v4114_v48 = vsel %vm3936_vm4, %v2955_v6, -inf  ;;  %v3031_v42 = vrot.slane %v3030_v13, 1  ;;  %v1292_v58 = vcombine.high %v10542_v4, %v10542_v4  ;;  %v3038_v45 = vrot.slane %v3037_v61, 1 }
 0x21d   :  { %v4116_v28 = vmax.f32 %v4114_v48, %v10556_v15  ;;  %v4505_v40 = vsel %vm4449_vm5, %v4110_v17, %v4107_v5  ;;  %v3025_v9 = vmax.f32 %v3023_v30, %v3024_v49  ;;  %v10576_v37 = vsel %vm3936_vm4, %v3018_v33, -inf }
 0x21e   :  { %v4506_v35 = vsel %vm4451_vm6, %v4113_v25, %v4505_v40  ;;  %v3032_v27 = vmax.f32 %v3030_v13, %v3031_v42  ;;  %v1299_v18 = vrot.slane %v10542_v4, %v9957_v47  ;;  %v1306_v15 = vrot.slane %v1292_v58, %v9957_v47  ;;  %v544_v4 = vpop.f32.mrf.mxu0 }
 0x21f   :  { %v10584_v20 = vsel %vm3936_vm4, %v3025_v9, -inf  ;;  %v10588_v21 = vsel %vm4453_vm7, %v4116_v28, %v4506_v35  ;;  %v10597_v46 = vsel %vm376_vm1, %v4832_v14, %v4833_v12  ;;  %v3039_v44 = vmax.f32 %v3037_v61, %v3038_v45 }
 0x220   :  { %v10600_v53 = vsel %vm3936_vm4, %v3032_v27, -inf  ;;  %v1307_v23 = vcombine.high %v1299_v18, %v1299_v18  ;;  %v2956_v51 = vsel %vm2143_vm3, %v1299_v18, -inf  ;;  %v1308_v7 = vcombine.high %v1306_v15, %v1306_v15  ;;  %v9135_v39 = vpop.f32.mrf.mxu0 }
 0x221   :  { %v2957_v36 = vrot.slane %v2956_v51, 4  ;;  %v2970_v56 = vsel %vm2143_vm3, %v1306_v15, -inf  ;;  %v4835_v59 = vrot.slane %v10581_v50, 2  ;;  %v10606_v60 = vsel %vm3936_vm4, %v3039_v44, -inf }
 0x222   :  { %v2963_v14 = vsel %vm2143_vm3, %v1307_v23, -inf  ;;  %v2971_v12 = vrot.slane %v2970_v56, 4  ;;  %v4836_v26 = vrot.slane %v10590_v34, 2  ;;  %v2977_v62 = vsel %vm2143_vm3, %v1308_v7, -inf }
 0x223   :  { %v2958_v3 = vmax.f32 %v2956_v51, %v2957_v36  ;;  %v2964_v1 = vrot.slane %v2963_v14, 4  ;;  %v553_v29 = vadd.f32 %v10411_v57, %v9134_v24  ;;  %v2978_v31 = vrot.slane %v2977_v62, 4 }
 0x224   :  { %v2972_v10 = vmax.f32 %v2970_v56, %v2971_v12  ;;  %v10613_v52 = vsel %vm376_vm1, %v4835_v59, %v4836_v26  ;;  %v545_v41 = vadd.f32 %v10411_v57, %v544_v4  ;;  %v10619_v30 = vadd.f32 %v10411_v57, %v9135_v39 }
 0x225   :  { %v2959_v16 = vrot.slane %v2958_v3, 2  ;;  %v2965_v0 = vmax.f32 %v2963_v14, %v2964_v1  ;;  %v5106_v19 = vpack.c.bf16 %v10613_v52, %v10597_v46  ;;  %v705_v38 = vmax.f32 %v553_v29, 0.0 }
 0x226   :  { %v2973_v8 = vrot.slane %v2972_v10, 2  ;;  %v2979_v5 = vmax.f32 %v2977_v62, %v2978_v31  ;;  %v703_v22 = vmax.f32 %v545_v41, 0.0 }
 0x227   :  { %v2960_v13 = vmax.f32 %v2958_v3, %v2959_v16  ;;  %v2966_v6 = vrot.slane %v2965_v0, 2  ;;  %9172 = vmatprep.mubr.msk.bf16.mxu0 %vm3936_vm4, %v5106_v19  ;;  %v1377_v32 = vcombine.high %v705_v38, %v705_v38  ;;  %v1384_v2 = vrot.slane %v705_v38, %v9957_v47 }
 0x228   :  { %v2974_v63 = vmax.f32 %v2972_v10, %v2973_v8  ;;  %v2980_v17 = vrot.slane %v2979_v5, 2  ;;  %v1343_v25 = vcombine.high %v703_v22, %v703_v22  ;;  %v1350_v33 = vrot.slane %v703_v22, %v9957_v47 }
 0x229   :  { %v2961_v49 = vrot.slane %v2960_v13, 1  ;;  %v2967_v24 = vmax.f32 %v2965_v0, %v2966_v6  ;;  %v1391_v48 = vrot.slane %v1377_v32, %v9957_v47  ;;  %v1392_v42 = vcombine.high %v1384_v2, %v1384_v2 }
 0x22a   :  { %v2975_v61 = vrot.slane %v2974_v63, 1  ;;  %v2981_v57 = vmax.f32 %v2979_v5, %v2980_v17  ;;  %v3096_v58 = vsel %vm2143_vm3, %v1384_v2, -inf  ;;  %v1357_v28 = vrot.slane %v1343_v25, %v9957_v47 }
 0x22b   :  { %v2962_v40 = vmax.f32 %v2960_v13, %v2961_v49  ;;  %v2968_v9 = vrot.slane %v2967_v24, 1  ;;  %v1393_v35 = vcombine.high %v1391_v48, %v1391_v48  ;;  %v3097_v27 = vrot.slane %v3096_v58, 4 }
 0x22c   :  { %v2976_v45 = vmax.f32 %v2974_v63, %v2975_v61  ;;  %v2982_v18 = vrot.slane %v2981_v57, 1  ;;  %v3103_v15 = vsel %vm2143_vm3, %v1392_v42, -inf  ;;  %v3110_v4 = vsel %vm2143_vm3, %v1391_v48, -inf }
 0x22d   :  { %v2969_v44 = vmax.f32 %v2967_v24, %v2968_v9  ;;  %v4117_v23 = vsel %vm3936_vm4, %v2962_v40, -inf  ;;  %v3098_v51 = vmax.f32 %v3096_v58, %v3097_v27  ;;  %v3104_v7 = vrot.slane %v3103_v15, 4  ;;  %v10650_v27 = vld [vmem:[#allocation2 + $0x40] sm:$0xff] }
 0x22e   :  { %v2983_v36 = vmax.f32 %v2981_v57, %v2982_v18  ;;  %v4119_v56 = vmax.f32 %v4117_v23, %v10576_v37  ;;  %v4123_v59 = vsel %vm3936_vm4, %v2976_v45, -inf  ;;  %v3111_v14 = vrot.slane %v3110_v4, 4 }
 0x22f   :  { %v4120_v12 = vsel %vm3936_vm4, %v2969_v44, -inf  ;;  %v4125_v26 = vmax.f32 %v4123_v59, %v10600_v53  ;;  %v3099_v3 = vrot.slane %v3098_v51, 2  ;;  %v3105_v1 = vmax.f32 %v3103_v15, %v3104_v7  ;;  %v10655_v7 = vld [vmem:[#allocation2 + $0x48] sm:$0x3] }
 0x230   :  { %v4122_v62 = vmax.f32 %v4120_v12, %v10584_v20  ;;  %v4126_v29 = vsel %vm3936_vm4, %v2983_v36, -inf  ;;  %v4508_v39 = vsel %vm4455_vm8, %v4119_v56, %v10588_v21  ;;  %v3112_v10 = vmax.f32 %v3110_v4, %v3111_v14 }
 0x231   :  { %v4128_v31 = vmax.f32 %v4126_v29, %v10606_v60  ;;  %v3100_v37 = vmax.f32 %v3098_v51, %v3099_v3  ;;  %v3106_v41 = vrot.slane %v3105_v1, 2  ;;  %v3117_v16 = vsel %vm2143_vm3, %v1393_v35, -inf }
 0x232   :  { %v4509_v0 = vsel %vm4457_vm9, %v4122_v62, %v4508_v39  ;;  %v3113_v19 = vrot.slane %v3112_v10, 2  ;;  %v3118_v53 = vrot.slane %v3117_v16, 4  ;;  %v1358_v38 = vcombine.high %v1350_v33, %v1350_v33 }
 0x233   :  { %v4510_v8 = vsel %vm4459_vm10, %v4125_v26, %v4509_v0  ;;  %v3101_v20 = vrot.slane %v3100_v37, 1  ;;  %v3107_v5 = vmax.f32 %v3105_v1, %v3106_v41  ;;  %v1359_v22 = vcombine.high %v1357_v28, %v1357_v28 }
 0x234   :  { %v4511_v13 = vsel %vm4461_vm11, %v4128_v31, %v4510_v8  ;;  %v3114_v21 = vmax.f32 %v3112_v10, %v3113_v19  ;;  %v3119_v6 = vmax.f32 %v3117_v16, %v3118_v53  ;;  %v3040_v60 = vsel %vm2143_vm3, %v1350_v33, -inf }
 0x235   :  { %4591 = vst.msk [vmem:[#allocation4 + $0x38] sm:$0xff] %vm3936_vm4, %v4511_v13  ;;  %4648 = vst.msk [vmem:[#allocation2 + $0x81] sm:$0xff] %vm3936_vm4, %v4511_v13  ;;  %v3102_v32 = vmax.f32 %v3100_v37, %v3101_v20  ;;  %v3108_v2 = vrot.slane %v3107_v5, 1  ;;  %v3041_v63 = vrot.slane %v3040_v60, 4  ;;  %v3047_v17 = vsel %vm2143_vm3, %v1358_v38, -inf }
 0x236   :  { %v3115_v25 = vrot.slane %v3114_v21, 1  ;;  %v3120_v49 = vrot.slane %v3119_v6, 2  ;;  %v3048_v24 = vrot.slane %v3047_v17, 4  ;;  %v3054_v48 = vsel %vm2143_vm3, %v1357_v28, -inf }
 0x237   :  { %v3109_v42 = vmax.f32 %v3107_v5, %v3108_v2  ;;  %v4130_v61 = vsel %vm3936_vm4, %v3102_v32, -inf  ;;  %v3042_v57 = vmax.f32 %v3040_v60, %v3041_v63  ;;  %v3055_v58 = vrot.slane %v3054_v48, 4 }
 0x238   :  { %v3116_v33 = vmax.f32 %v3114_v21, %v3115_v25  ;;  %v3121_v40 = vmax.f32 %v3119_v6, %v3120_v49  ;;  %v3049_v9 = vmax.f32 %v3047_v17, %v3048_v24  ;;  %v3061_v35 = vsel %vm2143_vm3, %v1359_v22, -inf }
 0x239   :  { %v4133_v45 = vsel %vm3936_vm4, %v3109_v42, -inf  ;;  %v3043_v18 = vrot.slane %v3042_v57, 2  ;;  %v3056_v15 = vmax.f32 %v3054_v48, %v3055_v58  ;;  %v3062_v4 = vrot.slane %v3061_v35, 4  ;;  %v547_v48 = vpop.f32.mrf.mxu0 }
 0x23a   :  { %v3122_v44 = vrot.slane %v3121_v40, 1  ;;  %v4136_v28 = vsel %vm3936_vm4, %v3116_v33, -inf  ;;  %v3050_v23 = vrot.slane %v3049_v9, 2  ;;  %v706_v51 = vmax.f32 %v10619_v30, 0.0 }
 0x23b   :  { %v3044_v36 = vmax.f32 %v3042_v57, %v3043_v18  ;;  %v3057_v56 = vrot.slane %v3056_v15, 2  ;;  %v3063_v59 = vmax.f32 %v3061_v35, %v3062_v4  ;;  %v4838_v14 = vrot.slane %v10650_v27, 2 }
 0x23c   :  { %v3123_v12 = vmax.f32 %v3121_v40, %v3122_v44  ;;  %v3051_v26 = vmax.f32 %v3049_v9, %v3050_v23  ;;  %v1394_v3 = vcombine.high %v706_v51, %v706_v51  ;;  %v1401_v1 = vrot.slane %v706_v51, %v9957_v47  ;;  %v10669_v40 = vld [vmem:[#allocation2 + $0x50] sm:$0xff] }
 0x23d   :  { %v3045_v62 = vrot.slane %v3044_v36, 1  ;;  %v3058_v29 = vmax.f32 %v3056_v15, %v3057_v56  ;;  %v3064_v39 = vrot.slane %v3063_v59, 2  ;;  %v4839_v10 = vrot.slane %v10655_v7, 2  ;;  %v10673_v15 = vld [vmem:[#allocation2 + $0x58] sm:$0x3] }
 0x23e   :  { %v4139_v31 = vsel %vm3936_vm4, %v3123_v12, -inf  ;;  %v3052_v30 = vrot.slane %v3051_v26, 1  ;;  %v1408_v37 = vrot.slane %v1394_v3, %v9957_v47  ;;  %v1409_v41 = vcombine.high %v1401_v1, %v1401_v1 }
 0x23f   :  { %v3046_v16 = vmax.f32 %v3044_v36, %v3045_v62  ;;  %v3059_v0 = vrot.slane %v3058_v29, 1  ;;  %v3065_v19 = vmax.f32 %v3063_v59, %v3064_v39  ;;  %v3124_v53 = vsel %vm2143_vm3, %v1401_v1, -inf  ;;  %v9138_v59 = vpop.f32.mrf.mxu0  ;;  %v10686_v39 = vld [vmem:[%s12883_s2] ss:$0 sm:$0xff] }
 0x240   :  { %v3053_v38 = vmax.f32 %v3051_v26, %v3052_v30  ;;  %v1410_v8 = vcombine.high %v1408_v37, %v1408_v37  ;;  %v3125_v20 = vrot.slane %v3124_v53, 4  ;;  %v3131_v5 = vsel %vm2143_vm3, %v1409_v41, -inf }
 0x241   :  { %v3060_v22 = vmax.f32 %v3058_v29, %v3059_v0  ;;  %v3066_v13 = vrot.slane %v3065_v19, 1  ;;  %v4129_v21 = vsel %vm3936_vm4, %v3046_v16, -inf  ;;  %v3132_v6 = vrot.slane %v3131_v5, 4 }
 0x242   :  { %v4131_v60 = vmax.f32 %v4129_v21, %v4130_v61  ;;  %v4132_v32 = vsel %vm3936_vm4, %v3053_v38, -inf  ;;  %v3126_v2 = vmax.f32 %v3124_v53, %v3125_v20  ;;  %v3138_v63 = vsel %vm2143_vm3, %v1408_v37, -inf }
 0x243   :  { %v3067_v17 = vmax.f32 %v3065_v19, %v3066_v13  ;;  %v4134_v25 = vmax.f32 %v4132_v32, %v4133_v45  ;;  %v4135_v49 = vsel %vm3936_vm4, %v3060_v22, -inf  ;;  %v3133_v24 = vmax.f32 %v3131_v5, %v3132_v6 }
 0x244   :  { %v4137_v42 = vmax.f32 %v4135_v49, %v4136_v28  ;;  %v3127_v57 = vrot.slane %v3126_v2, 2  ;;  %v3139_v58 = vrot.slane %v3138_v63, 4  ;;  %v3145_v33 = vsel %vm2143_vm3, %v1410_v8, -inf }
 0x245   :  { %v4138_v61 = vsel %vm3936_vm4, %v3067_v17, -inf  ;;  %v4512_v9 = vsel %vm4449_vm5, %v4134_v25, %v4131_v60  ;;  %v3134_v35 = vrot.slane %v3133_v24, 2  ;;  %v3146_v18 = vrot.slane %v3145_v33, 4 }
 0x246   :  { %v4140_v45 = vmax.f32 %v4138_v61, %v4139_v31  ;;  %v4513_v4 = vsel %vm4451_vm6, %v4137_v42, %v4512_v9  ;;  %v3128_v44 = vmax.f32 %v3126_v2, %v3127_v57  ;;  %v3140_v23 = vmax.f32 %v3138_v63, %v3139_v58 }
 0x247   :  { %v3135_v28 = vmax.f32 %v3133_v24, %v3134_v35  ;;  %v3147_v51 = vmax.f32 %v3145_v33, %v3146_v18  ;;  %v10677_v36 = vsel %vm376_vm1, %v4838_v14, %v4839_v10  ;;  %v4841_v56 = vrot.slane %v10669_v40, 2 }
 0x248   :  { %v3129_v12 = vrot.slane %v3128_v44, 1  ;;  %v3141_v26 = vrot.slane %v3140_v23, 2  ;;  %v4842_v3 = vrot.slane %v10673_v15, 2  ;;  %v9209_v1 = vpack.i.bf16 %v10650_v27, %v10581_v50 }
 0x249   :  { %v3136_v62 = vrot.slane %v3135_v28, 1  ;;  %v3148_v29 = vrot.slane %v3147_v51, 2  ;;  %v548_v14 = vadd.f32 %v10686_v39, %v547_v48  ;;  %v10690_v10 = vsel %vm4453_vm7, %v4140_v45, %v4513_v4 }
 0x24a   :  { %v3130_v31 = vmax.f32 %v3128_v44, %v3129_v12  ;;  %v3142_v30 = vmax.f32 %v3140_v23, %v3141_v26  ;;  %v10693_v37 = vsel %vm376_vm1, %v4841_v56, %v4842_v3  ;;  %9210 = vrot.lane.b32.xlu1 %v9209_v1, %s9715_s21  ;;  %v569_v41 = vadd.f32 %v10686_v39, %v9138_v59 }
 0x24b   :  { %v3137_v16 = vmax.f32 %v3135_v28, %v3136_v62  ;;  %v3149_v0 = vmax.f32 %v3147_v51, %v3148_v29  ;;  %v5110_v19 = vpack.c.bf16 %v10693_v37, %v10677_v36  ;;  %v704_v53 = vmax.f32 %v548_v14, 0.0 }
 0x24c   :  { %v3143_v38 = vrot.slane %v3142_v30, 1  ;;  %v10700_v8 = vsel %vm3936_vm4, %v3130_v31, -inf  ;;  %v709_v20 = vmax.f32 %v569_v41, 0.0  ;;  %v4736_v5 = vrot.slane %v10441_v11, 1 }
 0x24d   :  { %v3150_v22 = vrot.slane %v3149_v0, 1  ;;  %v10704_v13 = vsel %vm3936_vm4, %v3137_v16, -inf  ;;  %v1360_v21 = vcombine.high %v704_v53, %v704_v53  ;;  %v1367_v6 = vrot.slane %v704_v53, %v9957_v47  ;;  %9173 = vmatmul.mubr.msk.bf16.vlgmr.msra.gmra.mxu0 %vm3936_vm4, %v5110_v19 }
 0x24e   :  { %v3144_v60 = vmax.f32 %v3142_v30, %v3143_v38  ;;  %v1445_v32 = vcombine.high %v709_v20, %v709_v20  ;;  %v1452_v2 = vrot.slane %v709_v20, %v9957_v47  ;;  %v4737_v63 = vrot.slane %v10529_v55, 1 }
 0x24f   :  { %v3151_v17 = vmax.f32 %v3149_v0, %v3150_v22  ;;  %v1374_v25 = vrot.slane %v1360_v21, %v9957_v47  ;;  %v1375_v49 = vcombine.high %v1367_v6, %v1367_v6  ;;  %v3068_v24 = vsel %vm2143_vm3, %v1367_v6, -inf }
 0x250   :  { %v10713_v48 = vsel %vm3936_vm4, %v3144_v60, -inf  ;;  %v3069_v42 = vrot.slane %v3068_v24, 4  ;;  %v1459_v57 = vrot.slane %v1445_v32, %v9957_v47  ;;  %v1460_v58 = vcombine.high %v1452_v2, %v1452_v2  ;;  %v560_v60 = vpop.f32.mrf.mxu0 }
 0x251   :  { %v10717_v33 = vsel %vm3936_vm4, %v3151_v17, -inf  ;;  %v1376_v61 = vcombine.high %v1374_v25, %v1374_v25  ;;  %v3075_v9 = vsel %vm2143_vm3, %v1375_v49, -inf  ;;  %v3082_v35 = vsel %vm2143_vm3, %v1374_v25, -inf }
 0x252   :  { %v3070_v18 = vmax.f32 %v3068_v24, %v3069_v42  ;;  %v3076_v45 = vrot.slane %v3075_v9, 4  ;;  %v3083_v4 = vrot.slane %v3082_v35, 4  ;;  %v1461_v44 = vcombine.high %v1459_v57, %v1459_v57 }
 0x253   :  { %v3089_v23 = vsel %vm2143_vm3, %v1376_v61, -inf  ;;  %v3208_v28 = vsel %vm2143_vm3, %v1452_v2, -inf  ;;  %v3215_v51 = vsel %vm2143_vm3, %v1460_v58, -inf  ;;  %v3222_v56 = vsel %vm2143_vm3, %v1459_v57, -inf }
 0x254   :  { %v3071_v59 = vrot.slane %v3070_v18, 2  ;;  %v3077_v12 = vmax.f32 %v3075_v9, %v3076_v45  ;;  %v3084_v26 = vmax.f32 %v3082_v35, %v3083_v4  ;;  %v3090_v3 = vrot.slane %v3089_v23, 4 }
 0x255   :  { %v3209_v1 = vrot.slane %v3208_v28, 4  ;;  %v3216_v62 = vrot.slane %v3215_v51, 4  ;;  %v3223_v29 = vrot.slane %v3222_v56, 4  ;;  %v3229_v14 = vsel %vm2143_vm3, %v1461_v44, -inf }
 0x256   :  { %v3072_v31 = vmax.f32 %v3070_v18, %v3071_v59  ;;  %v3078_v30 = vrot.slane %v3077_v12, 2  ;;  %v3085_v41 = vrot.slane %v3084_v26, 2  ;;  %v3091_v16 = vmax.f32 %v3089_v23, %v3090_v3  ;;  %v9139_v23 = vpop.f32.mrf.mxu0 }
 0x257   :  { %v3210_v0 = vmax.f32 %v3208_v28, %v3209_v1  ;;  %v3217_v19 = vmax.f32 %v3215_v51, %v3216_v62  ;;  %v3224_v53 = vmax.f32 %v3222_v56, %v3223_v29  ;;  %v3230_v38 = vrot.slane %v3229_v14, 4 }
 0x258   :  { %v3073_v20 = vrot.slane %v3072_v31, 1  ;;  %v3079_v22 = vmax.f32 %v3077_v12, %v3078_v30  ;;  %v3086_v21 = vmax.f32 %v3084_v26, %v3085_v41  ;;  %v3092_v6 = vrot.slane %v3091_v16, 2 }
 0x259   :  { %v3211_v32 = vrot.slane %v3210_v0, 2  ;;  %v3218_v2 = vrot.slane %v3217_v19, 2  ;;  %v3225_v17 = vrot.slane %v3224_v53, 2  ;;  %v3231_v25 = vmax.f32 %v3229_v14, %v3230_v38 }
 0x25a   :  { %v3074_v49 = vmax.f32 %v3072_v31, %v3073_v20  ;;  %v3080_v24 = vrot.slane %v3079_v22, 1  ;;  %v3087_v42 = vrot.slane %v3086_v21, 1  ;;  %v3093_v57 = vmax.f32 %v3091_v16, %v3092_v6 }
 0x25b   :  { %v3212_v58 = vmax.f32 %v3210_v0, %v3211_v32  ;;  %v3219_v61 = vmax.f32 %v3217_v19, %v3218_v2  ;;  %v3226_v9 = vmax.f32 %v3224_v53, %v3225_v17  ;;  %v3232_v35 = vrot.slane %v3231_v25, 2  ;;  %v563_v0 = vpop.f32.mrf.mxu0 }
 0x25c   :  { %v3081_v18 = vmax.f32 %v3079_v22, %v3080_v24  ;;  %v3088_v45 = vmax.f32 %v3086_v21, %v3087_v42  ;;  %v3094_v4 = vrot.slane %v3093_v57, 1  ;;  %v4141_v44 = vsel %vm3936_vm4, %v3074_v49, -inf }
 0x25d   :  { %v4143_v28 = vmax.f32 %v4141_v44, %v10700_v8  ;;  %v3213_v51 = vrot.slane %v3212_v58, 1  ;;  %v3220_v56 = vrot.slane %v3219_v61, 1  ;;  %v3227_v59 = vrot.slane %v3226_v9, 1  ;;  %v9142_v2 = vpop.f32.mrf.mxu0 }
 0x25e   :  { %v3095_v12 = vmax.f32 %v3093_v57, %v3094_v4  ;;  %v4144_v26 = vsel %vm3936_vm4, %v3081_v18, -inf  ;;  %v4147_v3 = vsel %vm3936_vm4, %v3088_v45, -inf  ;;  %v3233_v1 = vmax.f32 %v3231_v25, %v3232_v35 }
 0x25f   :  { %v4146_v62 = vmax.f32 %v4144_v26, %v10704_v13  ;;  %v4149_v29 = vmax.f32 %v4147_v3, %v10713_v48  ;;  %v4515_v14 = vsel %vm4455_vm8, %v4143_v28, %v10690_v10  ;;  %v3214_v31 = vmax.f32 %v3212_v58, %v3213_v51 }
 0x260   :  { %v4150_v30 = vsel %vm3936_vm4, %v3095_v12, -inf  ;;  %v3221_v8 = vmax.f32 %v3219_v61, %v3220_v56  ;;  %v3228_v41 = vmax.f32 %v3226_v9, %v3227_v59  ;;  %v3234_v16 = vrot.slane %v3233_v1, 1 }
 0x261   :  { %v4152_v19 = vmax.f32 %v4150_v30, %v10717_v33  ;;  %v4516_v53 = vsel %vm4457_vm9, %v4146_v62, %v4515_v14  ;;  %v10738_v38 = vsel %vm3936_vm4, %v3214_v31, -inf  ;;  %v10745_v10 = vsel %vm4729_vm12, %v4736_v5, %v4737_v63 }
 0x262   :  { %v4517_v13 = vsel %vm4459_vm10, %v4149_v29, %v4516_v53  ;;  %v3235_v48 = vmax.f32 %v3233_v1, %v3234_v16  ;;  %v10749_v20 = vsel %vm3936_vm4, %v3221_v8, -inf  ;;  %v10752_v33 = vsel %vm3936_vm4, %v3228_v41, -inf }
 0x263   :  { %v4518_v22 = vsel %vm4461_vm11, %v4152_v19, %v4517_v13  ;;  %v4739_v21 = vrot.slane %v10581_v50, 1  ;;  %v4740_v55 = vrot.slane %v10590_v34, 1  ;;  %v561_v11 = vadd.f32 %v10686_v39, %v560_v60 }
 0x264   :  { %4592 = vst.msk [vmem:[#allocation4 + $0x40] sm:$0xff] %vm3936_vm4, %v4518_v22  ;;  %4649 = vst.msk [vmem:[#allocation2 + $0xb1] sm:$0xff] %vm3936_vm4, %v4518_v22  ;;  %v10761_v5 = vsel %vm3936_vm4, %v3235_v48, -inf  ;;  %v572_v63 = vadd.f32 %v10686_v39, %v9139_v23  ;;  %v564_v6 = vadd.f32 %v10686_v39, %v563_v0  ;;  %v4742_v32 = vrot.slane %v10650_v27, 1 }
 0x265   :  { %v10767_v50 = vsel %vm4729_vm12, %v4739_v21, %v4740_v55  ;;  %v707_v34 = vmax.f32 %v561_v11, 0.0  ;;  %v4743_v60 = vrot.slane %v10655_v7, 1  ;;  %v4745_v17 = vrot.slane %v10669_v40, 1 }
 0x266   :  { %v9214_v25 = vpack.i.bf16 %v10767_v50, %v10745_v10  ;;  %v710_v49 = vmax.f32 %v572_v63, 0.0  ;;  %v10773_v24 = vmax.f32 %v564_v6, 0.0  ;;  %v4746_v42 = vrot.slane %v10673_v15, 1 }
 0x267   :  { %v1411_v57 = vcombine.high %v707_v34, %v707_v34  ;;  %v1418_v27 = vrot.slane %v707_v34, %v9957_v47  ;;  %v10778_v58 = vsel %vm4729_vm12, %v4742_v32, %v4743_v60  ;;  %v10781_v61 = vadd.f32 %v10686_v39, %v9142_v2 }
 0x268   :  { %9215 = vrot.lane.b32.xlu1 %v9214_v25, %s9715_s21  ;;  %v1462_v7 = vcombine.high %v710_v49, %v710_v49  ;;  %v1469_v9 = vrot.slane %v710_v49, %v9957_v47  ;;  %v1428_v35 = vcombine.high %v10773_v24, %v10773_v24  ;;  %v10789_v15 = vrot.slane %v10773_v24, %v9957_v47 }
 0x269   :  { %v1425_v18 = vrot.slane %v1411_v57, %v9957_v47  ;;  %v1426_v45 = vcombine.high %v1418_v27, %v1418_v27  ;;  %v3152_v4 = vsel %vm2143_vm3, %v1418_v27, -inf  ;;  %v10794_v44 = vsel %vm4729_vm12, %v4745_v17, %v4746_v42 }
 0x26a   :  { %v3153_v23 = vrot.slane %v3152_v4, 4  ;;  %v1476_v28 = vrot.slane %v1462_v7, %v9957_v47  ;;  %v1477_v51 = vcombine.high %v1469_v9, %v1469_v9  ;;  %v3236_v56 = vsel %vm2143_vm3, %v1469_v9, -inf }
 0x26b   :  { %v1427_v59 = vcombine.high %v1425_v18, %v1425_v18  ;;  %v3159_v12 = vsel %vm2143_vm3, %v1426_v45, -inf  ;;  %v3166_v26 = vsel %vm2143_vm3, %v1425_v18, -inf  ;;  %v3237_v3 = vrot.slane %v3236_v56, 4 }
 0x26c   :  { %v3154_v1 = vmax.f32 %v3152_v4, %v3153_v23  ;;  %v3160_v62 = vrot.slane %v3159_v12, 4  ;;  %v3167_v29 = vrot.slane %v3166_v26, 4  ;;  %v1478_v14 = vcombine.high %v1476_v28, %v1476_v28 }
 0x26d   :  { %v3173_v31 = vsel %vm2143_vm3, %v1427_v59, -inf  ;;  %v3238_v30 = vmax.f32 %v3236_v56, %v3237_v3  ;;  %v3243_v8 = vsel %vm2143_vm3, %v1477_v51, -inf  ;;  %v3250_v41 = vsel %vm2143_vm3, %v1476_v28, -inf }
 0x26e   :  { %v3155_v16 = vrot.slane %v3154_v1, 2  ;;  %v3161_v0 = vmax.f32 %v3159_v12, %v3160_v62  ;;  %v3168_v19 = vmax.f32 %v3166_v26, %v3167_v29  ;;  %v3174_v53 = vrot.slane %v3173_v31, 4 }
 0x26f   :  { %v3239_v13 = vrot.slane %v3238_v30, 2  ;;  %v3244_v48 = vrot.slane %v3243_v8, 4  ;;  %v3251_v22 = vrot.slane %v3250_v41, 4  ;;  %v3257_v21 = vsel %vm2143_vm3, %v1478_v14, -inf }
 0x270   :  { %v3156_v55 = vmax.f32 %v3154_v1, %v3155_v16  ;;  %v3162_v11 = vrot.slane %v3161_v0, 2  ;;  %v3169_v63 = vrot.slane %v3168_v19, 2  ;;  %v3175_v6 = vmax.f32 %v3173_v31, %v3174_v53 }
 0x271   :  { %v3240_v32 = vmax.f32 %v3238_v30, %v3239_v13  ;;  %v3245_v2 = vmax.f32 %v3243_v8, %v3244_v48  ;;  %v3252_v34 = vmax.f32 %v3250_v41, %v3251_v22  ;;  %v3258_v60 = vrot.slane %v3257_v21, 4  ;;  %v576_v48 = vpop.f32.mrf.mxu0 }
 0x272   :  { %v3157_v17 = vrot.slane %v3156_v55, 1  ;;  %v3163_v25 = vmax.f32 %v3161_v0, %v3162_v11  ;;  %v3170_v49 = vmax.f32 %v3168_v19, %v3169_v63  ;;  %v3176_v42 = vrot.slane %v3175_v6, 2 }
 0x273   :  { %v3241_v57 = vrot.slane %v3240_v32, 1  ;;  %v3246_v27 = vrot.slane %v3245_v2, 2  ;;  %v3253_v7 = vrot.slane %v3252_v34, 2  ;;  %v3259_v9 = vmax.f32 %v3257_v21, %v3258_v60 }
 0x274   :  { %v3158_v18 = vmax.f32 %v3156_v55, %v3157_v17  ;;  %v3164_v45 = vrot.slane %v3163_v25, 1  ;;  %v3171_v4 = vrot.slane %v3170_v49, 1  ;;  %v3177_v23 = vmax.f32 %v3175_v6, %v3176_v42  ;;  %v9143_v17 = vpop.f32.mrf.mxu0 }
 0x275   :  { %v3242_v28 = vmax.f32 %v3240_v32, %v3241_v57  ;;  %v3247_v51 = vmax.f32 %v3245_v2, %v3246_v27  ;;  %v3254_v56 = vmax.f32 %v3252_v34, %v3253_v7  ;;  %v3260_v59 = vrot.slane %v3259_v9, 2 }
 0x276   :  { %v3165_v12 = vmax.f32 %v3163_v25, %v3164_v45  ;;  %v3172_v26 = vmax.f32 %v3170_v49, %v3171_v4  ;;  %v3178_v3 = vrot.slane %v3177_v23, 1  ;;  %v4153_v1 = vsel %vm3936_vm4, %v3158_v18, -inf }
 0x277   :  { %v4155_v62 = vmax.f32 %v4153_v1, %v10738_v38  ;;  %v3248_v29 = vrot.slane %v3247_v51, 1  ;;  %v3255_v14 = vrot.slane %v3254_v56, 1  ;;  %v3261_v31 = vmax.f32 %v3259_v9, %v3260_v59 }
 0x278   :  { %v3179_v30 = vmax.f32 %v3177_v23, %v3178_v3  ;;  %v4156_v8 = vsel %vm3936_vm4, %v3165_v12, -inf  ;;  %v4159_v41 = vsel %vm3936_vm4, %v3172_v26, -inf  ;;  %v10809_v16 = vsel %vm3936_vm4, %v3242_v28, -inf }
 0x279   :  { %v4158_v0 = vmax.f32 %v4156_v8, %v10749_v20  ;;  %v4161_v19 = vmax.f32 %v4159_v41, %v10752_v33  ;;  %v3249_v53 = vmax.f32 %v3247_v51, %v3248_v29  ;;  %v3256_v13 = vmax.f32 %v3254_v56, %v3255_v14 }
 0x27a   :  { %v4162_v38 = vsel %vm3936_vm4, %v3179_v30, -inf  ;;  %v3262_v22 = vrot.slane %v3261_v31, 1  ;;  %v1442_v21 = vrot.slane %v1428_v35, %v9957_v47  ;;  %v1443_v55 = vcombine.high %v10789_v15, %v10789_v15 }
 0x27b   :  { %v4164_v11 = vmax.f32 %v4162_v38, %v10761_v5  ;;  %v4519_v20 = vsel %vm4449_vm5, %v4158_v0, %v4155_v62  ;;  %v10823_v33 = vsel %vm3936_vm4, %v3249_v53, -inf  ;;  %v10826_v63 = vsel %vm3936_vm4, %v3256_v13, -inf }
 0x27c   :  { %v4520_v6 = vsel %vm4451_vm6, %v4161_v19, %v4519_v20  ;;  %v3263_v32 = vmax.f32 %v3261_v31, %v3262_v22  ;;  %v1444_v2 = vcombine.high %v1442_v21, %v1442_v21  ;;  %v3180_v24 = vsel %vm2143_vm3, %v10789_v15, -inf }
 0x27d   :  { %v3181_v35 = vrot.slane %v3180_v24, 4  ;;  %v3187_v34 = vsel %vm2143_vm3, %v1443_v55, -inf  ;;  %v3194_v5 = vsel %vm2143_vm3, %v1442_v21, -inf  ;;  %v4521_v60 = vsel %vm4453_vm7, %v4164_v11, %v4520_v6 }
 0x27e   :  { %v10835_v25 = vsel %vm3936_vm4, %v3263_v32, -inf  ;;  %v3188_v49 = vrot.slane %v3187_v34, 4  ;;  %v3195_v42 = vrot.slane %v3194_v5, 4  ;;  %v3201_v57 = vsel %vm2143_vm3, %v1444_v2, -inf }
 0x27f   :  { %v3182_v27 = vmax.f32 %v3180_v24, %v3181_v35  ;;  %v3202_v7 = vrot.slane %v3201_v57, 4  ;;  %v9224_v15 = vpack.i.bf16 %v10794_v44, %v10778_v58  ;;  %v713_v9 = vmax.f32 %v10781_v61, 0.0 }
 0x280   :  { %v3189_v18 = vmax.f32 %v3187_v34, %v3188_v49  ;;  %v3196_v45 = vmax.f32 %v3194_v5, %v3195_v42  ;;  %v577_v4 = vadd.f32 %v10686_v39, %v576_v48  ;;  %v588_v23 = vadd.f32 %v10686_v39, %v9143_v17 }
 0x281   :  { %v3183_v28 = vrot.slane %v3182_v27, 2  ;;  %v3203_v51 = vmax.f32 %v3201_v57, %v3202_v7  ;;  %9225 = vrot.lane.b32.xlu1 %v9224_v15, %s9715_s21  ;;  %v1513_v56 = vcombine.high %v713_v9, %v713_v9  ;;  %v1520_v59 = vrot.slane %v713_v9, %v9957_v47 }
 0x282   :  { %v3190_v12 = vrot.slane %v3189_v18, 2  ;;  %v3197_v26 = vrot.slane %v3196_v45, 2  ;;  %v711_v3 = vmax.f32 %v577_v4, 0.0  ;;  %v10845_v1 = vmax.f32 %v588_v23, 0.0 }
 0x283   :  { %v3184_v62 = vmax.f32 %v3182_v27, %v3183_v28  ;;  %v3204_v61 = vrot.slane %v3203_v51, 2  ;;  %v1527_v29 = vrot.slane %v1513_v56, %v9957_v47  ;;  %v1528_v14 = vcombine.high %v1520_v59, %v1520_v59 }
 0x284   :  { %v3191_v31 = vmax.f32 %v3189_v18, %v3190_v12  ;;  %v3198_v30 = vmax.f32 %v3196_v45, %v3197_v26  ;;  %v3320_v8 = vsel %vm2143_vm3, %v1520_v59, -inf  ;;  %v1479_v41 = vcombine.high %v711_v3, %v711_v3 }
 0x285   :  { %v3185_v0 = vrot.slane %v3184_v62, 1  ;;  %v3205_v19 = vmax.f32 %v3203_v51, %v3204_v61  ;;  %v1529_v53 = vcombine.high %v1527_v29, %v1527_v29  ;;  %v3321_v13 = vrot.slane %v3320_v8, 4 }
 0x286   :  { %v3192_v48 = vrot.slane %v3191_v31, 1  ;;  %v3199_v38 = vrot.slane %v3198_v30, 1  ;;  %v3327_v22 = vsel %vm2143_vm3, %v1528_v14, -inf  ;;  %v3334_v21 = vsel %vm2143_vm3, %v1527_v29, -inf }
 0x287   :  { %v3186_v55 = vmax.f32 %v3184_v62, %v3185_v0  ;;  %v3206_v11 = vrot.slane %v3205_v19, 1  ;;  %v3322_v20 = vmax.f32 %v3320_v8, %v3321_v13  ;;  %v3328_v6 = vrot.slane %v3327_v22, 4 }
 0x288   :  { %v3193_v32 = vmax.f32 %v3191_v31, %v3192_v48  ;;  %v3200_v2 = vmax.f32 %v3198_v30, %v3199_v38  ;;  %v3335_v24 = vrot.slane %v3334_v21, 4  ;;  %v3341_v35 = vsel %vm2143_vm3, %v1529_v53, -inf }
 0x289   :  { %v3207_v34 = vmax.f32 %v3205_v19, %v3206_v11  ;;  %v4165_v5 = vsel %vm3936_vm4, %v3186_v55, -inf  ;;  %v3323_v17 = vrot.slane %v3322_v20, 2  ;;  %v3329_v49 = vmax.f32 %v3327_v22, %v3328_v6 }
 0x28a   :  { %v4167_v42 = vmax.f32 %v4165_v5, %v10809_v16  ;;  %v4168_v57 = vsel %vm3936_vm4, %v3193_v32, -inf  ;;  %v4171_v27 = vsel %vm3936_vm4, %v3200_v2, -inf  ;;  %v3336_v7 = vmax.f32 %v3334_v21, %v3335_v24 }
 0x28b   :  { %v4170_v15 = vmax.f32 %v4168_v57, %v10823_v33  ;;  %v4173_v9 = vmax.f32 %v4171_v27, %v10826_v63  ;;  %v4174_v18 = vsel %vm3936_vm4, %v3207_v34, -inf  ;;  %v3324_v45 = vmax.f32 %v3322_v20, %v3323_v17  ;;  %v10875_v20 = vld [vmem:[#allocation2 + $0x60] sm:$0xff] }
 0x28c   :  { %v4176_v4 = vmax.f32 %v4174_v18, %v10835_v25  ;;  %v4522_v23 = vsel %vm4455_vm8, %v4167_v42, %v4521_v60  ;;  %v3330_v28 = vrot.slane %v3329_v49, 2  ;;  %v3337_v51 = vrot.slane %v3336_v7, 2 }
 0x28d   :  { %v4523_v16 = vsel %vm4457_vm9, %v4170_v15, %v4522_v23  ;;  %v3325_v56 = vrot.slane %v3324_v45, 1  ;;  %v3342_v59 = vrot.slane %v3341_v35, 4  ;;  %v1486_v12 = vrot.slane %v711_v3, %v9957_v47 }
 0x28e   :  { %v4524_v26 = vsel %vm4459_vm10, %v4173_v9, %v4523_v16  ;;  %v3331_v33 = vmax.f32 %v3329_v49, %v3330_v28  ;;  %v3338_v62 = vmax.f32 %v3336_v7, %v3337_v51  ;;  %v1493_v63 = vrot.slane %v1479_v41, %v9957_v47  ;;  %v579_v7 = vpop.f32.mrf.mxu0 }
 0x28f   :  { %v4525_v61 = vsel %vm4461_vm11, %v4176_v4, %v4524_v26  ;;  %v3326_v29 = vmax.f32 %v3324_v45, %v3325_v56  ;;  %v3343_v25 = vmax.f32 %v3341_v35, %v3342_v59  ;;  %v1494_v14 = vcombine.high %v1486_v12, %v1486_v12 }
 0x290   :  { %4593 = vst.msk [vmem:[#allocation4 + $0x48] sm:$0xff] %vm3936_vm4, %v4525_v61  ;;  %4650 = vst.msk [vmem:[#allocation2 + $0xc1] sm:$0xff] %vm3936_vm4, %v4525_v61  ;;  %v3332_v60 = vrot.slane %v3331_v33, 1  ;;  %v3339_v31 = vrot.slane %v3338_v62, 1  ;;  %v1495_v30 = vcombine.high %v1493_v63, %v1493_v63  ;;  %v3264_v3 = vsel %vm2143_vm3, %v1486_v12, -inf }
 0x291   :  { %v3344_v8 = vrot.slane %v3343_v25, 2  ;;  %v10870_v0 = vsel %vm3936_vm4, %v3326_v29, -inf  ;;  %v3265_v19 = vrot.slane %v3264_v3, 4  ;;  %v3271_v41 = vsel %vm2143_vm3, %v1494_v14, -inf }
 0x292   :  { %v3333_v53 = vmax.f32 %v3331_v33, %v3332_v60  ;;  %v3340_v13 = vmax.f32 %v3338_v62, %v3339_v31  ;;  %v3272_v48 = vrot.slane %v3271_v41, 4  ;;  %v3278_v38 = vsel %vm2143_vm3, %v1493_v63, -inf  ;;  %v9146_v63 = vpop.f32.mrf.mxu0 }
 0x293   :  { %v3345_v22 = vmax.f32 %v3343_v25, %v3344_v8  ;;  %v3266_v21 = vmax.f32 %v3264_v3, %v3265_v19  ;;  %v3279_v55 = vrot.slane %v3278_v38, 4  ;;  %v3285_v11 = vsel %vm2143_vm3, %v1495_v30, -inf }
 0x294   :  { %v4181_v6 = vsel %vm3936_vm4, %v3333_v53, -inf  ;;  %v4184_v32 = vsel %vm3936_vm4, %v3340_v13, -inf  ;;  %v3273_v2 = vmax.f32 %v3271_v41, %v3272_v48  ;;  %v3286_v24 = vrot.slane %v3285_v11, 4 }
 0x295   :  { %v3346_v35 = vrot.slane %v3345_v22, 1  ;;  %v3267_v34 = vrot.slane %v3266_v21, 2  ;;  %v3280_v5 = vmax.f32 %v3278_v38, %v3279_v55  ;;  %v1530_v17 = vcombine.high %v10845_v1, %v10845_v1 }
 0x296   :  { %v3274_v49 = vrot.slane %v3273_v2, 2  ;;  %v3287_v42 = vmax.f32 %v3285_v11, %v3286_v24  ;;  %v1537_v57 = vrot.slane %v10845_v1, %v9957_v47  ;;  %v4844_v27 = vrot.slane %v10875_v20, 2 }
 0x297   :  { %v3347_v15 = vmax.f32 %v3345_v22, %v3346_v35  ;;  %v3268_v9 = vmax.f32 %v3266_v21, %v3267_v34  ;;  %v3281_v18 = vrot.slane %v3280_v5, 2  ;;  %v1544_v45 = vrot.slane %v1530_v17, %v9957_v47  ;;  %v592_v21 = vpop.f32.mrf.mxu0 }
 0x298   :  { %v3275_v4 = vmax.f32 %v3273_v2, %v3274_v49  ;;  %v3288_v23 = vrot.slane %v3287_v42, 2  ;;  %v1545_v28 = vcombine.high %v1537_v57, %v1537_v57  ;;  %v3348_v51 = vsel %vm2143_vm3, %v1537_v57, -inf }
 0x299   :  { %v4187_v16 = vsel %vm3936_vm4, %v3347_v15, -inf  ;;  %v3269_v56 = vrot.slane %v3268_v9, 1  ;;  %v3282_v59 = vmax.f32 %v3280_v5, %v3281_v18  ;;  %v1546_v12 = vcombine.high %v1544_v45, %v1544_v45 }
 0x29a   :  { %v3276_v26 = vrot.slane %v3275_v4, 1  ;;  %v3289_v1 = vmax.f32 %v3287_v42, %v3288_v23  ;;  %v3349_v33 = vrot.slane %v3348_v51, 4  ;;  %v3355_v62 = vsel %vm2143_vm3, %v1545_v28, -inf }
 0x29b   :  { %v3270_v61 = vmax.f32 %v3268_v9, %v3269_v56  ;;  %v3283_v29 = vrot.slane %v3282_v59, 1  ;;  %v3356_v25 = vrot.slane %v3355_v62, 4  ;;  %v3362_v14 = vsel %vm2143_vm3, %v1544_v45, -inf  ;;  %v9147_v45 = vpop.f32.mrf.mxu0 }
 0x29c   :  { %v3277_v60 = vmax.f32 %v3275_v4, %v3276_v26  ;;  %v3290_v31 = vrot.slane %v3289_v1, 1  ;;  %v3350_v30 = vmax.f32 %v3348_v51, %v3349_v33  ;;  %v3363_v3 = vrot.slane %v3362_v14, 4 }
 0x29d   :  { %v3284_v8 = vmax.f32 %v3282_v59, %v3283_v29  ;;  %v4177_v19 = vsel %vm3936_vm4, %v3270_v61, -inf  ;;  %v3357_v41 = vmax.f32 %v3355_v62, %v3356_v25  ;;  %v3369_v53 = vsel %vm2143_vm3, %v1546_v12, -inf }
 0x29e   :  { %v3291_v13 = vmax.f32 %v3289_v1, %v3290_v31  ;;  %v4179_v48 = vmax.f32 %v4177_v19, %v10870_v0  ;;  %v4180_v38 = vsel %vm3936_vm4, %v3277_v60, -inf  ;;  %v3351_v22 = vrot.slane %v3350_v30, 2 }
 0x29f   :  { %v4182_v55 = vmax.f32 %v4180_v38, %v4181_v6  ;;  %v4183_v11 = vsel %vm3936_vm4, %v3284_v8, -inf  ;;  %v3358_v2 = vrot.slane %v3357_v41, 2  ;;  %v3364_v24 = vmax.f32 %v3362_v14, %v3363_v3 }
 0x2a0   :  { %v4185_v35 = vmax.f32 %v4183_v11, %v4184_v32  ;;  %v4186_v34 = vsel %vm3936_vm4, %v3291_v13, -inf  ;;  %v3352_v5 = vmax.f32 %v3350_v30, %v3351_v22  ;;  %v3370_v17 = vrot.slane %v3369_v53, 4 }
 0x2a1   :  { %v4188_v49 = vmax.f32 %v4186_v34, %v4187_v16  ;;  %v4526_v42 = vsel %vm4449_vm5, %v4182_v55, %v4179_v48  ;;  %v3359_v57 = vmax.f32 %v3357_v41, %v3358_v2  ;;  %v3365_v15 = vrot.slane %v3364_v24, 2 }
 0x2a2   :  { %v4527_v0 = vsel %vm4451_vm6, %v4185_v35, %v4526_v42  ;;  %v3353_v9 = vrot.slane %v3352_v5, 1  ;;  %v3371_v18 = vmax.f32 %v3369_v53, %v3370_v17  ;;  %v9219_v6 = vpack.i.bf16 %v10875_v20, %v10669_v40 }
 0x2a3   :  { %v3360_v4 = vrot.slane %v3359_v57, 1  ;;  %v3366_v23 = vmax.f32 %v3364_v24, %v3365_v15  ;;  %v580_v32 = vadd.f32 %v10686_v39, %v579_v7  ;;  %v10901_v28 = vsel %vm4453_vm7, %v4188_v49, %v4527_v0 }
 0x2a4   :  { %v3354_v51 = vmax.f32 %v3352_v5, %v3353_v9  ;;  %v3372_v16 = vrot.slane %v3371_v18, 2  ;;  %9220 = vrot.lane.b32.xlu0 %v9219_v6, %s9715_s21  ;;  %v601_v56 = vadd.f32 %v10686_v39, %v9146_v63  ;;  %v593_v59 = vadd.f32 %v10686_v39, %v592_v21 }
 0x2a5   :  { %v3361_v12 = vmax.f32 %v3359_v57, %v3360_v4  ;;  %v3367_v26 = vrot.slane %v3366_v23, 1  ;;  %v712_v1 = vmax.f32 %v580_v32, 0.0  ;;  %v10907_v40 = vadd.f32 %v10686_v39, %v9147_v45 }
 0x2a6   :  { %v3373_v33 = vmax.f32 %v3371_v18, %v3372_v16  ;;  %v10910_v7 = vsel %vm3936_vm4, %v3354_v51, -inf  ;;  %v717_v62 = vmax.f32 %v601_v56, 0.0  ;;  %v10912_v61 = vmax.f32 %v593_v59, 0.0 }
 0x2a7   :  { %v3368_v29 = vmax.f32 %v3366_v23, %v3367_v26  ;;  %v10915_v25 = vsel %vm3936_vm4, %v3361_v12, -inf  ;;  %v1496_v63 = vcombine.high %v712_v1, %v712_v1  ;;  %v1503_v14 = vrot.slane %v712_v1, %v9957_v47 }
 0x2a8   :  { %v3374_v60 = vrot.slane %v3373_v33, 1  ;;  %v1581_v31 = vcombine.high %v717_v62, %v717_v62  ;;  %v1588_v30 = vrot.slane %v717_v62, %v9957_v47  ;;  %v1547_v39 = vcombine.high %v10912_v61, %v10912_v61 }
 0x2a9   :  { %v10922_v3 = vsel %vm3936_vm4, %v3368_v29, -inf  ;;  %v1510_v8 = vrot.slane %v1496_v63, %v9957_v47  ;;  %v1511_v19 = vcombine.high %v1503_v14, %v1503_v14  ;;  %v3292_v41 = vsel %vm2143_vm3, %v1503_v14, -inf }
 0x2aa   :  { %v3375_v53 = vmax.f32 %v3373_v33, %v3374_v60  ;;  %v3293_v13 = vrot.slane %v3292_v41, 4  ;;  %v1595_v48 = vrot.slane %v1581_v31, %v9957_v47  ;;  %v1596_v38 = vcombine.high %v1588_v30, %v1588_v30 }
 0x2ab   :  { %v1512_v22 = vcombine.high %v1510_v8, %v1510_v8  ;;  %v3299_v21 = vsel %vm2143_vm3, %v1511_v19, -inf  ;;  %v3306_v55 = vsel %vm2143_vm3, %v1510_v8, -inf  ;;  %v3432_v11 = vsel %vm2143_vm3, %v1588_v30, -inf }
 0x2ac   :  { %v10931_v2 = vsel %vm3936_vm4, %v3375_v53, -inf  ;;  %v3294_v24 = vmax.f32 %v3292_v41, %v3293_v13  ;;  %v3300_v35 = vrot.slane %v3299_v21, 4  ;;  %v3307_v34 = vrot.slane %v3306_v55, 4 }
 0x2ad   :  { %v3313_v5 = vsel %vm2143_vm3, %v1512_v22, -inf  ;;  %v1597_v17 = vcombine.high %v1595_v48, %v1595_v48  ;;  %v3433_v49 = vrot.slane %v3432_v11, 4  ;;  %v3439_v42 = vsel %vm2143_vm3, %v1596_v38, -inf }
 0x2ae   :  { %v3295_v57 = vrot.slane %v3294_v24, 2  ;;  %v3301_v15 = vmax.f32 %v3299_v21, %v3300_v35  ;;  %v3308_v0 = vmax.f32 %v3306_v55, %v3307_v34  ;;  %v3314_v9 = vrot.slane %v3313_v5, 4 }
 0x2af   :  { %v3434_v18 = vmax.f32 %v3432_v11, %v3433_v49  ;;  %v3440_v6 = vrot.slane %v3439_v42, 4  ;;  %v3446_v45 = vsel %vm2143_vm3, %v1595_v48, -inf  ;;  %v3453_v4 = vsel %vm2143_vm3, %v1597_v17, -inf }
 0x2b0   :  { %v3296_v23 = vmax.f32 %v3294_v24, %v3295_v57  ;;  %v3302_v32 = vrot.slane %v3301_v15, 2  ;;  %v3309_v51 = vrot.slane %v3308_v0, 2  ;;  %v3315_v16 = vmax.f32 %v3313_v5, %v3314_v9 }
 0x2b1   :  { %v3435_v56 = vrot.slane %v3434_v18, 2  ;;  %v3441_v59 = vmax.f32 %v3439_v42, %v3440_v6  ;;  %v3447_v12 = vrot.slane %v3446_v45, 4  ;;  %v3454_v26 = vrot.slane %v3453_v4, 4 }
 0x2b2   :  { %v3297_v1 = vrot.slane %v3296_v23, 1  ;;  %v3303_v33 = vmax.f32 %v3301_v15, %v3302_v32  ;;  %v3310_v62 = vmax.f32 %v3308_v0, %v3309_v51  ;;  %v3316_v29 = vrot.slane %v3315_v16, 2 }
 0x2b3   :  { %v3436_v63 = vmax.f32 %v3434_v18, %v3435_v56  ;;  %v3442_v14 = vrot.slane %v3441_v59, 2  ;;  %v3448_v60 = vmax.f32 %v3446_v45, %v3447_v12  ;;  %v3455_v31 = vmax.f32 %v3453_v4, %v3454_v26 }
 0x2b4   :  { %v3298_v30 = vmax.f32 %v3296_v23, %v3297_v1  ;;  %v3304_v8 = vrot.slane %v3303_v33, 1  ;;  %v3311_v19 = vrot.slane %v3310_v62, 1  ;;  %v3317_v41 = vmax.f32 %v3315_v16, %v3316_v29 }
 0x2b5   :  { %v3437_v53 = vrot.slane %v3436_v63, 1  ;;  %v3443_v13 = vmax.f32 %v3441_v59, %v3442_v14  ;;  %v3449_v48 = vrot.slane %v3448_v60, 2  ;;  %v3456_v38 = vrot.slane %v3455_v31, 2 }
 0x2b6   :  { %v3305_v22 = vmax.f32 %v3303_v33, %v3304_v8  ;;  %v3312_v21 = vmax.f32 %v3310_v62, %v3311_v19  ;;  %v3318_v55 = vrot.slane %v3317_v41, 1  ;;  %v4189_v11 = vsel %vm3936_vm4, %v3298_v30, -inf }
 0x2b7   :  { %v4191_v24 = vmax.f32 %v4189_v11, %v10910_v7  ;;  %v3438_v35 = vmax.f32 %v3436_v63, %v3437_v53  ;;  %v3444_v34 = vrot.slane %v3443_v13, 1  ;;  %v3450_v5 = vmax.f32 %v3448_v60, %v3449_v48 }
 0x2b8   :  { %v3319_v17 = vmax.f32 %v3317_v41, %v3318_v55  ;;  %v4192_v49 = vsel %vm3936_vm4, %v3305_v22, -inf  ;;  %v4195_v42 = vsel %vm3936_vm4, %v3312_v21, -inf  ;;  %v3457_v57 = vmax.f32 %v3455_v31, %v3456_v38 }
 0x2b9   :  { %v4194_v15 = vmax.f32 %v4192_v49, %v10915_v25  ;;  %v4197_v0 = vmax.f32 %v4195_v42, %v10922_v3  ;;  %v4529_v9 = vsel %vm4455_vm8, %v4191_v24, %v10901_v28  ;;  %v3445_v18 = vmax.f32 %v3443_v13, %v3444_v34 }
 0x2ba   :  { %v4198_v6 = vsel %vm3936_vm4, %v3319_v17, -inf  ;;  %v3451_v7 = vrot.slane %v3450_v5, 1  ;;  %v3458_v45 = vrot.slane %v3457_v57, 1  ;;  %v10947_v4 = vsel %vm3936_vm4, %v3438_v35, -inf }
 0x2bb   :  { %v4200_v23 = vmax.f32 %v4198_v6, %v10931_v2  ;;  %v4530_v32 = vsel %vm4457_vm9, %v4194_v15, %v4529_v9  ;;  %v10952_v51 = vsel %vm3936_vm4, %v3445_v18, -inf  ;;  %v1554_v25 = vrot.slane %v10912_v61, %v9957_v47 }
 0x2bc   :  { %v4531_v28 = vsel %vm4459_vm10, %v4197_v0, %v4530_v32  ;;  %v3452_v3 = vmax.f32 %v3450_v5, %v3451_v7  ;;  %v3459_v16 = vmax.f32 %v3457_v57, %v3458_v45  ;;  %v1561_v56 = vrot.slane %v1547_v39, %v9957_v47 }
 0x2bd   :  { %v4532_v59 = vsel %vm4461_vm11, %v4200_v23, %v4531_v28  ;;  %v1562_v2 = vcombine.high %v1554_v25, %v1554_v25  ;;  %v3376_v12 = vsel %vm2143_vm3, %v1554_v25, -inf  ;;  %v718_v26 = vmax.f32 %v10907_v40, 0.0 }
 0x2be   :  { %4594 = vst.msk [vmem:[#allocation4 + $0x50] sm:$0xff] %vm3936_vm4, %v4532_v59  ;;  %4651 = vst.msk [vmem:[#allocation2 + $0xd1] sm:$0xff] %vm3936_vm4, %v4532_v59  ;;  %v10967_v1 = vsel %vm3936_vm4, %v3452_v3, -inf  ;;  %v10970_v33 = vsel %vm3936_vm4, %v3459_v16, -inf  ;;  %v1563_v62 = vcombine.high %v1561_v56, %v1561_v56  ;;  %v3377_v61 = vrot.slane %v3376_v12, 4 }
 0x2bf   :  { %v3383_v39 = vsel %vm2143_vm3, %v1562_v2, -inf  ;;  %v3390_v29 = vsel %vm2143_vm3, %v1561_v56, -inf  ;;  %v1598_v63 = vcombine.high %v718_v26, %v718_v26  ;;  %v1605_v14 = vrot.slane %v718_v26, %v9957_v47 }
 0x2c0   :  { %v3378_v40 = vmax.f32 %v3376_v12, %v3377_v61  ;;  %v3384_v60 = vrot.slane %v3383_v39, 4  ;;  %v3391_v31 = vrot.slane %v3390_v29, 4  ;;  %v3397_v30 = vsel %vm2143_vm3, %v1563_v62, -inf }
 0x2c1   :  { %v3398_v8 = vrot.slane %v3397_v30, 4  ;;  %v1612_v19 = vrot.slane %v1598_v63, %v9957_v47  ;;  %v1613_v41 = vcombine.high %v1605_v14, %v1605_v14  ;;  %v3460_v53 = vsel %vm2143_vm3, %v1605_v14, -inf }
 0x2c2   :  { %v3379_v13 = vrot.slane %v3378_v40, 2  ;;  %v3385_v48 = vmax.f32 %v3383_v39, %v3384_v60  ;;  %v3392_v38 = vmax.f32 %v3390_v29, %v3391_v31  ;;  %v3461_v22 = vrot.slane %v3460_v53, 4  ;;  %v595_v29 = vpop.f32.mrf.mxu0 }
 0x2c3   :  { %v3399_v21 = vmax.f32 %v3397_v30, %v3398_v8  ;;  %v1614_v55 = vcombine.high %v1612_v19, %v1612_v19  ;;  %v3467_v11 = vsel %vm2143_vm3, %v1613_v41, -inf  ;;  %v3474_v24 = vsel %vm2143_vm3, %v1612_v19, -inf  ;;  %v4670_v41 = vld [vmem:[#allocation2 + $0x68] sm:$0x3] }
 0x2c4   :  { %v3380_v35 = vmax.f32 %v3378_v40, %v3379_v13  ;;  %v3386_v34 = vrot.slane %v3385_v48, 2  ;;  %v3393_v5 = vrot.slane %v3392_v38, 2  ;;  %v3462_v17 = vmax.f32 %v3460_v53, %v3461_v22  ;;  %v10988_v22 = vld [vmem:[#allocation2 + $0x70] sm:$0xff] }
 0x2c5   :  { %v3400_v49 = vrot.slane %v3399_v21, 2  ;;  %v3468_v42 = vrot.slane %v3467_v11, 4  ;;  %v3475_v57 = vrot.slane %v3474_v24, 4  ;;  %v3481_v15 = vsel %vm2143_vm3, %v1614_v55, -inf }
 0x2c6   :  { %v3381_v0 = vrot.slane %v3380_v35, 1  ;;  %v3387_v9 = vmax.f32 %v3385_v48, %v3386_v34  ;;  %v3394_v18 = vmax.f32 %v3392_v38, %v3393_v5  ;;  %v3463_v6 = vrot.slane %v3462_v17, 2  ;;  %v4672_v5 = vld [vmem:[#allocation2 + $0x78] sm:$0x3] }
 0x2c7   :  { %v3401_v7 = vmax.f32 %v3399_v21, %v3400_v49  ;;  %v3469_v45 = vmax.f32 %v3467_v11, %v3468_v42  ;;  %v3476_v23 = vmax.f32 %v3474_v24, %v3475_v57  ;;  %v3482_v32 = vrot.slane %v3481_v15, 4  ;;  %v9150_v24 = vpop.f32.mrf.mxu0 }
 0x2c8   :  { %v3382_v25 = vmax.f32 %v3380_v35, %v3381_v0  ;;  %v3388_v28 = vrot.slane %v3387_v9, 1  ;;  %v3395_v3 = vrot.slane %v3394_v18, 1  ;;  %v3464_v16 = vmax.f32 %v3462_v17, %v3463_v6 }
 0x2c9   :  { %v3402_v56 = vrot.slane %v3401_v7, 1  ;;  %v3470_v59 = vrot.slane %v3469_v45, 2  ;;  %v3477_v2 = vrot.slane %v3476_v23, 2  ;;  %v3483_v12 = vmax.f32 %v3481_v15, %v3482_v32  ;;  %v608_v32 = vpop.f32.mrf.mxu0 }
 0x2ca   :  { %v3389_v26 = vmax.f32 %v3387_v9, %v3388_v28  ;;  %v3396_v62 = vmax.f32 %v3394_v18, %v3395_v3  ;;  %v4201_v61 = vsel %vm3936_vm4, %v3382_v25, -inf  ;;  %v3465_v39 = vrot.slane %v3464_v16, 1 }
 0x2cb   :  { %v3403_v63 = vmax.f32 %v3401_v7, %v3402_v56  ;;  %v4203_v14 = vmax.f32 %v4201_v61, %v10947_v4  ;;  %v3471_v40 = vmax.f32 %v3469_v45, %v3470_v59  ;;  %v3478_v60 = vmax.f32 %v3476_v23, %v3477_v2 }
 0x2cc   :  { %v4204_v31 = vsel %vm3936_vm4, %v3389_v26, -inf  ;;  %v4207_v30 = vsel %vm3936_vm4, %v3396_v62, -inf  ;;  %v3466_v8 = vmax.f32 %v3464_v16, %v3465_v39  ;;  %v3484_v19 = vrot.slane %v3483_v12, 2 }
 0x2cd   :  { %v4206_v53 = vmax.f32 %v4204_v31, %v10952_v51  ;;  %v4209_v13 = vmax.f32 %v4207_v30, %v10967_v1  ;;  %v4210_v48 = vsel %vm3936_vm4, %v3403_v63, -inf  ;;  %v3472_v38 = vrot.slane %v3471_v40, 1  ;;  %v10998_v51 = vld [vmem:[%s12883_s2] ss:$0 sm:$0xff] }
 0x2ce   :  { %v4212_v4 = vmax.f32 %v4210_v48, %v10970_v33  ;;  %v3479_v21 = vrot.slane %v3478_v60, 1  ;;  %v3485_v55 = vmax.f32 %v3483_v12, %v3484_v19  ;;  %v10992_v11 = vsel %vm3936_vm4, %v3466_v8, -inf }
 0x2cf   :  { %v4533_v35 = vsel %vm4449_vm5, %v4206_v53, %v4203_v14  ;;  %v3473_v34 = vmax.f32 %v3471_v40, %v3472_v38  ;;  %v596_v1 = vadd.f32 %v10998_v51, %v595_v29  ;;  %v4845_v17 = vrot.slane %v4670_v41, 2  ;;  %v9151_v14 = vpop.f32.mrf.mxu0 }
 0x2d0   :  { %v4534_v33 = vsel %vm4451_vm6, %v4209_v13, %v4533_v35  ;;  %v3480_v49 = vmax.f32 %v3478_v60, %v3479_v21  ;;  %v3486_v42 = vrot.slane %v3485_v55, 1  ;;  %v4847_v57 = vrot.slane %v10988_v22, 2 }
 0x2d1   :  { %v11004_v15 = vsel %vm3936_vm4, %v3473_v34, -inf  ;;  %v716_v0 = vmax.f32 %v596_v1, 0.0  ;;  %v11007_v9 = vsel %vm4453_vm7, %v4212_v4, %v4534_v33  ;;  %v11012_v18 = vsel %vm376_vm1, %v4844_v27, %v4845_v17 }
 0x2d2   :  { %v3487_v6 = vmax.f32 %v3485_v55, %v3486_v42  ;;  %v11015_v7 = vsel %vm3936_vm4, %v3480_v49, -inf  ;;  %v4848_v45 = vrot.slane %v4672_v5, 2  ;;  %v4748_v23 = vrot.slane %v10875_v20, 1 }
 0x2d3   :  { %v1564_v25 = vcombine.high %v716_v0, %v716_v0  ;;  %v1571_v28 = vrot.slane %v716_v0, %v9957_v47  ;;  %v4749_v3 = vrot.slane %v4670_v41, 1  ;;  %v4751_v16 = vrot.slane %v10988_v22, 1 }
 0x2d4   :  { %v11021_v56 = vsel %vm3936_vm4, %v3487_v6, -inf  ;;  %v11024_v27 = vsel %vm376_vm1, %v4847_v57, %v4848_v45  ;;  %v4752_v59 = vrot.slane %v4672_v5, 1  ;;  %v617_v2 = vadd.f32 %v10998_v51, %v9150_v24 }
 0x2d5   :  { %v1578_v12 = vrot.slane %v1564_v25, %v9957_v47  ;;  %v1579_v26 = vcombine.high %v1571_v28, %v1571_v28  ;;  %v3404_v20 = vsel %vm2143_vm3, %v1571_v28, -inf  ;;  %v5114_v62 = vpack.c.bf16 %v11024_v27, %v11012_v18 }
 0x2d6   :  { %v3405_v61 = vrot.slane %v3404_v20, 4  ;;  %v11032_v39 = vsel %vm4729_vm12, %v4748_v23, %v4749_v3  ;;  %v11035_v29 = vsel %vm4729_vm12, %v4751_v16, %v4752_v59  ;;  %v721_v63 = vmax.f32 %v617_v2, 0.0 }
 0x2d7   :  { %v1580_v40 = vcombine.high %v1578_v12, %v1578_v12  ;;  %v3411_v60 = vsel %vm2143_vm3, %v1579_v26, -inf  ;;  %v3418_v31 = vsel %vm2143_vm3, %v1578_v12, -inf  ;;  %9176 = vmatprep.mubr.msk.bf16.mxu0 %vm3936_vm4, %v5114_v62  ;;  %v9234_v30 = vpack.i.bf16 %v11035_v29, %v11032_v39 }
 0x2d8   :  { %v3406_v8 = vmax.f32 %v3404_v20, %v3405_v61  ;;  %v3412_v19 = vrot.slane %v3411_v60, 4  ;;  %v3419_v41 = vrot.slane %v3418_v31, 4  ;;  %v1649_v53 = vcombine.high %v721_v63, %v721_v63 }
 0x2d9   :  { %v3425_v13 = vsel %vm2143_vm3, %v1580_v40, -inf  ;;  %9235 = vrot.lane.b32.xlu1 %v9234_v30, %s9715_s21  ;;  %v1656_v48 = vrot.slane %v721_v63, %v9957_v47  ;;  %v609_v38 = vadd.f32 %v10998_v51, %v608_v32  ;;  %v11047_v4 = vadd.f32 %v10998_v51, %v9151_v14 }
 0x2da   :  { %v3407_v21 = vrot.slane %v3406_v8, 2  ;;  %v3413_v55 = vmax.f32 %v3411_v60, %v3412_v19  ;;  %v3420_v24 = vmax.f32 %v3418_v31, %v3419_v41  ;;  %v3426_v35 = vrot.slane %v3425_v13, 4 }
 0x2db   :  { %v1663_v34 = vrot.slane %v1649_v53, %v9957_v47  ;;  %v1664_v1 = vcombine.high %v1656_v48, %v1656_v48  ;;  %v3544_v5 = vsel %vm2143_vm3, %v1656_v48, -inf  ;;  %v719_v17 = vmax.f32 %v609_v38, 0.0 }
 0x2dc   :  { %v3408_v33 = vmax.f32 %v3406_v8, %v3407_v21  ;;  %v3414_v49 = vrot.slane %v3413_v55, 2  ;;  %v3421_v42 = vrot.slane %v3420_v24, 2  ;;  %v3427_v57 = vmax.f32 %v3425_v13, %v3426_v35 }
 0x2dd   :  { %v1665_v0 = vcombine.high %v1663_v34, %v1663_v34  ;;  %v3545_v6 = vrot.slane %v3544_v5, 4  ;;  %v3551_v45 = vsel %vm2143_vm3, %v1664_v1, -inf  ;;  %v3558_v23 = vsel %vm2143_vm3, %v1663_v34, -inf }
 0x2de   :  { %v3409_v32 = vrot.slane %v3408_v33, 1  ;;  %v3415_v25 = vmax.f32 %v3413_v55, %v3414_v49  ;;  %v3422_v28 = vmax.f32 %v3420_v24, %v3421_v42  ;;  %v3428_v3 = vrot.slane %v3427_v57, 2 }
 0x2df   :  { %v3546_v16 = vmax.f32 %v3544_v5, %v3545_v6  ;;  %v3552_v59 = vrot.slane %v3551_v45, 4  ;;  %v3559_v2 = vrot.slane %v3558_v23, 4  ;;  %v3565_v12 = vsel %vm2143_vm3, %v1665_v0, -inf }
 0x2e0   :  { %v3410_v26 = vmax.f32 %v3408_v33, %v3409_v32  ;;  %v3416_v20 = vrot.slane %v3415_v25, 1  ;;  %v3423_v62 = vrot.slane %v3422_v28, 1  ;;  %v3429_v61 = vmax.f32 %v3427_v57, %v3428_v3 }
 0x2e1   :  { %v3547_v63 = vrot.slane %v3546_v16, 2  ;;  %v3553_v14 = vmax.f32 %v3551_v45, %v3552_v59  ;;  %v3560_v40 = vmax.f32 %v3558_v23, %v3559_v2  ;;  %v3566_v60 = vrot.slane %v3565_v12, 4 }
 0x2e2   :  { %v3417_v31 = vmax.f32 %v3415_v25, %v3416_v20  ;;  %v3424_v30 = vmax.f32 %v3422_v28, %v3423_v62  ;;  %v3430_v8 = vrot.slane %v3429_v61, 1  ;;  %v4213_v19 = vsel %vm3936_vm4, %v3410_v26, -inf }
 0x2e3   :  { %v4215_v41 = vmax.f32 %v4213_v19, %v10992_v11  ;;  %v3548_v53 = vmax.f32 %v3546_v16, %v3547_v63  ;;  %v3554_v13 = vrot.slane %v3553_v14, 2  ;;  %v3561_v48 = vrot.slane %v3560_v40, 2 }
 0x2e4   :  { %v3431_v38 = vmax.f32 %v3429_v61, %v3430_v8  ;;  %v4216_v21 = vsel %vm3936_vm4, %v3417_v31, -inf  ;;  %v4219_v55 = vsel %vm3936_vm4, %v3424_v30, -inf  ;;  %v3567_v24 = vmax.f32 %v3565_v12, %v3566_v60 }
 0x2e5   :  { %v4218_v35 = vmax.f32 %v4216_v21, %v11004_v15  ;;  %v4221_v34 = vmax.f32 %v4219_v55, %v11015_v7  ;;  %v4536_v1 = vsel %vm4455_vm8, %v4215_v41, %v11007_v9  ;;  %v3549_v5 = vrot.slane %v3548_v53, 1 }
 0x2e6   :  { %v4222_v33 = vsel %vm3936_vm4, %v3431_v38, -inf  ;;  %v3555_v11 = vmax.f32 %v3553_v14, %v3554_v13  ;;  %v3562_v49 = vmax.f32 %v3560_v40, %v3561_v48  ;;  %v3568_v42 = vrot.slane %v3567_v24, 2  ;;  %v11083_v40 = vld [vmem:[#allocation2 + $0x80] sm:$0xff] }
 0x2e7   :  { %v4224_v57 = vmax.f32 %v4222_v33, %v11021_v56  ;;  %v4537_v0 = vsel %vm4457_vm9, %v4218_v35, %v4536_v1  ;;  %v3550_v6 = vmax.f32 %v3548_v53, %v3549_v5  ;;  %v1615_v45 = vcombine.high %v719_v17, %v719_v17 }
 0x2e8   :  { %v4538_v23 = vsel %vm4459_vm10, %v4221_v34, %v4537_v0  ;;  %v3556_v15 = vrot.slane %v3555_v11, 1  ;;  %v3563_v32 = vrot.slane %v3562_v49, 1  ;;  %v3569_v7 = vmax.f32 %v3567_v24, %v3568_v42 }
 0x2e9   :  { %v4539_v25 = vsel %vm4461_vm11, %v4224_v57, %v4538_v23  ;;  %v11068_v9 = vsel %vm3936_vm4, %v3550_v6, -inf  ;;  %v1622_v28 = vrot.slane %v719_v17, %v9957_v47  ;;  %v1629_v3 = vrot.slane %v1615_v45, %v9957_v47 }
 0x2ea   :  { %4595 = vst.msk [vmem:[#allocation4 + $0x58] sm:$0xff] %vm3936_vm4, %v4539_v25  ;;  %4652 = vst.msk [vmem:[#allocation2 + $0xe1] sm:$0xff] %vm3936_vm4, %v4539_v25  ;;  %v3557_v56 = vmax.f32 %v3555_v11, %v3556_v15  ;;  %v3564_v16 = vmax.f32 %v3562_v49, %v3563_v32  ;;  %v3570_v59 = vrot.slane %v3569_v7, 1  ;;  %v722_v2 = vmax.f32 %v11047_v4, 0.0 }
 0x2eb   :  { %v1630_v12 = vcombine.high %v1622_v28, %v1622_v28  ;;  %v1631_v26 = vcombine.high %v1629_v3, %v1629_v3  ;;  %v3488_v20 = vsel %vm2143_vm3, %v1622_v28, -inf  ;;  %v3502_v62 = vsel %vm2143_vm3, %v1629_v3, -inf }
 0x2ec   :  { %v3571_v61 = vmax.f32 %v3569_v7, %v3570_v59  ;;  %v11078_v17 = vsel %vm3936_vm4, %v3557_v56, -inf  ;;  %v11081_v63 = vsel %vm3936_vm4, %v3564_v16, -inf  ;;  %v3489_v14 = vrot.slane %v3488_v20, 4 }
 0x2ed   :  { %v3495_v60 = vsel %vm2143_vm3, %v1630_v12, -inf  ;;  %v3503_v31 = vrot.slane %v3502_v62, 4  ;;  %v3509_v4 = vsel %vm2143_vm3, %v1631_v26, -inf  ;;  %v1666_v30 = vcombine.high %v722_v2, %v722_v2 }
 0x2ee   :  { %v11088_v8 = vsel %vm3936_vm4, %v3571_v61, -inf  ;;  %v3490_v19 = vmax.f32 %v3488_v20, %v3489_v14  ;;  %v3496_v41 = vrot.slane %v3495_v60, 4  ;;  %v3510_v53 = vrot.slane %v3509_v4, 4  ;;  %v611_v20 = vpop.f32.mrf.mxu0 }
 0x2ef   :  { %v3504_v13 = vmax.f32 %v3502_v62, %v3503_v31  ;;  %v1673_v48 = vrot.slane %v722_v2, %v9957_v47  ;;  %v1680_v38 = vrot.slane %v1666_v30, %v9957_v47  ;;  %v4964_v21 = vrot.slane %v11083_v40, 2 }
 0x2f0   :  { %v3491_v55 = vrot.slane %v3490_v19, 2  ;;  %v3497_v24 = vmax.f32 %v3495_v60, %v3496_v41  ;;  %v3511_v35 = vmax.f32 %v3509_v4, %v3510_v53  ;;  %v9229_v34 = vpack.i.bf16 %v11083_v40, %v10988_v22 }
 0x2f1   :  { %v3505_v1 = vrot.slane %v3504_v13, 2  ;;  %v1681_v5 = vcombine.high %v1673_v48, %v1673_v48  ;;  %v1682_v33 = vcombine.high %v1680_v38, %v1680_v38  ;;  %v3572_v11 = vsel %vm2143_vm3, %v1673_v48, -inf }
 0x2f2   :  { %v3492_v49 = vmax.f32 %v3490_v19, %v3491_v55  ;;  %v3498_v42 = vrot.slane %v3497_v24, 2  ;;  %v3512_v57 = vrot.slane %v3511_v35, 2  ;;  %v3573_v0 = vrot.slane %v3572_v11, 4  ;;  %9230 = vrot.lane.b32.xlu0 %v9229_v34, %s9715_s21 }
 0x2f3   :  { %v3506_v6 = vmax.f32 %v3504_v13, %v3505_v1  ;;  %v3579_v45 = vsel %vm2143_vm3, %v1681_v5, -inf  ;;  %v3586_v23 = vsel %vm2143_vm3, %v1680_v38, -inf  ;;  %v3593_v15 = vsel %vm2143_vm3, %v1682_v33, -inf  ;;  %v4674_v38 = vld [vmem:[#allocation2 + $0x88] sm:$0x3]  ;;  %v4675_v1 = vld [vmem:[#allocation2 + $0x90] sm:$0xff]  ;;  %v9154_v5 = vpop.f32.mrf.mxu0 }
 0x2f4   :  { %v3493_v32 = vrot.slane %v3492_v49, 1  ;;  %v3499_v22 = vmax.f32 %v3497_v24, %v3498_v42  ;;  %v3513_v7 = vmax.f32 %v3511_v35, %v3512_v57  ;;  %v3574_v25 = vmax.f32 %v3572_v11, %v3573_v0 }
 0x2f5   :  { %v3507_v28 = vrot.slane %v3506_v6, 1  ;;  %v3580_v3 = vrot.slane %v3579_v45, 4  ;;  %v3587_v56 = vrot.slane %v3586_v23, 4  ;;  %v3594_v16 = vrot.slane %v3593_v15, 4 }
 0x2f6   :  { %v3494_v59 = vmax.f32 %v3492_v49, %v3493_v32  ;;  %v3500_v2 = vrot.slane %v3499_v22, 1  ;;  %v3514_v12 = vrot.slane %v3513_v7, 1  ;;  %v3575_v26 = vrot.slane %v3574_v25, 2 }
 0x2f7   :  { %v3508_v62 = vmax.f32 %v3506_v6, %v3507_v28  ;;  %v3581_v61 = vmax.f32 %v3579_v45, %v3580_v3  ;;  %v3588_v14 = vmax.f32 %v3586_v23, %v3587_v56  ;;  %v3595_v60 = vmax.f32 %v3593_v15, %v3594_v16  ;;  %v4676_v15 = vld [vmem:[#allocation2 + $0x98] sm:$0x3] }
 0x2f8   :  { %v3501_v31 = vmax.f32 %v3499_v22, %v3500_v2  ;;  %v3515_v4 = vmax.f32 %v3513_v7, %v3514_v12  ;;  %v4225_v30 = vsel %vm3936_vm4, %v3494_v59, -inf  ;;  %v3576_v19 = vmax.f32 %v3574_v25, %v3575_v26  ;;  %v624_v25 = vpop.f32.mrf.mxu0 }
 0x2f9   :  { %v4227_v41 = vmax.f32 %v4225_v30, %v11068_v9  ;;  %v4231_v53 = vsel %vm3936_vm4, %v3508_v62, -inf  ;;  %v3582_v13 = vrot.slane %v3581_v61, 2  ;;  %v3589_v48 = vrot.slane %v3588_v14, 2 }
 0x2fa   :  { %v4228_v55 = vsel %vm3936_vm4, %v3501_v31, -inf  ;;  %v4233_v24 = vmax.f32 %v4231_v53, %v11081_v63  ;;  %v4234_v35 = vsel %vm3936_vm4, %v3515_v4, -inf  ;;  %v3577_v34 = vrot.slane %v3576_v19, 1 }
 0x2fb   :  { %v4230_v33 = vmax.f32 %v4228_v55, %v11078_v17  ;;  %v4236_v11 = vmax.f32 %v4234_v35, %v11088_v8  ;;  %v3583_v49 = vmax.f32 %v3581_v61, %v3582_v13  ;;  %v3590_v9 = vmax.f32 %v3588_v14, %v3589_v48 }
 0x2fc   :  { %v3578_v42 = vmax.f32 %v3576_v19, %v3577_v34  ;;  %v3596_v57 = vrot.slane %v3595_v60, 2  ;;  %v612_v0 = vadd.f32 %v10998_v51, %v611_v20  ;;  %v4965_v6 = vrot.slane %v4674_v38, 2 }
 0x2fd   :  { %v4540_v45 = vsel %vm4449_vm5, %v4230_v33, %v4227_v41  ;;  %v3584_v23 = vrot.slane %v3583_v49, 1  ;;  %v3591_v63 = vrot.slane %v3590_v9, 1  ;;  %v5040_v32 = vrot.slane %v4675_v1, 2 }
 0x2fe   :  { %v4541_v22 = vsel %vm4451_vm6, %v4233_v24, %v4540_v45  ;;  %v3597_v7 = vmax.f32 %v3595_v60, %v3596_v57  ;;  %v11112_v17 = vsel %vm3936_vm4, %v3578_v42, -inf  ;;  %v720_v8 = vmax.f32 %v612_v0, 0.0 }
 0x2ff   :  { %v3585_v28 = vmax.f32 %v3583_v49, %v3584_v23  ;;  %v3592_v3 = vmax.f32 %v3590_v9, %v3591_v63  ;;  %v11115_v56 = vsel %vm4453_vm7, %v4236_v11, %v4541_v22  ;;  %v11120_v16 = vsel %vm376_vm1, %v4964_v21, %v4965_v6 }
 0x300   :  { %v3598_v59 = vrot.slane %v3597_v7, 1  ;;  %v1632_v2 = vcombine.high %v720_v8, %v720_v8  ;;  %v1639_v12 = vrot.slane %v720_v8, %v9957_v47  ;;  %v5041_v26 = vrot.slane %v4676_v15, 2 }
 0x301   :  { %v11124_v20 = vsel %vm3936_vm4, %v3585_v28, -inf  ;;  %v11127_v62 = vsel %vm3936_vm4, %v3592_v3, -inf  ;;  %v633_v61 = vadd.f32 %v10998_v51, %v9154_v5  ;;  %v625_v14 = vadd.f32 %v10998_v51, %v624_v25 }
 0x302   :  { %v3599_v60 = vmax.f32 %v3597_v7, %v3598_v59  ;;  %v1646_v40 = vrot.slane %v1632_v2, %v9957_v47  ;;  %v1647_v21 = vcombine.high %v1639_v12, %v1639_v12  ;;  %v3516_v31 = vsel %vm2143_vm3, %v1639_v12, -inf }
 0x303   :  { %v3517_v4 = vrot.slane %v3516_v31, 4  ;;  %v5042_v30 = vsel %vm376_vm1, %v5040_v32, %v5041_v26  ;;  %v725_v19 = vmax.f32 %v633_v61, 0.0  ;;  %v11134_v41 = vmax.f32 %v625_v14, 0.0 }
 0x304   :  { %v11137_v53 = vsel %vm3936_vm4, %v3599_v60, -inf  ;;  %v1648_v13 = vcombine.high %v1646_v40, %v1646_v40  ;;  %v3523_v48 = vsel %vm2143_vm3, %v1647_v21, -inf  ;;  %v3530_v38 = vsel %vm2143_vm3, %v1646_v40, -inf }
 0x305   :  { %v3518_v55 = vmax.f32 %v3516_v31, %v3517_v4  ;;  %v3524_v24 = vrot.slane %v3523_v48, 4  ;;  %v3531_v35 = vrot.slane %v3530_v38, 4  ;;  %v5118_v34 = vpack.c.bf16 %v5042_v30, %v11120_v16 }
 0x306   :  { %v3537_v1 = vsel %vm2143_vm3, %v1648_v13, -inf  ;;  %v1717_v5 = vcombine.high %v725_v19, %v725_v19  ;;  %v1724_v33 = vrot.slane %v725_v19, %v9957_v47  ;;  %v1683_v11 = vcombine.high %v11134_v41, %v11134_v41 }
 0x307   :  { %v3519_v49 = vrot.slane %v3518_v55, 2  ;;  %v3525_v9 = vmax.f32 %v3523_v48, %v3524_v24  ;;  %v3532_v42 = vmax.f32 %v3530_v38, %v3531_v35  ;;  %v3538_v57 = vrot.slane %v3537_v1, 4  ;;  %9177 = vmatmul.mubr.msk.bf16.gmra.mxu0 %vm3936_vm4, %v5118_v34 }
 0x308   :  { %v1731_v0 = vrot.slane %v1717_v5, %v9957_v47  ;;  %v1732_v6 = vcombine.high %v1724_v33, %v1724_v33  ;;  %v3656_v45 = vsel %vm2143_vm3, %v1724_v33, -inf  ;;  %v11151_v23 = vrot.slane %v11134_v41, %v9957_v47 }
 0x309   :  { %v3520_v63 = vmax.f32 %v3518_v55, %v3519_v49  ;;  %v3526_v15 = vrot.slane %v3525_v9, 2  ;;  %v3533_v32 = vrot.slane %v3532_v42, 2  ;;  %v3539_v22 = vmax.f32 %v3537_v1, %v3538_v57 }
 0x30a   :  { %v1733_v7 = vcombine.high %v1731_v0, %v1731_v0  ;;  %v3657_v8 = vrot.slane %v3656_v45, 4  ;;  %v3663_v25 = vsel %vm2143_vm3, %v1732_v6, -inf  ;;  %v3670_v28 = vsel %vm2143_vm3, %v1731_v0, -inf }
 0x30b   :  { %v3521_v3 = vrot.slane %v3520_v63, 1  ;;  %v3527_v59 = vmax.f32 %v3525_v9, %v3526_v15  ;;  %v3534_v2 = vmax.f32 %v3532_v42, %v3533_v32  ;;  %v3540_v12 = vrot.slane %v3539_v22, 2 }
 0x30c   :  { %v3658_v26 = vmax.f32 %v3656_v45, %v3657_v8  ;;  %v3664_v61 = vrot.slane %v3663_v25, 4  ;;  %v3671_v14 = vrot.slane %v3670_v28, 4  ;;  %v3677_v60 = vsel %vm2143_vm3, %v1733_v7, -inf }
 0x30d   :  { %v3522_v40 = vmax.f32 %v3520_v63, %v3521_v3  ;;  %v3528_v21 = vrot.slane %v3527_v59, 1  ;;  %v3535_v31 = vrot.slane %v3534_v2, 1  ;;  %v3541_v4 = vmax.f32 %v3539_v22, %v3540_v12 }
 0x30e   :  { %v3659_v30 = vrot.slane %v3658_v26, 2  ;;  %v3665_v19 = vmax.f32 %v3663_v25, %v3664_v61  ;;  %v3672_v41 = vmax.f32 %v3670_v28, %v3671_v14  ;;  %v3678_v13 = vrot.slane %v3677_v60, 4  ;;  %v9155_v28 = vpop.f32.mrf.mxu0 }
 0x30f   :  { %v3529_v48 = vmax.f32 %v3527_v59, %v3528_v21  ;;  %v3536_v38 = vmax.f32 %v3534_v2, %v3535_v31  ;;  %v3542_v55 = vrot.slane %v3541_v4, 1  ;;  %v4237_v24 = vsel %vm3936_vm4, %v3522_v40, -inf }
 0x310   :  { %v4239_v35 = vmax.f32 %v4237_v24, %v11112_v17  ;;  %v3660_v34 = vmax.f32 %v3658_v26, %v3659_v30  ;;  %v3666_v1 = vrot.slane %v3665_v19, 2  ;;  %v3673_v5 = vrot.slane %v3672_v41, 2  ;;  %v627_v31 = vpop.f32.mrf.mxu0 }
 0x311   :  { %v3543_v33 = vmax.f32 %v3541_v4, %v3542_v55  ;;  %v4240_v49 = vsel %vm3936_vm4, %v3529_v48, -inf  ;;  %v4243_v9 = vsel %vm3936_vm4, %v3536_v38, -inf  ;;  %v3679_v42 = vmax.f32 %v3677_v60, %v3678_v13  ;;  %v11185_v13 = vld [vmem:[#allocation2 + $0xa0] sm:$0xff]  ;;  %v11187_v48 = vld [vmem:[#allocation2 + $0xa8] sm:$0x3] }
 0x312   :  { %v4242_v57 = vmax.f32 %v4240_v49, %v11124_v20  ;;  %v4245_v0 = vmax.f32 %v4243_v9, %v11127_v62  ;;  %v4543_v6 = vsel %vm4455_vm8, %v4239_v35, %v11115_v56  ;;  %v3661_v45 = vrot.slane %v3660_v34, 1  ;;  %v9367_v35 = vld [vmem:[%s12884_s3 + $0x78] sm:$0xff]  }
 0x313   :  { %v4246_v63 = vsel %vm3936_vm4, %v3543_v33, -inf  ;;  %v3667_v17 = vmax.f32 %v3665_v19, %v3666_v1  ;;  %v3674_v15 = vmax.f32 %v3672_v41, %v3673_v5  ;;  %v3680_v32 = vrot.slane %v3679_v42, 2  ;;  %v9369_v1 = vld [vmem:[%s12884_s3 + $0x70] sm:$0xff]   ;;  %8956 = vmatprep.subr.bf16.mxu1 %v9367_v35 }
 0x314   :  { %v4248_v22 = vmax.f32 %v4246_v63, %v11137_v53  ;;  %v4544_v7 = vsel %vm4457_vm9, %v4242_v57, %v4543_v6  ;;  %v3662_v8 = vmax.f32 %v3660_v34, %v3661_v45  ;;  %v1697_v25 = vrot.slane %v1683_v11, %v9957_v47  ;;  %v9368_v34 = vld [vmem:[%s12884_s3 + $0x38] sm:$0xff]   ;;  %v11206_v45 = vld [vmem:[#allocation2 + $0xb0] sm:$0xff] }
 0x315   :  { %v4545_v20 = vsel %vm4459_vm10, %v4245_v0, %v4544_v7  ;;  %v3668_v62 = vrot.slane %v3667_v17, 1  ;;  %v3675_v3 = vrot.slane %v3674_v15, 1  ;;  %v3681_v59 = vmax.f32 %v3679_v42, %v3680_v32  ;;  %8957 = vmatpush3.bf16.msra.mxu1 %v9368_v34 }
 0x316   :  { %v4546_v56 = vsel %vm4461_vm11, %v4248_v22, %v4545_v20  ;;  %v1698_v2 = vcombine.high %v11151_v23, %v11151_v23  ;;  %v1699_v12 = vcombine.high %v1697_v25, %v1697_v25  ;;  %v3600_v11 = vsel %vm2143_vm3, %v11151_v23, -inf  ;;  %v9370_v22 = vld [vmem:[%s12884_s3 + $0x30] sm:$0xff]   ;;  %8958 = vmatprep.subr.bf16.mxu1 %v9369_v1  ;;  %v9371_v20 = vld [vmem:[%s12884_s3 + $0x68] sm:$0xff]  }
 0x317   :  { %4596 = vst.msk [vmem:[#allocation4 + $0x60] sm:$0xff] %vm3936_vm4, %v4546_v56  ;;  %4653 = vst.msk [vmem:[#allocation2 + $0xf1] sm:$0xff] %vm3936_vm4, %v4546_v56  ;;  %v3669_v53 = vmax.f32 %v3667_v17, %v3668_v62  ;;  %v3676_v26 = vmax.f32 %v3674_v15, %v3675_v3  ;;  %v3682_v61 = vrot.slane %v3681_v59, 1  ;;  %v3601_v14 = vrot.slane %v3600_v11, 4 }
 0x318   :  { %v3607_v60 = vsel %vm2143_vm3, %v1698_v2, -inf  ;;  %v3614_v40 = vsel %vm2143_vm3, %v1697_v25, -inf  ;;  %v3621_v21 = vsel %vm2143_vm3, %v1699_v12, -inf  ;;  %v11180_v30 = vsel %vm3936_vm4, %v3662_v8, -inf }
 0x319   :  { %v3683_v4 = vmax.f32 %v3681_v59, %v3682_v61  ;;  %v11183_v19 = vsel %vm3936_vm4, %v3669_v53, -inf  ;;  %v3608_v41 = vrot.slane %v3607_v60, 4  ;;  %v3602_v23 = vmax.f32 %v3600_v11, %v3601_v14  ;;  %8959 = vmatpush3.bf16.msra.mxu1 %v9370_v22 }
 0x31a   :  { %v3615_v38 = vrot.slane %v3614_v40, 4  ;;  %v3622_v55 = vrot.slane %v3621_v21, 4  ;;  %v636_v24 = vadd.f32 %v10998_v51, %v9155_v28  ;;  %v11200_v5 = vsel %vm3936_vm4, %v3676_v26, -inf  ;;  %8960 = vmatprep.subr.bf16.mxu1 %v9371_v20 }
 0x31b   :  { %v11203_v33 = vsel %vm3936_vm4, %v3683_v4, -inf  ;;  %v3609_v49 = vmax.f32 %v3607_v60, %v3608_v41  ;;  %v628_v9 = vadd.f32 %v10998_v51, %v627_v31  ;;  %v3603_v42 = vrot.slane %v3602_v23, 2 }
 0x31c   :  { %v3616_v57 = vmax.f32 %v3614_v40, %v3615_v38  ;;  %v3623_v0 = vmax.f32 %v3621_v21, %v3622_v55  ;;  %v726_v6 = vmax.f32 %v636_v24, 0.0  ;;  %v4754_v15 = vrot.slane %v11185_v13, 1  ;;  %v9372_v40 = vld [vmem:[%s12884_s3 + $0x28] sm:$0xff]  }
 0x31d   :  { %v3610_v63 = vrot.slane %v3609_v49, 2  ;;  %v724_v17 = vmax.f32 %v628_v9, 0.0  ;;  %v4755_v32 = vrot.slane %v11187_v48, 1  ;;  %v3604_v7 = vmax.f32 %v3602_v23, %v3603_v42  ;;  %v9373_v23 = vld [vmem:[%s12884_s3 + $0x60] sm:$0xff]   ;;  %8961 = vmatpush3.bf16.msra.mxu1 %v9372_v40 }
 0x31e   :  { %v3617_v8 = vrot.slane %v3616_v57, 2  ;;  %v3624_v25 = vrot.slane %v3623_v0, 2  ;;  %v1734_v28 = vcombine.high %v726_v6, %v726_v6  ;;  %v1741_v3 = vrot.slane %v726_v6, %v9957_v47  ;;  %8962 = vmatprep.subr.bf16.mxu1 %v9373_v23  ;;  %v9382_v48 = vld [vmem:[%s12884_s3] sm:$0xff]  }
 0x31f   :  { %v3611_v62 = vmax.f32 %v3609_v49, %v3610_v63  ;;  %v1700_v59 = vcombine.high %v724_v17, %v724_v17  ;;  %v4757_v56 = vrot.slane %v11206_v45, 1  ;;  %v3605_v2 = vrot.slane %v3604_v7, 1  ;;  %v9374_v63 = vld [vmem:[%s12884_s3 + $0x20] sm:$0xff]  }
 0x320   :  { %v3618_v12 = vmax.f32 %v3616_v57, %v3617_v8  ;;  %v3625_v53 = vmax.f32 %v3623_v0, %v3624_v25  ;;  %v1748_v26 = vrot.slane %v1734_v28, %v9957_v47  ;;  %v1749_v11 = vcombine.high %v1741_v3, %v1741_v3  ;;  %v9375_v25 = vld [vmem:[%s12884_s3 + $0x58] sm:$0xff]  }
 0x321   :  { %v3612_v61 = vrot.slane %v3611_v62, 1  ;;  %v3684_v14 = vsel %vm2143_vm3, %v1741_v3, -inf  ;;  %v1707_v60 = vrot.slane %v724_v17, %v9957_v47  ;;  %v3606_v21 = vmax.f32 %v3604_v7, %v3605_v2  ;;  %8963 = vmatpush3.bf16.msra.mxu1 %v9374_v63 }
 0x322   :  { %v3619_v31 = vrot.slane %v3618_v12, 1  ;;  %v3626_v4 = vrot.slane %v3625_v53, 1  ;;  %v1750_v41 = vcombine.high %v1748_v26, %v1748_v26  ;;  %v3685_v55 = vrot.slane %v3684_v14, 4  ;;  %8964 = vmatprep.subr.bf16.mxu1 %v9375_v25 }
 0x323   :  { %v3613_v38 = vmax.f32 %v3611_v62, %v3612_v61  ;;  %v3691_v24 = vsel %vm2143_vm3, %v1749_v11, -inf  ;;  %v3698_v35 = vsel %vm2143_vm3, %v1748_v26, -inf  ;;  %v4249_v49 = vsel %vm3936_vm4, %v3606_v21, -inf  ;;  %v9377_v21 = vld [vmem:[%s12884_s3 + $0x50] sm:$0xff]  }
 0x324   :  { %v3620_v34 = vmax.f32 %v3618_v12, %v3619_v31  ;;  %v3627_v1 = vmax.f32 %v3625_v53, %v3626_v4  ;;  %v3692_v9 = vrot.slane %v3691_v24, 4  ;;  %v3686_v57 = vmax.f32 %v3684_v14, %v3685_v55 }
 0x325   :  { %v4252_v42 = vsel %vm3936_vm4, %v3613_v38, -inf  ;;  %v3699_v0 = vrot.slane %v3698_v35, 4  ;;  %v1714_v6 = vrot.slane %v1700_v59, %v9957_v47  ;;  %v4251_v28 = vmax.f32 %v4249_v49, %v11180_v30  ;;  %v9376_v30 = vld [vmem:[%s12884_s3 + $0x18] sm:$0xff]  }
 0x326   :  { %v4254_v17 = vmax.f32 %v4252_v42, %v11183_v19  ;;  %v4255_v22 = vsel %vm3936_vm4, %v3620_v34, -inf  ;;  %v11238_v7 = vsel %vm3936_vm4, %v3627_v1, -inf  ;;  %v3693_v8 = vmax.f32 %v3691_v24, %v3692_v9  ;;  %v9158_v34 = vpop.f32.mrf.mxu0  ;;  %8965 = vmatpush3.bf16.msra.mxu1 %v9376_v30  ;;  %v9378_v42 = vld [vmem:[%s12884_s3 + $0x10] sm:$0xff]  }
 0x327   :  { %v4257_v20 = vmax.f32 %v4255_v22, %v11200_v5  ;;  %v3687_v62 = vrot.slane %v3686_v57, 2  ;;  %v3700_v3 = vmax.f32 %v3698_v35, %v3699_v0  ;;  %v4260_v19 = vmax.f32 %v11238_v7, %v11203_v33  ;;  %8966 = vmatprep.subr.bf16.mxu1 %v9377_v21 }
 0x328   :  { %v3694_v59 = vrot.slane %v3693_v8, 2  ;;  %v3705_v2 = vsel %vm2143_vm3, %v1750_v41, -inf  ;;  %v1715_v12 = vcombine.high %v1707_v60, %v1707_v60  ;;  %v4547_v53 = vsel %vm4449_vm5, %v4254_v17, %v4251_v28 }
 0x329   :  { %v3688_v26 = vmax.f32 %v3686_v57, %v3687_v62  ;;  %v3701_v61 = vrot.slane %v3700_v3, 2  ;;  %v3706_v11 = vrot.slane %v3705_v2, 4  ;;  %v1716_v14 = vcombine.high %v1714_v6, %v1714_v6 }
 0x32a   :  { %v3695_v5 = vmax.f32 %v3693_v8, %v3694_v59  ;;  %v3628_v40 = vsel %vm2143_vm3, %v1707_v60, -inf  ;;  %v3635_v33 = vsel %vm2143_vm3, %v1715_v12, -inf  ;;  %v3642_v24 = vsel %vm2143_vm3, %v1714_v6, -inf  ;;  %v9379_v6 = vld [vmem:[%s12884_s3 + $0x48] sm:$0xff]   ;;  %v640_v12 = vpop.f32.mrf.mxu0  ;;  %8967 = vmatpush3.bf16.msra.mxu1 %v9378_v42 }
 0x32b   :  { %v3689_v31 = vrot.slane %v3688_v26, 1  ;;  %v3702_v4 = vmax.f32 %v3700_v3, %v3701_v61  ;;  %v3707_v41 = vmax.f32 %v3705_v2, %v3706_v11  ;;  %v3629_v23 = vrot.slane %v3628_v40, 4  ;;  %v11267_v2 = vld [vmem:[#allocation2 + $0xb8] sm:$0x3]  ;;  %8968 = vmatprep.subr.bf16.mxu1 %v9379_v6 }
 0x32c   :  { %v3696_v38 = vrot.slane %v3695_v5, 1  ;;  %v3636_v55 = vrot.slane %v3635_v33, 4  ;;  %v3649_v35 = vsel %vm2143_vm3, %v1716_v14, -inf  ;;  %v3643_v63 = vrot.slane %v3642_v24, 4 }
 0x32d   :  { %v3690_v1 = vmax.f32 %v3688_v26, %v3689_v31  ;;  %v3703_v60 = vrot.slane %v3702_v4, 1  ;;  %v3708_v49 = vrot.slane %v3707_v41, 2  ;;  %v3630_v9 = vmax.f32 %v3628_v40, %v3629_v23 }
 0x32e   :  { %v3697_v57 = vmax.f32 %v3695_v5, %v3696_v38  ;;  %v3637_v0 = vmax.f32 %v3635_v33, %v3636_v55  ;;  %v3650_v17 = vrot.slane %v3649_v35, 4  ;;  %v4548_v22 = vsel %vm4451_vm6, %v4257_v20, %v4547_v53  ;;  %v9380_v20 = vld [vmem:[%s12884_s3 + $0x8] sm:$0xff]   ;;  %v9381_v33 = vld [vmem:[%s12884_s3 + $0x40] sm:$0xff]  }
 0x32f   :  { %v3704_v7 = vmax.f32 %v3702_v4, %v3703_v60  ;;  %v3709_v8 = vmax.f32 %v3707_v41, %v3708_v49  ;;  %v3631_v25 = vrot.slane %v3630_v9, 2  ;;  %v4262_v28 = vsel %vm3936_vm4, %v3690_v1, -inf  ;;  %8969 = vmatpush3.bf16.msra.mxu1 %v9380_v20 }
 0x330   :  { %v3638_v62 = vrot.slane %v3637_v0, 2  ;;  %v3644_v3 = vmax.f32 %v3642_v24, %v3643_v63  ;;  %v3651_v59 = vmax.f32 %v3649_v35, %v3650_v17  ;;  %v4265_v61 = vsel %vm3936_vm4, %v3697_v57, -inf  ;;  %v9159_v24 = vpop.f32.mrf.mxu0  ;;  %8970 = vmatprep.subr.bf16.mxu1 %v9381_v33 }
 0x331   :  { %v3710_v26 = vrot.slane %v3709_v8, 1  ;;  %v4268_v11 = vsel %vm3936_vm4, %v3704_v7, -inf  ;;  %v3632_v30 = vmax.f32 %v3630_v9, %v3631_v25  ;;  %v4549_v40 = vsel %vm4453_vm7, %v4260_v19, %v4548_v22 }
 0x332   :  { %v3639_v53 = vmax.f32 %v3637_v0, %v3638_v62  ;;  %v3645_v5 = vrot.slane %v3644_v3, 2  ;;  %v3652_v14 = vrot.slane %v3651_v59, 2  ;;  %v4756_v4 = vsel %vm4729_vm12, %v4754_v15, %v4755_v32 }
 0x333   :  { %v3711_v21 = vmax.f32 %v3709_v8, %v3710_v26  ;;  %v3633_v31 = vrot.slane %v3632_v30, 1  ;;  %v4758_v41 = vrot.slane %v11267_v2, 1  ;;  %v649_v19 = vadd.f32 %v10998_v51, %v9158_v34  ;;  %8971 = vmatpush3.bf16.msra.mxu1 %v9382_v48  ;;  %v9383_v48 = vld [vmem:[%s12884_s3 + $0xf8] sm:$0xff]  }
 0x334   :  { %v3640_v23 = vrot.slane %v3639_v53, 1  ;;  %v3646_v38 = vmax.f32 %v3644_v3, %v3645_v5  ;;  %v3653_v55 = vmax.f32 %v3651_v59, %v3652_v14  ;;  %v641_v13 = vadd.f32 %v10998_v51, %v640_v12  ;;  %9020 = vmatprep.subr.bf16.mxu1 %v9383_v48 }
 0x335   :  { %v4271_v35 = vsel %vm3936_vm4, %v3711_v21, -inf  ;;  %v3634_v1 = vmax.f32 %v3632_v30, %v3633_v31  ;;  %v11289_v60 = vsel %vm4729_vm12, %v4757_v56, %v4758_v41  ;;  %v729_v42 = vmax.f32 %v649_v19, 0.0 }
 0x336   :  { %v3641_v15 = vmax.f32 %v3639_v53, %v3640_v23  ;;  %v3647_v32 = vrot.slane %v3646_v38, 1  ;;  %v3654_v49 = vrot.slane %v3653_v55, 1  ;;  %v9244_v34 = vpack.i.bf16 %v11289_v60, %v4756_v4 }
 0x337   :  { %v4261_v9 = vsel %vm3936_vm4, %v3634_v1, -inf  ;;  %v727_v57 = vmax.f32 %v641_v13, 0.0  ;;  %v11298_v56 = vadd.f32 %v10998_v51, %v9159_v24  ;;  %v1785_v7 = vcombine.high %v729_v42, %v729_v42 }
 0x338   :  { %v3648_v0 = vmax.f32 %v3646_v38, %v3647_v32  ;;  %v3655_v63 = vmax.f32 %v3653_v55, %v3654_v49  ;;  %v4263_v17 = vmax.f32 %v4261_v9, %v4262_v28  ;;  %v4264_v6 = vsel %vm3936_vm4, %v3641_v15, -inf  ;;  %9245 = vrot.lane.b32.xlu1 %v9244_v34, %s9715_s21 }
 0x339   :  { %v4266_v22 = vmax.f32 %v4264_v6, %v4265_v61  ;;  %v1792_v8 = vrot.slane %v729_v42, %v9957_v47  ;;  %v1751_v25 = vcombine.high %v727_v57, %v727_v57  ;;  %v1758_v59 = vrot.slane %v727_v57, %v9957_v47 }
 0x33a   :  { %v4267_v62 = vsel %vm3936_vm4, %v3648_v0, -inf  ;;  %v4270_v3 = vsel %vm3936_vm4, %v3655_v63, -inf  ;;  %v4550_v51 = vsel %vm4455_vm8, %v4263_v17, %v4549_v40  ;;  %v1799_v30 = vrot.slane %v1785_v7, %v9957_v47 }
 0x33b   :  { %v4269_v12 = vmax.f32 %v4267_v62, %v4268_v11  ;;  %v4272_v28 = vmax.f32 %v4270_v3, %v4271_v35  ;;  %v4551_v26 = vsel %vm4457_vm9, %v4266_v22, %v4550_v51  ;;  %v1800_v61 = vcombine.high %v1792_v8, %v1792_v8 }
 0x33c   :  { %v3768_v20 = vsel %vm2143_vm3, %v1792_v8, -inf  ;;  %v1765_v53 = vrot.slane %v1751_v25, %v9957_v47  ;;  %v1766_v5 = vcombine.high %v1758_v59, %v1758_v59  ;;  %v1801_v33 = vcombine.high %v1799_v30, %v1799_v30 }
 0x33d   :  { %v4552_v14 = vsel %vm4459_vm10, %v4269_v12, %v4551_v26  ;;  %v3769_v21 = vrot.slane %v3768_v20, 4  ;;  %v3782_v40 = vsel %vm2143_vm3, %v1799_v30, -inf  ;;  %v3775_v11 = vsel %vm2143_vm3, %v1800_v61, -inf }
 0x33e   :  { %v4553_v31 = vsel %vm4461_vm11, %v4272_v28, %v4552_v14  ;;  %v3783_v4 = vrot.slane %v3782_v40, 4  ;;  %v1767_v41 = vcombine.high %v1765_v53, %v1765_v53  ;;  %v3776_v38 = vrot.slane %v3775_v11, 4 }
 0x33f   :  { %4597 = vst.msk [vmem:[#allocation4 + $0x68] sm:$0xff] %vm3936_vm4, %v4553_v31  ;;  %4654 = vst.msk [vmem:[#allocation2 + $0x101] sm:$0xff] %vm3936_vm4, %v4553_v31  ;;  %v3770_v23 = vmax.f32 %v3768_v20, %v3769_v21  ;;  %v3789_v55 = vsel %vm2143_vm3, %v1801_v33, -inf  ;;  %v3712_v19 = vsel %vm2143_vm3, %v1758_v59, -inf  ;;  %v3719_v13 = vsel %vm2143_vm3, %v1766_v5, -inf }
 0x340   :  { %v3784_v24 = vmax.f32 %v3782_v40, %v3783_v4  ;;  %v3790_v35 = vrot.slane %v3789_v55, 4  ;;  %v3713_v1 = vrot.slane %v3712_v19, 4  ;;  %v3777_v32 = vmax.f32 %v3775_v11, %v3776_v38  ;;  %v11326_v38 = vld [vmem:[#allocation2 + $0xc0] sm:$0xff] }
 0x341   :  { %v3771_v15 = vrot.slane %v3770_v23, 2  ;;  %v3720_v49 = vrot.slane %v3719_v13, 4  ;;  %v3726_v34 = vsel %vm2143_vm3, %v1765_v53, -inf  ;;  %v3733_v22 = vsel %vm2143_vm3, %v1767_v41, -inf }
 0x342   :  { %v3785_v9 = vrot.slane %v3784_v24, 2  ;;  %v3791_v42 = vmax.f32 %v3789_v55, %v3790_v35  ;;  %v3714_v57 = vmax.f32 %v3712_v19, %v3713_v1  ;;  %v3727_v0 = vrot.slane %v3726_v34, 4  ;;  %v643_v55 = vpop.f32.mrf.mxu0 }
 0x343   :  { %v3772_v63 = vmax.f32 %v3770_v23, %v3771_v15  ;;  %v3778_v17 = vrot.slane %v3777_v32, 2  ;;  %v3721_v6 = vmax.f32 %v3719_v13, %v3720_v49  ;;  %v3734_v12 = vrot.slane %v3733_v22, 4 }
 0x344   :  { %v3786_v7 = vmax.f32 %v3784_v24, %v3785_v9  ;;  %v3792_v8 = vrot.slane %v3791_v42, 2  ;;  %v3715_v25 = vrot.slane %v3714_v57, 2  ;;  %v3728_v62 = vmax.f32 %v3726_v34, %v3727_v0 }
 0x345   :  { %v3773_v3 = vrot.slane %v3772_v63, 1  ;;  %v3779_v51 = vmax.f32 %v3777_v32, %v3778_v17  ;;  %v3722_v59 = vrot.slane %v3721_v6, 2  ;;  %v3735_v14 = vmax.f32 %v3733_v22, %v3734_v12 }
 0x346   :  { %v3787_v28 = vrot.slane %v3786_v7, 1  ;;  %v3793_v26 = vmax.f32 %v3791_v42, %v3792_v8  ;;  %v3716_v30 = vmax.f32 %v3714_v57, %v3715_v25  ;;  %v3729_v61 = vrot.slane %v3728_v62, 2 }
 0x347   :  { %v3774_v20 = vmax.f32 %v3772_v63, %v3773_v3  ;;  %v3780_v53 = vrot.slane %v3779_v51, 1  ;;  %v3723_v5 = vmax.f32 %v3721_v6, %v3722_v59  ;;  %v3736_v23 = vrot.slane %v3735_v14, 2  ;;  %v9162_v6 = vpop.f32.mrf.mxu0 }
 0x348   :  { %v3788_v33 = vmax.f32 %v3786_v7, %v3787_v28  ;;  %v3794_v21 = vrot.slane %v3793_v26, 1  ;;  %v3717_v40 = vrot.slane %v3716_v30, 1  ;;  %v3730_v31 = vmax.f32 %v3728_v62, %v3729_v61 }
 0x349   :  { %v3781_v11 = vmax.f32 %v3779_v51, %v3780_v53  ;;  %v4274_v4 = vsel %vm3936_vm4, %v3774_v20, -inf  ;;  %v3724_v41 = vrot.slane %v3723_v5, 1  ;;  %v3737_v15 = vmax.f32 %v3735_v14, %v3736_v23  ;;  %v11343_v51 = vld [vmem:[%s12883_s2] ss:$0 sm:$0xff] }
 0x34a   :  { %v3795_v19 = vmax.f32 %v3793_v26, %v3794_v21  ;;  %v4280_v24 = vsel %vm3936_vm4, %v3788_v33, -inf  ;;  %v3718_v35 = vmax.f32 %v3716_v30, %v3717_v40  ;;  %v3731_v1 = vrot.slane %v3730_v31, 1 }
 0x34b   :  { %v4277_v13 = vsel %vm3936_vm4, %v3781_v11, -inf  ;;  %v3725_v48 = vmax.f32 %v3723_v5, %v3724_v41  ;;  %v730_v32 = vmax.f32 %v11298_v56, 0.0  ;;  %v4856_v42 = vrot.slane %v11326_v38, 2 }
 0x34c   :  { %v4283_v49 = vsel %vm3936_vm4, %v3795_v19, -inf  ;;  %v3732_v34 = vmax.f32 %v3730_v31, %v3731_v1  ;;  %v4273_v9 = vsel %vm3936_vm4, %v3718_v35, -inf  ;;  %v3738_v57 = vrot.slane %v3737_v15, 1 }
 0x34d   :  { %v4275_v0 = vmax.f32 %v4273_v9, %v4274_v4  ;;  %v4276_v63 = vsel %vm3936_vm4, %v3725_v48, -inf  ;;  %v1802_v17 = vcombine.high %v730_v32, %v730_v32  ;;  %v1809_v8 = vrot.slane %v730_v32, %v9957_v47 }
 0x34e   :  { %v4278_v22 = vmax.f32 %v4276_v63, %v4277_v13  ;;  %v4279_v7 = vsel %vm3936_vm4, %v3732_v34, -inf  ;;  %v9239_v56 = vpack.i.bf16 %v11326_v38, %v11206_v45  ;;  %v3739_v25 = vmax.f32 %v3737_v15, %v3738_v57 }
 0x34f   :  { %v4281_v62 = vmax.f32 %v4279_v7, %v4280_v24  ;;  %v1816_v3 = vrot.slane %v1802_v17, %v9957_v47  ;;  %v644_v59 = vadd.f32 %v11343_v51, %v643_v55  ;;  %v1817_v28 = vcombine.high %v1809_v8, %v1809_v8 }
 0x350   :  { %v4554_v12 = vsel %vm4449_vm5, %v4278_v22, %v4275_v0  ;;  %v3796_v26 = vsel %vm2143_vm3, %v1809_v8, -inf  ;;  %9240 = vrot.lane.b32.xlu0 %v9239_v56, %s9715_s21  ;;  %v665_v45 = vadd.f32 %v11343_v51, %v9162_v6  ;;  %v4282_v30 = vsel %vm3936_vm4, %v3739_v25, -inf }
 0x351   :  { %v4555_v61 = vsel %vm4451_vm6, %v4281_v62, %v4554_v12  ;;  %v1818_v20 = vcombine.high %v1816_v3, %v1816_v3  ;;  %v3797_v53 = vrot.slane %v3796_v26, 4  ;;  %v4284_v5 = vmax.f32 %v4282_v30, %v4283_v49 }
 0x352   :  { %v3803_v14 = vsel %vm2143_vm3, %v1817_v28, -inf  ;;  %v3810_v33 = vsel %vm2143_vm3, %v1816_v3, -inf  ;;  %v728_v21 = vmax.f32 %v644_v59, 0.0  ;;  %v733_v13 = vmax.f32 %v665_v45, 0.0 }
 0x353   :  { %v3798_v40 = vmax.f32 %v3796_v26, %v3797_v53  ;;  %v3804_v31 = vrot.slane %v3803_v14, 4  ;;  %v3811_v11 = vrot.slane %v3810_v33, 4  ;;  %v3817_v4 = vsel %vm2143_vm3, %v1818_v20, -inf }
 0x354   :  { %v3818_v41 = vrot.slane %v3817_v4, 4  ;;  %v1768_v23 = vcombine.high %v728_v21, %v728_v21  ;;  %v1775_v55 = vrot.slane %v728_v21, %v9957_v47  ;;  %v11357_v19 = vsel %vm4453_vm7, %v4284_v5, %v4555_v61  ;;  %v656_v61 = vpop.f32.mrf.mxu0 }
 0x355   :  { %v3799_v24 = vrot.slane %v3798_v40, 2  ;;  %v3805_v35 = vmax.f32 %v3803_v14, %v3804_v31  ;;  %v3812_v1 = vmax.f32 %v3810_v33, %v3811_v11 }
 0x356   :  { %v3819_v48 = vmax.f32 %v3817_v4, %v3818_v41  ;;  %v1782_v15 = vrot.slane %v1768_v23, %v9957_v47  ;;  %v1783_v32 = vcombine.high %v1775_v55, %v1775_v55  ;;  %v3740_v49 = vsel %vm2143_vm3, %v1775_v55, -inf }
 0x357   :  { %v3800_v34 = vmax.f32 %v3798_v40, %v3799_v24  ;;  %v3806_v9 = vrot.slane %v3805_v35, 2  ;;  %v3813_v57 = vrot.slane %v3812_v1, 2  ;;  %v3741_v0 = vrot.slane %v3740_v49, 4 }
 0x358   :  { %v3820_v63 = vrot.slane %v3819_v48, 2  ;;  %v1784_v17 = vcombine.high %v1782_v15, %v1782_v15  ;;  %v3747_v6 = vsel %vm2143_vm3, %v1783_v32, -inf  ;;  %v3754_v22 = vsel %vm2143_vm3, %v1782_v15, -inf }
 0x359   :  { %v3801_v7 = vrot.slane %v3800_v34, 1  ;;  %v3807_v8 = vmax.f32 %v3805_v35, %v3806_v9  ;;  %v3814_v56 = vmax.f32 %v3812_v1, %v3813_v57  ;;  %v3742_v25 = vmax.f32 %v3740_v49, %v3741_v0 }
 0x35a   :  { %v3821_v62 = vmax.f32 %v3819_v48, %v3820_v63  ;;  %v3748_v3 = vrot.slane %v3747_v6, 4  ;;  %v3755_v59 = vrot.slane %v3754_v22, 4  ;;  %v3761_v12 = vsel %vm2143_vm3, %v1784_v17, -inf  ;;  %v9163_v48 = vpop.f32.mrf.mxu0 }
 0x35b   :  { %v3802_v28 = vmax.f32 %v3800_v34, %v3801_v7  ;;  %v3808_v26 = vrot.slane %v3807_v8, 1  ;;  %v3815_v45 = vrot.slane %v3814_v56, 1  ;;  %v3743_v30 = vrot.slane %v3742_v25, 2 }
 0x35c   :  { %v3822_v20 = vrot.slane %v3821_v62, 1  ;;  %v3749_v53 = vmax.f32 %v3747_v6, %v3748_v3  ;;  %v3756_v5 = vmax.f32 %v3754_v22, %v3755_v59  ;;  %v3762_v14 = vrot.slane %v3761_v12, 4 }
 0x35d   :  { %v3809_v33 = vmax.f32 %v3807_v8, %v3808_v26  ;;  %v3816_v21 = vmax.f32 %v3814_v56, %v3815_v45  ;;  %v4286_v40 = vsel %vm3936_vm4, %v3802_v28, -inf  ;;  %v3744_v31 = vmax.f32 %v3742_v25, %v3743_v30 }
 0x35e   :  { %v3823_v11 = vmax.f32 %v3821_v62, %v3822_v20  ;;  %v3750_v4 = vrot.slane %v3749_v53, 2  ;;  %v3757_v41 = vrot.slane %v3756_v5, 2  ;;  %v3763_v23 = vmax.f32 %v3761_v12, %v3762_v14 }
 0x35f   :  { %v4289_v55 = vsel %vm3936_vm4, %v3809_v33, -inf  ;;  %v4292_v24 = vsel %vm3936_vm4, %v3816_v21, -inf  ;;  %v3745_v35 = vrot.slane %v3744_v31, 1  ;;  %v1853_v1 = vcombine.high %v733_v13, %v733_v13 }
 0x360   :  { %v4295_v15 = vsel %vm3936_vm4, %v3823_v11, -inf  ;;  %v3751_v32 = vmax.f32 %v3749_v53, %v3750_v4  ;;  %v3758_v49 = vmax.f32 %v3756_v5, %v3757_v41  ;;  %v3764_v34 = vrot.slane %v3763_v23, 2 }
 0x361   :  { %v3746_v9 = vmax.f32 %v3744_v31, %v3745_v35  ;;  %v1860_v57 = vrot.slane %v733_v13, %v9957_v47  ;;  %v1867_v0 = vrot.slane %v1853_v1, %v9957_v47  ;;  %v657_v63 = vadd.f32 %v11343_v51, %v656_v61 }
 0x362   :  { %v3752_v17 = vrot.slane %v3751_v32, 1  ;;  %v3759_v6 = vrot.slane %v3758_v49, 1  ;;  %v3765_v22 = vmax.f32 %v3763_v23, %v3764_v34  ;;  %v668_v7 = vadd.f32 %v11343_v51, %v9163_v48 }
 0x363   :  { %v4285_v8 = vsel %vm3936_vm4, %v3746_v9, -inf  ;;  %v1868_v56 = vcombine.high %v1860_v57, %v1860_v57  ;;  %v1869_v25 = vcombine.high %v1867_v0, %v1867_v0  ;;  %v3880_v62 = vsel %vm2143_vm3, %v1860_v57, -inf }
 0x364   :  { %v3753_v3 = vmax.f32 %v3751_v32, %v3752_v17  ;;  %v3760_v59 = vmax.f32 %v3758_v49, %v3759_v6  ;;  %v3766_v12 = vrot.slane %v3765_v22, 1  ;;  %v4287_v28 = vmax.f32 %v4285_v8, %v4286_v40 }
 0x365   :  { %v3881_v13 = vrot.slane %v3880_v62, 4  ;;  %v3887_v26 = vsel %vm2143_vm3, %v1868_v56, -inf  ;;  %v3894_v45 = vsel %vm2143_vm3, %v1867_v0, -inf  ;;  %v3901_v30 = vsel %vm2143_vm3, %v1869_v25, -inf }
 0x366   :  { %v3767_v61 = vmax.f32 %v3765_v22, %v3766_v12  ;;  %v4288_v20 = vsel %vm3936_vm4, %v3753_v3, -inf  ;;  %v4291_v53 = vsel %vm3936_vm4, %v3760_v59, -inf  ;;  %v4557_v5 = vsel %vm4455_vm8, %v4287_v28, %v11357_v19 }
 0x367   :  { %v4290_v14 = vmax.f32 %v4288_v20, %v4289_v55  ;;  %v4293_v33 = vmax.f32 %v4291_v53, %v4292_v24  ;;  %v3882_v21 = vmax.f32 %v3880_v62, %v3881_v13  ;;  %v3888_v31 = vrot.slane %v3887_v26, 4 }
 0x368   :  { %v4294_v40 = vsel %vm3936_vm4, %v3767_v61, -inf  ;;  %v3895_v11 = vrot.slane %v3894_v45, 4  ;;  %v3902_v4 = vrot.slane %v3901_v30, 4  ;;  %v731_v41 = vmax.f32 %v657_v63, 0.0 }
 0x369   :  { %v4296_v23 = vmax.f32 %v4294_v40, %v4295_v15  ;;  %v4558_v35 = vsel %vm4457_vm9, %v4290_v14, %v4557_v5  ;;  %v3883_v1 = vrot.slane %v3882_v21, 2  ;;  %v3889_v48 = vmax.f32 %v3887_v26, %v3888_v31 }
 0x36a   :  { %v4559_v32 = vsel %vm4459_vm10, %v4293_v33, %v4558_v35  ;;  %v3896_v49 = vmax.f32 %v3894_v45, %v3895_v11  ;;  %v3903_v34 = vmax.f32 %v3901_v30, %v3902_v4  ;;  %v1819_v9 = vcombine.high %v731_v41, %v731_v41  ;;  %v659_v35 = vpop.f32.mrf.mxu0 }
 0x36b   :  { %v4560_v19 = vsel %vm4461_vm11, %v4296_v23, %v4559_v32  ;;  %v3884_v55 = vmax.f32 %v3882_v21, %v3883_v1  ;;  %v3890_v24 = vrot.slane %v3889_v48, 2  ;;  %v1826_v57 = vrot.slane %v731_v41, %v9957_v47  ;;  %v11395_v1 = vld [vmem:[#allocation2 + $0xc8] sm:$0x3] }
 0x36c   :  { %4598 = vst.msk [vmem:[#allocation4 + $0x70] sm:$0xff] %vm3936_vm4, %v4560_v19  ;;  %4655 = vst.msk [vmem:[#allocation2 + $0x111] sm:$0xff] %vm3936_vm4, %v4560_v19  ;;  %v3897_v15 = vrot.slane %v3896_v49, 2  ;;  %v3904_v0 = vrot.slane %v3903_v34, 2  ;;  %v1833_v63 = vrot.slane %v1819_v9, %v9957_v47  ;;  %v734_v17 = vmax.f32 %v668_v7, 0.0 }
 0x36d   :  { %v3885_v6 = vrot.slane %v3884_v55, 1  ;;  %v3891_v22 = vmax.f32 %v3889_v48, %v3890_v24  ;;  %v1834_v8 = vcombine.high %v1826_v57, %v1826_v57  ;;  %v3824_v56 = vsel %vm2143_vm3, %v1826_v57, -inf }
 0x36e   :  { %v3898_v25 = vmax.f32 %v3896_v49, %v3897_v15  ;;  %v3905_v62 = vmax.f32 %v3903_v34, %v3904_v0  ;;  %v1835_v3 = vcombine.high %v1833_v63, %v1833_v63  ;;  %v3825_v59 = vrot.slane %v3824_v56, 4 }
 0x36f   :  { %v3886_v12 = vmax.f32 %v3884_v55, %v3885_v6  ;;  %v3892_v28 = vrot.slane %v3891_v22, 1  ;;  %v3831_v13 = vsel %vm2143_vm3, %v1834_v8, -inf  ;;  %v3838_v26 = vsel %vm2143_vm3, %v1833_v63, -inf }
 0x370   :  { %v3899_v45 = vrot.slane %v3898_v25, 1  ;;  %v3906_v30 = vrot.slane %v3905_v62, 1  ;;  %v3826_v61 = vmax.f32 %v3824_v56, %v3825_v59  ;;  %v3832_v20 = vrot.slane %v3831_v13, 4 }
 0x371   :  { %v3893_v7 = vmax.f32 %v3891_v22, %v3892_v28  ;;  %v4298_v53 = vsel %vm3936_vm4, %v3886_v12, -inf  ;;  %v3839_v5 = vrot.slane %v3838_v26, 4  ;;  %v3845_v14 = vsel %vm2143_vm3, %v1835_v3, -inf }
 0x372   :  { %v3900_v33 = vmax.f32 %v3898_v25, %v3899_v45  ;;  %v3907_v21 = vmax.f32 %v3905_v62, %v3906_v30  ;;  %v3827_v31 = vrot.slane %v3826_v61, 2  ;;  %v3833_v40 = vmax.f32 %v3831_v13, %v3832_v20 }
 0x373   :  { %v4301_v11 = vsel %vm3936_vm4, %v3893_v7, -inf  ;;  %v3840_v4 = vmax.f32 %v3838_v26, %v3839_v5  ;;  %v3846_v41 = vrot.slane %v3845_v14, 4  ;;  %v1870_v23 = vcombine.high %v734_v17, %v734_v17 }
 0x374   :  { %v4304_v48 = vsel %vm3936_vm4, %v3900_v33, -inf  ;;  %v4307_v32 = vsel %vm3936_vm4, %v3907_v21, -inf  ;;  %v3828_v49 = vmax.f32 %v3826_v61, %v3827_v31  ;;  %v3834_v34 = vrot.slane %v3833_v40, 2 }
 0x375   :  { %v3841_v9 = vrot.slane %v3840_v4, 2  ;;  %v3847_v19 = vmax.f32 %v3845_v14, %v3846_v41  ;;  %v1877_v55 = vrot.slane %v734_v17, %v9957_v47  ;;  %v1884_v24 = vrot.slane %v1870_v23, %v9957_v47 }
 0x376   :  { %v3829_v57 = vrot.slane %v3828_v49, 1  ;;  %v3835_v15 = vmax.f32 %v3833_v40, %v3834_v34  ;;  %v660_v0 = vadd.f32 %v11343_v51, %v659_v35  ;;  %v4857_v63 = vrot.slane %v11395_v1, 2 }
 0x377   :  { %v3842_v6 = vmax.f32 %v3840_v4, %v3841_v9  ;;  %v3848_v22 = vrot.slane %v3847_v19, 2  ;;  %v1885_v8 = vcombine.high %v1877_v55, %v1877_v55  ;;  %v1886_v56 = vcombine.high %v1884_v24, %v1884_v24 }
 0x378   :  { %v3830_v25 = vmax.f32 %v3828_v49, %v3829_v57  ;;  %v3836_v62 = vrot.slane %v3835_v15, 1  ;;  %v3908_v3 = vsel %vm2143_vm3, %v1877_v55, -inf  ;;  %v3922_v59 = vsel %vm2143_vm3, %v1884_v24, -inf }
 0x379   :  { %v3843_v12 = vrot.slane %v3842_v6, 1  ;;  %v3849_v17 = vmax.f32 %v3847_v19, %v3848_v22  ;;  %v3909_v28 = vrot.slane %v3908_v3, 4  ;;  %v3915_v13 = vsel %vm2143_vm3, %v1885_v8, -inf }
 0x37a   :  { %v3837_v26 = vmax.f32 %v3835_v15, %v3836_v62  ;;  %v4297_v51 = vsel %vm3936_vm4, %v3830_v25, -inf  ;;  %v3916_v45 = vrot.slane %v3915_v13, 4  ;;  %v3923_v30 = vrot.slane %v3922_v59, 4 }
 0x37b   :  { %v3844_v61 = vmax.f32 %v3842_v6, %v3843_v12  ;;  %v3850_v20 = vrot.slane %v3849_v17, 1  ;;  %v4299_v7 = vmax.f32 %v4297_v51, %v4298_v53  ;;  %v3910_v5 = vmax.f32 %v3908_v3, %v3909_v28 }
 0x37c   :  { %v4300_v14 = vsel %vm3936_vm4, %v3837_v26, -inf  ;;  %v3917_v33 = vmax.f32 %v3915_v13, %v3916_v45  ;;  %v3924_v21 = vmax.f32 %v3922_v59, %v3923_v30  ;;  %v3929_v31 = vsel %vm2143_vm3, %v1886_v56, -inf }
 0x37d   :  { %v3851_v40 = vmax.f32 %v3849_v17, %v3850_v20  ;;  %v4302_v4 = vmax.f32 %v4300_v14, %v4301_v11  ;;  %v4303_v41 = vsel %vm3936_vm4, %v3844_v61, -inf  ;;  %v3911_v23 = vrot.slane %v3910_v5, 2 }
 0x37e   :  { %v4305_v35 = vmax.f32 %v4303_v41, %v4304_v48  ;;  %v3918_v49 = vrot.slane %v3917_v33, 2  ;;  %v3925_v34 = vrot.slane %v3924_v21, 2  ;;  %v3930_v9 = vrot.slane %v3929_v31, 4  ;;  %v11414_v48 = vld [vmem:[#allocation2 + $0xd0] sm:$0xff] }
 0x37f   :  { %v4306_v19 = vsel %vm3936_vm4, %v3851_v40, -inf  ;;  %v4561_v53 = vsel %vm4449_vm5, %v4302_v4, %v4299_v7  ;;  %v3912_v55 = vmax.f32 %v3910_v5, %v3911_v23  ;;  %v732_v24 = vmax.f32 %v660_v0, 0.0  ;;  %v4684_v5 = vld [vmem:[#allocation2 + $0xd8] sm:$0x3] }
 0x380   :  { %v4308_v57 = vmax.f32 %v4306_v19, %v4307_v32  ;;  %v4562_v15 = vsel %vm4451_vm6, %v4305_v35, %v4561_v53  ;;  %v3919_v6 = vmax.f32 %v3917_v33, %v3918_v49  ;;  %v3926_v22 = vmax.f32 %v3924_v21, %v3925_v34 }
 0x381   :  { %v3913_v8 = vrot.slane %v3912_v55, 1  ;;  %v3931_v11 = vmax.f32 %v3929_v31, %v3930_v9  ;;  %v1836_v56 = vcombine.high %v732_v24, %v732_v24  ;;  %v1843_v25 = vrot.slane %v732_v24, %v9957_v47 }
 0x382   :  { %v3920_v62 = vrot.slane %v3919_v6, 1  ;;  %v3927_v3 = vrot.slane %v3926_v22, 1  ;;  %v11417_v59 = vsel %vm4453_vm7, %v4308_v57, %v4562_v15  ;;  %v11422_v32 = vsel %vm376_vm1, %v4856_v42, %v4857_v63 }
 0x383   :  { %v3914_v0 = vmax.f32 %v3912_v55, %v3913_v8  ;;  %v3932_v12 = vrot.slane %v3931_v11, 2  ;;  %v1850_v17 = vrot.slane %v1836_v56, %v9957_v47  ;;  %v1851_v28 = vcombine.high %v1843_v25, %v1843_v25  ;;  %v11441_v55 = vld [vmem:[#allocation2 + $0xe0] sm:$0xff]  ;;  %v11453_v56 = vld [vmem:[#allocation2 + $0xf0] sm:$0xff] }
 0x384   :  { %v3921_v13 = vmax.f32 %v3919_v6, %v3920_v62  ;;  %v3928_v26 = vmax.f32 %v3926_v22, %v3927_v3  ;;  %v3852_v51 = vsel %vm2143_vm3, %v1843_v25, -inf  ;;  %v4859_v45 = vrot.slane %v11414_v48, 2 }
 0x385   :  { %v3933_v30 = vmax.f32 %v3931_v11, %v3932_v12  ;;  %v11428_v61 = vsel %vm3936_vm4, %v3914_v0, -inf  ;;  %v1852_v20 = vcombine.high %v1850_v17, %v1850_v17  ;;  %v3853_v7 = vrot.slane %v3852_v51, 4  ;;  %v4686_v11 = vld [vmem:[#allocation2 + $0xe8] sm:$0x3] }
 0x386   :  { %v11431_v42 = vsel %vm3936_vm4, %v3921_v13, -inf  ;;  %v11434_v63 = vsel %vm3936_vm4, %v3928_v26, -inf  ;;  %v3859_v14 = vsel %vm2143_vm3, %v1851_v28, -inf  ;;  %v3866_v33 = vsel %vm2143_vm3, %v1850_v17, -inf  ;;  %v4688_v26 = vld [vmem:[#allocation2 + $0xf8] sm:$0x3] }
 0x387   :  { %v3934_v21 = vrot.slane %v3933_v30, 1  ;;  %v3854_v31 = vmax.f32 %v3852_v51, %v3853_v7  ;;  %v3860_v40 = vrot.slane %v3859_v14, 4  ;;  %v3867_v4 = vrot.slane %v3866_v33, 4 }
 0x388   :  { %v3873_v41 = vsel %vm2143_vm3, %v1852_v20, -inf  ;;  %v4860_v23 = vrot.slane %v4684_v5, 2  ;;  %v4760_v35 = vrot.slane %v11326_v38, 1  ;;  %v4761_v49 = vrot.slane %v11395_v1, 1 }
 0x389   :  { %v3935_v34 = vmax.f32 %v3933_v30, %v3934_v21  ;;  %v3855_v9 = vrot.slane %v3854_v31, 2  ;;  %v3861_v19 = vmax.f32 %v3859_v14, %v3860_v40  ;;  %v3868_v53 = vmax.f32 %v3866_v33, %v3867_v4 }
 0x38a   :  { %v3874_v24 = vrot.slane %v3873_v41, 4  ;;  %v11444_v57 = vsel %vm376_vm1, %v4859_v45, %v4860_v23  ;;  %v11447_v15 = vsel %vm4729_vm12, %v4760_v35, %v4761_v49  ;;  %v4763_v6 = vrot.slane %v11414_v48, 1 }
 0x38b   :  { %v11451_v22 = vsel %vm3936_vm4, %v3935_v34, -inf  ;;  %v3856_v38 = vmax.f32 %v3854_v31, %v3855_v9  ;;  %v3862_v1 = vrot.slane %v3861_v19, 2  ;;  %v3869_v8 = vrot.slane %v3868_v53, 2 }
 0x38c   :  { %v3875_v25 = vmax.f32 %v3873_v41, %v3874_v24  ;;  %v5123_v62 = vpack.c.bf16 %v11444_v57, %v11422_v32  ;;  %v4764_v3 = vrot.slane %v4684_v5, 1  ;;  %v4862_v0 = vrot.slane %v11441_v55, 2  ;;  %v11479_v24 = vld [vmem:[#allocation2 + $0x100] sm:$0xff] }
 0x38d   :  { %v3857_v12 = vrot.slane %v3856_v38, 1  ;;  %v3863_v17 = vmax.f32 %v3861_v19, %v3862_v1  ;;  %v3870_v28 = vmax.f32 %v3868_v53, %v3869_v8  ;;  %v9249_v13 = vpack.i.bf16 %v11441_v55, %v11414_v48 }
 0x38e   :  { %v3876_v51 = vrot.slane %v3875_v25, 2  ;;  %9180 = vmatprep.mubr.msk.bf16.mxu0 %vm3936_vm4, %v5123_v62  ;;  %v11462_v45 = vsel %vm4729_vm12, %v4763_v6, %v4764_v3  ;;  %v4863_v30 = vrot.slane %v4686_v11, 2  ;;  %v4865_v20 = vrot.slane %v11453_v56, 2  ;;  %v4690_v6 = vld [vmem:[#allocation2 + $0x108] sm:$0x3] }
 0x38f   :  { %v3858_v7 = vmax.f32 %v3856_v38, %v3857_v12  ;;  %v3864_v5 = vrot.slane %v3863_v17, 1  ;;  %v3871_v14 = vrot.slane %v3870_v28, 1  ;;  %v9254_v33 = vpack.i.bf16 %v11462_v45, %v11447_v15  ;;  %9250 = vrot.lane.b32.xlu0 %v9249_v13, %s9715_s21 }
 0x390   :  { %v3877_v21 = vmax.f32 %v3875_v25, %v3876_v51  ;;  %v11469_v31 = vsel %vm376_vm1, %v4862_v0, %v4863_v30  ;;  %v4866_v40 = vrot.slane %v4688_v26, 2  ;;  %v4766_v4 = vrot.slane %v11441_v55, 1  ;;  %v11488_v25 = vld [vmem:[#allocation2 + $0x110] sm:$0xff]  ;;  %v11498_v30 = vpop.permute.xlu0 %9200 }
 0x391   :  { %v3865_v41 = vmax.f32 %v3863_v17, %v3864_v5  ;;  %v3872_v23 = vmax.f32 %v3870_v28, %v3871_v14  ;;  %v4309_v35 = vsel %vm3936_vm4, %v3858_v7, -inf  ;;  %9255 = vrot.lane.b32.xlu1 %v9254_v33, %s9715_s21  ;;  %v4767_v49 = vrot.slane %v4686_v11, 1 }
 0x392   :  { %v3878_v34 = vrot.slane %v3877_v21, 1  ;;  %v4311_v9 = vmax.f32 %v4309_v35, %v11428_v61  ;;  %v11476_v19 = vsel %vm376_vm1, %v4865_v20, %v4866_v40  ;;  %v4769_v53 = vrot.slane %v11453_v56, 1  ;;  %v4692_v61 = vld [vmem:[#allocation2 + $0x118] sm:$0x3] }
 0x393   :  { %v4312_v38 = vsel %vm3936_vm4, %v3865_v41, -inf  ;;  %v4315_v1 = vsel %vm3936_vm4, %v3872_v23, -inf  ;;  %v5127_v8 = vpack.c.bf16 %v11476_v19, %v11469_v31  ;;  %v11486_v11 = vsel %vm4729_vm12, %v4766_v4, %v4767_v49  ;;  %v11520_v41 = vld [vmem:[#allocation2 + $0x138] sm:$0x3] }
 0x394   :  { %v3879_v62 = vmax.f32 %v3877_v21, %v3878_v34  ;;  %v4314_v3 = vmax.f32 %v4312_v38, %v11431_v42  ;;  %v4317_v0 = vmax.f32 %v4315_v1, %v11434_v63  ;;  %v4564_v12 = vsel %vm4455_vm8, %v4311_v9, %v11417_v59  ;;  %v11538_v1 = vld [vmem:[#allocation2 + $0x80] sm:$0xff] }
 0x395   :  { %9181 = vmatmul.mubr.msk.bf16.gmra.mxu0 %vm3936_vm4, %v5127_v8  ;;  %v4770_v17 = vrot.slane %v4688_v26, 1  ;;  %v4868_v28 = vrot.slane %v11479_v24, 2  ;;  %v9259_v13 = vpack.i.bf16 %v11479_v24, %v11453_v56  ;;  %v4869_v51 = vrot.slane %v4690_v6, 2 }
 0x396   :  { %v4318_v20 = vsel %vm3936_vm4, %v3879_v62, -inf  ;;  %v4565_v42 = vsel %vm4457_vm9, %v4314_v3, %v4564_v12  ;;  %v4871_v63 = vrot.slane %v11488_v25, 2  ;;  %v4872_v7 = vrot.slane %v4692_v61, 2  ;;  %v9631_v3 = vld [vmem:[#allocation2 + $0x88] sm:$0x3]  ;;  %v11543_v12 = vld [vmem:[#allocation2 + $0x90] sm:$0xff] }
 0x397   :  { %v4320_v59 = vmax.f32 %v4318_v20, %v11451_v22  ;;  %v4566_v5 = vsel %vm4459_vm10, %v4317_v0, %v4565_v42  ;;  %v11506_v26 = vsel %vm4729_vm12, %v4769_v53, %v4770_v17  ;;  %9260 = vrot.lane.b32.xlu0 %v9259_v13, %s9715_s21  ;;  %v11510_v14 = vsel %vm376_vm1, %v4868_v28, %v4869_v51  ;;  %v11518_v22 = vld [vmem:[#allocation2 + $0x130] sm:$0xff]  ;;  %v9633_v28 = vld [vmem:[#allocation2 + $0x98] sm:$0x3] }
 0x398   :  { %12900 = vst [vmem:[#allocation13_spill] sm:$0xff] %v11506_v26  ;;  %v9264_v33 = vpack.i.bf16 %v11506_v26, %v11486_v11  ;;  %v11515_v21 = vsel %vm376_vm1, %v4871_v63, %v4872_v7  ;;  %v4772_v40 = vrot.slane %v11479_v24, 1  ;;  %v4773_v4 = vrot.slane %v4690_v6, 1  ;;  %v9634_v51 = vld [vmem:[#allocation2 + $0x10] sm:$0xff]  ;;  %v9635_v42 = vld [vmem:[#allocation2 + $0x18] sm:$0x3]  ;;  %v9211_v7 = vpop.permute.xlu1 %9210 }
 0x399   :  { %v4567_v23 = vsel %vm4461_vm11, %v4320_v59, %v4566_v5  ;;  %v5131_v35 = vpack.c.bf16 %v11515_v21, %v11510_v14  ;;  %v4775_v49 = vrot.slane %v11488_v25, 1  ;;  %v4776_v34 = vrot.slane %v4692_v61, 1  ;;  %v9206_v61 = vpop.permute.xlu0 %9205 }
 0x39a   :  { %4599 = vst.msk [vmem:[#allocation4 + $0x78] sm:$0xff] %vm3936_vm4, %v4567_v23  ;;  %4656 = vst.msk [vmem:[#allocation2 + $0x121] sm:$0xff] %vm3936_vm4, %v4567_v23  ;;  %9265 = vrot.lane.b32.xlu1 %v9264_v33, %s9715_s21  ;;  %v11530_v9 = vsel %vm4729_vm12, %v4772_v40, %v4773_v4  ;;  %v5043_v6 = vrot.slane %v11518_v22, 2  ;;  %v5044_v38 = vrot.slane %v11520_v41, 2  ;;  %v4942_v8 = vrot.slane %v11538_v1, 1  ;;  %v9636_v23 = vld [vmem:[#allocation2] sm:$0xff] }
 0x39b   :  { %12901 = vst [vmem:[#allocation14_spill] sm:$0xff] %v11530_v9  ;;  %9184 = vmatprep.mubr.msk.bf16.mxu0 %vm3936_vm4, %v5131_v35  ;;  %v11534_v53 = vsel %vm4729_vm12, %v4775_v49, %v4776_v34  ;;  %v4943_v0 = vrot.slane %v9631_v3, 1  ;;  %v5022_v17 = vrot.slane %v11543_v12, 1  ;;  %v5023_v13 = vrot.slane %v9633_v28, 1  ;;  %v9637_v28 = vld [vmem:[#allocation2 + $0x8] sm:$0x3] }
 0x39c   :  { %12902 = vst [vmem:[#allocation15_spill] sm:$0xff] %v11534_v53  ;;  %v9274_v62 = vpack.i.bf16 %v11534_v53, %v11530_v9  ;;  %v4829_v20 = vrot.slane %v9634_v51, 2  ;;  %v4830_v63 = vrot.slane %v9635_v42, 2  ;;  %v9203_v59 = vunpack.i.h.bf16 %v11498_v30  ;;  %v9216_v53 = vpop.permute.xlu1 %9215 }
 0x39d   :  { %v11549_v5 = vsel %vm4729_vm12, %v4942_v8, %v4943_v0  ;;  %v5024_v33 = vsel %vm4729_vm12, %v5022_v17, %v5023_v13  ;;  %v9207_v40 = vunpack.i.l.bf16 %v9206_v61  ;;  %v9208_v4 = vunpack.i.h.bf16 %v9206_v61  ;;  %v11562_v61 = vld [vmem:[#allocation2 + $0xb0] sm:$0xff] }
 0x39e   :  { %9275 = vrot.lane.b32.xlu1 %v9274_v62, %s9715_s21  ;;  %v4826_v35 = vrot.slane %v9636_v23, 2  ;;  %v9284_v49 = vpack.i.bf16 %v10677_v36, %v10613_v52  ;;  %v9202_v34 = vunpack.i.l.bf16 %v11498_v30  ;;  %v5045_v3 = vsel %vm376_vm1, %v5043_v6, %v5044_v38 }
 0x39f   :  { %v4827_v62 = vrot.slane %v9637_v28, 2  ;;  %v9294_v8 = vpack.i.bf16 %v5024_v33, %v11549_v5  ;;  %v4831_v0 = vsel %vm376_vm1, %v4829_v20, %v4830_v63  ;;  %v4853_v17 = vrot.slane %v11562_v61, 2 }
 0x3a0   :  { %v5050_v13 = vsel %vm3936_vm4, %v9636_v23, %v9207_v40  ;;  %v5067_v28 = vsel %vm3936_vm4, %v4831_v0, %v9203_v59  ;;  %v4854_v33 = vrot.slane %v11267_v2, 2  ;;  %v5051_v63 = vsel %vm3936_vm4, %v9634_v51, %v9208_v4  ;;  %v9384_v2 = vld [vmem:[%s12884_s3 + $0xb8] sm:$0xff]  }
 0x3a1   :  { %v11556_v42 = vld [vmem:[#allocation2 + $0x120] sm:$0xff]  ;;  %v11558_v43 = vld [vmem:[#allocation2 + $0x128] sm:$0x3]  ;;  %v4828_v20 = vsel %vm376_vm1, %v4826_v35, %v4827_v62  ;;  %v9213_v47 = vunpack.i.h.bf16 %v9211_v7  ;;  %v9212_v9 = vunpack.i.l.bf16 %v9211_v7  ;;  %v9279_v51 = vpack.i.bf16 %v10597_v46, %v4831_v0  ;;  %v9221_v35 = vpop.permute.xlu0 %9220 }
 0x3a2   :  { %9285 = vrot.lane.b32.xlu1 %v9284_v49, %s9715_s21  ;;  %v4967_v30 = vrot.slane %v11556_v42, 2  ;;  %v9269_v6 = vpack.i.bf16 %v11556_v42, %v11488_v25  ;;  %v4968_v38 = vrot.slane %v11558_v43, 2  ;;  %v5066_v23 = vsel %vm3936_vm4, %v4828_v20, %v9202_v34 }
 0x3a3   :  { %v5102_v49 = vpack.c.bf16 %v5051_v63, %v5050_v13  ;;  %v5103_v59 = vpack.c.bf16 %v5067_v28, %v5066_v23  ;;  %v9218_v4 = vunpack.i.h.bf16 %v9216_v53  ;;  %v11588_v62 = vsel %vm376_vm1, %v4853_v17, %v4854_v33  ;;  %v9639_v17 = vld [vmem:[#allocation2 + $0x20] sm:$0xff]  ;;  %v9640_v13 = vld [vmem:[#allocation2 + $0x30] sm:$0xff]  ;;  %v9226_v63 = vpop.permute.xlu1 %9225 }
 0x3a4   :  { %9270 = vrot.lane.b32.xlu0 %v9269_v6, %s9715_s21  ;;  %v11577_v40 = vsel %vm376_vm1, %v4967_v30, %v4968_v38  ;;  %v9217_v7 = vunpack.i.l.bf16 %v9216_v53  ;;  %v5068_v34 = vsel %vm3936_vm4, %v10597_v46, %v9212_v9  ;;  %v9223_v9 = vunpack.i.h.bf16 %v9221_v35  ;;  %v9387_v6 = vld [vmem:[%s12884_s3 + $0xe8] sm:$0xff]  }
 0x3a5   :  { %v5135_v26 = vpack.c.bf16 %v5045_v3, %v11577_v40  ;;  %5487 = vmatprep.mubr.bf16.mxu1 %v5103_v59  ;;  %v5069_v3 = vsel %vm3936_vm4, %v10613_v52, %v9213_v47  ;;  %v5053_v46 = vsel %vm3936_vm4, %v9640_v13, %v9218_v4  ;;  %v9386_v47 = vld [vmem:[%s12884_s3 + $0xb0] sm:$0xff]   ;;  %v9289_v52 = vpack.i.bf16 %v11012_v18, %v10693_v37  ;;  %v9231_v28 = vpop.permute.xlu0 %9230  ;;  %v9641_v13 = vld [vmem:[#allocation2 + $0x40] sm:$0xff] }
 0x3a6   :  { %9295 = vrot.lane.b32.xlu1 %v9294_v8, %s9715_s21  ;;  %v9385_v8 = vld [vmem:[%s12884_s3 + $0xf0] sm:$0xff]   ;;  %5488 = vmatmul.mubr.bf16.vlgmr.msra.gmra.mxu1 %v5102_v49  ;;  %v5107_v0 = vpack.c.bf16 %v5069_v3, %v5068_v34  ;;  %v5052_v53 = vsel %vm3936_vm4, %v9639_v17, %v9217_v7  ;;  %v9222_v30 = vunpack.i.l.bf16 %v9221_v35  ;;  %v5071_v38 = vsel %vm3936_vm4, %v10693_v37, %v9223_v9  ;;  %v9388_v37 = vld [vmem:[%s12884_s3 + $0xa8] sm:$0xff]  }
 0x3a7   :  { %9185 = vmatmul.mubr.msk.bf16.gmra.mxu0 %vm3936_vm4, %v5135_v26  ;;  %v9304_v26 = vpack.i.bf16 %v11422_v32, %v11588_v62  ;;  %9021 = vmatpush3.bf16.msra.mxu1 %v9384_v2  ;;  %v9314_v33 = vpack.i.bf16 %v11510_v14, %v11476_v19  ;;  %v11616_v20 = vpack.c.bf16 %v5053_v46, %v5052_v53  ;;  %v4945_v2 = vrot.slane %v11556_v42, 1  ;;  %v9642_v9 = vld [vmem:[#allocation2 + $0x50] sm:$0xff] }
 0x3a8   :  { %9280 = vrot.lane.b32.xlu0 %v9279_v51, %s9715_s21  ;;  %5495 = vmatprep.mubr.bf16.mxu1 %v5107_v0  ;;  %v5070_v23 = vsel %vm3936_vm4, %v10677_v36, %v9222_v30  ;;  %v9299_v49 = vpack.i.bf16 %v11120_v16, %v11024_v27  ;;  %v4946_v51 = vrot.slane %v11558_v43, 1  ;;  %v9233_v4 = vunpack.i.h.bf16 %v9231_v28  ;;  %v9389_v36 = vld [vmem:[%s12884_s3 + $0xe0] sm:$0xff]  }
 0x3a9   :  { %9022 = vmatprep.subr.bf16.mxu1 %v9385_v8  ;;  %v5111_v59 = vpack.c.bf16 %v5071_v38, %v5070_v23  ;;  %v9232_v35 = vunpack.i.l.bf16 %v9231_v28  ;;  %v5025_v16 = vrot.slane %v11518_v22, 1  ;;  %v5026_v7 = vrot.slane %v11520_v41, 1  ;;  %v9390_v43 = vld [vmem:[%s12884_s3 + $0xa0] sm:$0xff]   ;;  %v9393_v38 = vld [vmem:[%s12884_s3 + $0xd0] sm:$0xff]   ;;  %v9395_v23 = vld [vmem:[%s12884_s3 + $0xc8] sm:$0xff]  }
 0x3aa   :  { %9305 = vrot.lane.b32.xlu1 %v9304_v26, %s9715_s21  ;;  %v9228_v34 = vunpack.i.h.bf16 %v9226_v63  ;;  %v9227_v3 = vunpack.i.l.bf16 %v9226_v63  ;;  %v9324_v8 = vpack.i.bf16 %v11577_v40, %v11515_v21  ;;  %v9309_v41 = vpack.i.bf16 %v11469_v31, %v11444_v57  ;;  %v9391_v40 = vld [vmem:[%s12884_s3 + $0xd8] sm:$0xff]   ;;  %v9394_v63 = vld [vmem:[%s12884_s3 + $0x90] sm:$0xff]  }
 0x3ab   :  { %9023 = vmatpush3.bf16.msra.mxu1 %v9386_v47  ;;  %v5072_v26 = vsel %vm3936_vm4, %v11012_v18, %v9232_v35  ;;  %v5073_v0 = vsel %vm3936_vm4, %v11024_v27, %v9233_v4  ;;  %v11651_v17 = vsel %vm4729_vm12, %v4945_v2, %v4946_v51  ;;  %v5027_v53 = vsel %vm4729_vm12, %v5025_v16, %v5026_v7  ;;  %v9236_v18 = vpop.permute.xlu1 %9235  ;;  %v9396_v4 = vld [vmem:[%s12884_s3 + $0x88] sm:$0xff]   ;;  %v9646_v7 = vld [vmem:[#allocation2 + $0xa0] sm:$0xff] }
 0x3ac   :  { %9290 = vrot.lane.b32.xlu0 %v9289_v52, %s9715_s21  ;;  %9024 = vmatprep.subr.bf16.mxu1 %v9387_v6  ;;  %v5054_v46 = vsel %vm3936_vm4, %v9641_v13, %v9227_v3  ;;  %v5055_v47 = vsel %vm3936_vm4, %v9642_v9, %v9228_v34  ;;  %v5115_v27 = vpack.c.bf16 %v5073_v0, %v5072_v26  ;;  %v9392_v52 = vld [vmem:[%s12884_s3 + $0x98] sm:$0xff]   ;;  %v9238_v28 = vunpack.i.h.bf16 %v9236_v18  ;;  %v9645_v35 = vld [vmem:[#allocation2 + $0xa8] sm:$0x3]  ;;  %v9397_v3 = vld [vmem:[%s12884_s3 + $0xc0] sm:$0xff]  }
 0x3ad   :  { %v9319_v30 = vpack.i.bf16 %v5027_v53, %v11651_v17  ;;  %v11661_v6 = vpack.c.bf16 %v5055_v47, %v5054_v46  ;;  %v4850_v34 = vrot.slane %v9646_v7, 2 }
 0x3ae   :  { %9315 = vrot.lane.b32.xlu1 %v9314_v33, %s9715_s21  ;;  %5496 = vmatmul.mubr.bf16.gmra.mxu1 %v11616_v20  ;;  %v9237_v33 = vunpack.i.l.bf16 %v9236_v18 }
 0x3af   :  { %5503 = vmatprep.mubr.bf16.mxu1 %v5111_v59  ;;  %9025 = vmatpush3.bf16.msra.mxu1 %v9388_v37  ;;  %v9644_v37 = vld [vmem:[#allocation2 + $0x70] sm:$0xff]  ;;  %v9246_v51 = vpop.permute.xlu1 %9245 }
 0x3b0   :  { %9300 = vrot.lane.b32.xlu0 %v9299_v49, %s9715_s21  ;;  %9026 = vmatprep.subr.bf16.mxu1 %v9389_v36  ;;  %v9643_v49 = vld [vmem:[#allocation2 + $0x60] sm:$0xff]  ;;  %v5057_v2 = vsel %vm3936_vm4, %v9644_v37, %v9238_v28  ;;  %v4851_v36 = vrot.slane %v9645_v35, 2 }
 0x3b1   :  { %v5056_v59 = vsel %vm3936_vm4, %v9643_v49, %v9237_v33 }
 0x3b2   :  { %9325 = vrot.lane.b32.xlu1 %v9324_v8, %s9715_s21  ;;  %v11679_v16 = vpack.c.bf16 %v5057_v2, %v5056_v59  ;;  %v9248_v8 = vunpack.i.h.bf16 %v9246_v51  ;;  %v4852_v0 = vsel %vm376_vm1, %v4850_v34, %v4851_v36  ;;  %v9647_v59 = vld [vmem:[#allocation2 + $0xc0] sm:$0xff] }
 0x3b3   :  { %9027 = vmatpush3.bf16.msra.mxu1 %v9390_v43  ;;  %v9247_v43 = vunpack.i.l.bf16 %v9246_v51 }
 0x3b4   :  { %9310 = vrot.lane.b32.xlu0 %v9309_v41, %s9715_s21  ;;  %9028 = vmatprep.subr.bf16.mxu1 %v9391_v40  ;;  %v9398_v41 = vld [vmem:[%s12884_s3 + $0x80] sm:$0xff]   ;;  %v5059_v46 = vsel %vm3936_vm4, %v11562_v61, %v9248_v8 }
 0x3b5   :  { %v5058_v13 = vsel %vm3936_vm4, %v9646_v7, %v9247_v43 }
 0x3b6   :  { %5504 = vmatmul.mubr.bf16.gmra.mxu1 %v11661_v6 }
 0x3b7   :  { %5511 = vmatprep.mubr.bf16.mxu1 %v5115_v27  ;;  %9029 = vmatpush3.bf16.msra.mxu1 %v9392_v52  ;;  %v5119_v27 = vpack.c.bf16 %v5059_v46, %v5058_v13 }
 0x3b8   :  { %9320 = vrot.lane.b32.xlu0 %v9319_v30, %s9715_s21  ;;  %9030 = vmatprep.subr.bf16.mxu1 %v9393_v38 }
 0x3bb   :  { %9031 = vmatpush3.bf16.msra.mxu1 %v9394_v63 }
 0x3bc   :  { %9032 = vmatprep.subr.bf16.mxu1 %v9395_v23 }
 0x3be   :  { %5512 = vmatmul.mubr.bf16.gmra.mxu1 %v11679_v16 }
 0x3bf   :  { %9033 = vmatpush3.bf16.msra.mxu1 %v9396_v4 }
 0x3c0   :  { %9034 = vmatprep.subr.bf16.mxu1 %v9397_v3 }
 0x3c2   :  { %v9241_v26 = vpop.permute.xlu0 %9240 }
 0x3c3   :  { %v9243_v40 = vunpack.i.h.bf16 %v9241_v26  ;;  %v9242_v53 = vunpack.i.l.bf16 %v9241_v26  ;;  %9035 = vmatpush3.bf16.msra.mxu1 %v9398_v41 }
 0x3c5   :  { %v5074_v9 = vsel %vm3936_vm4, %v4852_v0, %v9242_v53  ;;  %v5075_v47 = vsel %vm3936_vm4, %v11588_v62, %v9243_v40 }
 0x3c6   :  { %v5120_v18 = vpack.c.bf16 %v5075_v47, %v5074_v9 }
 0x3c8   :  { %5519 = vmatprep.mubr.bf16.mxu1 %v5120_v18 }
 0x3c9   :  { %5520 = vmatmul.mubr.bf16.gmra.mxu1 %v5119_v27 }
 0x401   :  { %v9251_v52 = vpop.permute.xlu0 %9250 }
 0x402   :  { %v9253_v30 = vunpack.i.h.bf16 %v9251_v52  ;;  %v9252_v38 = vunpack.i.l.bf16 %v9251_v52 }
 0x403   :  { %v9256_v28 = vpop.permute.xlu1 %9255 }
 0x404   :  { %v9258_v33 = vunpack.i.h.bf16 %v9256_v28  ;;  %v9257_v63 = vunpack.i.l.bf16 %v9256_v28  ;;  %v5076_v23 = vsel %vm3936_vm4, %v11422_v32, %v9252_v38  ;;  %v5077_v61 = vsel %vm3936_vm4, %v11444_v57, %v9253_v30 }
 0x405   :  { %v5124_v49 = vpack.c.bf16 %v5077_v61, %v5076_v23 }
 0x406   :  { %v5060_v62 = vsel %vm3936_vm4, %v9647_v59, %v9257_v63  ;;  %v5061_v37 = vsel %vm3936_vm4, %v11414_v48, %v9258_v33 }
 0x407   :  { %5527 = vmatprep.mubr.bf16.mxu1 %v5124_v49  ;;  %v11702_v2 = vpack.c.bf16 %v5061_v37, %v5060_v62 }
 0x409   :  { %5528 = vmatmul.mubr.bf16.gmra.mxu1 %v11702_v2  ;;  %v9261_v51 = vpop.permute.xlu0 %9260 }
 0x40a   :  { %v9263_v4 = vunpack.i.h.bf16 %v9261_v51  ;;  %v9262_v35 = vunpack.i.l.bf16 %v9261_v51 }
 0x40c   :  { %v9266_v36 = vpop.permute.xlu1 %9265  ;;  %v5078_v32 = vsel %vm3936_vm4, %v11469_v31, %v9262_v35  ;;  %v5079_v57 = vsel %vm3936_vm4, %v11476_v19, %v9263_v4 }
 0x40d   :  { %v9268_v7 = vunpack.i.h.bf16 %v9266_v36  ;;  %v9267_v34 = vunpack.i.l.bf16 %v9266_v36  ;;  %v5128_v3 = vpack.c.bf16 %v5079_v57, %v5078_v32 }
 0x40f   :  { %5535 = vmatprep.mubr.bf16.mxu1 %v5128_v3  ;;  %v5062_v48 = vsel %vm3936_vm4, %v11441_v55, %v9267_v34  ;;  %v5063_v8 = vsel %vm3936_vm4, %v11453_v56, %v9268_v7 }
 0x410   :  { %v11713_v43 = vpack.c.bf16 %v5063_v8, %v5062_v48  ;;  %v9276_v41 = vpop.permute.xlu1 %9275 }
 0x411   :  { %v9278_v26 = vunpack.i.h.bf16 %v9276_v41  ;;  %v9277_v31 = vunpack.i.l.bf16 %v9276_v41 }
 0x412   :  { %5536 = vmatmul.mubr.bf16.gmra.mxu1 %v11713_v43 }
 0x413   :  { %v5064_v53 = vsel %vm3936_vm4, %v11479_v24, %v9277_v31  ;;  %v5065_v13 = vsel %vm3936_vm4, %v11488_v25, %v9278_v26  ;;  %v12903_v31 = vld [vmem:[#allocation13_spill] sm:$0xff] }
 0x414   :  { %v5130_v47 = vpack.c.bf16 %v5065_v13, %v5064_v53  ;;  %v9286_v52 = vpop.permute.xlu1 %9285 }
 0x415   :  { %v9288_v30 = vunpack.i.h.bf16 %v9286_v52  ;;  %v9287_v38 = vunpack.i.l.bf16 %v9286_v52 }
 0x416   :  { %v9271_v0 = vpop.permute.xlu0 %9270 }
 0x417   :  { %v9273_v40 = vunpack.i.h.bf16 %v9271_v0  ;;  %v9272_v19 = vunpack.i.l.bf16 %v9271_v0  ;;  %v5085_v28 = vsel %vm3936_vm4, %v10778_v58, %v9288_v30 }
 0x418   :  { %v9296_v33 = vpop.permute.xlu1 %9295 }
 0x419   :  { %v5080_v55 = vsel %vm3936_vm4, %v11510_v14, %v9272_v19  ;;  %v5081_v56 = vsel %vm3936_vm4, %v11515_v21, %v9273_v40  ;;  %v5084_v21 = vsel %vm3936_vm4, %v10767_v50, %v9287_v38  ;;  %v9298_v61 = vunpack.i.h.bf16 %v9296_v33  ;;  %v12904_v40 = vld [vmem:[#allocation14_spill] sm:$0xff] }
 0x41a   :  { %v9281_v46 = vpop.permute.xlu0 %9280  ;;  %v5132_v9 = vpack.c.bf16 %v5081_v56, %v5080_v55  ;;  %v5108_v63 = vpack.c.bf16 %v5085_v28, %v5084_v21 }
 0x41b   :  { %v9283_v18 = vunpack.i.h.bf16 %v9281_v46  ;;  %v9282_v27 = vunpack.i.l.bf16 %v9281_v46  ;;  %v5099_v59 = vsel %vm3936_vm4, %v11543_v12, %v9298_v61  ;;  %v12905_v46 = vld [vmem:[#allocation15_spill] sm:$0xff] }
 0x41c   :  { %5543 = vmatprep.mubr.bf16.mxu1 %v5132_v9 }
 0x41d   :  { %5544 = vmatmul.mubr.bf16.gmra.mxu1 %v5130_v47  ;;  %v5083_v24 = vsel %vm3936_vm4, %v10745_v10, %v9283_v18  ;;  %v5082_v25 = vsel %vm3936_vm4, %v10526_v54, %v9282_v27  ;;  %v9297_v54 = vunpack.i.l.bf16 %v9296_v33 }
 0x41e   :  { %5584 = vmatprep.mubr.bf16.mxu1 %v11616_v20  ;;  %v5104_v14 = vpack.c.bf16 %v5083_v24, %v5082_v25  ;;  %v9291_v20 = vpop.permute.xlu0 %9290 }
 0x41f   :  { %v9293_v10 = vunpack.i.h.bf16 %v9291_v20  ;;  %v9292_v23 = vunpack.i.l.bf16 %v9291_v20  ;;  %v5098_v58 = vsel %vm3936_vm4, %v11538_v1, %v9297_v54  ;;  %v9399_v54 = vld [vmem:[%s12886_s5 + $0x70] ss:$8 sps:$4 sm:$0xff]  }
 0x420   :  { %v5117_v4 = vpack.c.bf16 %v5099_v59, %v5098_v58 }
 0x421   :  { %v5086_v49 = vsel %vm3936_vm4, %v10794_v44, %v9292_v23 }
 0x422   :  { %v9301_v50 = vpop.permute.xlu0 %9300 }
 0x423   :  { %v9303_v37 = vunpack.i.h.bf16 %v9301_v50  ;;  %v9302_v51 = vunpack.i.l.bf16 %v9301_v50 }
 0x425   :  { %5585 = vmatmul.mubr.bf16.vlgmr.msra.gmra.mxu1 %v5104_v14  ;;  %v5089_v44 = vsel %vm3936_vm4, %v11549_v5, %v9303_v37 }
 0x426   :  { %5592 = vmatprep.mubr.bf16.mxu1 %v11661_v6  ;;  %v5087_v6 = vsel %vm3936_vm4, %v11032_v39, %v9293_v10  ;;  %v9306_v39 = vpop.permute.xlu1 %9305  ;;  %v9311_v57 = vpop.permute.xlu0 %9310 }
 0x427   :  { %v5112_v62 = vpack.c.bf16 %v5087_v6, %v5086_v49  ;;  %v9308_v36 = vunpack.i.h.bf16 %v9306_v39  ;;  %v9307_v32 = vunpack.i.l.bf16 %v9306_v39  ;;  %v9313_v34 = vunpack.i.h.bf16 %v9311_v57  ;;  %v9401_v49 = vld [vmem:[%s12886_s5 + $0x74] ss:$8 sps:$4 sm:$0xff]   ;;  %v9404_v39 = vld [vmem:[%s12886_s5 + $0x64] ss:$8 sps:$4 sm:$0xff]  }
 0x428   :  { %7722 = vmatprep.subr.bf16.mxu1 %v9401_v49  ;;  %v9450_v49 = vld [vmem:[%s12886_s5 + $0xe0] ss:$8 sps:$4 sm:$0xff]  }
 0x429   :  { %v5090_v1 = vsel %vm3936_vm4, %v11289_v60, %v9307_v32  ;;  %v5091_v12 = vsel %vm3936_vm4, %v11447_v15, %v9308_v36  ;;  %v5093_v3 = vsel %vm3936_vm4, %v11486_v11, %v9313_v34  ;;  %7723 = vmatpush1.bf16.msra.mxu1 %v9399_v54  ;;  %v9407_v36 = vld [vmem:[%s12886_s5 + $0x174] ss:$8 sps:$4 sm:$0xff]   ;;  %v9413_v34 = vld [vmem:[%s12886_s5 + $0x164] ss:$8 sps:$4 sm:$0xff]  }
 0x42a   :  { %v5121_v7 = vpack.c.bf16 %v5091_v12, %v5090_v1  ;;  %v9321_v48 = vpop.permute.xlu0 %9320  ;;  %7724 = vmatprep.subr.bf16.mxu1 %v9404_v39  ;;  %7775 = vmatprep.subr.bf16.mxu0 %v9407_v36  ;;  %v9408_v12 = vld [vmem:[%s12886_s5 + $0x50] ss:$8 sps:$4 sm:$0xff]   ;;  %v9458_v39 = vld [vmem:[%s12886_s5 + $0xd4] ss:$8 sps:$4 sm:$0xff]   ;;  %v11920_v36 = vpop.f32.mrf.mxu0 }
 0x42b   :  { %v9323_v26 = vunpack.i.h.bf16 %v9321_v48  ;;  %v9322_v15 = vunpack.i.l.bf16 %v9321_v48  ;;  %v9420_v48 = vld [vmem:[%s12886_s5 + $0x30] ss:$8 sps:$4 sm:$0xff]  }
 0x42d   :  { %5593 = vmatmul.mubr.bf16.gmra.mxu1 %v5108_v63  ;;  %v5101_v11 = vsel %vm3936_vm4, %v11518_v22, %v9323_v26  ;;  %v9426_v26 = vld [vmem:[%s12886_s5 + $0x20] ss:$8 sps:$4 sm:$0xff]  }
 0x42e   :  { %5600 = vmatprep.mubr.bf16.mxu1 %v11679_v16  ;;  %v5088_v16 = vsel %vm3936_vm4, %v11035_v29, %v9302_v51  ;;  %v9312_v29 = vunpack.i.l.bf16 %v9311_v57  ;;  %v9410_v57 = vld [vmem:[%s12886_s5 + $0x54] ss:$8 sps:$4 sm:$0xff]  }
 0x42f   :  { %v5116_v35 = vpack.c.bf16 %v5089_v44, %v5088_v16  ;;  %v9402_v44 = vld [vmem:[%s12886_s5 + $0x60] ss:$8 sps:$4 sm:$0xff]  }
 0x430   :  { %v5092_v5 = vsel %vm3936_vm4, %v11462_v45, %v9312_v29  ;;  %v5100_v45 = vsel %vm3936_vm4, %v11556_v42, %v9322_v15  ;;  %7725 = vmatpush1.bf16.msra.mxu1 %v9402_v44  ;;  %v9414_v29 = vld [vmem:[%s12886_s5 + $0x40] ss:$8 sps:$4 sm:$0xff]   ;;  %v9428_v15 = vld [vmem:[%s12886_s5 + $0x24] ss:$8 sps:$4 sm:$0xff]   ;;  %v9456_v44 = vld [vmem:[%s12886_s5 + $0xd0] ss:$8 sps:$4 sm:$0xff]  }
 0x431   :  { %v5125_v8 = vpack.c.bf16 %v5093_v3, %v5092_v5  ;;  %v5134_v56 = vpack.c.bf16 %v5101_v11, %v5100_v45  ;;  %7726 = vmatprep.subr.bf16.mxu1 %v9410_v57  ;;  %v9416_v5 = vld [vmem:[%s12886_s5 + $0x44] ss:$8 sps:$4 sm:$0xff]   ;;  %v9417_v3 = vld [vmem:[%s12886_s5 + $0x150] ss:$8 sps:$4 sm:$0xff]  }
 0x432   :  { %v9437_v45 = vld [vmem:[%s12886_s5 + $0x124] ss:$8 sps:$4 sm:$0xff]  }
 0x434   :  { %7727 = vmatpush1.bf16.msra.mxu1 %v9408_v12  ;;  %v9461_v12 = vld [vmem:[%s12886_s5 + $0x1e4] ss:$8 sps:$4 sm:$0xff]  }
 0x435   :  { %5601 = vmatmul.mubr.bf16.gmra.mxu1 %v5112_v62  ;;  %7728 = vmatprep.subr.bf16.mxu1 %v9416_v5 }
 0x436   :  { %5608 = vmatprep.mubr.bf16.mxu1 %v5117_v4 }
 0x438   :  { %7729 = vmatpush1.bf16.msra.mxu1 %v9414_v29  ;;  %v5683_v29 = vpop.f32.mrf.mxu0 }
 0x43d   :  { %5609 = vmatmul.mubr.bf16.gmra.mxu1 %v5116_v35  ;;  %v9405_v35 = vld [vmem:[%s12886_s5 + $0x170] ss:$8 sps:$4 sm:$0xff]  }
 0x43e   :  { %5616 = vmatprep.mubr.bf16.mxu1 %v11702_v2  ;;  %v9316_v2 = vpop.permute.xlu1 %9315  ;;  %7776 = vmatpush1.bf16.msra.mxu0 %v9405_v35  ;;  %v9459_v35 = vld [vmem:[%s12886_s5 + $0x1e0] ss:$8 sps:$4 sm:$0xff]  }
 0x43f   :  { %v9318_v60 = vunpack.i.h.bf16 %v9316_v2  ;;  %v9317_v41 = vunpack.i.l.bf16 %v9316_v2  ;;  %7777 = vmatprep.subr.bf16.mxu0 %v9413_v34  ;;  %v9419_v2 = vld [vmem:[%s12886_s5 + $0x154] ss:$8 sps:$4 sm:$0xff]  }
 0x441   :  { %v5094_v0 = vsel %vm3936_vm4, %v12903_v31, %v9317_v41  ;;  %v9425_v41 = vld [vmem:[%s12886_s5 + $0x144] ss:$8 sps:$4 sm:$0xff]   ;;  %v9429_v31 = vld [vmem:[%s12886_s5 + $0x130] ss:$8 sps:$4 sm:$0xff]  }
 0x442   :  { %v9326_v19 = vpop.permute.xlu1 %9325 }
 0x443   :  { %v9328_v13 = vunpack.i.h.bf16 %v9326_v19  ;;  %v9327_v55 = vunpack.i.l.bf16 %v9326_v19  ;;  %v9435_v19 = vld [vmem:[%s12886_s5 + $0x120] ss:$8 sps:$4 sm:$0xff]  }
 0x445   :  { %5617 = vmatmul.mubr.bf16.gmra.mxu1 %v5121_v7  ;;  %v5096_v9 = vsel %vm3936_vm4, %v12905_v46, %v9327_v55  ;;  %v9411_v7 = vld [vmem:[%s12886_s5 + $0x160] ss:$8 sps:$4 sm:$0xff]   ;;  %v9441_v55 = vld [vmem:[%s12886_s5 + $0x110] ss:$8 sps:$4 sm:$0xff]   ;;  %v9443_v46 = vld [vmem:[%s12886_s5 + $0x114] ss:$8 sps:$4 sm:$0xff]  }
 0x446   :  { %5624 = vmatprep.mubr.bf16.mxu1 %v11713_v43  ;;  %v5095_v43 = vsel %vm3936_vm4, %v12904_v40, %v9318_v60  ;;  %7778 = vmatpush1.bf16.msra.mxu0 %v9411_v7  ;;  %v9423_v60 = vld [vmem:[%s12886_s5 + $0x140] ss:$8 sps:$4 sm:$0xff]   ;;  %v9432_v40 = vld [vmem:[%s12886_s5 + $0x10] ss:$8 sps:$4 sm:$0xff]  }
 0x447   :  { %v5129_v53 = vpack.c.bf16 %v5095_v43, %v5094_v0  ;;  %7779 = vmatprep.subr.bf16.mxu0 %v9419_v2  ;;  %v9431_v0 = vld [vmem:[%s12886_s5 + $0x134] ss:$8 sps:$4 sm:$0xff]   ;;  %v8705_v7 = vld [vmem:[%s12885_s4] ss:$0 sm:$0xff] }
 0x448   :  { %v9434_v43 = vld [vmem:[%s12886_s5 + $0x14] ss:$8 sps:$4 sm:$0xff]  }
 0x44a   :  { %7780 = vmatpush1.bf16.msra.mxu0 %v9417_v3 }
 0x44b   :  { %7781 = vmatprep.subr.bf16.mxu0 %v9425_v41  ;;  %v11931_v41 = vpop.f32.mrf.mxu0 }
 0x44d   :  { %5625 = vmatmul.mubr.bf16.gmra.mxu1 %v5125_v8  ;;  %v9422_v8 = vld [vmem:[%s12886_s5 + $0x34] ss:$8 sps:$4 sm:$0xff]  }
 0x44e   :  { %5632 = vmatprep.mubr.bf16.mxu1 %v5130_v47  ;;  %v5097_v47 = vsel %vm3936_vm4, %v11651_v17, %v9328_v13  ;;  %7730 = vmatprep.subr.bf16.mxu1 %v9422_v8  ;;  %v9440_v13 = vld [vmem:[%s12886_s5 + $0x4] ss:$8 sps:$4 sm:$0xff]  }
 0x44f   :  { %v5133_v18 = vpack.c.bf16 %v5097_v47, %v5096_v9  ;;  %7731 = vmatpush1.bf16.msra.mxu1 %v9420_v48  ;;  %7782 = vmatpush1.bf16.msra.mxu0 %v9423_v60 }
 0x450   :  { %7732 = vmatprep.subr.bf16.mxu1 %v9428_v15  ;;  %7783 = vmatprep.subr.bf16.mxu0 %v9431_v0 }
 0x453   :  { %7733 = vmatpush1.bf16.msra.mxu1 %v9426_v26  ;;  %7784 = vmatpush1.bf16.msra.mxu0 %v9429_v31 }
 0x454   :  { %7734 = vmatprep.subr.bf16.mxu1 %v9434_v43  ;;  %7785 = vmatprep.subr.bf16.mxu0 %v9437_v45 }
 0x455   :  { %5633 = vmatmul.mubr.bf16.gmra.mxu1 %v5129_v53  ;;  %v9438_v53 = vld [vmem:[%s12886_s5] ss:$8 sps:$4 sm:$0xff]  }
 0x456   :  { %5640 = vmatprep.mubr.bf16.mxu1 %v5134_v56 }
 0x457   :  { %7735 = vmatpush1.bf16.msra.mxu1 %v9432_v40  ;;  %7786 = vmatpush1.bf16.msra.mxu0 %v9435_v19 }
 0x458   :  { %7736 = vmatprep.subr.bf16.mxu1 %v9440_v13  ;;  %7787 = vmatprep.subr.bf16.mxu0 %v9443_v46 }
 0x45b   :  { %7737 = vmatpush1.bf16.msra.mxu1 %v9438_v53  ;;  %7788 = vmatpush1.bf16.msra.mxu0 %v9441_v55 }
 0x45d   :  { %5641 = vmatmul.mubr.bf16.gmra.mxu1 %v5133_v18 }
 0x466   :  { %v8972_v27 = vpop.f32.mrf.mxu1 }
 0x468   :  { %v8973_v24 = vpop.f32.mrf.mxu1 }
 0x469   :  { %v11769_v42 = vadd.f32 %v8973_v24, %v8972_v27 }
 0x46a   :  { %v11771_v25 = vpop.f32.mrf.mxu1 }
 0x46b   :  { %v5490_v3 = vadd.f32 %v11769_v42, %v8705_v7 }
 0x46c   :  { %v11773_v22 = vpop.f32.mrf.mxu1 }
 0x46d   :  { %v8977_v2 = vadd.f32 %v11773_v22, %v11771_v25 }
 0x46e   :  { %v8978_v52 = vpop.f32.mrf.mxu1 }
 0x46f   :  { %v5493_v15 = vadd.f32 %v8977_v2, %v8705_v7 }
 0x470   :  { %v8979_v14 = vpop.f32.mrf.mxu1 }
 0x471   :  { %v11775_v30 = vadd.f32 %v8979_v14, %v8978_v52  ;;  %v9444_v52 = vld [vmem:[%s12886_s5 + $0xf0] ss:$8 sps:$4 sm:$0xff]   ;;  %v9446_v14 = vld [vmem:[%s12886_s5 + $0xf4] ss:$8 sps:$4 sm:$0xff]  }
 0x472   :  { %v8981_v38 = vpop.f32.mrf.mxu1  ;;  %7738 = vmatprep.subr.bf16.mxu1 %v9446_v14 }
 0x473   :  { %7739 = vmatpush2.bf16.msra.mxu1 %v9444_v52  ;;  %v5498_v40 = vadd.f32 %v11775_v30, %v8705_v7 }
 0x474   :  { %v8982_v21 = vpop.f32.mrf.mxu1 }
 0x475   :  { %v11777_v28 = vadd.f32 %v8982_v21, %v8981_v38  ;;  %v9447_v38 = vld [vmem:[%s12886_s5 + $0x100] ss:$8 sps:$4 sm:$0xff]  }
 0x476   :  { %v8984_v20 = vpop.f32.mrf.mxu1 }
 0x477   :  { %v11935_v43 = vadd.f32 %v11777_v28, %v8705_v7 }
 0x478   :  { %v8985_v17 = vpop.f32.mrf.mxu1 }
 0x479   :  { %v11779_v33 = vadd.f32 %v8985_v17, %v8984_v20  ;;  %v9449_v20 = vld [vmem:[%s12886_s5 + $0x104] ss:$8 sps:$4 sm:$0xff]  }
 0x47a   :  { %v8987_v63 = vpop.f32.mrf.mxu1  ;;  %7789 = vmatprep.subr.bf16.mxu0 %v9449_v20 }
 0x47b   :  { %7790 = vmatpush1.bf16.msra.mxu0 %v9447_v38  ;;  %v11938_v42 = vadd.f32 %v11779_v33, %v8705_v7 }
 0x47c   :  { %v8988_v10 = vpop.f32.mrf.mxu1 }
 0x47d   :  { %v11781_v23 = vadd.f32 %v8988_v10, %v8987_v63 }
 0x47e   :  { %v8990_v61 = vpop.f32.mrf.mxu1 }
 0x47f   :  { %v11941_v25 = vadd.f32 %v11781_v23, %v8705_v7 }
 0x480   :  { %v8991_v6 = vpop.f32.mrf.mxu1 }
 0x481   :  { %v11789_v50 = vadd.f32 %v8991_v6, %v8990_v61  ;;  %v9452_v6 = vld [vmem:[%s12886_s5 + $0xe4] ss:$8 sps:$4 sm:$0xff]  }
 0x482   :  { %v8993_v58 = vpop.f32.mrf.mxu1  ;;  %7740 = vmatprep.subr.bf16.mxu1 %v9452_v6  ;;  %v9464_v6 = vld [vmem:[%s12886_s5 + $0xc4] ss:$8 sps:$4 sm:$0xff]  }
 0x483   :  { %7741 = vmatpush2.bf16.msra.mxu1 %v9450_v49  ;;  %v11944_v53 = vadd.f32 %v11789_v50, %v8705_v7  ;;  %v9462_v49 = vld [vmem:[%s12886_s5 + $0xc0] ss:$8 sps:$4 sm:$0xff]  }
 0x484   :  { %v8994_v59 = vpop.f32.mrf.mxu1  ;;  %7742 = vmatprep.subr.bf16.mxu1 %v9458_v39  ;;  %v9467_v39 = vld [vmem:[%s12886_s5 + $0x1d4] ss:$8 sps:$4 sm:$0xff]  }
 0x485   :  { %v11791_v62 = vadd.f32 %v8994_v59, %v8993_v58  ;;  %v9453_v58 = vld [vmem:[%s12886_s5 + $0x1f0] ss:$8 sps:$4 sm:$0xff]  }
 0x487   :  { %7743 = vmatpush2.bf16.msra.mxu1 %v9456_v44  ;;  %v11947_v13 = vadd.f32 %v11791_v62, %v8705_v7  ;;  %v9465_v44 = vld [vmem:[%s12886_s5 + $0x1d0] ss:$8 sps:$4 sm:$0xff]  }
 0x488   :  { %7744 = vmatprep.subr.bf16.mxu1 %v9464_v6 }
 0x489   :  { %v8996_v37 = vpop.f32.mrf.mxu1 }
 0x48b   :  { %v8997_v51 = vpop.f32.mrf.mxu1  ;;  %7745 = vmatpush2.bf16.msra.mxu1 %v9462_v49 }
 0x48c   :  { %v11793_v4 = vadd.f32 %v8997_v51, %v8996_v37  ;;  %v9455_v37 = vld [vmem:[%s12886_s5 + $0x1f4] ss:$8 sps:$4 sm:$0xff]  }
 0x48d   :  { %v8999_v16 = vpop.f32.mrf.mxu1  ;;  %7791 = vmatprep.subr.bf16.mxu0 %v9455_v37 }
 0x48e   :  { %7792 = vmatpush2.bf16.msra.mxu0 %v9453_v58  ;;  %v11950_v30 = vadd.f32 %v11793_v4, %v8705_v7 }
 0x48f   :  { %v9000_v32 = vpop.f32.mrf.mxu1  ;;  %7793 = vmatprep.subr.bf16.mxu0 %v9461_v12 }
 0x490   :  { %v11807_v1 = vadd.f32 %v9000_v32, %v8999_v16 }
 0x492   :  { %7794 = vmatpush2.bf16.msra.mxu0 %v9459_v35  ;;  %v11953_v28 = vadd.f32 %v11807_v1, %v8705_v7 }
 0x493   :  { %7795 = vmatprep.subr.bf16.mxu0 %v9467_v39 }
 0x496   :  { %7796 = vmatpush2.bf16.msra.mxu0 %v9465_v44 }
 0x4c9   :  { %v9002_v11 = vpop.f32.mrf.mxu1 }
 0x4cb   :  { %v9003_v56 = vpop.f32.mrf.mxu1 }
 0x4cc   :  { %v11881_v9 = vadd.f32 %v9003_v56, %v9002_v11  ;;  %v5686_v11 = vpop.f32.mrf.mxu0  ;;  %v12906_v56 = vld [vmem:[#allocation12_spill] sm:$0xff] }
 0x4cd   :  { %v9005_v47 = vpop.f32.mrf.mxu1 }
 0x4cf   :  { %v9006_v18 = vpop.f32.mrf.mxu1 }
 0x4d0   :  { %v11883_v27 = vadd.f32 %v9006_v18, %v9005_v47  ;;  %v11957_v18 = vadd.f32 %v11881_v9, %v8705_v7 }
 0x4d2   :  { %v9008_v24 = vpop.f32.mrf.mxu1  ;;  %v11960_v50 = vadd.f32 %v11883_v27, %v8705_v7 }
 0x4d4   :  { %v9009_v21 = vpop.f32.mrf.mxu1 }
 0x4d5   :  { %v11897_v17 = vadd.f32 %v9009_v21, %v9008_v24 }
 0x4d6   :  { %v9011_v63 = vpop.f32.mrf.mxu1 }
 0x4d7   :  { %v11963_v62 = vadd.f32 %v11897_v17, %v8705_v7 }
 0x4d8   :  { %v9012_v10 = vpop.f32.mrf.mxu1 }
 0x4d9   :  { %v9013_v61 = vadd.f32 %v9012_v10, %v9011_v63 }
 0x4db   :  { %v11965_v4 = vadd.f32 %v9013_v61, %v8705_v7 }
 0x4dd   :  { %v9014_v54 = vpop.f32.mrf.mxu1 }
 0x4df   :  { %v9015_v59 = vpop.f32.mrf.mxu1 }
 0x4e0   :  { %v9016_v51 = vadd.f32 %v9015_v59, %v9014_v54 }
 0x4e1   :  { %v9017_v16 = vpop.f32.mrf.mxu1 }
 0x4e2   :  { %v11969_v21 = vadd.f32 %v9016_v51, %v8705_v7 }
 0x4e3   :  { %v9018_v32 = vpop.f32.mrf.mxu1 }
 0x4e4   :  { %v9019_v57 = vadd.f32 %v9018_v32, %v9017_v16 }
 0x4e5   :  { %v9036_v34 = vpop.f32.mrf.mxu1 }
 0x4e6   :  { %v11971_v20 = vadd.f32 %v9019_v57, %v8705_v7 }
 0x4e7   :  { %v9037_v5 = vpop.f32.mrf.mxu1 }
 0x4e8   :  { %v9038_v48 = vadd.f32 %v9037_v5, %v9036_v34 }
 0x4e9   :  { %v9039_v8 = vpop.f32.mrf.mxu1 }
 0x4ea   :  { %v5587_v60 = vadd.f32 %v9038_v48, %v5490_v3 }
 0x4eb   :  { %v9040_v26 = vpop.f32.mrf.mxu1 }
 0x4ec   :  { %v5684_v31 = vadd.f32 %v5683_v29, %v5587_v60  ;;  %v9041_v0 = vadd.f32 %v9040_v26, %v9039_v8 }
 0x4ed   :  { %v9042_v19 = vpop.f32.mrf.mxu1 }
 0x4ee   :  { %v5746_v22 = vmax.f32 %v5684_v31, 0.0  ;;  %v5590_v45 = vadd.f32 %v9041_v0, %v5493_v15  ;;  %v9468_v0 = vld [vmem:[%s12886_s5 + $0xb0] ss:$8 sps:$4 sm:$0xff]  }
 0x4ef   :  { %v9043_v33 = vpop.f32.mrf.mxu1 }
 0x4f0   :  { %v5778_v55 = vcombine.high %v5746_v22, %v5746_v22  ;;  %v5785_v23 = vrot.slane %v5746_v22, %v12906_v56  ;;  %v5687_v46 = vadd.f32 %v5686_v11, %v5590_v45  ;;  %v9044_v47 = vadd.f32 %v9043_v33, %v9042_v19  ;;  %v9471_v33 = vld [vmem:[%s12886_s5 + $0x1c0] ss:$8 sps:$4 sm:$0xff]  }
 0x4f1   :  { %v9045_v24 = vpop.f32.mrf.mxu1 }
 0x4f2   :  { %v5792_v1 = vrot.slane %v5778_v55, %v12906_v56  ;;  %v5793_v52 = vcombine.high %v5785_v23, %v5785_v23  ;;  %v6115_v14 = vsel %vm6114_vm13, %v5785_v23, -inf  ;;  %v5747_v38 = vmax.f32 %v5687_v46, 0.0 }
 0x4f3   :  { %v6116_v9 = vrot.slane %v6115_v14, 4  ;;  %v5595_v63 = vadd.f32 %v9044_v47, %v5498_v40  ;;  %v9046_v27 = vpop.f32.mrf.mxu1  ;;  %v9470_v40 = vld [vmem:[%s12886_s5 + $0xb4] ss:$8 sps:$4 sm:$0xff]  }
 0x4f4   :  { %v5794_v10 = vcombine.high %v5792_v1, %v5792_v1  ;;  %v6122_v17 = vsel %vm6114_vm13, %v5793_v52, -inf  ;;  %v6129_v61 = vsel %vm6114_vm13, %v5792_v1, -inf  ;;  %v5795_v54 = vcombine.high %v5747_v38, %v5747_v38  ;;  %7746 = vmatprep.subr.bf16.mxu1 %v9470_v40 }
 0x4f5   :  { %v6117_v58 = vmax.f32 %v6115_v14, %v6116_v9  ;;  %v6123_v59 = vrot.slane %v6122_v17, 4  ;;  %v6130_v37 = vrot.slane %v6129_v61, 4  ;;  %v5802_v51 = vrot.slane %v5747_v38, %v12906_v56  ;;  %v11982_v16 = vpop.f32.mrf.mxu1  ;;  %7747 = vmatpush2.bf16.msra.mxu1 %v9468_v0 }
 0x4f6   :  { %v6136_v35 = vsel %vm6114_vm13, %v5794_v10, -inf  ;;  %v5809_v32 = vrot.slane %v5795_v54, %v12906_v56  ;;  %v5692_v12 = vadd.f32 %v11920_v36, %v5595_v63  ;;  %v9047_v57 = vadd.f32 %v9046_v27, %v9045_v24  ;;  %v9473_v24 = vld [vmem:[%s12886_s5 + $0x1c4] ss:$8 sps:$4 sm:$0xff]  }
 0x4f7   :  { %v6118_v7 = vrot.slane %v6117_v58, 2  ;;  %v6124_v34 = vmax.f32 %v6122_v17, %v6123_v59  ;;  %v6131_v29 = vmax.f32 %v6129_v61, %v6130_v37  ;;  %v6137_v5 = vrot.slane %v6136_v35, 4  ;;  %v11995_v36 = vpop.f32.mrf.mxu1  ;;  %7797 = vmatprep.subr.bf16.mxu0 %v9473_v24 }
 0x4f8   :  { %v5810_v3 = vcombine.high %v5802_v51, %v5802_v51  ;;  %v5811_v2 = vcombine.high %v5809_v32, %v5809_v32  ;;  %v6143_v48 = vsel %vm6114_vm13, %v5802_v51, -inf  ;;  %v6157_v8 = vsel %vm6114_vm13, %v5809_v32, -inf  ;;  %7798 = vmatpush2.bf16.msra.mxu0 %v9471_v33 }
 0x4f9   :  { %v6119_v60 = vmax.f32 %v6117_v58, %v6118_v7  ;;  %v6125_v26 = vrot.slane %v6124_v34, 2  ;;  %v6132_v15 = vrot.slane %v6131_v29, 2  ;;  %v6138_v31 = vmax.f32 %v6136_v35, %v6137_v5  ;;  %v12013_v17 = vpop.f32.mrf.mxu1 }
 0x4fa   :  { %v6144_v19 = vrot.slane %v6143_v48, 4  ;;  %v6150_v22 = vsel %vm6114_vm13, %v5810_v3, -inf  ;;  %v6158_v45 = vrot.slane %v6157_v8, 4  ;;  %v6164_v11 = vsel %vm6114_vm13, %v5811_v2, -inf }
 0x4fb   :  { %v6120_v55 = vrot.slane %v6119_v60, 1  ;;  %v6126_v23 = vmax.f32 %v6124_v34, %v6125_v26  ;;  %v6133_v46 = vmax.f32 %v6131_v29, %v6132_v15  ;;  %v6139_v47 = vrot.slane %v6138_v31, 2  ;;  %v12017_v3 = vpop.f32.mrf.mxu1 }
 0x4fc   :  { %v6145_v1 = vmax.f32 %v6143_v48, %v6144_v19  ;;  %v6151_v52 = vrot.slane %v6150_v22, 4  ;;  %v6159_v14 = vmax.f32 %v6157_v8, %v6158_v45  ;;  %v6165_v38 = vrot.slane %v6164_v11, 4 }
 0x4fd   :  { %v12011_v9 = vmax.f32 %v6119_v60, %v6120_v55  ;;  %v6127_v63 = vrot.slane %v6126_v23, 1  ;;  %v6134_v27 = vrot.slane %v6133_v46, 1  ;;  %v6140_v10 = vmax.f32 %v6138_v31, %v6139_v47  ;;  %v12024_v33 = vpop.f32.mrf.mxu1 }
 0x4fe   :  { %v6146_v61 = vrot.slane %v6145_v1, 2  ;;  %v6152_v54 = vmax.f32 %v6150_v22, %v6151_v52  ;;  %v6160_v49 = vrot.slane %v6159_v14, 2  ;;  %v6166_v6 = vmax.f32 %v6164_v11, %v6165_v38 }
 0x4ff   :  { %v6128_v58 = vmax.f32 %v6126_v23, %v6127_v63  ;;  %v6135_v59 = vmax.f32 %v6133_v46, %v6134_v27  ;;  %v6141_v37 = vrot.slane %v6140_v10, 1  ;;  %v5748_v51 = vmax.f32 %v5692_v12, 0.0 }
 0x500   :  { %v6147_v44 = vmax.f32 %v6145_v1, %v6146_v61  ;;  %v6153_v39 = vrot.slane %v6152_v54, 2  ;;  %v6161_v35 = vmax.f32 %v6159_v14, %v6160_v49  ;;  %v6167_v32 = vrot.slane %v6166_v6, 2  ;;  %v9476_v61 = vld [vmem:[%s12886_s5 + $0xa4] ss:$8 sps:$4 sm:$0xff]  }
 0x501   :  { %v6142_v7 = vmax.f32 %v6140_v10, %v6141_v37  ;;  %v5812_v34 = vcombine.high %v5748_v51, %v5748_v51  ;;  %v5819_v29 = vrot.slane %v5748_v51, %v12906_v56  ;;  %v5598_v5 = vadd.f32 %v9047_v57, %v11935_v43  ;;  %v9474_v10 = vld [vmem:[%s12886_s5 + $0xa0] ss:$8 sps:$4 sm:$0xff]   ;;  %v9479_v37 = vld [vmem:[%s12886_s5 + $0x1b4] ss:$8 sps:$4 sm:$0xff]   ;;  %v12042_v51 = vpop.f32.mrf.mxu0  ;;  %7748 = vmatprep.subr.bf16.mxu1 %v9476_v61 }
 0x502   :  { %v6148_v2 = vrot.slane %v6147_v44, 1  ;;  %v6154_v48 = vmax.f32 %v6152_v54, %v6153_v39  ;;  %v6162_v8 = vrot.slane %v6161_v35, 1  ;;  %v6168_v60 = vmax.f32 %v6166_v6, %v6167_v32  ;;  %7749 = vmatpush2.bf16.msra.mxu1 %v9474_v10  ;;  %7799 = vmatprep.subr.bf16.mxu0 %v9479_v37 }
 0x503   :  { %v5826_v26 = vrot.slane %v5812_v34, %v12906_v56  ;;  %v5827_v15 = vcombine.high %v5819_v29, %v5819_v29  ;;  %v6171_v12 = vsel %vm6114_vm13, %v5819_v29, -inf  ;;  %v5695_v31 = vadd.f32 %v11931_v41, %v5598_v5  ;;  %v9480_v29 = vld [vmem:[%s12886_s5 + $0x90] ss:$8 sps:$4 sm:$0xff]   ;;  %v9482_v5 = vld [vmem:[%s12886_s5 + $0x94] ss:$8 sps:$4 sm:$0xff]  }
 0x504   :  { %v6149_v0 = vmax.f32 %v6147_v44, %v6148_v2  ;;  %v6155_v40 = vrot.slane %v6154_v48, 1  ;;  %v6163_v19 = vmax.f32 %v6161_v35, %v6162_v8  ;;  %v6169_v22 = vrot.slane %v6168_v60, 1  ;;  %7750 = vmatprep.subr.bf16.mxu1 %v9482_v5 }
 0x505   :  { %v5828_v45 = vcombine.high %v5826_v26, %v5826_v26  ;;  %v6172_v11 = vrot.slane %v6171_v12, 4  ;;  %v6178_v43 = vsel %vm6114_vm13, %v5827_v15, -inf  ;;  %v6185_v57 = vsel %vm6114_vm13, %v5826_v26, -inf  ;;  %v9483_v26 = vld [vmem:[%s12886_s5 + $0x1a0] ss:$8 sps:$4 sm:$0xff]  }
 0x506   :  { %v6156_v55 = vmax.f32 %v6154_v48, %v6155_v40  ;;  %v6170_v23 = vmax.f32 %v6168_v60, %v6169_v22  ;;  %v6563_v46 = vmax.f32 %v12011_v9, %v6149_v0  ;;  %v6565_v47 = vmax.f32 %v6135_v59, %v6163_v19  ;;  %v9055_v59 = vpop.f32.mrf.mxu1  ;;  %v9485_v15 = vld [vmem:[%s12886_s5 + $0x1a4] ss:$8 sps:$4 sm:$0xff]   ;;  %v5699_v22 = vpop.f32.mrf.mxu0  ;;  %7751 = vmatpush2.bf16.msra.mxu1 %v9480_v29 }
 0x507   :  { %v6173_v24 = vmax.f32 %v6171_v12, %v6172_v11  ;;  %v6179_v1 = vrot.slane %v6178_v43, 4  ;;  %v6186_v41 = vrot.slane %v6185_v57, 4  ;;  %v6192_v52 = vsel %vm6114_vm13, %v5828_v45, -inf }
 0x508   :  { %v6564_v14 = vmax.f32 %v6128_v58, %v6156_v55  ;;  %v6566_v38 = vmax.f32 %v6142_v7, %v6170_v23  ;;  %v6193_v63 = vrot.slane %v6192_v52, 4  ;;  %v5749_v27 = vmax.f32 %v5695_v31, 0.0  ;;  %v9477_v58 = vld [vmem:[%s12886_s5 + $0x1b0] ss:$8 sps:$4 sm:$0xff]   ;;  %v9057_v19 = vpop.f32.mrf.mxu1  ;;  %v12071_v61 = vpop.f32.mrf.mxu0 }
 0x509   :  { %v6174_v54 = vrot.slane %v6173_v24, 2  ;;  %v6180_v9 = vmax.f32 %v6178_v43, %v6179_v1  ;;  %v6187_v49 = vmax.f32 %v6185_v57, %v6186_v41  ;;  %v9050_v6 = vadd.f32 %v11995_v36, %v11982_v16  ;;  %7800 = vmatpush2.bf16.msra.mxu0 %v9477_v58 }
 0x50a   :  { %v6627_v44 = vsel %vm4449_vm5, %v6564_v14, %v6563_v46  ;;  %v6194_v39 = vmax.f32 %v6192_v52, %v6193_v63  ;;  %v5829_v35 = vcombine.high %v5749_v27, %v5749_v27  ;;  %v5836_v32 = vrot.slane %v5749_v27, %v12906_v56  ;;  %7801 = vmatprep.subr.bf16.mxu0 %v9485_v15  ;;  %v9058_v10 = vpop.f32.mrf.mxu1 }
 0x50b   :  { %v6628_v16 = vsel %vm4451_vm6, %v6565_v47, %v6627_v44  ;;  %v6175_v36 = vmax.f32 %v6173_v24, %v6174_v54  ;;  %v6181_v7 = vrot.slane %v6180_v9, 2  ;;  %v6188_v34 = vrot.slane %v6187_v49, 2 }
 0x50c   :  { %v6629_v2 = vsel %vm4453_vm7, %v6566_v38, %v6628_v16  ;;  %v6195_v48 = vrot.slane %v6194_v39, 2  ;;  %v5843_v8 = vrot.slane %v5829_v35, %v12906_v56  ;;  %v5844_v60 = vcombine.high %v5836_v32, %v5836_v32 }
 0x50d   :  { %6659 = vst [vmem:[#allocation6] sm:$0xf] %v6629_v2  ;;  %6680 = vst [vmem:[#allocation3 + $0x9] sm:$0xf] %v6629_v2  ;;  %v6176_v12 = vrot.slane %v6175_v36, 1  ;;  %v6182_v31 = vmax.f32 %v6180_v9, %v6181_v7  ;;  %v6189_v0 = vmax.f32 %v6187_v49, %v6188_v34  ;;  %v6199_v40 = vsel %vm6114_vm13, %v5836_v32, -inf  ;;  %7802 = vmatpush2.bf16.msra.mxu0 %v9483_v26 }
 0x50e   :  { %v6196_v45 = vmax.f32 %v6194_v39, %v6195_v48  ;;  %v5845_v11 = vcombine.high %v5843_v8, %v5843_v8  ;;  %v6200_v43 = vrot.slane %v6199_v40, 4  ;;  %v6206_v57 = vsel %vm6114_vm13, %v5844_v60, -inf  ;;  %v9491_v26 = vld [vmem:[%s12886_s5 + $0x194] ss:$8 sps:$4 sm:$0xff]  }
 0x50f   :  { %v12063_v55 = vmax.f32 %v6175_v36, %v6176_v12  ;;  %v6183_v23 = vrot.slane %v6182_v31, 1  ;;  %v6190_v46 = vrot.slane %v6189_v0, 1  ;;  %v6207_v47 = vrot.slane %v6206_v57, 4  ;;  %7803 = vmatprep.subr.bf16.mxu0 %v9491_v26 }
 0x510   :  { %v6197_v24 = vrot.slane %v6196_v45, 1  ;;  %v6201_v1 = vmax.f32 %v6199_v40, %v6200_v43  ;;  %v6213_v41 = vsel %vm6114_vm13, %v5843_v8, -inf  ;;  %v6220_v52 = vsel %vm6114_vm13, %v5845_v11, -inf }
 0x511   :  { %v12067_v14 = vmax.f32 %v6182_v31, %v6183_v23  ;;  %v12069_v38 = vmax.f32 %v6189_v0, %v6190_v46  ;;  %v6208_v63 = vmax.f32 %v6206_v57, %v6207_v47  ;;  %v6214_v27 = vrot.slane %v6213_v41, 4  ;;  %v9489_v0 = vld [vmem:[%s12886_s5 + $0x190] ss:$8 sps:$4 sm:$0xff]  }
 0x512   :  { %v12073_v54 = vmax.f32 %v6196_v45, %v6197_v24  ;;  %v6202_v9 = vrot.slane %v6201_v1, 2  ;;  %v6221_v49 = vrot.slane %v6220_v52, 4  ;;  %v5603_v58 = vadd.f32 %v9050_v6, %v11938_v42  ;;  %v9488_v42 = vld [vmem:[%s12886_s5 + $0x84] ss:$8 sps:$4 sm:$0xff]   ;;  %v5702_v6 = vpop.f32.mrf.mxu0  ;;  %7804 = vmatpush2.bf16.msra.mxu0 %v9489_v0 }
 0x513   :  { %v6209_v37 = vrot.slane %v6208_v63, 2  ;;  %v6215_v44 = vmax.f32 %v6213_v41, %v6214_v27  ;;  %v9053_v39 = vadd.f32 %v12017_v3, %v12013_v17  ;;  %v9056_v35 = vadd.f32 %v9055_v59, %v12024_v33  ;;  %v9486_v33 = vld [vmem:[%s12886_s5 + $0x80] ss:$8 sps:$4 sm:$0xff]   ;;  %7752 = vmatprep.subr.bf16.mxu1 %v9488_v42  ;;  %v9495_v27 = vld [vmem:[%s12886_s5 + $0x274] ss:$8 sps:$4 sm:$0xff]  }
 0x514   :  { %v6203_v32 = vmax.f32 %v6201_v1, %v6202_v9  ;;  %v6222_v16 = vmax.f32 %v6220_v52, %v6221_v49  ;;  %v5700_v36 = vadd.f32 %v5699_v22, %v5603_v58  ;;  %v9059_v7 = vadd.f32 %v9058_v10, %v9057_v19  ;;  %7753 = vmatpush2.bf16.msra.mxu1 %v9486_v33  ;;  %v9497_v58 = vld [vmem:[%s12886_s5 + $0x180] ss:$8 sps:$4 sm:$0xff]  }
 0x515   :  { %v6210_v34 = vmax.f32 %v6208_v63, %v6209_v37  ;;  %v6216_v29 = vrot.slane %v6215_v44, 2  ;;  %v5606_v5 = vadd.f32 %v9053_v39, %v11941_v25  ;;  %v5611_v2 = vadd.f32 %v9056_v35, %v11944_v53  ;;  %v9499_v37 = vld [vmem:[%s12886_s5 + $0x184] ss:$8 sps:$4 sm:$0xff]   ;;  %7828 = vmatprep.subr.bf16.mxu1 %v9495_v27 }
 0x516   :  { %v6204_v48 = vrot.slane %v6203_v32, 1  ;;  %v6223_v8 = vrot.slane %v6222_v16, 2  ;;  %v5750_v17 = vmax.f32 %v5700_v36, 0.0  ;;  %v12085_v3 = vadd.f32 %v9059_v7, %v11947_v13  ;;  %7805 = vmatprep.subr.bf16.mxu0 %v9499_v37 }
 0x517   :  { %v6211_v59 = vrot.slane %v6210_v34, 1  ;;  %v6217_v60 = vmax.f32 %v6215_v44, %v6216_v29  ;;  %v5703_v25 = vadd.f32 %v5702_v6, %v5606_v5  ;;  %v5708_v53 = vadd.f32 %v12042_v51, %v5611_v2  ;;  %7806 = vmatpush2.bf16.msra.mxu0 %v9497_v58 }
 0x518   :  { %v6205_v15 = vmax.f32 %v6203_v32, %v6204_v48  ;;  %v6224_v12 = vmax.f32 %v6222_v16, %v6223_v8  ;;  %v5846_v31 = vcombine.high %v5750_v17, %v5750_v17  ;;  %v5853_v13 = vrot.slane %v5750_v17, %v12906_v56 }
 0x519   :  { %v6212_v40 = vmax.f32 %v6210_v34, %v6211_v59  ;;  %v6218_v19 = vrot.slane %v6217_v60, 1  ;;  %v5751_v22 = vmax.f32 %v5703_v25, 0.0  ;;  %v12098_v45 = vmax.f32 %v5708_v53, 0.0  ;;  %v9507_v34 = vld [vmem:[%s12886_s5 + $0x374] ss:$8 sps:$4 sm:$0xff]  }
 0x51a   :  { %v6225_v51 = vrot.slane %v6224_v12, 1  ;;  %v6567_v11 = vmax.f32 %v12063_v55, %v6205_v15  ;;  %v5860_v43 = vrot.slane %v5846_v31, %v12906_v56  ;;  %v5861_v57 = vcombine.high %v5853_v13, %v5853_v13  ;;  %7881 = vmatprep.subr.bf16.mxu0 %v9507_v34 }
 0x51b   :  { %v6219_v23 = vmax.f32 %v6217_v60, %v6218_v19  ;;  %v6568_v46 = vmax.f32 %v12067_v14, %v6212_v40  ;;  %v6227_v47 = vsel %vm6114_vm13, %v5853_v13, -inf  ;;  %v5863_v24 = vcombine.high %v5751_v22, %v5751_v22  ;;  %v12111_v14 = vpop.f32.mrf.mxu1 }
 0x51c   :  { %v6226_v1 = vmax.f32 %v6224_v12, %v6225_v51  ;;  %v5862_v41 = vcombine.high %v5860_v43, %v5860_v43  ;;  %v6228_v52 = vrot.slane %v6227_v47, 4  ;;  %v6234_v63 = vsel %vm6114_vm13, %v5861_v57, -inf }
 0x51d   :  { %v6569_v55 = vmax.f32 %v12069_v38, %v6219_v23  ;;  %v6630_v10 = vsel %vm4449_vm5, %v6568_v46, %v6567_v11  ;;  %v6235_v9 = vrot.slane %v6234_v63, 4  ;;  %v6241_v49 = vsel %vm6114_vm13, %v5860_v43, -inf  ;;  %v12129_v17 = vpop.f32.mrf.mxu1 }
 0x51e   :  { %v6570_v44 = vmax.f32 %v12073_v54, %v6226_v1  ;;  %v6229_v39 = vmax.f32 %v6227_v47, %v6228_v52  ;;  %v6242_v35 = vrot.slane %v6241_v49, 4  ;;  %v6248_v38 = vsel %vm6114_vm13, %v5862_v41, -inf }
 0x51f   :  { %v6631_v32 = vsel %vm4451_vm6, %v6569_v55, %v6630_v10  ;;  %v6236_v16 = vmax.f32 %v6234_v63, %v6235_v9  ;;  %v6249_v36 = vrot.slane %v6248_v38, 4  ;;  %v5870_v7 = vrot.slane %v5751_v22, %v12906_v56  ;;  %v12134_v43 = vpop.f32.mrf.mxu1 }
 0x520   :  { %v6632_v29 = vsel %vm4453_vm7, %v6570_v44, %v6631_v32  ;;  %v6230_v5 = vrot.slane %v6229_v39, 2  ;;  %v6243_v54 = vmax.f32 %v6241_v49, %v6242_v35  ;;  %v5877_v2 = vrot.slane %v5863_v24, %v12906_v56 }
 0x521   :  { %6660 = vst [vmem:[#allocation6 + $0x4] sm:$0xf] %v6632_v29  ;;  %6681 = vst [vmem:[#allocation3 + $0x11] sm:$0xf] %v6632_v29  ;;  %v6237_v42 = vrot.slane %v6236_v16, 2  ;;  %v6250_v6 = vmax.f32 %v6248_v38, %v6249_v36  ;;  %v5878_v48 = vcombine.high %v5870_v7, %v5870_v7  ;;  %v6255_v8 = vsel %vm6114_vm13, %v5870_v7, -inf  ;;  %v12140_v44 = vpop.f32.mrf.mxu1 }
 0x522   :  { %v6231_v33 = vmax.f32 %v6229_v39, %v6230_v5  ;;  %v6244_v59 = vrot.slane %v6243_v54, 2  ;;  %v5879_v60 = vcombine.high %v5877_v2, %v5877_v2  ;;  %v6256_v25 = vrot.slane %v6255_v8, 4 }
 0x523   :  { %v6238_v53 = vmax.f32 %v6236_v16, %v6237_v42  ;;  %v6251_v26 = vrot.slane %v6250_v6, 2  ;;  %v6262_v15 = vsel %vm6114_vm13, %v5878_v48, -inf  ;;  %v6269_v12 = vsel %vm6114_vm13, %v5877_v2, -inf }
 0x524   :  { %v6232_v31 = vrot.slane %v6231_v33, 1  ;;  %v6245_v13 = vmax.f32 %v6243_v54, %v6244_v59  ;;  %v6257_v0 = vmax.f32 %v6255_v8, %v6256_v25  ;;  %v6263_v40 = vrot.slane %v6262_v15, 4  ;;  %v12148_v8 = vpop.f32.mrf.mxu1 }
 0x525   :  { %v6239_v19 = vrot.slane %v6238_v53, 1  ;;  %v6252_v22 = vmax.f32 %v6250_v6, %v6251_v26  ;;  %v6270_v51 = vrot.slane %v6269_v12, 4  ;;  %v6276_v11 = vsel %vm6114_vm13, %v5879_v60, -inf }
 0x526   :  { %v6233_v57 = vmax.f32 %v6231_v33, %v6232_v31  ;;  %v6246_v23 = vrot.slane %v6245_v13, 1  ;;  %v6258_v46 = vrot.slane %v6257_v0, 2  ;;  %v6264_v47 = vmax.f32 %v6262_v15, %v6263_v40 }
 0x527   :  { %v6240_v24 = vmax.f32 %v6238_v53, %v6239_v19  ;;  %v6253_v1 = vrot.slane %v6252_v22, 1  ;;  %v6271_v41 = vmax.f32 %v6269_v12, %v6270_v51  ;;  %v6277_v52 = vrot.slane %v6276_v11, 4  ;;  %v9067_v51 = vpop.f32.mrf.mxu1 }
 0x528   :  { %v6247_v63 = vmax.f32 %v6245_v13, %v6246_v23  ;;  %v6259_v27 = vmax.f32 %v6257_v0, %v6258_v46  ;;  %v6265_v55 = vrot.slane %v6264_v47, 2  ;;  %v5880_v10 = vcombine.high %v12098_v45, %v12098_v45 }
 0x529   :  { %v6254_v9 = vmax.f32 %v6252_v22, %v6253_v1  ;;  %v6272_v49 = vrot.slane %v6271_v41, 2  ;;  %v6278_v58 = vmax.f32 %v6276_v11, %v6277_v52  ;;  %v5887_v37 = vrot.slane %v12098_v45, %v12906_v56  ;;  %v12151_v11 = vpop.f32.mrf.mxu0 }
 0x52a   :  { %v6260_v39 = vrot.slane %v6259_v27, 1  ;;  %v6266_v35 = vmax.f32 %v6264_v47, %v6265_v55  ;;  %v5894_v38 = vrot.slane %v5880_v10, %v12906_v56  ;;  %v5711_v32 = vadd.f32 %v12071_v61, %v12085_v3 }
 0x52b   :  { %v6273_v16 = vmax.f32 %v6271_v41, %v6272_v49  ;;  %v6279_v36 = vrot.slane %v6278_v58, 2  ;;  %v5895_v7 = vcombine.high %v5887_v37, %v5887_v37  ;;  %v6283_v34 = vsel %vm6114_vm13, %v5887_v37, -inf }
 0x52c   :  { %v6261_v29 = vmax.f32 %v6259_v27, %v6260_v39  ;;  %v6267_v5 = vrot.slane %v6266_v35, 1  ;;  %v5896_v54 = vcombine.high %v5894_v38, %v5894_v38  ;;  %v6284_v2 = vrot.slane %v6283_v34, 4 }
 0x52d   :  { %v6274_v42 = vrot.slane %v6273_v16, 1  ;;  %v6280_v45 = vmax.f32 %v6278_v58, %v6279_v36  ;;  %v6290_v6 = vsel %vm6114_vm13, %v5895_v7, -inf  ;;  %v6297_v48 = vsel %vm6114_vm13, %v5894_v38, -inf  ;;  %v5715_v38 = vpop.f32.mrf.mxu0 }
 0x52e   :  { %v6268_v33 = vmax.f32 %v6266_v35, %v6267_v5  ;;  %v6571_v59 = vmax.f32 %v6233_v57, %v6261_v29  ;;  %v6285_v61 = vmax.f32 %v6283_v34, %v6284_v2  ;;  %v6291_v3 = vrot.slane %v6290_v6, 4  ;;  %v9069_v35 = vpop.f32.mrf.mxu1 }
 0x52f   :  { %v6275_v60 = vmax.f32 %v6273_v16, %v6274_v42  ;;  %v6281_v25 = vrot.slane %v6280_v45, 1  ;;  %v6298_v53 = vrot.slane %v6297_v48, 4  ;;  %v6304_v26 = vsel %vm6114_vm13, %v5896_v54, -inf }
 0x530   :  { %v6572_v15 = vmax.f32 %v6240_v24, %v6268_v33  ;;  %v6286_v12 = vrot.slane %v6285_v61, 2  ;;  %v6292_v31 = vmax.f32 %v6290_v6, %v6291_v3  ;;  %v6305_v13 = vrot.slane %v6304_v26, 4  ;;  %v9070_v33 = vpop.f32.mrf.mxu1 }
 0x531   :  { %v6282_v0 = vmax.f32 %v6280_v45, %v6281_v25  ;;  %v6573_v40 = vmax.f32 %v6247_v63, %v6275_v60  ;;  %v6299_v19 = vmax.f32 %v6297_v48, %v6298_v53  ;;  %v5753_v22 = vmax.f32 %v5711_v32, 0.0 }
 0x532   :  { %v6633_v57 = vsel %vm4449_vm5, %v6572_v15, %v6571_v59  ;;  %v6287_v23 = vmax.f32 %v6285_v61, %v6286_v12  ;;  %v6293_v46 = vrot.slane %v6292_v31, 2  ;;  %v6306_v47 = vmax.f32 %v6304_v26, %v6305_v13  ;;  %v12170_v59 = vpop.f32.mrf.mxu0 }
 0x533   :  { %v6574_v1 = vmax.f32 %v6254_v9, %v6282_v0  ;;  %v6634_v41 = vsel %vm4451_vm6, %v6573_v40, %v6633_v57  ;;  %v6300_v52 = vrot.slane %v6299_v19, 2  ;;  %v5897_v24 = vcombine.high %v5753_v22, %v5753_v22 }
 0x534   :  { %v6288_v27 = vrot.slane %v6287_v23, 1  ;;  %v6294_v55 = vmax.f32 %v6292_v31, %v6293_v46  ;;  %v6307_v10 = vrot.slane %v6306_v47, 2  ;;  %v5904_v63 = vrot.slane %v5753_v22, %v12906_v56  ;;  %v5718_v46 = vpop.f32.mrf.mxu0 }
 0x535   :  { %v6635_v49 = vsel %vm4453_vm7, %v6574_v1, %v6634_v41  ;;  %v6301_v58 = vmax.f32 %v6299_v19, %v6300_v52  ;;  %v5911_v37 = vrot.slane %v5897_v24, %v12906_v56  ;;  %v9062_v39 = vadd.f32 %v12129_v17, %v12111_v14 }
 0x536   :  { %6661 = vst [vmem:[#allocation6 + $0x8] sm:$0xf] %v6635_v49  ;;  %6682 = vst [vmem:[#allocation3 + $0x19] sm:$0xf] %v6635_v49  ;;  %v12160_v9 = vmax.f32 %v6287_v23, %v6288_v27  ;;  %v6295_v32 = vrot.slane %v6294_v55, 1  ;;  %v6308_v16 = vmax.f32 %v6306_v47, %v6307_v10  ;;  %v5912_v36 = vcombine.high %v5904_v63, %v5904_v63 }
 0x537   :  { %v6302_v7 = vrot.slane %v6301_v58, 1  ;;  %v5913_v34 = vcombine.high %v5911_v37, %v5911_v37  ;;  %v6311_v29 = vsel %vm6114_vm13, %v5904_v63, -inf  ;;  %v6325_v5 = vsel %vm6114_vm13, %v5911_v37, -inf }
 0x538   :  { %v12164_v54 = vmax.f32 %v6294_v55, %v6295_v32  ;;  %v6309_v2 = vrot.slane %v6308_v16, 1  ;;  %v6312_v42 = vrot.slane %v6311_v29, 4  ;;  %v6318_v14 = vsel %vm6114_vm13, %v5912_v36, -inf }
 0x539   :  { %v12167_v17 = vmax.f32 %v6301_v58, %v6302_v7  ;;  %v6319_v45 = vrot.slane %v6318_v14, 4  ;;  %v6326_v6 = vrot.slane %v6325_v5, 4  ;;  %v6332_v48 = vsel %vm6114_vm13, %v5913_v34, -inf }
 0x53a   :  { %v12172_v61 = vmax.f32 %v6308_v16, %v6309_v2  ;;  %v6313_v3 = vmax.f32 %v6311_v29, %v6312_v42  ;;  %v6333_v60 = vrot.slane %v6332_v48, 4  ;;  %v5619_v25 = vadd.f32 %v9062_v39, %v11950_v30  ;;  %v12194_v42 = vpop.f32.mrf.mxu1 }
 0x53b   :  { %v6320_v53 = vmax.f32 %v6318_v14, %v6319_v45  ;;  %v6327_v26 = vmax.f32 %v6325_v5, %v6326_v6  ;;  %v9065_v15 = vadd.f32 %v12140_v44, %v12134_v43  ;;  %v9068_v12 = vadd.f32 %v9067_v51, %v12148_v8 }
 0x53c   :  { %v6314_v31 = vrot.slane %v6313_v3, 2  ;;  %v6334_v13 = vmax.f32 %v6332_v48, %v6333_v60  ;;  %v5716_v0 = vadd.f32 %v5715_v38, %v5619_v25  ;;  %v9071_v40 = vadd.f32 %v9070_v33, %v9069_v35 }
 0x53d   :  { %v6321_v19 = vrot.slane %v6320_v53, 2  ;;  %v6328_v22 = vrot.slane %v6327_v26, 2  ;;  %v5622_v57 = vadd.f32 %v9065_v15, %v11953_v28  ;;  %v5627_v23 = vadd.f32 %v9068_v12, %v11957_v18 }
 0x53e   :  { %v6315_v47 = vmax.f32 %v6313_v3, %v6314_v31  ;;  %v6335_v30 = vrot.slane %v6334_v13, 2  ;;  %v5754_v1 = vmax.f32 %v5716_v0, 0.0  ;;  %v12181_v41 = vadd.f32 %v9071_v40, %v11960_v50  ;;  %v12203_v31 = vpop.f32.mrf.mxu1 }
 0x53f   :  { %v6322_v43 = vmax.f32 %v6320_v53, %v6321_v19  ;;  %v6329_v44 = vmax.f32 %v6327_v26, %v6328_v22  ;;  %v5719_v8 = vadd.f32 %v5718_v46, %v5622_v57  ;;  %v5724_v51 = vadd.f32 %v12151_v11, %v5627_v23 }
 0x540   :  { %v6316_v52 = vrot.slane %v6315_v47, 1  ;;  %v6336_v24 = vmax.f32 %v6334_v13, %v6335_v30  ;;  %v5914_v27 = vcombine.high %v5754_v1, %v5754_v1  ;;  %v5921_v55 = vrot.slane %v5754_v1, %v12906_v56 }
 0x541   :  { %v6323_v28 = vrot.slane %v6322_v43, 1  ;;  %v6330_v10 = vrot.slane %v6329_v44, 1  ;;  %v5755_v18 = vmax.f32 %v5719_v8, 0.0  ;;  %v12185_v63 = vmax.f32 %v5724_v51, 0.0 }
 0x542   :  { %v6317_v49 = vmax.f32 %v6315_v47, %v6316_v52  ;;  %v6337_v58 = vrot.slane %v6336_v24, 1  ;;  %v5928_v50 = vrot.slane %v5914_v27, %v12906_v56  ;;  %v5929_v37 = vcombine.high %v5921_v55, %v5921_v55 }
 0x543   :  { %v6324_v39 = vmax.f32 %v6322_v43, %v6323_v28  ;;  %v6331_v35 = vmax.f32 %v6329_v44, %v6330_v10  ;;  %v6339_v38 = vsel %vm6114_vm13, %v5921_v55, -inf  ;;  %v5931_v11 = vcombine.high %v5755_v18, %v5755_v18 }
 0x544   :  { %v6338_v32 = vmax.f32 %v6336_v24, %v6337_v58  ;;  %v6575_v16 = vmax.f32 %v12160_v9, %v6317_v49  ;;  %v5930_v36 = vcombine.high %v5928_v50, %v5928_v50  ;;  %v6340_v7 = vrot.slane %v6339_v38, 4  ;;  %v12209_v24 = vpop.f32.mrf.mxu1 }
 0x545   :  { %v6576_v34 = vmax.f32 %v12164_v54, %v6324_v39  ;;  %v6577_v29 = vmax.f32 %v12167_v17, %v6331_v35  ;;  %v6346_v5 = vsel %vm6114_vm13, %v5929_v37, -inf  ;;  %v6353_v2 = vsel %vm6114_vm13, %v5928_v50, -inf }
 0x546   :  { %v6578_v14 = vmax.f32 %v12172_v61, %v6338_v32  ;;  %v6341_v45 = vmax.f32 %v6339_v38, %v6340_v7  ;;  %v6347_v6 = vrot.slane %v6346_v5, 4  ;;  %v6354_v48 = vrot.slane %v6353_v2, 4  ;;  %v12213_v7 = vpop.f32.mrf.mxu1 }
 0x547   :  { %v6636_v33 = vsel %vm4449_vm5, %v6576_v34, %v6575_v16  ;;  %v6360_v9 = vsel %vm6114_vm13, %v5930_v36, -inf  ;;  %v5938_v3 = vrot.slane %v5755_v18, %v12906_v56  ;;  %v5945_v54 = vrot.slane %v5931_v11, %v12906_v56 }
 0x548   :  { %v6637_v17 = vsel %vm4451_vm6, %v6577_v29, %v6636_v33  ;;  %v6342_v60 = vrot.slane %v6341_v45, 2  ;;  %v6348_v25 = vmax.f32 %v6346_v5, %v6347_v6  ;;  %v6355_v53 = vmax.f32 %v6353_v2, %v6354_v48 }
 0x549   :  { %v6638_v26 = vsel %vm4453_vm7, %v6578_v14, %v6637_v17  ;;  %v6361_v15 = vrot.slane %v6360_v9, 4  ;;  %v5946_v61 = vcombine.high %v5938_v3, %v5938_v3  ;;  %v5947_v12 = vcombine.high %v5945_v54, %v5945_v54 }
 0x54a   :  { %6662 = vst [vmem:[#allocation6 + $0xc] sm:$0xf] %v6638_v26  ;;  %6683 = vst [vmem:[#allocation3 + $0x21] sm:$0xf] %v6638_v26  ;;  %v6343_v13 = vmax.f32 %v6341_v45, %v6342_v60  ;;  %v6349_v0 = vrot.slane %v6348_v25, 2  ;;  %v6356_v40 = vrot.slane %v6355_v53, 2  ;;  %v5948_v38 = vcombine.high %v12185_v63, %v12185_v63  ;;  %v12221_v26 = vpop.f32.mrf.mxu1 }
 0x54b   :  { %v6367_v19 = vsel %vm6114_vm13, %v5938_v3, -inf  ;;  %v6362_v22 = vmax.f32 %v6360_v9, %v6361_v15  ;;  %v6374_v23 = vsel %vm6114_vm13, %v5946_v61, -inf  ;;  %v6381_v46 = vsel %vm6114_vm13, %v5945_v54, -inf }
 0x54c   :  { %v6368_v57 = vrot.slane %v6367_v19, 4  ;;  %v6344_v47 = vrot.slane %v6343_v13, 1  ;;  %v6350_v30 = vmax.f32 %v6348_v25, %v6349_v0  ;;  %v6357_v1 = vmax.f32 %v6355_v53, %v6356_v40 }
 0x54d   :  { %v6375_v43 = vrot.slane %v6374_v23, 4  ;;  %v6363_v44 = vrot.slane %v6362_v22, 2  ;;  %v6382_v51 = vrot.slane %v6381_v46, 4  ;;  %v6388_v52 = vsel %vm6114_vm13, %v5947_v12, -inf }
 0x54e   :  { %v6369_v8 = vmax.f32 %v6367_v19, %v6368_v57  ;;  %v6345_v27 = vmax.f32 %v6343_v13, %v6344_v47  ;;  %v6351_v55 = vrot.slane %v6350_v30, 1  ;;  %v6358_v28 = vrot.slane %v6357_v1, 1 }
 0x54f   :  { %v6376_v10 = vmax.f32 %v6374_v23, %v6375_v43  ;;  %v6364_v18 = vmax.f32 %v6362_v22, %v6363_v44  ;;  %v6383_v58 = vmax.f32 %v6381_v46, %v6382_v51  ;;  %v6389_v50 = vrot.slane %v6388_v52, 4 }
 0x550   :  { %v6370_v49 = vrot.slane %v6369_v8, 2  ;;  %v6352_v37 = vmax.f32 %v6350_v30, %v6351_v55  ;;  %v6359_v39 = vmax.f32 %v6357_v1, %v6358_v28  ;;  %v5955_v29 = vrot.slane %v12185_v63, %v12906_v56  ;;  %v9079_v1 = vpop.f32.mrf.mxu1 }
 0x551   :  { %v6377_v35 = vrot.slane %v6376_v10, 2  ;;  %v6365_v11 = vrot.slane %v6364_v18, 1  ;;  %v6384_v16 = vrot.slane %v6383_v58, 2  ;;  %v6390_v36 = vmax.f32 %v6388_v52, %v6389_v50  ;;  %v12227_v52 = vpop.f32.mrf.mxu0 }
 0x552   :  { %v6371_v32 = vmax.f32 %v6369_v8, %v6370_v49  ;;  %v5962_v5 = vrot.slane %v5948_v38, %v12906_v56  ;;  %v5727_v2 = vadd.f32 %v12170_v59, %v12181_v41  ;;  %v5963_v9 = vcombine.high %v5955_v29, %v5955_v29 }
 0x553   :  { %v6378_v34 = vmax.f32 %v6376_v10, %v6377_v35  ;;  %v6366_v14 = vmax.f32 %v6364_v18, %v6365_v11  ;;  %v6385_v6 = vmax.f32 %v6383_v58, %v6384_v16  ;;  %v6391_v48 = vrot.slane %v6390_v36, 2  ;;  %v9081_v11 = vpop.f32.mrf.mxu1 }
 0x554   :  { %v6372_v45 = vrot.slane %v6371_v32, 1  ;;  %v5964_v3 = vcombine.high %v5962_v5, %v5962_v5  ;;  %v6395_v54 = vsel %vm6114_vm13, %v5955_v29, -inf  ;;  %v6402_v15 = vsel %vm6114_vm13, %v5963_v9, -inf  ;;  %v5731_v29 = vpop.f32.mrf.mxu0 }
 0x555   :  { %v6379_v33 = vrot.slane %v6378_v34, 1  ;;  %v6386_v60 = vrot.slane %v6385_v6, 1  ;;  %v6392_v25 = vmax.f32 %v6390_v36, %v6391_v48  ;;  %v6396_v53 = vrot.slane %v6395_v54, 4 }
 0x556   :  { %v6373_v17 = vmax.f32 %v6371_v32, %v6372_v45  ;;  %v6409_v59 = vsel %vm6114_vm13, %v5962_v5, -inf  ;;  %v6416_v41 = vsel %vm6114_vm13, %v5964_v3, -inf  ;;  %v6403_v19 = vrot.slane %v6402_v15, 4 }
 0x557   :  { %v6380_v63 = vmax.f32 %v6378_v34, %v6379_v33  ;;  %v6387_v61 = vmax.f32 %v6385_v6, %v6386_v60  ;;  %v6393_v12 = vrot.slane %v6392_v25, 1  ;;  %v6397_v0 = vmax.f32 %v6395_v54, %v6396_v53 }
 0x558   :  { %v6579_v13 = vmax.f32 %v6345_v27, %v6373_v17  ;;  %v6410_v22 = vrot.slane %v6409_v59, 4  ;;  %v6417_v57 = vrot.slane %v6416_v41, 4  ;;  %v5757_v30 = vmax.f32 %v5727_v2, 0.0  ;;  %v9082_v17 = vpop.f32.mrf.mxu1 }
 0x559   :  { %v6580_v40 = vmax.f32 %v6352_v37, %v6380_v63  ;;  %v6394_v23 = vmax.f32 %v6392_v25, %v6393_v12  ;;  %v6581_v46 = vmax.f32 %v6359_v39, %v6387_v61  ;;  %v6398_v47 = vrot.slane %v6397_v0, 2 }
 0x55a   :  { %v6404_v44 = vmax.f32 %v6402_v15, %v6403_v19  ;;  %v6411_v8 = vmax.f32 %v6409_v59, %v6410_v22  ;;  %v6418_v51 = vmax.f32 %v6416_v41, %v6417_v57  ;;  %v5965_v10 = vcombine.high %v5757_v30, %v5757_v30  ;;  %v12248_v15 = vpop.f32.mrf.mxu0 }
 0x55b   :  { %v6639_v43 = vsel %vm4449_vm5, %v6580_v40, %v6579_v13  ;;  %v6582_v55 = vmax.f32 %v6366_v14, %v6394_v23  ;;  %v6399_v28 = vmax.f32 %v6397_v0, %v6398_v47  ;;  %v5972_v50 = vrot.slane %v5757_v30, %v12906_v56 }
 0x55c   :  { %v6640_v27 = vsel %vm4451_vm6, %v6581_v46, %v6639_v43  ;;  %v6405_v18 = vrot.slane %v6404_v44, 2  ;;  %v6412_v49 = vrot.slane %v6411_v8, 2  ;;  %v6419_v58 = vrot.slane %v6418_v51, 2 }
 0x55d   :  { %v6641_v37 = vsel %vm4453_vm7, %v6582_v55, %v6640_v27  ;;  %v6400_v39 = vrot.slane %v6399_v28, 1  ;;  %v5979_v35 = vrot.slane %v5965_v10, %v12906_v56  ;;  %v9074_v38 = vadd.f32 %v12203_v31, %v12194_v42 }
 0x55e   :  { %6663 = vst [vmem:[#allocation6 + $0x10] sm:$0xf] %v6641_v37  ;;  %6684 = vst [vmem:[#allocation3 + $0x39] sm:$0xf] %v6641_v37  ;;  %v6406_v32 = vmax.f32 %v6404_v44, %v6405_v18  ;;  %v6413_v16 = vmax.f32 %v6411_v8, %v6412_v49  ;;  %v6420_v36 = vmax.f32 %v6418_v51, %v6419_v58  ;;  %v6423_v14 = vsel %vm6114_vm13, %v5972_v50, -inf  ;;  %v5734_v44 = vpop.f32.mrf.mxu0 }
 0x55f   :  { %v5980_v34 = vcombine.high %v5972_v50, %v5972_v50  ;;  %v12235_v5 = vmax.f32 %v6399_v28, %v6400_v39  ;;  %v5981_v2 = vcombine.high %v5979_v35, %v5979_v35  ;;  %v6437_v45 = vsel %vm6114_vm13, %v5979_v35, -inf }
 0x560   :  { %v6407_v6 = vrot.slane %v6406_v32, 1  ;;  %v6414_v48 = vrot.slane %v6413_v16, 1  ;;  %v6421_v33 = vrot.slane %v6420_v36, 1  ;;  %v6424_v9 = vrot.slane %v6423_v14, 4 }
 0x561   :  { %v6430_v42 = vsel %vm6114_vm13, %v5980_v34, -inf  ;;  %v6438_v31 = vrot.slane %v6437_v45, 4  ;;  %v6444_v3 = vsel %vm6114_vm13, %v5981_v2, -inf  ;;  %v5635_v54 = vadd.f32 %v9074_v38, %v11963_v62 }
 0x562   :  { %v12242_v60 = vmax.f32 %v6406_v32, %v6407_v6  ;;  %v12244_v25 = vmax.f32 %v6413_v16, %v6414_v48  ;;  %v12246_v53 = vmax.f32 %v6420_v36, %v6421_v33  ;;  %v6425_v63 = vmax.f32 %v6423_v14, %v6424_v9 }
 0x563   :  { %v6431_v59 = vrot.slane %v6430_v42, 4  ;;  %v6439_v41 = vmax.f32 %v6437_v45, %v6438_v31  ;;  %v6445_v61 = vrot.slane %v6444_v3, 4  ;;  %v5732_v12 = vadd.f32 %v5731_v29, %v5635_v54 }
 0x564   :  { %v6426_v13 = vrot.slane %v6425_v63, 2  ;;  %v9077_v0 = vadd.f32 %v12213_v7, %v12209_v24  ;;  %v9080_v62 = vadd.f32 %v9079_v1, %v12221_v26  ;;  %v9083_v40 = vadd.f32 %v9082_v17, %v9081_v11 }
 0x565   :  { %v6432_v19 = vmax.f32 %v6430_v42, %v6431_v59  ;;  %v6440_v22 = vrot.slane %v6439_v41, 2  ;;  %v6446_v57 = vmax.f32 %v6444_v3, %v6445_v61  ;;  %v5758_v23 = vmax.f32 %v5732_v12, 0.0 }
 0x566   :  { %v6427_v46 = vmax.f32 %v6425_v63, %v6426_v13  ;;  %v5638_v47 = vadd.f32 %v9077_v0, %v11965_v4  ;;  %v5643_v30 = vadd.f32 %v9080_v62, %v11969_v21  ;;  %v12256_v43 = vadd.f32 %v9083_v40, %v11971_v20 }
 0x567   :  { %v6433_v8 = vrot.slane %v6432_v19, 2  ;;  %v6441_v51 = vmax.f32 %v6439_v41, %v6440_v22  ;;  %v6447_v55 = vrot.slane %v6446_v57, 2  ;;  %v5982_v24 = vcombine.high %v5758_v23, %v5758_v23 }
 0x568   :  { %v6428_v7 = vrot.slane %v6427_v46, 1  ;;  %v5989_v26 = vrot.slane %v5758_v23, %v12906_v56  ;;  %v5735_v1 = vadd.f32 %v5734_v44, %v5638_v47  ;;  %v5740_v27 = vadd.f32 %v12227_v52, %v5643_v30 }
 0x569   :  { %v6434_v28 = vmax.f32 %v6432_v19, %v6433_v8  ;;  %v6442_v10 = vrot.slane %v6441_v51, 1  ;;  %v6448_v18 = vmax.f32 %v6446_v57, %v6447_v55  ;;  %v5996_v4 = vrot.slane %v5982_v24, %v12906_v56 }
 0x56a   :  { %v6429_v21 = vmax.f32 %v6427_v46, %v6428_v7  ;;  %v5997_v49 = vcombine.high %v5989_v26, %v5989_v26  ;;  %v6451_v20 = vsel %vm6114_vm13, %v5989_v26, -inf  ;;  %v5759_v58 = vmax.f32 %v5735_v1, 0.0 }
 0x56b   :  { %v6435_v50 = vrot.slane %v6434_v28, 1  ;;  %v6443_v37 = vmax.f32 %v6441_v51, %v6442_v10  ;;  %v6449_v39 = vrot.slane %v6448_v18, 1  ;;  %v5998_v35 = vcombine.high %v5996_v4, %v5996_v4 }
 0x56c   :  { %v6583_v38 = vmax.f32 %v12235_v5, %v6429_v21  ;;  %v6452_v11 = vrot.slane %v6451_v20, 4  ;;  %v6458_v32 = vsel %vm6114_vm13, %v5997_v49, -inf  ;;  %v6465_v52 = vsel %vm6114_vm13, %v5996_v4, -inf }
 0x56d   :  { %v6436_v16 = vmax.f32 %v6434_v28, %v6435_v50  ;;  %v6450_v36 = vmax.f32 %v6448_v18, %v6449_v39  ;;  %v6585_v34 = vmax.f32 %v12244_v25, %v6443_v37  ;;  %v6459_v29 = vrot.slane %v6458_v32, 4 }
 0x56e   :  { %v6453_v2 = vmax.f32 %v6451_v20, %v6452_v11  ;;  %v6466_v14 = vrot.slane %v6465_v52, 4  ;;  %v6472_v45 = vsel %vm6114_vm13, %v5998_v35, -inf  ;;  %v5999_v6 = vcombine.high %v5759_v58, %v5759_v58 }
 0x56f   :  { %v6584_v48 = vmax.f32 %v12242_v60, %v6436_v16  ;;  %v6586_v33 = vmax.f32 %v12246_v53, %v6450_v36  ;;  %v6460_v5 = vmax.f32 %v6458_v32, %v6459_v29  ;;  %v6473_v9 = vrot.slane %v6472_v45, 4 }
 0x570   :  { %v6454_v42 = vrot.slane %v6453_v2, 2  ;;  %v6467_v31 = vmax.f32 %v6465_v52, %v6466_v14  ;;  %v6006_v3 = vrot.slane %v5759_v58, %v12906_v56  ;;  %v6013_v54 = vrot.slane %v5999_v6, %v12906_v56 }
 0x571   :  { %v6642_v17 = vsel %vm4449_vm5, %v6584_v48, %v6583_v38  ;;  %v6461_v25 = vrot.slane %v6460_v5, 2  ;;  %v6474_v63 = vmax.f32 %v6472_v45, %v6473_v9  ;;  %v5760_v59 = vmax.f32 %v5740_v27, 0.0 }
 0x572   :  { %v6643_v41 = vsel %vm4451_vm6, %v6585_v34, %v6642_v17  ;;  %v6455_v61 = vmax.f32 %v6453_v2, %v6454_v42  ;;  %v6468_v12 = vrot.slane %v6467_v31, 2  ;;  %v6014_v60 = vcombine.high %v6006_v3, %v6006_v3 }
 0x573   :  { %v6644_v53 = vsel %vm4453_vm7, %v6586_v33, %v6643_v41  ;;  %v6462_v13 = vmax.f32 %v6460_v5, %v6461_v25  ;;  %v6475_v0 = vrot.slane %v6474_v63, 2  ;;  %v6015_v62 = vcombine.high %v6013_v54, %v6013_v54 }
 0x574   :  { %6664 = vst [vmem:[#allocation6 + $0x14] sm:$0xf] %v6644_v53  ;;  %6685 = vst [vmem:[#allocation3 + $0x41] sm:$0xf] %v6644_v53  ;;  %v6456_v40 = vrot.slane %v6455_v61, 1  ;;  %v6469_v19 = vmax.f32 %v6467_v31, %v6468_v12  ;;  %v6479_v22 = vsel %vm6114_vm13, %v6006_v3, -inf  ;;  %v6016_v18 = vcombine.high %v5760_v59, %v5760_v59 }
 0x575   :  { %v6486_v57 = vsel %vm6114_vm13, %v6014_v60, -inf  ;;  %v6463_v23 = vrot.slane %v6462_v13, 1  ;;  %v6476_v46 = vmax.f32 %v6474_v63, %v6475_v0  ;;  %v6480_v47 = vrot.slane %v6479_v22, 4 }
 0x576   :  { %v6487_v30 = vrot.slane %v6486_v57, 4  ;;  %v6457_v44 = vmax.f32 %v6455_v61, %v6456_v40  ;;  %v6470_v8 = vrot.slane %v6469_v19, 1  ;;  %v6493_v51 = vsel %vm6114_vm13, %v6013_v54, -inf }
 0x577   :  { %v6500_v55 = vsel %vm6114_vm13, %v6015_v62, -inf  ;;  %v6464_v24 = vmax.f32 %v6462_v13, %v6463_v23  ;;  %v6477_v7 = vrot.slane %v6476_v46, 1  ;;  %v6481_v26 = vmax.f32 %v6479_v22, %v6480_v47 }
 0x578   :  { %v6488_v1 = vmax.f32 %v6486_v57, %v6487_v30  ;;  %v6471_v27 = vmax.f32 %v6469_v19, %v6470_v8  ;;  %v6494_v28 = vrot.slane %v6493_v51, 4  ;;  %v6501_v10 = vrot.slane %v6500_v55, 4  ;;  %v12288_v8 = vld [vmem:[#allocation3] sm:$0x3f] }
 0x579   :  { %v6478_v4 = vmax.f32 %v6476_v46, %v6477_v7  ;;  %v6482_v21 = vrot.slane %v6481_v26, 2  ;;  %v6023_v20 = vrot.slane %v5760_v59, %v12906_v56  ;;  %v6030_v37 = vrot.slane %v6016_v18, %v12906_v56 }
 0x57a   :  { %v6489_v49 = vrot.slane %v6488_v1, 2  ;;  %v6495_v58 = vmax.f32 %v6493_v51, %v6494_v28  ;;  %v6502_v50 = vmax.f32 %v6500_v55, %v6501_v10  ;;  %v5743_v39 = vadd.f32 %v12248_v15, %v12256_v43  ;;  %v12290_v51 = vld [vmem:[#allocation3 + $0x8] sm:$0x3f]  ;;  %v12297_v28 = vld [vmem:[#allocation3 + $0x10] sm:$0x3f] }
 0x57b   :  { %v6483_v35 = vmax.f32 %v6481_v26, %v6482_v21  ;;  %v6031_v11 = vcombine.high %v6023_v20, %v6023_v20  ;;  %v6507_v32 = vsel %vm6114_vm13, %v6023_v20, -inf  ;;  %v6032_v36 = vcombine.high %v6030_v37, %v6030_v37  ;;  %v12299_v10 = vld [vmem:[#allocation3 + $0x18] sm:$0x3f] }
 0x57c   :  { %v6490_v38 = vmax.f32 %v6488_v1, %v6489_v49  ;;  %v6496_v52 = vrot.slane %v6495_v58, 2  ;;  %v6503_v16 = vrot.slane %v6502_v50, 2  ;;  %v6508_v34 = vrot.slane %v6507_v32, 4 }
 0x57d   :  { %v6484_v29 = vrot.slane %v6483_v35, 1  ;;  %v6514_v14 = vsel %vm6114_vm13, %v6031_v11, -inf  ;;  %v6521_v45 = vsel %vm6114_vm13, %v6030_v37, -inf  ;;  %v6528_v42 = vsel %vm6114_vm13, %v6032_v36, -inf }
 0x57e   :  { %v6491_v2 = vrot.slane %v6490_v38, 1  ;;  %v6497_v6 = vmax.f32 %v6495_v58, %v6496_v52  ;;  %v6504_v48 = vmax.f32 %v6502_v50, %v6503_v16  ;;  %v6509_v33 = vmax.f32 %v6507_v32, %v6508_v34 }
 0x57f   :  { %v6515_v5 = vrot.slane %v6514_v14, 4  ;;  %v6485_v15 = vmax.f32 %v6483_v35, %v6484_v29  ;;  %v6522_v9 = vrot.slane %v6521_v45, 4  ;;  %v6529_v41 = vrot.slane %v6528_v42, 4 }
 0x580   :  { %v6492_v43 = vmax.f32 %v6490_v38, %v6491_v2  ;;  %v6498_v31 = vrot.slane %v6497_v6, 1  ;;  %v6505_v3 = vrot.slane %v6504_v48, 1  ;;  %v6510_v54 = vrot.slane %v6509_v33, 2 }
 0x581   :  { %v6516_v17 = vmax.f32 %v6514_v14, %v6515_v5  ;;  %v6587_v25 = vmax.f32 %v6457_v44, %v6485_v15  ;;  %v6523_v59 = vmax.f32 %v6521_v45, %v6522_v9  ;;  %v6530_v62 = vmax.f32 %v6528_v42, %v6529_v41  ;;  %v12318_v5 = vld [vmem:[#allocation3 + $0x20] sm:$0x3f] }
 0x582   :  { %v6588_v63 = vmax.f32 %v6464_v24, %v6492_v43  ;;  %v6499_v61 = vmax.f32 %v6497_v6, %v6498_v31  ;;  %v6506_v12 = vmax.f32 %v6504_v48, %v6505_v3  ;;  %v6511_v60 = vmax.f32 %v6509_v33, %v6510_v54  ;;  %v9502_v41 = vld [vmem:[%s12886_s5 + $0x264] ss:$8 sps:$4 sm:$0xff]  }
 0x583   :  { %v6517_v53 = vrot.slane %v6516_v17, 2  ;;  %v6524_v0 = vrot.slane %v6523_v59, 2  ;;  %v5761_v40 = vmax.f32 %v5743_v39, 0.0  ;;  %v6531_v47 = vrot.slane %v6530_v62, 2 }
 0x584   :  { %v6645_v13 = vsel %vm4449_vm5, %v6588_v63, %v6587_v25  ;;  %v6589_v19 = vmax.f32 %v6471_v27, %v6499_v61  ;;  %v6590_v22 = vmax.f32 %v6478_v4, %v6506_v12  ;;  %v6512_v57 = vrot.slane %v6511_v60, 1  ;;  %v9493_v63 = vld [vmem:[%s12886_s5 + $0x270] ss:$8 sps:$4 sm:$0xff]  }
 0x585   :  { %v6518_v23 = vmax.f32 %v6516_v17, %v6517_v53  ;;  %v6525_v46 = vmax.f32 %v6523_v59, %v6524_v0  ;;  %v6033_v30 = vcombine.high %v5761_v40, %v5761_v40  ;;  %v6040_v44 = vrot.slane %v5761_v40, %v12906_v56  ;;  %v12345_v40 = vld [vmem:[#allocation3 + $0x38] sm:$0x3f] }
 0x586   :  { %v6646_v55 = vsel %vm4451_vm6, %v6589_v19, %v6645_v13  ;;  %v12294_v26 = vmax.f32 %v6511_v60, %v6512_v57  ;;  %v6708_v21 = vrot.slane %v12288_v8, 1  ;;  %v6709_v49 = vrot.slane %v12290_v51, 1 }
 0x587   :  { %v6519_v24 = vrot.slane %v6518_v23, 1  ;;  %v6647_v7 = vsel %vm4453_vm7, %v6590_v22, %v6646_v55  ;;  %v6526_v1 = vrot.slane %v6525_v46, 1  ;;  %v6047_v27 = vrot.slane %v6033_v30, %v12906_v56 }
 0x588   :  { %6665 = vst [vmem:[#allocation6 + $0x18] sm:$0xf] %v6647_v7  ;;  %6686 = vst [vmem:[#allocation3 + $0x49] sm:$0xf] %v6647_v7  ;;  %v6048_v18 = vcombine.high %v6040_v44, %v6040_v44  ;;  %v6535_v4 = vsel %vm6114_vm13, %v6040_v44, -inf  ;;  %v12306_v58 = vmax.f32 %v6530_v62, %v6531_v47  ;;  %v6710_v38 = vrot.slane %v12297_v28, 1 }
 0x589   :  { %v12304_v20 = vmax.f32 %v6518_v23, %v6519_v24  ;;  %v6049_v50 = vcombine.high %v6047_v27, %v6047_v27  ;;  %v6536_v37 = vrot.slane %v6535_v4, 4  ;;  %v6549_v35 = vsel %vm6114_vm13, %v6047_v27, -inf  ;;  %v12343_v62 = vld [vmem:[#allocation3 + $0x30] sm:$0x3f]  ;;  %v9500_v24 = vld [vmem:[%s12886_s5 + $0x260] ss:$8 sps:$4 sm:$0xff]  }
 0x58a   :  { %v6542_v39 = vsel %vm6114_vm13, %v6048_v18, -inf  ;;  %v6711_v11 = vrot.slane %v12299_v10, 1  ;;  %v12312_v32 = vmax.f32 %v6525_v46, %v6526_v1  ;;  %v6550_v36 = vrot.slane %v6549_v35, 4  ;;  %v9505_v7 = vld [vmem:[%s12886_s5 + $0x370] ss:$8 sps:$4 sm:$0xff]  }
 0x58b   :  { %v6537_v52 = vmax.f32 %v6535_v4, %v6536_v37  ;;  %v6543_v16 = vrot.slane %v6542_v39, 4  ;;  %v6556_v34 = vsel %vm6114_vm13, %v6049_v50, -inf  ;;  %v6716_v29 = vrot.slane %v12288_v8, 2  ;;  %v9510_v37 = vld [vmem:[%s12886_s5 + $0x254] ss:$8 sps:$4 sm:$0xff]  }
 0x58c   :  { %v8750_v2 = vcombine.low %v12288_v8, %v12290_v51  ;;  %v8751_v14 = vcombine.low %v6708_v21, %v6709_v49  ;;  %v6551_v48 = vmax.f32 %v6549_v35, %v6550_v36  ;;  %v6557_v33 = vrot.slane %v6556_v34, 4  ;;  %v12350_v8 = vld [vmem:[#allocation3 + $0x40] sm:$0x3f] }
 0x58d   :  { %v6538_v45 = vrot.slane %v6537_v52, 2  ;;  %v6544_v6 = vmax.f32 %v6542_v39, %v6543_v16  ;;  %v12320_v15 = vcombine.low %v6709_v49, %v6710_v38  ;;  %v12324_v43 = vcombine.low %v6710_v38, %v6711_v11  ;;  %v12370_v39 = vld [vmem:[#allocation3 + $0x28] sm:$0x3f] }
 0x58e   :  { %v12328_v9 = vcombine.low %v12297_v28, %v12299_v10  ;;  %v8753_v42 = vcombine.low %v12290_v51, %v12297_v28  ;;  %v6552_v54 = vrot.slane %v6551_v48, 2  ;;  %v6558_v17 = vmax.f32 %v6556_v34, %v6557_v33  ;;  %v9511_v33 = vld [vmem:[%s12886_s5 + $0x360] ss:$8 sps:$4 sm:$0xff]  }
 0x58f   :  { %v6539_v31 = vmax.f32 %v6537_v52, %v6538_v45  ;;  %v6545_v3 = vrot.slane %v6544_v6, 2  ;;  %v6829_v25 = vpack.c.bf16 %v12324_v43, %v8751_v14  ;;  %v8759_v61 = vcombine.low %v12299_v10, %v12318_v5  ;;  %v12352_v55 = vld [vmem:[#allocation3 + $0x48] sm:$0x3f] }
 0x590   :  { %v6828_v59 = vpack.c.bf16 %v12328_v9, %v8750_v2  ;;  %v6717_v12 = vrot.slane %v12290_v51, 2  ;;  %v6553_v13 = vmax.f32 %v6551_v48, %v6552_v54  ;;  %v6559_v0 = vrot.slane %v6558_v17, 2  ;;  %v9513_v52 = vld [vmem:[%s12886_s5 + $0x364] ss:$8 sps:$4 sm:$0xff]   ;;  %v9519_v54 = vld [vmem:[%s12886_s5 + $0x354] ss:$8 sps:$4 sm:$0xff]  }
 0x591   :  { %v6540_v60 = vrot.slane %v6539_v31, 1  ;;  %v6546_v53 = vmax.f32 %v6544_v6, %v6545_v3  ;;  %v6533_v19 = vrot.slane %v12306_v58, 1  ;;  %7754 = vmatprep.mubr.bf16.mxu1 %v6829_v25  ;;  %v6831_v22 = vpack.c.bf16 %v8759_v61, %v8753_v42  ;;  %v9516_v42 = vld [vmem:[%s12886_s5 + $0x244] ss:$8 sps:$4 sm:$0xff]   ;;  %v9514_v61 = vld [vmem:[%s12886_s5 + $0x240] ss:$8 sps:$4 sm:$0xff]  }
 0x592   :  { %v6718_v57 = vrot.slane %v12297_v28, 2  ;;  %v6719_v23 = vrot.slane %v12299_v10, 2  ;;  %v6554_v30 = vrot.slane %v6553_v13, 1  ;;  %v6560_v44 = vmax.f32 %v6558_v17, %v6559_v0  ;;  %7755 = vmatmul.mubr.bf16.vlgmr.msra.gmra.mxu1 %v6828_v59  ;;  %v9522_v51 = vld [vmem:[%s12886_s5 + $0x234] ss:$8 sps:$4 sm:$0xff]  }
 0x593   :  { %v6541_v46 = vmax.f32 %v6539_v31, %v6540_v60  ;;  %v6547_v47 = vrot.slane %v6546_v53, 1  ;;  %7829 = vmatpush1.bf16.msra.mxu1 %v9493_v63  ;;  %7807 = vmatprep.mubr.bf16.mxu0 %v6831_v22  ;;  %v8752_v1 = vcombine.low %v6716_v29, %v6717_v12  ;;  %v6712_v28 = vrot.slane %v12343_v62, 1 }
 0x594   :  { %v12362_v27 = vcombine.low %v6718_v57, %v6719_v23  ;;  %v6713_v18 = vrot.slane %v12345_v40, 1  ;;  %v6555_v21 = vmax.f32 %v6553_v13, %v6554_v30  ;;  %v6561_v49 = vrot.slane %v6560_v44, 1  ;;  %7830 = vmatprep.subr.bf16.mxu1 %v9502_v41  ;;  %v9517_v13 = vld [vmem:[%s12886_s5 + $0x350] ss:$8 sps:$4 sm:$0xff]  }
 0x595   :  { %v6548_v4 = vmax.f32 %v6546_v53, %v6547_v47  ;;  %v6591_v50 = vmax.f32 %v12294_v26, %v6541_v46  ;;  %v6534_v35 = vmax.f32 %v12306_v58, %v6533_v19  ;;  %v6714_v16 = vrot.slane %v12350_v8, 1  ;;  %v9508_v58 = vld [vmem:[%s12886_s5 + $0x250] ss:$8 sps:$4 sm:$0xff]   ;;  %v9525_v19 = vld [vmem:[%s12886_s5 + $0x344] ss:$8 sps:$4 sm:$0xff]  }
 0x596   :  { %v6830_v38 = vpack.c.bf16 %v12362_v27, %v8752_v1  ;;  %v6715_v36 = vrot.slane %v12352_v55, 1  ;;  %v6562_v26 = vmax.f32 %v6560_v44, %v6561_v49  ;;  %v6593_v29 = vmax.f32 %v12312_v32, %v6555_v21  ;;  %v9531_v44 = vld [vmem:[%s12886_s5 + $0x334] ss:$8 sps:$4 sm:$0xff]  }
 0x597   :  { %v6592_v34 = vmax.f32 %v12304_v20, %v6548_v4  ;;  %v8765_v2 = vcombine.low %v6712_v28, %v6713_v18  ;;  %7831 = vmatpush1.bf16.msra.mxu1 %v9500_v24  ;;  %v12390_v45 = vcombine.low %v12350_v8, %v12352_v55  ;;  %v6728_v6 = vrot.slane %v12318_v5, 2 }
 0x598   :  { %7808 = vmatmul.mubr.bf16.vlgmr.msra.gmra.mxu0 %v6830_v38  ;;  %v12386_v14 = vcombine.low %v6714_v16, %v6715_v36  ;;  %v6734_v20 = vrot.slane %v12370_v39, 2  ;;  %v6594_v32 = vmax.f32 %v6534_v35, %v6562_v26  ;;  %7832 = vmatprep.subr.bf16.mxu1 %v9510_v37  ;;  %v8764_v31 = vcombine.low %v12343_v62, %v12345_v40  ;;  %v9534_v37 = vld [vmem:[%s12886_s5 + $0x214] ss:$8 sps:$4 sm:$0xff]   ;;  %v9537_v35 = vld [vmem:[%s12886_s5 + $0x324] ss:$8 sps:$4 sm:$0xff]  }
 0x599   :  { %v6648_v48 = vsel %vm4449_vm5, %v6592_v34, %v6591_v50  ;;  %7882 = vmatpush1.bf16.msra.mxu0 %v9505_v7  ;;  %v8761_v25 = vcombine.low %v6719_v23, %v6728_v6  ;;  %v8755_v41 = vcombine.low %v6717_v12, %v6718_v57  ;;  %v6726_v53 = vrot.slane %v12318_v5, 1  ;;  %v9529_v50 = vld [vmem:[%s12886_s5 + $0x330] ss:$8 sps:$4 sm:$0xff]  }
 0x59a   :  { %v6649_v3 = vsel %vm4451_vm6, %v6593_v29, %v6648_v48  ;;  %7883 = vmatprep.subr.bf16.mxu0 %v9513_v52  ;;  %v6838_v17 = vpack.c.bf16 %v12386_v14, %v8765_v2  ;;  %v12408_v63 = vcombine.low %v6728_v6, %v6734_v20  ;;  %v6837_v60 = vpack.c.bf16 %v12390_v45, %v8764_v31  ;;  %v9532_v26 = vld [vmem:[%s12886_s5 + $0x210] ss:$8 sps:$4 sm:$0xff]   ;;  %v9535_v2 = vld [vmem:[%s12886_s5 + $0x320] ss:$8 sps:$4 sm:$0xff]   ;;  %v9543_v6 = vld [vmem:[%s12886_s5 + $0x314] ss:$8 sps:$4 sm:$0xff]  }
 0x59b   :  { %v6650_v59 = vsel %vm4453_vm7, %v6594_v32, %v6649_v3  ;;  %7833 = vmatpush1.bf16.msra.mxu1 %v9508_v58  ;;  %v6833_v12 = vpack.c.bf16 %v8761_v25, %v8755_v41  ;;  %v8762_v0 = vcombine.low %v12318_v5, %v12370_v39  ;;  %v12431_v22 = vcombine.low %v6711_v11, %v6726_v53  ;;  %v9520_v5 = vld [vmem:[%s12886_s5 + $0x230] ss:$8 sps:$4 sm:$0xff]   ;;  %v9523_v11 = vld [vmem:[%s12886_s5 + $0x340] ss:$8 sps:$4 sm:$0xff]   ;;  %v9551_v48 = vld [vmem:[%s12886_s5 + $0x304] ss:$8 sps:$4 sm:$0xff]  }
 0x59c   :  { %6666 = vst [vmem:[#allocation6 + $0x1c] sm:$0xf] %v6650_v59  ;;  %6687 = vst [vmem:[#allocation3 + $0x51] sm:$0xf] %v6650_v59  ;;  %7764 = vmatprep.mubr.bf16.mxu1 %v6838_v17  ;;  %7834 = vmatprep.subr.bf16.mxu1 %v9516_v42  ;;  %v12436_v23 = vcombine.low %v6713_v18, %v6714_v16  ;;  %v6836_v46 = vpack.c.bf16 %v12408_v63, %v12362_v27  ;;  %v6723_v47 = vrot.slane %v12352_v55, 2 }
 0x59d   :  { %7884 = vmatpush1.bf16.msra.mxu0 %v9511_v33  ;;  %7765 = vmatmul.mubr.bf16.gmra.mxu1 %v6837_v60  ;;  %v12434_v57 = vpack.c.bf16 %v8762_v0, %v12328_v9  ;;  %v6832_v10 = vpack.c.bf16 %v12431_v22, %v12320_v15  ;;  %v9528_v9 = vld [vmem:[%s12886_s5 + $0x224] ss:$8 sps:$4 sm:$0xff]   ;;  %v6732_v30 = vrot.slane %v12370_v39, 1  ;;  %v6720_v24 = vrot.slane %v12343_v62, 2  ;;  %v9526_v18 = vld [vmem:[%s12886_s5 + $0x220] ss:$8 sps:$4 sm:$0xff]  }
 0x59e   :  { %7885 = vmatprep.subr.bf16.mxu0 %v9519_v54  ;;  %7860 = vmatprep.mubr.bf16.mxu1 %v6833_v12  ;;  %v6721_v7 = vrot.slane %v12345_v40, 2  ;;  %v6722_v1 = vrot.slane %v12350_v8, 2  ;;  %v8767_v4 = vcombine.low %v12345_v40, %v12350_v8  ;;  %v9538_v20 = vld [vmem:[%s12886_s5 + $0x200] ss:$8 sps:$4 sm:$0xff]   ;;  %v9541_v32 = vld [vmem:[%s12886_s5 + $0x310] ss:$8 sps:$4 sm:$0xff]  }
 0x59f   :  { %7835 = vmatpush1.bf16.msra.mxu1 %v9514_v61  ;;  %v8763_v39 = vcombine.low %v6726_v53, %v6732_v30  ;;  %v9544_v33 = vld [vmem:[%s12886_s5 + $0x2f0] ss:$8 sps:$4 sm:$0xff]   ;;  %v9549_v42 = vld [vmem:[%s12886_s5 + $0x300] ss:$8 sps:$4 sm:$0xff]   ;;  %v9554_v31 = vld [vmem:[%s12886_s5 + $0x2e4] ss:$8 sps:$4 sm:$0xff]  }
 0x5a0   :  { %7836 = vmatprep.subr.bf16.mxu1 %v9522_v51  ;;  %v12472_v62 = vcombine.low %v6722_v1, %v6723_v47  ;;  %v8766_v52 = vcombine.low %v6720_v24, %v6721_v7  ;;  %v9559_v3 = vld [vmem:[%s12886_s5 + $0x3f4] ss:$8 sps:$4 sm:$0xff]   ;;  %v9552_v54 = vld [vmem:[%s12886_s5 + $0x2e0] ss:$8 sps:$4 sm:$0xff]   ;;  %v9557_v17 = vld [vmem:[%s12886_s5 + $0x3f0] ss:$8 sps:$4 sm:$0xff]  }
 0x5a1   :  { %7886 = vmatpush1.bf16.msra.mxu0 %v9517_v13  ;;  %v6835_v58 = vpack.c.bf16 %v8763_v39, %v12324_v43  ;;  %v9546_v43 = vld [vmem:[%s12886_s5 + $0x2f4] ss:$8 sps:$4 sm:$0xff]   ;;  %v9565_v59 = vld [vmem:[%s12886_s5 + $0x3e4] ss:$8 sps:$4 sm:$0xff]   ;;  %v9560_v41 = vld [vmem:[%s12886_s5 + $0x2d0] ss:$8 sps:$4 sm:$0xff]  }
 0x5a2   :  { %7887 = vmatprep.subr.bf16.mxu0 %v9525_v19  ;;  %v6839_v34 = vpack.c.bf16 %v12472_v62, %v8766_v52  ;;  %v9562_v25 = vld [vmem:[%s12886_s5 + $0x2d4] ss:$8 sps:$4 sm:$0xff]   ;;  %v9563_v61 = vld [vmem:[%s12886_s5 + $0x3e0] ss:$8 sps:$4 sm:$0xff]   ;;  %v9568_v60 = vld [vmem:[%s12886_s5 + $0x2c4] ss:$8 sps:$4 sm:$0xff]  }
 0x5a3   :  { %v12459_v28 = vld [vmem:[#allocation3 + $0x50] sm:$0x3f]  ;;  %7837 = vmatpush1.bf16.msra.mxu1 %v9520_v5  ;;  %v9566_v13 = vld [vmem:[%s12886_s5 + $0x2c0] ss:$8 sps:$4 sm:$0xff]   ;;  %v9577_v0 = vld [vmem:[%s12886_s5 + $0x3c4] ss:$8 sps:$4 sm:$0xff]  }
 0x5a4   :  { %v8773_v21 = vcombine.low %v12352_v55, %v12459_v28  ;;  %v6727_v49 = vrot.slane %v12459_v28, 1  ;;  %7838 = vmatprep.subr.bf16.mxu1 %v9528_v9  ;;  %v9571_v53 = vld [vmem:[%s12886_s5 + $0x3d4] ss:$8 sps:$4 sm:$0xff]   ;;  %v9569_v51 = vld [vmem:[%s12886_s5 + $0x3d0] ss:$8 sps:$4 sm:$0xff]   ;;  %v6729_v39 = vrot.slane %v12459_v28, 2 }
 0x5a5   :  { %7888 = vmatpush1.bf16.msra.mxu0 %v9523_v11  ;;  %v9574_v12 = vld [vmem:[%s12886_s5 + $0x2b4] ss:$8 sps:$4 sm:$0xff]   ;;  %v9572_v19 = vld [vmem:[%s12886_s5 + $0x2b0] ss:$8 sps:$4 sm:$0xff]   ;;  %v9575_v5 = vld [vmem:[%s12886_s5 + $0x3c0] ss:$8 sps:$4 sm:$0xff]  }
 0x5a6   :  { %7889 = vmatprep.subr.bf16.mxu0 %v9531_v44  ;;  %v6840_v38 = vpack.c.bf16 %v8773_v21, %v8767_v4  ;;  %v12490_v16 = vcombine.low %v6715_v36, %v6727_v49  ;;  %v9540_v36 = vld [vmem:[%s12886_s5 + $0x204] ss:$8 sps:$4 sm:$0xff]   ;;  %v9583_v9 = vld [vmem:[%s12886_s5 + $0x3b4] ss:$8 sps:$4 sm:$0xff]   ;;  %v9578_v30 = vld [vmem:[%s12886_s5 + $0x2a0] ss:$8 sps:$4 sm:$0xff]  }
 0x5a7   :  { %7839 = vmatpush1.bf16.msra.mxu1 %v9526_v18  ;;  %v9580_v11 = vld [vmem:[%s12886_s5 + $0x2a4] ss:$8 sps:$4 sm:$0xff]   ;;  %v9581_v44 = vld [vmem:[%s12886_s5 + $0x3b0] ss:$8 sps:$4 sm:$0xff]   ;;  %v9586_v24 = vld [vmem:[%s12886_s5 + $0x294] ss:$8 sps:$4 sm:$0xff]  }
 0x5a8   :  { %7817 = vmatprep.mubr.bf16.mxu0 %v6840_v38  ;;  %v6841_v29 = vpack.c.bf16 %v12490_v16, %v12436_v23  ;;  %7840 = vmatprep.subr.bf16.mxu1 %v9534_v37  ;;  %v9589_v18 = vld [vmem:[%s12886_s5 + $0x3a4] ss:$8 sps:$4 sm:$0xff]   ;;  %v9584_v4 = vld [vmem:[%s12886_s5 + $0x290] ss:$8 sps:$4 sm:$0xff]   ;;  %v9587_v21 = vld [vmem:[%s12886_s5 + $0x3a0] ss:$8 sps:$4 sm:$0xff]  }
 0x5a9   :  { %7890 = vmatpush1.bf16.msra.mxu0 %v9529_v50  ;;  %v9592_v50 = vld [vmem:[%s12886_s5 + $0x284] ss:$8 sps:$4 sm:$0xff]   ;;  %v9595_v37 = vld [vmem:[%s12886_s5 + $0x394] ss:$8 sps:$4 sm:$0xff]   ;;  %v9593_v52 = vld [vmem:[%s12886_s5 + $0x390] ss:$8 sps:$4 sm:$0xff]  }
 0x5aa   :  { %7891 = vmatprep.subr.bf16.mxu0 %v9537_v35  ;;  %7818 = vmatmul.mubr.bf16.gmra.mxu0 %v6839_v34  ;;  %v9590_v35 = vld [vmem:[%s12886_s5 + $0x280] ss:$8 sps:$4 sm:$0xff]   ;;  %v12608_v38 = vld [vmem:[#allocation3 + $0x58] sm:$0x3f]  ;;  %v8775_v34 = vcombine.low %v6723_v47, %v6729_v39  ;;  %v9604_v47 = vld [vmem:[%s12886_s5 + $0x464] ss:$8 sps:$4 sm:$0xff]  }
 0x5ab   :  { %7913 = vmatprep.mubr.bf16.mxu0 %v6835_v58  ;;  %7841 = vmatpush1.bf16.msra.mxu1 %v9532_v26  ;;  %v9598_v26 = vld [vmem:[%s12886_s5 + $0x474] ss:$8 sps:$4 sm:$0xff]   ;;  %v9596_v58 = vld [vmem:[%s12886_s5 + $0x470] ss:$8 sps:$4 sm:$0xff]   ;;  %v9599_v55 = vld [vmem:[%s12886_s5 + $0x380] ss:$8 sps:$4 sm:$0xff]  }
 0x5ac   :  { %7842 = vmatprep.subr.bf16.mxu1 %v9540_v36  ;;  %v6733_v36 = vrot.slane %v12608_v38, 1  ;;  %v9602_v8 = vld [vmem:[%s12886_s5 + $0x460] ss:$8 sps:$4 sm:$0xff]   ;;  %v9606_v15 = vld [vmem:[%s12886_s5 + $0x450] ss:$8 sps:$4 sm:$0xff]  }
 0x5ad   :  { %7892 = vmatpush1.bf16.msra.mxu0 %v9535_v2  ;;  %v9601_v2 = vld [vmem:[%s12886_s5 + $0x384] ss:$8 sps:$4 sm:$0xff]   ;;  %v9613_v23 = vld [vmem:[%s12886_s5 + $0x430] ss:$8 sps:$4 sm:$0xff]  }
 0x5ae   :  { %7893 = vmatprep.subr.bf16.mxu0 %v9543_v6  ;;  %v8769_v6 = vcombine.low %v6721_v7, %v6722_v1  ;;  %v8777_v40 = vcombine.low %v6727_v49, %v6733_v36  ;;  %v9608_v7 = vld [vmem:[%s12886_s5 + $0x454] ss:$8 sps:$4 sm:$0xff]   ;;  %v9611_v22 = vld [vmem:[%s12886_s5 + $0x444] ss:$8 sps:$4 sm:$0xff]  }
 0x5af   :  { %7843 = vmatpush1.bf16.msra.mxu1 %v9538_v20  ;;  %v9615_v49 = vld [vmem:[%s12886_s5 + $0x434] ss:$8 sps:$4 sm:$0xff]   ;;  %v9618_v16 = vld [vmem:[%s12886_s5 + $0x424] ss:$8 sps:$4 sm:$0xff]  }
 0x5b0   :  { %7844 = vmatprep.subr.bf16.mxu1 %v9546_v43  ;;  %v6842_v20 = vpack.c.bf16 %v8775_v34, %v8769_v6  ;;  %v6844_v1 = vpack.c.bf16 %v8777_v40, %v12386_v14  ;;  %v9609_v14 = vld [vmem:[%s12886_s5 + $0x440] ss:$8 sps:$4 sm:$0xff]   ;;  %v9619_v43 = vld [vmem:[%s12886_s5 + $0x410] ss:$8 sps:$4 sm:$0xff]  }
 0x5b1   :  { %7894 = vmatpush1.bf16.msra.mxu0 %v9541_v32 }
 0x5b2   :  { %7895 = vmatprep.subr.bf16.mxu0 %v9551_v48  ;;  %v9624_v48 = vld [vmem:[%s12886_s5 + $0x404] ss:$8 sps:$4 sm:$0xff]  }
 0x5b3   :  { %7845 = vmatpush2.bf16.msra.mxu1 %v9544_v33  ;;  %v9622_v33 = vld [vmem:[%s12886_s5 + $0x400] ss:$8 sps:$4 sm:$0xff]  }
 0x5b4   :  { %7846 = vmatprep.subr.bf16.mxu1 %v9554_v31 }
 0x5b5   :  { %7896 = vmatpush1.bf16.msra.mxu0 %v9549_v42  ;;  %v6735_v42 = vrot.slane %v12608_v38, 2 }
 0x5b6   :  { %7897 = vmatprep.subr.bf16.mxu0 %v9559_v3 }
 0x5b7   :  { %7847 = vmatpush2.bf16.msra.mxu1 %v9552_v54  ;;  %v6795_v31 = vcombine.low %v6729_v39, %v6735_v42 }
 0x5b8   :  { %7848 = vmatprep.subr.bf16.mxu1 %v9562_v25 }
 0x5b9   :  { %7898 = vmatpush2.bf16.msra.mxu0 %v9557_v17  ;;  %v6845_v3 = vpack.c.bf16 %v6795_v31, %v12472_v62 }
 0x5ba   :  { %7899 = vmatprep.subr.bf16.mxu0 %v9565_v59 }
 0x5bb   :  { %7849 = vmatpush2.bf16.msra.mxu1 %v9560_v41 }
 0x5bc   :  { %7850 = vmatprep.subr.bf16.mxu1 %v9568_v60 }
 0x5bd   :  { %7900 = vmatpush2.bf16.msra.mxu0 %v9563_v61 }
 0x5be   :  { %7901 = vmatprep.subr.bf16.mxu0 %v9571_v53 }
 0x5bf   :  { %7851 = vmatpush2.bf16.msra.mxu1 %v9566_v13 }
 0x5c0   :  { %7852 = vmatprep.subr.bf16.mxu1 %v9574_v12 }
 0x5c1   :  { %7902 = vmatpush2.bf16.msra.mxu0 %v9569_v51 }
 0x5c2   :  { %7903 = vmatprep.subr.bf16.mxu0 %v9577_v0 }
 0x5c3   :  { %7853 = vmatpush2.bf16.msra.mxu1 %v9572_v19 }
 0x5c4   :  { %7854 = vmatprep.subr.bf16.mxu1 %v9580_v11 }
 0x5c5   :  { %7904 = vmatpush2.bf16.msra.mxu0 %v9575_v5 }
 0x5c6   :  { %7905 = vmatprep.subr.bf16.mxu0 %v9583_v9 }
 0x5c7   :  { %7855 = vmatpush2.bf16.msra.mxu1 %v9578_v30 }
 0x5c8   :  { %7856 = vmatprep.subr.bf16.mxu1 %v9586_v24 }
 0x5c9   :  { %7906 = vmatpush2.bf16.msra.mxu0 %v9581_v44 }
 0x5ca   :  { %7907 = vmatprep.subr.bf16.mxu0 %v9589_v18 }
 0x5cb   :  { %7857 = vmatpush2.bf16.msra.mxu1 %v9584_v4 }
 0x5cc   :  { %7858 = vmatprep.subr.bf16.mxu1 %v9592_v50 }
 0x5cd   :  { %7908 = vmatpush2.bf16.msra.mxu0 %v9587_v21 }
 0x5ce   :  { %7909 = vmatprep.subr.bf16.mxu0 %v9595_v37 }
 0x5cf   :  { %7859 = vmatpush2.bf16.msra.mxu1 %v9590_v35 }
 0x5d0   :  { %7934 = vmatprep.subr.bf16.mxu1 %v9598_v26 }
 0x5d1   :  { %7910 = vmatpush2.bf16.msra.mxu0 %v9593_v52 }
 0x5d2   :  { %7911 = vmatprep.subr.bf16.mxu0 %v9601_v2  ;;  %7861 = vmatmul.mubr.bf16.vlgmr.msra.gmra.mxu1 %v6832_v10  ;;  %v8776_v10 = vcombine.low %v12459_v28, %v12608_v38 }
 0x5d3   :  { %7870 = vmatprep.mubr.bf16.mxu1 %v6842_v20  ;;  %7935 = vmatpush1.bf16.msra.mxu1 %v9596_v58 }
 0x5d4   :  { %7936 = vmatprep.subr.bf16.mxu1 %v9604_v47  ;;  %v6843_v32 = vpack.c.bf16 %v8776_v10, %v12390_v45  ;;  %v9621_v45 = vld [vmem:[%s12886_s5 + $0x414] ss:$8 sps:$4 sm:$0xff]  }
 0x5d5   :  { %7912 = vmatpush2.bf16.msra.mxu0 %v9599_v55 }
 0x5d7   :  { %7937 = vmatpush1.bf16.msra.mxu1 %v9602_v8 }
 0x5d8   :  { %7914 = vmatmul.mubr.bf16.vlgmr.msra.gmra.mxu0 %v12434_v57  ;;  %7938 = vmatprep.subr.bf16.mxu1 %v9608_v7  ;;  %v9716_v57 = vmov 0  }
 0x5d9   :  { %7923 = vmatprep.mubr.bf16.mxu0 %v6844_v1 }
 0x5da   :  { %7871 = vmatmul.mubr.bf16.gmra.mxu1 %v6841_v29  ;;  %v9616_v29 = vld [vmem:[%s12886_s5 + $0x420] ss:$8 sps:$4 sm:$0xff]   ;;  %s9717_s5 = smov [#allocation6]  }
 0x5db   :  { %7939 = vmatpush1.bf16.msra.mxu1 %v9606_v15  ;;  %7966 = vmatprep.mubr.bf16.mxu1 %v9716_v57  ;;  %s8608_s2 = sshll.u32 %s9717_s5, 4  ;;  %s8609_s2 = int_to_ptr.vmem [resolvable:$true] %s8608_s2 }
 0x5dc   :  { %7940 = vmatprep.subr.bf16.mxu1 %v9611_v22  ;;  %s9648_s22 = scalar_lea.vmem %s8609_s2, 512  ;;  %p9653_p1 = scmp.lt.s32.totalorder %s8609_s2, %s8609_s2 }
 0x5dd   :  { %p9649_p0 = scmp.ne.s32.totalorder %s8609_s2, %s9648_s22  ;;  %p9654_p2 = scmp.lt.s32.totalorder %s9648_s22, %s9648_s22 }
 0x5df   :  { %7941 = vmatpush1.bf16.msra.mxu1 %v9609_v14  ;;  %p9655_p3 = por %p9654_p2, %p9653_p1 }
 0x5e0   :  { %7924 = vmatmul.mubr.bf16.gmra.mxu0 %v6843_v32  ;;  %7942 = vmatprep.subr.bf16.mxu1 %v9615_v49 }
 0x5e1   :  { %p9656_p4 = pnand %p9655_p3, %p9649_p0 }
 0x5e3   :  { %7943 = vmatpush1.bf16.msra.mxu1 %v9613_v23 }
 0x5e4   :  { %7944 = vmatprep.subr.bf16.mxu1 %v9618_v16 }
 0x5e7   :  { %7945 = vmatpush1.bf16.msra.mxu1 %v9616_v29 }
 0x5e8   :  { %7946 = vmatprep.subr.bf16.mxu1 %v9621_v45 }
 0x5eb   :  { %7947 = vmatpush1.bf16.msra.mxu1 %v9619_v43 }
 0x5ec   :  { %7948 = vmatprep.subr.bf16.mxu1 %v9624_v48 }
 0x5ef   :  { %7949 = vmatpush1.bf16.msra.mxu1 %v9622_v33 }
 0x5f2   :  { %7967 = vmatmul.mubr.bf16.vlgmr.msra.gmra.mxu1 %v6836_v46 }
 0x5f3   :  { %7976 = vmatprep.mubr.bf16.mxu1 %v9716_v57 }
 0x5fa   :  { %7977 = vmatmul.mubr.bf16.gmra.mxu1 %v6845_v3 }
 0x652   :  { %v7756_v54 = vpop.f32.mrf.mxu1 }
 0x654   :  { %v7758_v17 = vpop.f32.mrf.mxu1 }
 0x656   :  { %v7760_v25 = vpop.f32.mrf.mxu1 }
 0x658   :  { %v7762_v59 = vpop.f32.mrf.mxu1  ;;  %v7809_v60 = vpop.f32.mrf.mxu0 }
 0x65a   :  { %v7811_v27 = vpop.f32.mrf.mxu0 }
 0x65c   :  { %v7813_v46 = vpop.f32.mrf.mxu0 }
 0x65d   :  { %v12696_v41 = vpop.f32.mrf.mxu1 }
 0x65e   :  { %v7815_v13 = vpop.f32.mrf.mxu0 }
 0x65f   :  { %v12698_v61 = vpop.f32.mrf.mxu1 }
 0x661   :  { %v12700_v53 = vpop.f32.mrf.mxu1 }
 0x663   :  { %v12702_v63 = vpop.f32.mrf.mxu1 }
 0x66a   :  { %v12704_v62 = vpop.f32.mrf.mxu0 }
 0x66c   :  { %v12706_v0 = vpop.f32.mrf.mxu0 }
 0x692   :  { %v7862_v28 = vpop.f32.mrf.mxu1 }
 0x694   :  { %v7864_v51 = vpop.f32.mrf.mxu1 }
 0x696   :  { %v7866_v12 = vpop.f32.mrf.mxu1 }
 0x697   :  { %9659 = shalt.err (!%p9656_p4)
}
 0x698   :  { %s9719_s23 = smov 4   ;;  %v7868_v19 = vpop.f32.mrf.mxu1  ;;  %s9668_s3 = scalar_lea.vmem %s8597_s20, 2048 }
 0x699   :  { %8614 = dma.vmem_to_hbm [thread:$0]  %s8609_s2, 512, %s12889_s8, [#allocation7], %s9715_s21, %s9715_s21, %s9719_s23  }
 0x69a   :  { %p9669_p5 = scmp.ne.s32.totalorder %s8597_s20, %s9668_s3  ;;  %p9673_p6 = scmp.lt.s32.totalorder %s8597_s20, %s8597_s20 }
 0x69b   :  { %p9674_p7 = scmp.lt.s32.totalorder %s9668_s3, %s9668_s3 }
 0x69d   :  { %p9675_p8 = por %p9674_p7, %p9673_p6 }
 0x69f   :  { %p9676_p9 = pnand %p9675_p8, %p9669_p5 }
 0x6a1   :  { %9679 = shalt.err (!%p9676_p9)
}
 0x6a2   :  { %s9720_s26 = smov 128   ;;  %s9721_s27 = smov 8   ;;  %v7823_v5 = vpop.f32.mrf.mxu0  ;;  %v12907_v11 = vld [vmem:[#allocation11_spill] sm:$0xff]  ;;  %v6990_v30 = vld [vmem:[%s12887_s6] sm:$0x3]  ;;  %v7872_v44 = vpop.f32.mrf.mxu1 }
 0x6a3   :  { %8602 = dma.vmem_to_hbm [thread:$0]  %s8597_s20, 2048, %s12888_s7, [#allocation5], %s9720_s26, %s9720_s26, %s9721_s27   ;;  %v6994_v9 = vsub.s32 0, %v12907_v11  ;;  %v6998_v24 = vsub.s32 1, %v12907_v11 }
 0x6a4   :  { %v7825_v18 = vpop.f32.mrf.mxu0  ;;  %v7874_v50 = vpop.f32.mrf.mxu1  ;;  %s9722_s6 = smov [#allocation8]  }
 0x6a5   :  { %v6995_v4 = vrot.slane %v6990_v30, %v6994_v9  ;;  %v6999_v37 = vrot.slane %v6990_v30, %v6998_v24  ;;  %s8620_s7 = sshll.u32 %s9722_s6, 4  ;;  %s8621_s7 = int_to_ptr.vmem [resolvable:$true] %s8620_s7 }
 0x6a6   :  { %v7915_v21 = vpop.f32.mrf.mxu0  ;;  %v7876_v38 = vpop.f32.mrf.mxu1  ;;  %s9688_s10 = scalar_lea.vmem %s8621_s7, 256  ;;  %p9693_p11 = scmp.lt.s32.totalorder %s8621_s7, %s8621_s7 }
 0x6a7   :  { %v7757_v39 = vadd.f32 %v7756_v54, %v6995_v4  ;;  %v7759_v52 = vadd.f32 %v7758_v17, %v6999_v37  ;;  %v7761_v58 = vadd.f32 %v7760_v25, %v6995_v4  ;;  %v7763_v55 = vadd.f32 %v7762_v59, %v6999_v37  ;;  %p9689_p10 = scmp.ne.s32.totalorder %s8621_s7, %s9688_s10  ;;  %p9694_p12 = scmp.lt.s32.totalorder %s9688_s10, %s9688_s10 }
 0x6a8   :  { %v7917_v35 = vpop.f32.mrf.mxu0  ;;  %v7878_v6 = vpop.f32.mrf.mxu1  ;;  %v7767_v32 = vadd.f32 %v12696_v41, %v6995_v4  ;;  %v7769_v33 = vadd.f32 %v12698_v61, %v6999_v37  ;;  %v7771_v42 = vadd.f32 %v12700_v53, %v6995_v4  ;;  %v7773_v17 = vadd.f32 %v12702_v63, %v6999_v37 }
 0x6a9   :  { %v7810_v26 = vadd.f32 %v7809_v60, %v7757_v39  ;;  %v7812_v34 = vadd.f32 %v7811_v27, %v7759_v52  ;;  %v7814_v40 = vadd.f32 %v7813_v46, %v7761_v58  ;;  %v7816_v7 = vadd.f32 %v7815_v13, %v7763_v55  ;;  %p9695_p13 = por %p9694_p12, %p9693_p11 }
 0x6aa   :  { %v7919_v36 = vpop.f32.mrf.mxu0  ;;  %v7820_v31 = vadd.f32 %v12704_v62, %v7767_v32  ;;  %v7822_v41 = vadd.f32 %v12706_v0, %v7769_v33  ;;  %v7824_v27 = vadd.f32 %v7823_v5, %v7771_v42 }
 0x6ab   :  { %v7863_v2 = vadd.f32 %v7862_v28, %v7810_v26  ;;  %v7865_v47 = vadd.f32 %v7864_v51, %v7812_v34  ;;  %v7867_v10 = vadd.f32 %v7866_v12, %v7814_v40  ;;  %v7869_v57 = vadd.f32 %v7868_v19, %v7816_v7  ;;  %p9696_p0 = pnand %p9695_p13, %p9689_p10 }
 0x6ac   :  { %v7921_v15 = vpop.f32.mrf.mxu0  ;;  %v7873_v46 = vadd.f32 %v7872_v44, %v7820_v31  ;;  %v7826_v28 = vadd.f32 %v7825_v18, %v7773_v17  ;;  %v7875_v12 = vadd.f32 %v7874_v50, %v7822_v41  ;;  %v7877_v62 = vadd.f32 %v7876_v38, %v7824_v27 }
 0x6ad   :  { %v7916_v20 = vadd.f32 %v7915_v21, %v7863_v2  ;;  %v7918_v1 = vadd.f32 %v7917_v35, %v7865_v47  ;;  %v7920_v23 = vadd.f32 %v7919_v36, %v7867_v10  ;;  %v7922_v29 = vadd.f32 %v7921_v15, %v7869_v57 }
 0x6ae   :  { %v7925_v45 = vpop.f32.mrf.mxu0  ;;  %v12734_v5 = vadd.f32 %v7878_v6, %v7826_v28 }
 0x6af   :  { %v12730_v19 = vadd.f32 %v7925_v45, %v7873_v46 }
 0x6b0   :  { %v7927_v13 = vpop.f32.mrf.mxu0 }
 0x6b1   :  { %v12736_v44 = vadd.f32 %v7927_v13, %v7875_v12 }
 0x6b2   :  { %v7968_v8 = vpop.f32.mrf.mxu1 }
 0x6b3   :  { %v7969_v22 = vadd.f32 %v7968_v8, %v7916_v20 }
 0x6b4   :  { %v7970_v14 = vpop.f32.mrf.mxu1 }
 0x6b5   :  { %v7971_v49 = vadd.f32 %v7970_v14, %v7918_v1  ;;  %v7987_v43 = vmax.f32 %v7969_v22, 0.0 }
 0x6b6   :  { %v7972_v16 = vpop.f32.mrf.mxu1 }
 0x6b7   :  { %v7988_v48 = vmax.f32 %v7971_v49, 0.0  ;;  %v7973_v3 = vadd.f32 %v7972_v16, %v7920_v23 }
 0x6b8   :  { %v7974_v54 = vpop.f32.mrf.mxu1 }
 0x6b9   :  { %v8003_v25 = vcombine.low %v7987_v43, %v7988_v48  ;;  %v8004_v59 = vcombine.high %v7987_v43, %v7988_v48  ;;  %v7975_v60 = vadd.f32 %v7974_v54, %v7922_v29  ;;  %v7989_v11 = vmax.f32 %v7973_v3, 0.0  ;;  %v7929_v43 = vpop.f32.mrf.mxu0 }
 0x6ba   :  { %v7978_v46 = vpop.f32.mrf.mxu1 }
 0x6bb   :  { %v8011_v51 = vrot.slane %v8003_v25, %v12906_v56  ;;  %v8018_v61 = vrot.slane %v8004_v59, %v12906_v56  ;;  %v7990_v53 = vmax.f32 %v7975_v60, 0.0  ;;  %v7931_v12 = vpop.f32.mrf.mxu0 }
 0x6bd   :  { %v8019_v63 = vcombine.high %v8011_v51, %v8011_v51  ;;  %v8020_v9 = vcombine.high %v8018_v61, %v8018_v61  ;;  %v8081_v30 = vrot.slane %v8011_v51, %v12906_v56  ;;  %v8097_v0 = vrot.slane %v8018_v61, %v12906_v56 }
 0x6be   :  { %v8021_v24 = vcombine.low %v7989_v11, %v7990_v53  ;;  %v8022_v18 = vcombine.high %v7989_v11, %v7990_v53  ;;  %v12754_v53 = vadd.f32 %v7929_v43, %v7877_v62 }
 0x6bf   :  { %v8082_v4 = vcombine.high %v8081_v30, %v8081_v30  ;;  %v8089_v21 = vrot.slane %v8019_v63, %v12906_v56  ;;  %v8098_v50 = vcombine.high %v8097_v0, %v8097_v0  ;;  %v8105_v37 = vrot.slane %v8020_v9, %v12906_v56 }
 0x6c0   :  { %v8235_v39 = vsel %vm6114_vm13, %v8081_v30, -inf  ;;  %v8263_v35 = vsel %vm6114_vm13, %v8097_v0, -inf  ;;  %v12743_v38 = vrot.slane %v8021_v24, %v12906_v56  ;;  %v12746_v52 = vrot.slane %v8022_v18, %v12906_v56 }
 0x6c1   :  { %v8090_v26 = vcombine.high %v8089_v21, %v8089_v21  ;;  %v8106_v34 = vcombine.high %v8105_v37, %v8105_v37  ;;  %v8236_v2 = vrot.slane %v8235_v39, 4  ;;  %v8242_v36 = vsel %vm6114_vm13, %v8082_v4, -inf }
 0x6c2   :  { %v8243_v58 = vrot.slane %v8242_v36, 4  ;;  %v8249_v6 = vsel %vm6114_vm13, %v8089_v21, -inf  ;;  %v8264_v55 = vrot.slane %v8263_v35, 4  ;;  %v8270_v47 = vsel %vm6114_vm13, %v8098_v50, -inf }
 0x6c3   :  { %v8237_v20 = vmax.f32 %v8235_v39, %v8236_v2  ;;  %v8250_v40 = vrot.slane %v8249_v6, 4  ;;  %v8256_v8 = vsel %vm6114_vm13, %v8090_v26, -inf  ;;  %v8271_v7 = vrot.slane %v8270_v47, 4  ;;  %v7980_v39 = vpop.f32.mrf.mxu1 }
 0x6c4   :  { %v8244_v1 = vmax.f32 %v8242_v36, %v8243_v58  ;;  %v8257_v15 = vrot.slane %v8256_v8, 4  ;;  %v8265_v22 = vmax.f32 %v8263_v35, %v8264_v55  ;;  %v8277_v10 = vsel %vm6114_vm13, %v8105_v37, -inf }
 0x6c5   :  { %v8238_v14 = vrot.slane %v8237_v20, 2  ;;  %v8251_v57 = vmax.f32 %v8249_v6, %v8250_v40  ;;  %v8272_v49 = vmax.f32 %v8270_v47, %v8271_v7  ;;  %v8278_v32 = vrot.slane %v8277_v10, 4 }
 0x6c6   :  { %v8245_v23 = vrot.slane %v8244_v1, 2  ;;  %v8258_v16 = vmax.f32 %v8256_v8, %v8257_v15  ;;  %v8266_v29 = vrot.slane %v8265_v22, 2  ;;  %v8284_v45 = vsel %vm6114_vm13, %v8106_v34, -inf }
 0x6c7   :  { %v8239_v48 = vmax.f32 %v8237_v20, %v8238_v14  ;;  %v8252_v33 = vrot.slane %v8251_v57, 2  ;;  %v8273_v42 = vrot.slane %v8272_v49, 2  ;;  %v8279_v31 = vmax.f32 %v8277_v10, %v8278_v32 }
 0x6c8   :  { %v8246_v3 = vmax.f32 %v8244_v1, %v8245_v23  ;;  %v8259_v54 = vrot.slane %v8258_v16, 2  ;;  %v8267_v17 = vmax.f32 %v8265_v22, %v8266_v29  ;;  %v8285_v25 = vrot.slane %v8284_v45, 4 }
 0x6c9   :  { %v8240_v59 = vrot.slane %v8239_v48, 1  ;;  %v8253_v60 = vmax.f32 %v8251_v57, %v8252_v33  ;;  %v8274_v41 = vmax.f32 %v8272_v49, %v8273_v42  ;;  %v8280_v27 = vrot.slane %v8279_v31, 2 }
 0x6ca   :  { %v8247_v28 = vrot.slane %v8246_v3, 1  ;;  %v8260_v13 = vmax.f32 %v8258_v16, %v8259_v54  ;;  %v8268_v51 = vrot.slane %v8267_v17, 1  ;;  %v8286_v61 = vmax.f32 %v8284_v45, %v8285_v25 }
 0x6cb   :  { %v8254_v11 = vrot.slane %v8253_v60, 1  ;;  %v8275_v63 = vrot.slane %v8274_v41, 1  ;;  %v8281_v9 = vmax.f32 %v8279_v31, %v8280_v27  ;;  %v8241_v30 = vmax.f32 %v8239_v48, %v8240_v59 }
 0x6cc   :  { %v8248_v0 = vmax.f32 %v8246_v3, %v8247_v28  ;;  %v8261_v24 = vrot.slane %v8260_v13, 1  ;;  %v8287_v18 = vrot.slane %v8286_v61, 2  ;;  %v8269_v4 = vmax.f32 %v8267_v17, %v8268_v51 }
 0x6cd   :  { %v8276_v21 = vmax.f32 %v8274_v41, %v8275_v63  ;;  %v8282_v50 = vrot.slane %v8281_v9, 1  ;;  %v8037_v37 = vcombine.high %v12743_v38, %v12743_v38  ;;  %v12759_v35 = vadd.f32 %v7931_v12, %v12734_v5 }
 0x6ce   :  { %v8288_v62 = vmax.f32 %v8286_v61, %v8287_v18  ;;  %v8038_v26 = vcombine.high %v12746_v52, %v12746_v52  ;;  %v12764_v34 = vadd.f32 %v7978_v46, %v12730_v19  ;;  %v8255_v2 = vmax.f32 %v8253_v60, %v8254_v11 }
 0x6cf   :  { %v8283_v36 = vmax.f32 %v8281_v9, %v8282_v50  ;;  %v8113_v58 = vrot.slane %v12743_v38, %v12906_v56  ;;  %v8121_v6 = vrot.slane %v8037_v37, %v12906_v56  ;;  %v8262_v55 = vmax.f32 %v8260_v13, %v8261_v24 }
 0x6d0   :  { %v8289_v47 = vrot.slane %v8288_v62, 1  ;;  %v8129_v5 = vrot.slane %v12746_v52, %v12906_v56  ;;  %v12772_v20 = vadd.f32 %v7980_v39, %v12736_v44  ;;  %v8459_v40 = vmax.f32 %v8241_v30, %v8269_v4 }
 0x6d1   :  { %v8460_v8 = vmax.f32 %v8248_v0, %v8276_v21  ;;  %v8114_v7 = vcombine.high %v8113_v58, %v8113_v58  ;;  %v8122_v19 = vcombine.high %v8121_v6, %v8121_v6  ;;  %v8137_v22 = vrot.slane %v8038_v26, %v12906_v56 }
 0x6d2   :  { %v8290_v1 = vmax.f32 %v8288_v62, %v8289_v47  ;;  %v8130_v15 = vcombine.high %v8129_v5, %v8129_v5  ;;  %v8291_v38 = vsel %vm6114_vm13, %v8113_v58, -inf  ;;  %v8461_v10 = vmax.f32 %v8255_v2, %v8283_v36 }
 0x6d3   :  { %v8292_v14 = vrot.slane %v8291_v38, 4  ;;  %v8298_v57 = vsel %vm6114_vm13, %v8114_v7, -inf  ;;  %v8305_v49 = vsel %vm6114_vm13, %v8121_v6, -inf  ;;  %v8312_v23 = vsel %vm6114_vm13, %v8122_v19, -inf }
 0x6d4   :  { %v8462_v52 = vmax.f32 %v8262_v55, %v8290_v1  ;;  %v8299_v32 = vrot.slane %v8298_v57, 4  ;;  %v8306_v44 = vrot.slane %v8305_v49, 4  ;;  %v8313_v29 = vrot.slane %v8312_v23, 4  ;;  %v7982_v55 = vpop.f32.mrf.mxu1 }
 0x6d5   :  { %v8293_v16 = vmax.f32 %v8291_v38, %v8292_v14  ;;  %v8319_v45 = vsel %vm6114_vm13, %v8129_v5, -inf  ;;  %v8326_v43 = vsel %vm6114_vm13, %v8130_v15, -inf  ;;  %v8138_v48 = vcombine.high %v8137_v22, %v8137_v22 }
 0x6d6   :  { %v8300_v33 = vmax.f32 %v8298_v57, %v8299_v32  ;;  %v8307_v42 = vmax.f32 %v8305_v49, %v8306_v44  ;;  %v8320_v31 = vrot.slane %v8319_v45, 4  ;;  %v8314_v54 = vmax.f32 %v8312_v23, %v8313_v29 }
 0x6d7   :  { %v8294_v3 = vrot.slane %v8293_v16, 2  ;;  %v8327_v17 = vrot.slane %v8326_v43, 4  ;;  %v8333_v25 = vsel %vm6114_vm13, %v8137_v22, -inf  ;;  %v8499_v59 = vcombine.low %v8461_v10, %v8462_v52  ;;  %v7984_v52 = vpop.f32.mrf.mxu1 }
 0x6d8   :  { %v8301_v60 = vrot.slane %v8300_v33, 2  ;;  %v8308_v41 = vrot.slane %v8307_v42, 2  ;;  %v8321_v27 = vmax.f32 %v8319_v45, %v8320_v31  ;;  %v8315_v28 = vrot.slane %v8314_v54, 2 }
 0x6d9   :  { %v8295_v46 = vmax.f32 %v8293_v16, %v8294_v3  ;;  %v8328_v13 = vmax.f32 %v8326_v43, %v8327_v17  ;;  %v8334_v51 = vrot.slane %v8333_v25, 4  ;;  %v12782_v61 = vcombine.low %v8459_v40, %v8460_v8 }
 0x6da   :  { %v8302_v12 = vmax.f32 %v8300_v33, %v8301_v60  ;;  %v8309_v11 = vmax.f32 %v8307_v42, %v8308_v41  ;;  %v8322_v63 = vrot.slane %v8321_v27, 2  ;;  %v8316_v9 = vmax.f32 %v8314_v54, %v8315_v28 }
 0x6db   :  { %v8329_v30 = vrot.slane %v8328_v13, 2  ;;  %v8335_v0 = vmax.f32 %v8333_v25, %v8334_v51  ;;  %v7992_v24 = vmax.f32 %v12772_v20, 0.0  ;;  %v8506_v18 = vrot.slane %v8499_v59, %v12906_v56 }
 0x6dc   :  { %v8296_v4 = vrot.slane %v8295_v46, 1  ;;  %v8323_v21 = vmax.f32 %v8321_v27, %v8322_v63  ;;  %v8340_v50 = vsel %vm6114_vm13, %v8138_v48, -inf  ;;  %v8303_v37 = vrot.slane %v8302_v12, 1 }
 0x6dd   :  { %v8330_v39 = vmax.f32 %v8328_v13, %v8329_v30  ;;  %v8336_v62 = vrot.slane %v8335_v0, 2  ;;  %v7991_v26 = vmax.f32 %v12764_v34, 0.0  ;;  %v8498_v2 = vrot.slane %v12782_v61, %v12906_v56 }
 0x6de   :  { %v8310_v36 = vrot.slane %v8309_v11, 1  ;;  %v8324_v58 = vrot.slane %v8323_v21, 1  ;;  %v8341_v6 = vrot.slane %v8340_v50, 4  ;;  %v8317_v47 = vrot.slane %v8316_v9, 1 }
 0x6df   :  { %v8331_v5 = vrot.slane %v8330_v39, 1  ;;  %v8337_v20 = vmax.f32 %v8335_v0, %v8336_v62  ;;  %v8039_v40 = vcombine.low %v7991_v26, %v7992_v24  ;;  %v12790_v8 = vrot.slane %v8506_v18, 7 }
 0x6e0   :  { %v12792_v7 = vmax.f32 %v8295_v46, %v8296_v4  ;;  %v8342_v19 = vmax.f32 %v8340_v50, %v8341_v6  ;;  %v8040_v1 = vcombine.high %v7991_v26, %v7992_v24  ;;  %v12794_v15 = vmax.f32 %v8302_v12, %v8303_v37 }
 0x6e1   :  { %v12796_v34 = vmax.f32 %v8323_v21, %v8324_v58  ;;  %v8338_v22 = vrot.slane %v8337_v20, 1  ;;  %v8047_v38 = vrot.slane %v8039_v40, %v12906_v56  ;;  %v8311_v10 = vmax.f32 %v8309_v11, %v8310_v36 }
 0x6e2   :  { %v8332_v14 = vmax.f32 %v8330_v39, %v8331_v5  ;;  %v8343_v57 = vrot.slane %v8342_v19, 2  ;;  %v8054_v49 = vrot.slane %v8040_v1, %v12906_v56  ;;  %v8318_v32 = vmax.f32 %v8316_v9, %v8317_v47 }
 0x6e3   :  { %v8055_v44 = vcombine.high %v8047_v38, %v8047_v38  ;;  %v8145_v23 = vrot.slane %v8047_v38, %v12906_v56  ;;  %v12802_v16 = vadd.f32 %v7982_v55, %v12754_v53  ;;  %v8339_v29 = vmax.f32 %v8337_v20, %v8338_v22 }
 0x6e4   :  { %v8344_v45 = vmax.f32 %v8342_v19, %v8343_v57  ;;  %v8056_v43 = vcombine.high %v8054_v49, %v8054_v49  ;;  %v8161_v48 = vrot.slane %v8054_v49, %v12906_v56  ;;  %v8463_v33 = vmax.f32 %v12792_v7, %v12796_v34 }
 0x6e5   :  { %v8146_v42 = vcombine.high %v8145_v23, %v8145_v23  ;;  %v8153_v31 = vrot.slane %v8055_v44, %v12906_v56  ;;  %v7985_v3 = vadd.f32 %v7984_v52, %v12759_v35  ;;  %v8464_v17 = vmax.f32 %v12794_v15, %v8332_v14 }
 0x6e6   :  { %v8345_v54 = vrot.slane %v8344_v45, 1  ;;  %v8162_v25 = vcombine.high %v8161_v48, %v8161_v48  ;;  %v8347_v53 = vsel %vm6114_vm13, %v8145_v23, -inf  ;;  %v8169_v60 = vrot.slane %v8056_v43, %v12906_v56 }
 0x6e7   :  { %v8154_v59 = vcombine.high %v8153_v31, %v8153_v31  ;;  %v8348_v41 = vrot.slane %v8347_v53, 4  ;;  %v8354_v27 = vsel %vm6114_vm13, %v8146_v42, -inf  ;;  %v8465_v28 = vmax.f32 %v8311_v10, %v8339_v29 }
 0x6e8   :  { %v8346_v46 = vmax.f32 %v8344_v45, %v8345_v54  ;;  %v8355_v13 = vrot.slane %v8354_v27, 4  ;;  %v8361_v51 = vsel %vm6114_vm13, %v8153_v31, -inf  ;;  %v8375_v63 = vsel %vm6114_vm13, %v8161_v48, -inf }
 0x6e9   :  { %v8349_v12 = vmax.f32 %v8347_v53, %v8348_v41  ;;  %v8362_v11 = vrot.slane %v8361_v51, 4  ;;  %v8368_v35 = vsel %vm6114_vm13, %v8154_v59, -inf  ;;  %v8376_v24 = vrot.slane %v8375_v63, 4 }
 0x6ea   :  { %v8466_v9 = vmax.f32 %v8318_v32, %v8346_v46  ;;  %v8356_v30 = vmax.f32 %v8354_v27, %v8355_v13  ;;  %v8369_v0 = vrot.slane %v8368_v35, 4  ;;  %v8382_v21 = vsel %vm6114_vm13, %v8162_v25, -inf }
 0x6eb   :  { %v8350_v18 = vrot.slane %v8349_v12, 2  ;;  %v8363_v4 = vmax.f32 %v8361_v51, %v8362_v11  ;;  %v8389_v50 = vsel %vm6114_vm13, %v8169_v60, -inf  ;;  %v8170_v37 = vcombine.high %v8169_v60, %v8169_v60 }
 0x6ec   :  { %v8357_v39 = vrot.slane %v8356_v30, 2  ;;  %v8370_v62 = vmax.f32 %v8368_v35, %v8369_v0  ;;  %v8377_v26 = vmax.f32 %v8375_v63, %v8376_v24  ;;  %v8383_v6 = vrot.slane %v8382_v21, 4 }
 0x6ed   :  { %v8351_v36 = vmax.f32 %v8349_v12, %v8350_v18  ;;  %v8364_v58 = vrot.slane %v8363_v4, 2  ;;  %v8390_v55 = vrot.slane %v8389_v50, 4  ;;  %v12818_v47 = vcombine.low %v8465_v28, %v8466_v9 }
 0x6ee   :  { %v8358_v5 = vmax.f32 %v8356_v30, %v8357_v39  ;;  %v8371_v20 = vrot.slane %v8370_v62, 2  ;;  %v8378_v40 = vrot.slane %v8377_v26, 2  ;;  %v8384_v1 = vmax.f32 %v8382_v21, %v8383_v6 }
 0x6ef   :  { %v8352_v7 = vrot.slane %v8351_v36, 1  ;;  %v8365_v19 = vmax.f32 %v8363_v4, %v8364_v58  ;;  %v8391_v15 = vmax.f32 %v8389_v50, %v8390_v55  ;;  %v7994_v10 = vmax.f32 %v7985_v3, 0.0 }
 0x6f0   :  { %v8359_v34 = vrot.slane %v8358_v5, 1  ;;  %v8372_v22 = vmax.f32 %v8370_v62, %v8371_v20  ;;  %v8379_v38 = vmax.f32 %v8377_v26, %v8378_v40  ;;  %v12820_v14 = vcombine.low %v8463_v33, %v8464_v17 }
 0x6f1   :  { %v8385_v57 = vrot.slane %v8384_v1, 2  ;;  %v8392_v49 = vrot.slane %v8391_v15, 2  ;;  %v7993_v52 = vmax.f32 %v12802_v16, 0.0  ;;  %v8522_v32 = vrot.slane %v12818_v47, %v12906_v56 }
 0x6f2   :  { %v12825_v44 = vmax.f32 %v8351_v36, %v8352_v7  ;;  %v8380_v23 = vrot.slane %v8379_v38, 1  ;;  %v8396_v29 = vsel %vm6114_vm13, %v8170_v37, -inf  ;;  %v8366_v45 = vrot.slane %v8365_v19, 1 }
 0x6f3   :  { %v8386_v43 = vmax.f32 %v8384_v1, %v8385_v57  ;;  %v8393_v48 = vmax.f32 %v8391_v15, %v8392_v49  ;;  %v8397_v42 = vrot.slane %v8396_v29, 4  ;;  %v8360_v31 = vmax.f32 %v8358_v5, %v8359_v34 }
 0x6f4   :  { %v8373_v3 = vrot.slane %v8372_v22, 1  ;;  %v8057_v33 = vcombine.low %v7993_v52, %v7994_v10  ;;  %v8058_v54 = vcombine.high %v7993_v52, %v7994_v10  ;;  %v8558_v16 = vsel %vm4449_vm5, %v12790_v8, %v8498_v2 }
 0x6f5   :  { %v8387_v17 = vrot.slane %v8386_v43, 1  ;;  %v8394_v25 = vrot.slane %v8393_v48, 1  ;;  %v8398_v53 = vmax.f32 %v8396_v29, %v8397_v42  ;;  %v8381_v59 = vmax.f32 %v8379_v38, %v8380_v23 }
 0x6f6   :  { %v8065_v60 = vrot.slane %v8057_v33, %v12906_v56  ;;  %v8072_v41 = vrot.slane %v8058_v54, %v12906_v56  ;;  %v8559_v27 = vsel %vm4453_vm7, %v12790_v8, %v8558_v16  ;;  %v8367_v46 = vmax.f32 %v8365_v19, %v8366_v45 }
 0x6f7   :  { %v8388_v28 = vmax.f32 %v8386_v43, %v8387_v17  ;;  %v8399_v13 = vrot.slane %v8398_v53, 2  ;;  %v8560_v51 = vsel %vm4457_vm9, %v12790_v8, %v8559_v27  ;;  %v8395_v12 = vmax.f32 %v8393_v48, %v8394_v25 }
 0x6f8   :  { %v8073_v11 = vcombine.high %v8065_v60, %v8065_v60  ;;  %v8177_v61 = vrot.slane %v8065_v60, %v12906_v56  ;;  %v8193_v2 = vrot.slane %v8072_v41, %v12906_v56  ;;  %v8374_v35 = vmax.f32 %v8372_v22, %v8373_v3 }
 0x6f9   :  { %v8400_v63 = vmax.f32 %v8398_v53, %v8399_v13  ;;  %v8074_v9 = vcombine.high %v8072_v41, %v8072_v41  ;;  %v8561_v30 = vsel %vm4461_vm11, %v12790_v8, %v8560_v51  ;;  %v8467_v0 = vmax.f32 %v12825_v44, %v8381_v59 }
 0x6fa   :  { %v8468_v24 = vmax.f32 %v8360_v31, %v8388_v28  ;;  %v8178_v18 = vcombine.high %v8177_v61, %v8177_v61  ;;  %v8185_v4 = vrot.slane %v8073_v11, %v12906_v56  ;;  %8587 = vst [vmem:[#allocation8] sm:$0xf] %v8561_v30  ;;  %v8194_v50 = vcombine.high %v8193_v2, %v8193_v2 }
 0x6fb   :  { %v8401_v21 = vrot.slane %v8400_v63, 1  ;;  %v8403_v37 = vsel %vm6114_vm13, %v8177_v61, -inf  ;;  %v8431_v39 = vsel %vm6114_vm13, %v8193_v2, -inf  ;;  %v8469_v62 = vmax.f32 %v8367_v46, %v8395_v12 }
 0x6fc   :  { %v8186_v26 = vcombine.high %v8185_v4, %v8185_v4  ;;  %v8404_v36 = vrot.slane %v8403_v37, 4  ;;  %v8410_v58 = vsel %vm6114_vm13, %v8178_v18, -inf  ;;  %v8201_v8 = vrot.slane %v8074_v9, %v12906_v56 }
 0x6fd   :  { %v8402_v6 = vmax.f32 %v8400_v63, %v8401_v21  ;;  %v8411_v55 = vrot.slane %v8410_v58, 4  ;;  %v8417_v5 = vsel %vm6114_vm13, %v8185_v4, -inf  ;;  %v8432_v19 = vrot.slane %v8431_v39, 4 }
 0x6fe   :  { %v8405_v20 = vmax.f32 %v8403_v37, %v8404_v36  ;;  %v8418_v40 = vrot.slane %v8417_v5, 4  ;;  %v8424_v7 = vsel %vm6114_vm13, %v8186_v26, -inf  ;;  %v8438_v22 = vsel %vm6114_vm13, %v8194_v50, -inf }
 0x6ff   :  { %v8470_v1 = vmax.f32 %v8374_v35, %v8402_v6  ;;  %v8412_v15 = vmax.f32 %v8410_v58, %v8411_v55  ;;  %v8425_v34 = vrot.slane %v8424_v7, 4  ;;  %v8433_v57 = vmax.f32 %v8431_v39, %v8432_v19 }
 0x700   :  { %v8406_v38 = vrot.slane %v8405_v20, 2  ;;  %v8419_v10 = vmax.f32 %v8417_v5, %v8418_v40  ;;  %v8439_v49 = vrot.slane %v8438_v22, 4  ;;  %v8445_v29 = vsel %vm6114_vm13, %v8201_v8, -inf }
 0x701   :  { %v8531_v52 = vcombine.low %v8469_v62, %v8470_v1  ;;  %v8413_v44 = vrot.slane %v8412_v15, 2  ;;  %v8426_v23 = vmax.f32 %v8424_v7, %v8425_v34  ;;  %v8523_v45 = vcombine.low %v8467_v0, %v8468_v24 }
 0x702   :  { %v8202_v43 = vcombine.high %v8201_v8, %v8201_v8  ;;  %v8420_v48 = vrot.slane %v8419_v10, 2  ;;  %v8440_v42 = vmax.f32 %v8438_v22, %v8439_v49  ;;  %v8434_v33 = vrot.slane %v8433_v57, 2 }
 0x703   :  { %v8538_v31 = vrot.slane %v8531_v52, %v12906_v56  ;;  %v8427_v3 = vrot.slane %v8426_v23, 2  ;;  %v8446_v54 = vrot.slane %v8445_v29, 4  ;;  %v8407_v17 = vmax.f32 %v8405_v20, %v8406_v38 }
 0x704   :  { %v8441_v25 = vrot.slane %v8440_v42, 2  ;;  %v8564_v53 = vrot.slane %v8522_v32, 7  ;;  %v8414_v59 = vmax.f32 %v8412_v15, %v8413_v44  ;;  %v8514_v41 = vrot.slane %v12820_v14, %v12906_v56 }
 0x705   :  { %v8571_v16 = vrot.slane %v8538_v31, 7  ;;  %v8447_v60 = vmax.f32 %v8445_v29, %v8446_v54  ;;  %v8530_v27 = vrot.slane %v8523_v45, %v12906_v56  ;;  %v8421_v46 = vmax.f32 %v8419_v10, %v8420_v48 }
 0x706   :  { %v8442_v28 = vmax.f32 %v8440_v42, %v8441_v25  ;;  %v8428_v13 = vmax.f32 %v8426_v23, %v8427_v3  ;;  %v8435_v51 = vmax.f32 %v8433_v57, %v8434_v33  ;;  %v8452_v11 = vsel %vm6114_vm13, %v8202_v43, -inf }
 0x707   :  { %v8448_v12 = vrot.slane %v8447_v60, 2  ;;  %v8408_v61 = vrot.slane %v8407_v17, 1  ;;  %v8453_v2 = vrot.slane %v8452_v11, 4  ;;  %v8415_v35 = vrot.slane %v8414_v59, 1 }
 0x708   :  { %v8565_v32 = vsel %vm4449_vm5, %v8564_v53, %v8514_v41  ;;  %v8572_v63 = vsel %vm4449_vm5, %v8571_v16, %v8530_v27  ;;  %v8422_v9 = vrot.slane %v8421_v46, 1  ;;  %v8443_v30 = vrot.slane %v8442_v28, 1 }
 0x709   :  { %v8449_v47 = vmax.f32 %v8447_v60, %v8448_v12  ;;  %v8454_v14 = vmax.f32 %v8452_v11, %v8453_v2  ;;  %v8566_v0 = vsel %vm4453_vm7, %v8564_v53, %v8565_v32  ;;  %v8429_v24 = vrot.slane %v8428_v13, 1 }
 0x70a   :  { %v8436_v18 = vrot.slane %v8435_v51, 1  ;;  %v8567_v4 = vsel %vm4457_vm9, %v8564_v53, %v8566_v0  ;;  %v8573_v21 = vsel %vm4453_vm7, %v8571_v16, %v8572_v63  ;;  %v8416_v36 = vmax.f32 %v8414_v59, %v8415_v35 }
 0x70b   :  { %v8450_v50 = vrot.slane %v8449_v47, 1  ;;  %v8455_v37 = vrot.slane %v8454_v14, 2  ;;  %v8568_v39 = vsel %vm4461_vm11, %v8564_v53, %v8567_v4  ;;  %v8574_v62 = vsel %vm4457_vm9, %v8571_v16, %v8573_v21 }
 0x70c   :  { %v8575_v26 = vsel %vm4461_vm11, %v8571_v16, %v8574_v62  ;;  %8588 = vst [vmem:[#allocation8 + $0x4] sm:$0xf] %v8568_v39  ;;  %v8444_v58 = vmax.f32 %v8442_v28, %v8443_v30  ;;  %v8409_v8 = vmax.f32 %v8407_v17, %v8408_v61  ;;  %v8423_v55 = vmax.f32 %v8421_v46, %v8422_v9 }
 0x70d   :  { %v8456_v6 = vmax.f32 %v8454_v14, %v8455_v37  ;;  %8589 = vst [vmem:[#allocation8 + $0x8] sm:$0xf] %v8575_v26  ;;  %v8430_v5 = vmax.f32 %v8428_v13, %v8429_v24  ;;  %v8437_v20 = vmax.f32 %v8435_v51, %v8436_v18  ;;  %v8451_v40 = vmax.f32 %v8449_v47, %v8450_v50 }
 0x70e   :  { %v8472_v1 = vmax.f32 %v8416_v36, %v8444_v58 }
 0x70f   :  { %v8457_v7 = vrot.slane %v8456_v6, 1  ;;  %v8471_v15 = vmax.f32 %v8409_v8, %v8437_v20  ;;  %v8473_v34 = vmax.f32 %v8423_v55, %v8451_v40 }
 0x711   :  { %v8458_v19 = vmax.f32 %v8456_v6, %v8457_v7  ;;  %v8539_v38 = vcombine.low %v8471_v15, %v8472_v1 }
 0x713   :  { %v8474_v22 = vmax.f32 %v8430_v5, %v8458_v19  ;;  %v8546_v49 = vrot.slane %v8539_v38, %v12906_v56 }
 0x715   :  { %v8547_v10 = vcombine.low %v8473_v34, %v8474_v22 }
 0x717   :  { %v8554_v57 = vrot.slane %v8547_v10, %v12906_v56 }
 0x719   :  { %v8578_v52 = vrot.slane %v8554_v57, 7 }
 0x71b   :  { %v8579_v44 = vsel %vm4449_vm5, %v8578_v52, %v8546_v49 }
 0x71c   :  { %v8580_v23 = vsel %vm4453_vm7, %v8578_v52, %v8579_v44 }
 0x71d   :  { %v8581_v29 = vsel %vm4457_vm9, %v8578_v52, %v8580_v23 }
 0x71e   :  { %v8582_v45 = vsel %vm4461_vm11, %v8578_v52, %v8581_v29 }
 0x71f   :  { %8590 = vst [vmem:[#allocation8 + $0xc] sm:$0xf] %v8582_v45 }
 0x720   :  { %9699 = shalt.err (!%p9696_p0)
}
 0x721   :  { %8626 = dma.vmem_to_hbm [thread:$0]  %s8621_s7, 256, %s12890_s9, [#allocation7], %s9715_s21, %s9715_s21, %s9719_s23  }
 0x722   :  { %9708 = dma.done.wait [#allocation5], 2048  }
 0x723   :  { %9709 = vsyncadd [#allocation5], 4294965248 }
 0x724   :  { %9710 = dma.done.wait [#allocation7], 768  }
 0x725   :  { %9711 = vsyncadd [#allocation7], 4294966528 }
 0x726   :  { %8636 = vsyncpa [#allocation5], 1 }
 0x727   :  { %8637 = vsyncpa [#allocation7], 1 }

</bundles_post_ra>
